<compile_context>
chip_gen: v6e
topology: v6e:2x2x1
jax: 0.10.0
libtpu: 0.0.40
codegen_flags: <defaults>
</compile_context>

<pallas_src>
import math

import jax
import jax.numpy as jnp
from jax import lax
from jax.experimental import pallas as pl
from jax.experimental.pallas import tpu as pltpu

_VMEM_LIMIT = 32 * 1024 * 1024  # valid on v5e/v6e (128 MiB) and v7x (64 MiB/TC)


# --------------------------------------------------------------------------
# XLA-side im2col that also folds the width max-pool: returns two patch
# tensors (even conv columns / odd conv columns), K order (dy, dx, ci).
# The kernels then never width-pool: pooled row = max of 4 conv dots.
# --------------------------------------------------------------------------
def im2col_even_odd(x, kh, kw, k_pad):
    n, h, w, c = x.shape
    ho, wo = h - kh + 1, w - kw + 1
    wp = wo // 2

    def build(parity):
        cols = []
        for dy in range(kh):
            for dx in range(kw):
                start = dx + parity
                cols.append(lax.slice(
                    x, (0, dy, start, 0),
                    (n, dy + ho, start + 2 * (wp - 1) + 1, c),
                    (1, 1, 2, 1)))
        p = jnp.concatenate(cols, axis=-1)
        if k_pad > kh * kw * c:
            p = jnp.pad(p, ((0, 0), (0, 0), (0, 0), (0, k_pad - kh * kw * c)))
        return p

    return build(0), build(1)


# --------------------------------------------------------------------------
# conv1 / conv3: fused conv + bias + ReLU + 2x2 maxpool from even/odd patches
# --------------------------------------------------------------------------
def _make_conv_pool_kernel(rp):
    def kernel(pe_ref, po_ref, w_ref, b_ref, o_ref):
        def body(p, carry):
            w = w_ref[...]
            d0 = jnp.dot(pe_ref[0, 2 * p], w, preferred_element_type=jnp.float32)
            d1 = jnp.dot(po_ref[0, 2 * p], w, preferred_element_type=jnp.float32)
            d2 = jnp.dot(pe_ref[0, 2 * p + 1], w, preferred_element_type=jnp.float32)
            d3 = jnp.dot(po_ref[0, 2 * p + 1], w, preferred_element_type=jnp.float32)
            y = jnp.maximum(jnp.maximum(d0, d1), jnp.maximum(d2, d3))  # 2x2 pool
            y = jnp.maximum(y + b_ref[...], 0.0)                       # bias+ReLU
            o_ref[0, p] = y.astype(o_ref.dtype)
            return carry
        lax.fori_loop(0, rp, body, 0)
    return kernel


def conv_relu_pool(patches_even, patches_odd, w, b, rows_per_step):
    n, hc, wp, kp = patches_even.shape
    cout = w.shape[1]
    hp = hc // 2
    rp = rows_per_step
    assert hp % rp == 0, (hp, rp)
    steps = hp // rp
    return pl.pallas_call(
        _make_conv_pool_kernel(rp),
        out_shape=jax.ShapeDtypeStruct((n, hp, wp, cout), jnp.bfloat16),
        grid=(n, steps),
        in_specs=[
            pl.BlockSpec((1, 2 * rp, wp, kp), lambda i, j: (i, j, 0, 0)),
            pl.BlockSpec((1, 2 * rp, wp, kp), lambda i, j: (i, j, 0, 0)),
            pl.BlockSpec((kp, cout), lambda i, j: (0, 0)),
            pl.BlockSpec((1, cout), lambda i, j: (0, 0)),
        ],
        out_specs=pl.BlockSpec((1, rp, wp, cout), lambda i, j: (i, j, 0, 0)),
        compiler_params=pltpu.CompilerParams(
            dimension_semantics=("parallel", "parallel"),
            vmem_limit_bytes=_VMEM_LIMIT),
    )(patches_even, patches_odd, w, b)


# --------------------------------------------------------------------------
# conv2 (Cin=512): kn2row — taps folded into N, no slab, no pooling matmuls
# --------------------------------------------------------------------------
def _make_conv2_kernel(rp, kh, kw, wc, wp, cout):
    n_in_rows = 2 * rp + kh - 1          # input rows needed by this block

    def kernel(x_ref, w_ref, b_ref, o_ref, zbuf, hbuf):
        r0 = pl.program_id(1) * (2 * rp)

        # Phase 1: Z[r] = x_row @ Wcat  (K=512, N=512) for every needed row.
        def zrow(t, carry):
            zbuf[t] = jnp.dot(x_ref[0, r0 + t], w_ref[...],
                              preferred_element_type=jnp.float32)
            return carry
        lax.fori_loop(0, n_in_rows, zrow, 0)

        # Phase 2: conv rows = sum of 25 shifted 16-lane slices of Z (VPU),
        # fused with bias + ReLU + 2x2 max-pool.
        def prow(p, carry):
            def conv_row(c):
                acc = jnp.zeros((wc, cout), jnp.float32)
                for dy in range(kh):
                    for dx in range(kw):
                        tap = dy * kw + dx
                        acc = acc + zbuf[c + dy, pl.ds(dx, wc),
                                         pl.ds(tap * cout, cout)]
                return acc
            h = jnp.maximum(conv_row(2 * p), conv_row(2 * p + 1))   # height pool
            h = jnp.maximum(h + b_ref[...], 0.0)                    # bias + ReLU
            hbuf[...] = h
            pooled = jnp.maximum(hbuf[pl.ds(0, wp, stride=2), :],   # width pool
                                 hbuf[pl.ds(1, wp, stride=2), :])   # (VPU only)
            o_ref[0, p] = pooled.astype(o_ref.dtype)
            return carry
        lax.fori_loop(0, rp, prow, 0)

    return kernel


def conv2_relu_pool(x, wcat, b, rows_per_step=14):
    n, h, wdt, cin = x.shape
    kh = kw = 5
    cout = b.shape[1]
    hc, wc = h - kh + 1, wdt - kw + 1
    hp, wp = hc // 2, wc // 2
    rp = rows_per_step
    assert hp % rp == 0, (hp, rp)
    steps = hp // rp
    n_in_rows = 2 * rp + kh - 1
    ncat = wcat.shape[1]
    return pl.pallas_call(
        _make_conv2_kernel(rp, kh, kw, wc, wp, cout),
        out_shape=jax.ShapeDtypeStruct((n, hp, wp, cout), jnp.bfloat16),
        grid=(n, steps),
        in_specs=[
            pl.BlockSpec((1, h, wdt, cin), lambda i, j: (i, 0, 0, 0)),
            pl.BlockSpec((cin, ncat), lambda i, j: (0, 0)),
            pl.BlockSpec((1, cout), lambda i, j: (0, 0)),
        ],
        out_specs=pl.BlockSpec((1, rp, wp, cout), lambda i, j: (i, j, 0, 0)),
        scratch_shapes=[
            pltpu.VMEM((n_in_rows, wc + kw - 1, ncat), jnp.float32),  # Z cache
            pltpu.VMEM((wc, cout), jnp.float32),                      # pool buf
        ],
        compiler_params=pltpu.CompilerParams(
            dimension_semantics=("parallel", "parallel"),
            vmem_limit_bytes=_VMEM_LIMIT),
    )(x, wcat, b)


# --------------------------------------------------------------------------
# fused fc1 -> relu -> fc2 -> relu -> fc3 (everything fits in VMEM)
# --------------------------------------------------------------------------
def _fc_kernel(x_ref, w1_ref, b1_ref, w2_ref, b2_ref, w3_ref, b3_ref, o_ref):
    h = jnp.dot(x_ref[...], w1_ref[...], preferred_element_type=jnp.float32)
    h = jnp.maximum(h + b1_ref[...], 0.0).astype(jnp.bfloat16)
    h = jnp.dot(h, w2_ref[...], preferred_element_type=jnp.float32)
    h = jnp.maximum(h + b2_ref[...], 0.0).astype(jnp.bfloat16)
    out = jnp.dot(h, w3_ref[...], preferred_element_type=jnp.float32) + b3_ref[...]
    o_ref[...] = out.astype(o_ref.dtype)


def fc_fused(x, w1, b1, w2, b2, w3, b3):
    n = x.shape[0]
    return pl.pallas_call(
        _fc_kernel,
        out_shape=jax.ShapeDtypeStruct((n, w3.shape[1]), jnp.float32),
        compiler_params=pltpu.CompilerParams(vmem_limit_bytes=_VMEM_LIMIT),
    )(x, w1, b1, w2, b2, w3, b3)


# --------------------------------------------------------------------------
# parameters (deterministic synthetic, PyTorch-like uniform fan-in init)
# --------------------------------------------------------------------------
def init_params():
    key = jax.random.PRNGKey(42)
    ks = jax.random.split(key, 12)

    def conv_p(kw_key, kb_key, kh, kw_, cin, cout):
        bound = 1.0 / math.sqrt(cin * kh * kw_)
        w = jax.random.uniform(kw_key, (kh, kw_, cin, cout), jnp.float32, -bound, bound)
        b = jax.random.uniform(kb_key, (1, cout), jnp.float32, -bound, bound)
        return w, b

    def fc_p(kw_key, kb_key, fin, fout):
        bound = 1.0 / math.sqrt(fin)
        w = jax.random.uniform(kw_key, (fin, fout), jnp.float32, -bound, bound)
        b = jax.random.uniform(kb_key, (1, fout), jnp.float32, -bound, bound)
        return w, b

    return dict(
        conv1=conv_p(ks[0], ks[1], 5, 5, 3, 500),
        conv2=conv_p(ks[2], ks[3], 5, 5, 500, 16),
        conv3=conv_p(ks[4], ks[5], 5, 5, 16, 32),
        fc1=fc_p(ks[6], ks[7], 32 * 12 * 12, 120),
        fc2=fc_p(ks[8], ks[9], 120, 84),
        fc3=fc_p(ks[10], ks[11], 84, 2),
    )


def prepare_params(params):
    """One-time padding / reshaping / casting (hoisted OUT of the jitted fwd)."""
    bf = jnp.bfloat16

    w1, b1 = params["conv1"]                                   # (5,5,3,500)
    w1 = jnp.pad(w1, ((0, 0), (0, 0), (0, 0), (0, 12)))        # cout 500 -> 512
    w1 = jnp.pad(w1.reshape(75, 512), ((0, 53), (0, 0)))       # K    75  -> 128
    b1 = jnp.pad(b1, ((0, 0), (0, 12)))

    w2, b2 = params["conv2"]                                   # (5,5,500,16)
    w2 = jnp.pad(w2, ((0, 0), (0, 0), (0, 12), (0, 0)))        # cin 500 -> 512
    # kn2row Wcat[ci, (dy*5+dx)*16 + co] = w2[dy, dx, ci, co]
    wcat = jnp.transpose(w2, (2, 0, 1, 3)).reshape(512, 400)
    wcat = jnp.pad(wcat, ((0, 0), (0, 112)))                   # N 400 -> 512

    w3, b3 = params["conv3"]                                   # (5,5,16,32)
    w3 = jnp.pad(w3.reshape(400, 32), ((0, 112), (0, 0)))      # K 400 -> 512

    fw1, fb1 = params["fc1"]
    fw2, fb2 = params["fc2"]
    fw3, fb3 = params["fc3"]
    return dict(
        w1=w1.astype(bf), b1=b1, w2=wcat.astype(bf), b2=b2,
        w3=w3.astype(bf), b3=b3,
        fw1=fw1.astype(bf), fb1=fb1, fw2=fw2.astype(bf), fb2=fb2,
        fw3=fw3.astype(bf), fb3=fb3,
    )


# --------------------------------------------------------------------------
# forward
# --------------------------------------------------------------------------
@jax.jit
def forward(x_nchw, p):
    # NCHW (PyTorch) -> NHWC (kernel layout), bf16 activations
    x = jnp.transpose(x_nchw, (0, 2, 3, 1)).astype(jnp.bfloat16)     # (N,124,124,3)

    pe, po = im2col_even_odd(x, 5, 5, k_pad=128)                     # 2x (N,120,60,128)
    x = conv_relu_pool(pe, po, p["w1"], p["b1"], rows_per_step=10)   # (N,60,60,512)

    x = conv2_relu_pool(x, p["w2"], p["b2"], rows_per_step=14)       # (N,28,28,16)

    pe, po = im2col_even_odd(x, 5, 5, k_pad=512)                     # 2x (N,24,12,512)
    x = conv_relu_pool(pe, po, p["w3"], p["b3"], rows_per_step=6)    # (N,12,12,32)

    # flatten in PyTorch NCHW channel-major order: x.view(-1, 32*12*12)
    x = jnp.transpose(x, (0, 3, 1, 2)).reshape(x.shape[0], 32 * 12 * 12)
    x = x.astype(jnp.bfloat16)
    return fc_fused(x, p["fw1"], p["fb1"], p["fw2"], p["fb2"], p["fw3"], p["fb3"])


if __name__ == "__main__":
    prep = prepare_params(init_params())     # one-time weight prep, outside jit
    x = jax.random.normal(jax.random.PRNGKey(0), (2, 3, 124, 124), jnp.float32)
    out = forward(x, prep)
    jax.block_until_ready(out)
    assert out.shape == (2, 2), out.shape
    print("KERNEL_OK")
</pallas_src>

<mosaic_0001>
module attributes {stable_mosaic.version = 11 : i64} {
  func.func @kernel(%arg0: i32, %arg1: i32, %arg2: memref<1x20x60x128xbf16, #tpu.memory_space<vmem>>, %arg3: memref<1x20x60x128xbf16, #tpu.memory_space<vmem>>, %arg4: memref<128x512xbf16, #tpu.memory_space<vmem>>, %arg5: memref<1x512xf32, #tpu.memory_space<vmem>>, %arg6: memref<1x10x60x512xbf16, #tpu.memory_space<vmem>>) attributes {dimension_semantics = [#tpu.dimension_semantics<parallel>, #tpu.dimension_semantics<parallel>], iteration_bounds = array<i64: 2, 6>, scalar_prefetch = 0 : i64, scratch_operands = 0 : i64, tpu.core_type = #tpu.core_type<tc>, window_params = [{transform_indices = @transform_0, window_bounds = array<i64: 1, 20, 60, 128>}, {transform_indices = @transform_1, window_bounds = array<i64: 1, 20, 60, 128>}, {pipeline_mode = #tpu.pipeline_mode<synchronous>, transform_indices = @transform_2, window_bounds = array<i64: 128, 512>}, {pipeline_mode = #tpu.pipeline_mode<synchronous>, transform_indices = @transform_3, window_bounds = array<i64: 1, 512>}, {transform_indices = @transform_4, window_bounds = array<i64: 1, 10, 60, 512>}]} {
    %c0_i32 = arith.constant 0 : i32
    %c10_i32 = arith.constant 10 : i32
    %0 = arith.addi %c0_i32, %c10_i32 : i32
    %c1_i32 = arith.constant 1 : i32
    scf.for %arg7 = %c0_i32 to %0 step %c1_i32  : i32 {
      %c0 = arith.constant 0 : index
      %c0_1 = arith.constant 0 : index
      %1 = vector.load %arg4[%c0, %c0_1] : memref<128x512xbf16, #tpu.memory_space<vmem>>, vector<128x512xbf16>
      %c2_i32 = arith.constant 2 : i32
      %2 = arith.muli %c2_i32, %arg7 : i32
      %c0_2 = arith.constant 0 : index
      %3 = arith.index_cast %2 : i32 to index
      %c0_3 = arith.constant 0 : index
      %c0_4 = arith.constant 0 : index
      %4 = vector.load %arg2[%c0_2, %3, %c0_3, %c0_4] : memref<1x20x60x128xbf16, #tpu.memory_space<vmem>>, vector<1x1x60x128xbf16>
      %5 = vector.shape_cast %4 : vector<1x1x60x128xbf16> to vector<60x128xbf16>
      %cst = arith.constant dense<0.000000e+00> : vector<60x512xf32>
      %6 = tpu.matmul %5, %1, %cst {dimension_numbers = #tpu.dot_dimension_numbers<[1], [0], [0], [1], [0, 0, 1, 1], [], []>} : vector<60x128xbf16>, vector<128x512xbf16>, vector<60x512xf32> -> vector<60x512xf32>
      %c2_i32_5 = arith.constant 2 : i32
      %7 = arith.muli %c2_i32_5, %arg7 : i32
      %c0_6 = arith.constant 0 : index
      %8 = arith.index_cast %7 : i32 to index
      %c0_7 = arith.constant 0 : index
      %c0_8 = arith.constant 0 : index
      %9 = vector.load %arg3[%c0_6, %8, %c0_7, %c0_8] : memref<1x20x60x128xbf16, #tpu.memory_space<vmem>>, vector<1x1x60x128xbf16>
      %10 = vector.shape_cast %9 : vector<1x1x60x128xbf16> to vector<60x128xbf16>
      %cst_9 = arith.constant dense<0.000000e+00> : vector<60x512xf32>
      %11 = tpu.matmul %10, %1, %cst_9 {dimension_numbers = #tpu.dot_dimension_numbers<[1], [0], [0], [1], [0, 0, 1, 1], [], []>} : vector<60x128xbf16>, vector<128x512xbf16>, vector<60x512xf32> -> vector<60x512xf32>
      %c2_i32_10 = arith.constant 2 : i32
      %12 = arith.muli %c2_i32_10, %arg7 : i32
      %c1_i32_11 = arith.constant 1 : i32
      %13 = arith.addi %12, %c1_i32_11 : i32
      %c0_12 = arith.constant 0 : index
      %14 = arith.index_cast %13 : i32 to index
      %c0_13 = arith.constant 0 : index
      %c0_14 = arith.constant 0 : index
      %15 = vector.load %arg2[%c0_12, %14, %c0_13, %c0_14] : memref<1x20x60x128xbf16, #tpu.memory_space<vmem>>, vector<1x1x60x128xbf16>
      %16 = vector.shape_cast %15 : vector<1x1x60x128xbf16> to vector<60x128xbf16>
      %cst_15 = arith.constant dense<0.000000e+00> : vector<60x512xf32>
      %17 = tpu.matmul %16, %1, %cst_15 {dimension_numbers = #tpu.dot_dimension_numbers<[1], [0], [0], [1], [0, 0, 1, 1], [], []>} : vector<60x128xbf16>, vector<128x512xbf16>, vector<60x512xf32> -> vector<60x512xf32>
      %c2_i32_16 = arith.constant 2 : i32
      %18 = arith.muli %c2_i32_16, %arg7 : i32
      %c1_i32_17 = arith.constant 1 : i32
      %19 = arith.addi %18, %c1_i32_17 : i32
      %c0_18 = arith.constant 0 : index
      %20 = arith.index_cast %19 : i32 to index
      %c0_19 = arith.constant 0 : index
      %c0_20 = arith.constant 0 : index
      %21 = vector.load %arg3[%c0_18, %20, %c0_19, %c0_20] : memref<1x20x60x128xbf16, #tpu.memory_space<vmem>>, vector<1x1x60x128xbf16>
      %22 = vector.shape_cast %21 : vector<1x1x60x128xbf16> to vector<60x128xbf16>
      %cst_21 = arith.constant dense<0.000000e+00> : vector<60x512xf32>
      %23 = tpu.matmul %22, %1, %cst_21 {dimension_numbers = #tpu.dot_dimension_numbers<[1], [0], [0], [1], [0, 0, 1, 1], [], []>} : vector<60x128xbf16>, vector<128x512xbf16>, vector<60x512xf32> -> vector<60x512xf32>
      %24 = arith.maximumf %6, %11 : vector<60x512xf32>
      %25 = arith.maximumf %17, %23 : vector<60x512xf32>
      %26 = arith.maximumf %24, %25 : vector<60x512xf32>
      %c0_22 = arith.constant 0 : index
      %c0_23 = arith.constant 0 : index
      %27 = vector.load %arg5[%c0_22, %c0_23] : memref<1x512xf32, #tpu.memory_space<vmem>>, vector<1x512xf32>
      %28 = vector.broadcast %27 : vector<1x512xf32> to vector<60x512xf32>
      %29 = arith.addf %26, %28 : vector<60x512xf32>
      %cst_24 = arith.constant 0.000000e+00 : f32
      %30 = vector.broadcast %cst_24 : f32 to vector<60x512xf32>
      %31 = arith.maximumf %29, %30 : vector<60x512xf32>
      %32 = arith.truncf %31 : vector<60x512xf32> to vector<60x512xbf16>
      %c0_25 = arith.constant 0 : index
      %33 = arith.index_cast %arg7 : i32 to index
      %c0_26 = arith.constant 0 : index
      %c0_27 = arith.constant 0 : index
      %34 = vector.load %arg6[%c0_25, %33, %c0_26, %c0_27] : memref<1x10x60x512xbf16, #tpu.memory_space<vmem>>, vector<1x1x60x512xbf16>
      %35 = vector.shape_cast %34 : vector<1x1x60x512xbf16> to vector<60x512xbf16>
      %36 = vector.shape_cast %32 : vector<60x512xbf16> to vector<1x1x60x512xbf16>
      tpu.vector_store %arg6[%c0_25, %33, %c0_26, %c0_27], %36 {strides = array<i32>} : memref<1x10x60x512xbf16, #tpu.memory_space<vmem>>, vector<1x1x60x512xbf16>,
    }
    %c10_i32_0 = arith.constant 10 : i32
    return
  }
  func.func @transform_0(%arg0: i32, %arg1: i32) -> (i32, i32, i32, i32) {
    %c0_i32 = arith.constant 0 : i32
    %c0_i32_0 = arith.constant 0 : i32
    %c0_i32_1 = arith.constant 0 : i32
    return %arg0, %arg1, %c0_i32, %c0_i32_0 : i32, i32, i32, i32
  }
  func.func @transform_1(%arg0: i32, %arg1: i32) -> (i32, i32, i32, i32) {
    %c0_i32 = arith.constant 0 : i32
    %c0_i32_0 = arith.constant 0 : i32
    %c0_i32_1 = arith.constant 0 : i32
    return %arg0, %arg1, %c0_i32, %c0_i32_0 : i32, i32, i32, i32
  }
  func.func @transform_2(%arg0: i32, %arg1: i32) -> (i32, i32) {
    %c0_i32 = arith.constant 0 : i32
    %c0_i32_0 = arith.constant 0 : i32
    %c0_i32_1 = arith.constant 0 : i32
    return %c0_i32, %c0_i32_0 : i32, i32
  }
  func.func @transform_3(%arg0: i32, %arg1: i32) -> (i32, i32) {
    %c0_i32 = arith.constant 0 : i32
    %c0_i32_0 = arith.constant 0 : i32
    %c0_i32_1 = arith.constant 0 : i32
    return %c0_i32, %c0_i32_0 : i32, i32
  }
  func.func @transform_4(%arg0: i32, %arg1: i32) -> (i32, i32, i32, i32) {
    %c0_i32 = arith.constant 0 : i32
    %c0_i32_0 = arith.constant 0 : i32
    %c0_i32_1 = arith.constant 0 : i32
    return %arg0, %arg1, %c0_i32, %c0_i32_0 : i32, i32, i32, i32
  }
}

module attributes {stable_mosaic.version = 11 : i64} {
  func.func @kernel(%arg0: i32, %arg1: i32, %arg2: memref<1x60x60x512xbf16, #tpu.memory_space<vmem>>, %arg3: memref<512x512xbf16, #tpu.memory_space<vmem>>, %arg4: memref<1x16xf32, #tpu.memory_space<vmem>>, %arg5: memref<1x14x28x16xbf16, #tpu.memory_space<vmem>>, %arg6: memref<32x60x512xf32, #tpu.memory_space<vmem>>, %arg7: memref<56x16xf32, #tpu.memory_space<vmem>>) attributes {dimension_semantics = [#tpu.dimension_semantics<parallel>, #tpu.dimension_semantics<parallel>], iteration_bounds = array<i64: 2, 2>, scalar_prefetch = 0 : i64, scratch_operands = 2 : i64, tpu.core_type = #tpu.core_type<tc>, window_params = [{transform_indices = @transform_0, window_bounds = array<i64: 1, 60, 60, 512>}, {pipeline_mode = #tpu.pipeline_mode<synchronous>, transform_indices = @transform_1, window_bounds = array<i64: 512, 512>}, {pipeline_mode = #tpu.pipeline_mode<synchronous>, transform_indices = @transform_2, window_bounds = array<i64: 1, 16>}, {transform_indices = @transform_3, window_bounds = array<i64: 1, 14, 28, 16>}]} {
    %c28_i32 = arith.constant 28 : i32
    %0 = arith.muli %arg1, %c28_i32 : i32
    %c0_i32 = arith.constant 0 : i32
    %c32_i32 = arith.constant 32 : i32
    %1 = arith.addi %c0_i32, %c32_i32 : i32
    %c1_i32 = arith.constant 1 : i32
    scf.for %arg8 = %c0_i32 to %1 step %c1_i32  : i32 {
      %3 = arith.addi %0, %arg8 : i32
      %c0 = arith.constant 0 : index
      %4 = arith.index_cast %3 : i32 to index
      %c0_4 = arith.constant 0 : index
      %c0_5 = arith.constant 0 : index
      %5 = vector.load %arg2[%c0, %4, %c0_4, %c0_5] : memref<1x60x60x512xbf16, #tpu.memory_space<vmem>>, vector<1x1x60x512xbf16>
      %6 = vector.shape_cast %5 : vector<1x1x60x512xbf16> to vector<60x512xbf16>
      %c0_6 = arith.constant 0 : index
      %c0_7 = arith.constant 0 : index
      %7 = vector.load %arg3[%c0_6, %c0_7] : memref<512x512xbf16, #tpu.memory_space<vmem>>, vector<512x512xbf16>
      %cst = arith.constant dense<0.000000e+00> : vector<60x512xf32>
      %8 = tpu.matmul %6, %7, %cst {dimension_numbers = #tpu.dot_dimension_numbers<[1], [0], [0], [1], [0, 0, 1, 1], [], []>} : vector<60x512xbf16>, vector<512x512xbf16>, vector<60x512xf32> -> vector<60x512xf32>
      %9 = arith.index_cast %arg8 : i32 to index
      %c0_8 = arith.constant 0 : index
      %c0_9 = arith.constant 0 : index
      %10 = vector.load %arg6[%9, %c0_8, %c0_9] : memref<32x60x512xf32, #tpu.memory_space<vmem>>, vector<1x60x512xf32>
      %11 = vector.shape_cast %10 : vector<1x60x512xf32> to vector<60x512xf32>
      %12 = vector.shape_cast %8 : vector<60x512xf32> to vector<1x60x512xf32>
      tpu.vector_store %arg6[%9, %c0_8, %c0_9], %12 {strides = array<i32>} : memref<32x60x512xf32, #tpu.memory_space<vmem>>, vector<1x60x512xf32>,
    }
    %c32_i32_0 = arith.constant 32 : i32
    %c0_i32_1 = arith.constant 0 : i32
    %c14_i32 = arith.constant 14 : i32
    %2 = arith.addi %c0_i32_1, %c14_i32 : i32
    %c1_i32_2 = arith.constant 1 : i32
    scf.for %arg8 = %c0_i32_1 to %2 step %c1_i32_2  : i32 {
      %c2_i32 = arith.constant 2 : i32
      %3 = arith.muli %c2_i32, %arg8 : i32
      %cst = arith.constant 0.000000e+00 : f32
      %4 = vector.broadcast %cst : f32 to vector<56x16xf32>
      %c0_i32_4 = arith.constant 0 : i32
      %5 = arith.addi %3, %c0_i32_4 : i32
      %6 = arith.index_cast %5 : i32 to index
      %c0 = arith.constant 0 : index
      %c0_5 = arith.constant 0 : index
      %7 = vector.load %arg6[%6, %c0, %c0_5] : memref<32x60x512xf32, #tpu.memory_space<vmem>>, vector<1x56x16xf32>
      %8 = vector.shape_cast %7 : vector<1x56x16xf32> to vector<56x16xf32>
      %9 = arith.addf %4, %8 : vector<56x16xf32>
      %c0_i32_6 = arith.constant 0 : i32
      %10 = arith.addi %3, %c0_i32_6 : i32
      %11 = arith.index_cast %10 : i32 to index
      %c1 = arith.constant 1 : index
      %c16 = arith.constant 16 : index
      %12 = vector.load %arg6[%11, %c1, %c16] : memref<32x60x512xf32, #tpu.memory_space<vmem>>, vector<1x56x16xf32>
      %13 = vector.shape_cast %12 : vector<1x56x16xf32> to vector<56x16xf32>
      %14 = arith.addf %9, %13 : vector<56x16xf32>
      %c0_i32_7 = arith.constant 0 : i32
      %15 = arith.addi %3, %c0_i32_7 : i32
      %16 = arith.index_cast %15 : i32 to index
      %c2 = arith.constant 2 : index
      %c32 = arith.constant 32 : index
      %17 = vector.load %arg6[%16, %c2, %c32] : memref<32x60x512xf32, #tpu.memory_space<vmem>>, vector<1x56x16xf32>
      %18 = vector.shape_cast %17 : vector<1x56x16xf32> to vector<56x16xf32>
      %19 = arith.addf %14, %18 : vector<56x16xf32>
      %c0_i32_8 = arith.constant 0 : i32
      %20 = arith.addi %3, %c0_i32_8 : i32
      %21 = arith.index_cast %20 : i32 to index
      %c3 = arith.constant 3 : index
      %c48 = arith.constant 48 : index
      %22 = vector.load %arg6[%21, %c3, %c48] : memref<32x60x512xf32, #tpu.memory_space<vmem>>, vector<1x56x16xf32>
      %23 = vector.shape_cast %22 : vector<1x56x16xf32> to vector<56x16xf32>
      %24 = arith.addf %19, %23 : vector<56x16xf32>
      %c0_i32_9 = arith.constant 0 : i32
      %25 = arith.addi %3, %c0_i32_9 : i32
      %26 = arith.index_cast %25 : i32 to index
      %c4 = arith.constant 4 : index
      %c64 = arith.constant 64 : index
      %27 = vector.load %arg6[%26, %c4, %c64] : memref<32x60x512xf32, #tpu.memory_space<vmem>>, vector<1x56x16xf32>
      %28 = vector.shape_cast %27 : vector<1x56x16xf32> to vector<56x16xf32>
      %29 = arith.addf %24, %28 : vector<56x16xf32>
      %c1_i32_10 = arith.constant 1 : i32
      %30 = arith.addi %3, %c1_i32_10 : i32
      %31 = arith.index_cast %30 : i32 to index
      %c0_11 = arith.constant 0 : index
      %c80 = arith.constant 80 : index
      %32 = vector.load %arg6[%31, %c0_11, %c80] : memref<32x60x512xf32, #tpu.memory_space<vmem>>, vector<1x56x16xf32>
      %33 = vector.shape_cast %32 : vector<1x56x16xf32> to vector<56x16xf32>
      %34 = arith.addf %29, %33 : vector<56x16xf32>
      %c1_i32_12 = arith.constant 1 : i32
      %35 = arith.addi %3, %c1_i32_12 : i32
      %36 = arith.index_cast %35 : i32 to index
      %c1_13 = arith.constant 1 : index
      %c96 = arith.constant 96 : index
      %37 = vector.load %arg6[%36, %c1_13, %c96] : memref<32x60x512xf32, #tpu.memory_space<vmem>>, vector<1x56x16xf32>
      %38 = vector.shape_cast %37 : vector<1x56x16xf32> to vector<56x16xf32>
      %39 = arith.addf %34, %38 : vector<56x16xf32>
      %c1_i32_14 = arith.constant 1 : i32
      %40 = arith.addi %3, %c1_i32_14 : i32
      %41 = arith.index_cast %40 : i32 to index
      %c2_15 = arith.constant 2 : index
      %c112 = arith.constant 112 : index
      %42 = vector.load %arg6[%41, %c2_15, %c112] : memref<32x60x512xf32, #tpu.memory_space<vmem>>, vector<1x56x16xf32>
      %43 = vector.shape_cast %42 : vector<1x56x16xf32> to vector<56x16xf32>
      %44 = arith.addf %39, %43 : vector<56x16xf32>
      %c1_i32_16 = arith.constant 1 : i32
      %45 = arith.addi %3, %c1_i32_16 : i32
      %46 = arith.index_cast %45 : i32 to index
      %c3_17 = arith.constant 3 : index
      %c128 = arith.constant 128 : index
      %47 = vector.load %arg6[%46, %c3_17, %c128] : memref<32x60x512xf32, #tpu.memory_space<vmem>>, vector<1x56x16xf32>
      %48 = vector.shape_cast %47 : vector<1x56x16xf32> to vector<56x16xf32>
      %49 = arith.addf %44, %48 : vector<56x16xf32>
      %c1_i32_18 = arith.constant 1 : i32
      %50 = arith.addi %3, %c1_i32_18 : i32
      %51 = arith.index_cast %50 : i32 to index
      %c4_19 = arith.constant 4 : index
      %c144 = arith.constant 144 : index
      %52 = vector.load %arg6[%51, %c4_19, %c144] : memref<32x60x512xf32, #tpu.memory_space<vmem>>, vector<1x56x16xf32>
      %53 = vector.shape_cast %52 : vector<1x56x16xf32> to vector<56x16xf32>
      %54 = arith.addf %49, %53 : vector<56x16xf32>
      %c2_i32_20 = arith.constant 2 : i32
      %55 = arith.addi %3, %c2_i32_20 : i32
      %56 = arith.index_cast %55 : i32 to index
      %c0_21 = arith.constant 0 : index
      %c160 = arith.constant 160 : index
      %57 = vector.load %arg6[%56, %c0_21, %c160] : memref<32x60x512xf32, #tpu.memory_space<vmem>>, vector<1x56x16xf32>
      %58 = vector.shape_cast %57 : vector<1x56x16xf32> to vector<56x16xf32>
      %59 = arith.addf %54, %58 : vector<56x16xf32>
      %c2_i32_22 = arith.constant 2 : i32
      %60 = arith.addi %3, %c2_i32_22 : i32
      %61 = arith.index_cast %60 : i32 to index
      %c1_23 = arith.constant 1 : index
      %c176 = arith.constant 176 : index
      %62 = vector.load %arg6[%61, %c1_23, %c176] : memref<32x60x512xf32, #tpu.memory_space<vmem>>, vector<1x56x16xf32>
      %63 = vector.shape_cast %62 : vector<1x56x16xf32> to vector<56x16xf32>
      %64 = arith.addf %59, %63 : vector<56x16xf32>
      %c2_i32_24 = arith.constant 2 : i32
      %65 = arith.addi %3, %c2_i32_24 : i32
      %66 = arith.index_cast %65 : i32 to index
      %c2_25 = arith.constant 2 : index
      %c192 = arith.constant 192 : index
      %67 = vector.load %arg6[%66, %c2_25, %c192] : memref<32x60x512xf32, #tpu.memory_space<vmem>>, vector<1x56x16xf32>
      %68 = vector.shape_cast %67 : vector<1x56x16xf32> to vector<56x16xf32>
      %69 = arith.addf %64, %68 : vector<56x16xf32>
      %c2_i32_26 = arith.constant 2 : i32
      %70 = arith.addi %3, %c2_i32_26 : i32
      %71 = arith.index_cast %70 : i32 to index
      %c3_27 = arith.constant 3 : index
      %c208 = arith.constant 208 : index
      %72 = vector.load %arg6[%71, %c3_27, %c208] : memref<32x60x512xf32, #tpu.memory_space<vmem>>, vector<1x56x16xf32>
      %73 = vector.shape_cast %72 : vector<1x56x16xf32> to vector<56x16xf32>
      %74 = arith.addf %69, %73 : vector<56x16xf32>
      %c2_i32_28 = arith.constant 2 : i32
      %75 = arith.addi %3, %c2_i32_28 : i32
      %76 = arith.index_cast %75 : i32 to index
      %c4_29 = arith.constant 4 : index
      %c224 = arith.constant 224 : index
      %77 = vector.load %arg6[%76, %c4_29, %c224] : memref<32x60x512xf32, #tpu.memory_space<vmem>>, vector<1x56x16xf32>
      %78 = vector.shape_cast %77 : vector<1x56x16xf32> to vector<56x16xf32>
      %79 = arith.addf %74, %78 : vector<56x16xf32>
      %c3_i32 = arith.constant 3 : i32
      %80 = arith.addi %3, %c3_i32 : i32
      %81 = arith.index_cast %80 : i32 to index
      %c0_30 = arith.constant 0 : index
      %c240 = arith.constant 240 : index
      %82 = vector.load %arg6[%81, %c0_30, %c240] : memref<32x60x512xf32, #tpu.memory_space<vmem>>, vector<1x56x16xf32>
      %83 = vector.shape_cast %82 : vector<1x56x16xf32> to vector<56x16xf32>
      %84 = arith.addf %79, %83 : vector<56x16xf32>
      %c3_i32_31 = arith.constant 3 : i32
      %85 = arith.addi %3, %c3_i32_31 : i32
      %86 = arith.index_cast %85 : i32 to index
      %c1_32 = arith.constant 1 : index
      %c256 = arith.constant 256 : index
      %87 = vector.load %arg6[%86, %c1_32, %c256] : memref<32x60x512xf32, #tpu.memory_space<vmem>>, vector<1x56x16xf32>
      %88 = vector.shape_cast %87 : vector<1x56x16xf32> to vector<56x16xf32>
      %89 = arith.addf %84, %88 : vector<56x16xf32>
      %c3_i32_33 = arith.constant 3 : i32
      %90 = arith.addi %3, %c3_i32_33 : i32
      %91 = arith.index_cast %90 : i32 to index
      %c2_34 = arith.constant 2 : index
      %c272 = arith.constant 272 : index
      %92 = vector.load %arg6[%91, %c2_34, %c272] : memref<32x60x512xf32, #tpu.memory_space<vmem>>, vector<1x56x16xf32>
      %93 = vector.shape_cast %92 : vector<1x56x16xf32> to vector<56x16xf32>
      %94 = arith.addf %89, %93 : vector<56x16xf32>
      %c3_i32_35 = arith.constant 3 : i32
      %95 = arith.addi %3, %c3_i32_35 : i32
      %96 = arith.index_cast %95 : i32 to index
      %c3_36 = arith.constant 3 : index
      %c288 = arith.constant 288 : index
      %97 = vector.load %arg6[%96, %c3_36, %c288] : memref<32x60x512xf32, #tpu.memory_space<vmem>>, vector<1x56x16xf32>
      %98 = vector.shape_cast %97 : vector<1x56x16xf32> to vector<56x16xf32>
      %99 = arith.addf %94, %98 : vector<56x16xf32>
      %c3_i32_37 = arith.constant 3 : i32
      %100 = arith.addi %3, %c3_i32_37 : i32
      %101 = arith.index_cast %100 : i32 to index
      %c4_38 = arith.constant 4 : index
      %c304 = arith.constant 304 : index
      %102 = vector.load %arg6[%101, %c4_38, %c304] : memref<32x60x512xf32, #tpu.memory_space<vmem>>, vector<1x56x16xf32>
      %103 = vector.shape_cast %102 : vector<1x56x16xf32> to vector<56x16xf32>
      %104 = arith.addf %99, %103 : vector<56x16xf32>
      %c4_i32 = arith.constant 4 : i32
      %105 = arith.addi %3, %c4_i32 : i32
      %106 = arith.index_cast %105 : i32 to index
      %c0_39 = arith.constant 0 : index
      %c320 = arith.constant 320 : index
      %107 = vector.load %arg6[%106, %c0_39, %c320] : memref<32x60x512xf32, #tpu.memory_space<vmem>>, vector<1x56x16xf32>
      %108 = vector.shape_cast %107 : vector<1x56x16xf32> to vector<56x16xf32>
      %109 = arith.addf %104, %108 : vector<56x16xf32>
      %c4_i32_40 = arith.constant 4 : i32
      %110 = arith.addi %3, %c4_i32_40 : i32
      %111 = arith.index_cast %110 : i32 to index
      %c1_41 = arith.constant 1 : index
      %c336 = arith.constant 336 : index
      %112 = vector.load %arg6[%111, %c1_41, %c336] : memref<32x60x512xf32, #tpu.memory_space<vmem>>, vector<1x56x16xf32>
      %113 = vector.shape_cast %112 : vector<1x56x16xf32> to vector<56x16xf32>
      %114 = arith.addf %109, %113 : vector<56x16xf32>
      %c4_i32_42 = arith.constant 4 : i32
      %115 = arith.addi %3, %c4_i32_42 : i32
      %116 = arith.index_cast %115 : i32 to index
      %c2_43 = arith.constant 2 : index
      %c352 = arith.constant 352 : index
      %117 = vector.load %arg6[%116, %c2_43, %c352] : memref<32x60x512xf32, #tpu.memory_space<vmem>>, vector<1x56x16xf32>
      %118 = vector.shape_cast %117 : vector<1x56x16xf32> to vector<56x16xf32>
      %119 = arith.addf %114, %118 : vector<56x16xf32>
      %c4_i32_44 = arith.constant 4 : i32
      %120 = arith.addi %3, %c4_i32_44 : i32
      %121 = arith.index_cast %120 : i32 to index
      %c3_45 = arith.constant 3 : index
      %c368 = arith.constant 368 : index
      %122 = vector.load %arg6[%121, %c3_45, %c368] : memref<32x60x512xf32, #tpu.memory_space<vmem>>, vector<1x56x16xf32>
      %123 = vector.shape_cast %122 : vector<1x56x16xf32> to vector<56x16xf32>
      %124 = arith.addf %119, %123 : vector<56x16xf32>
      %c4_i32_46 = arith.constant 4 : i32
      %125 = arith.addi %3, %c4_i32_46 : i32
      %126 = arith.index_cast %125 : i32 to index
      %c4_47 = arith.constant 4 : index
      %c384 = arith.constant 384 : index
      %127 = vector.load %arg6[%126, %c4_47, %c384] : memref<32x60x512xf32, #tpu.memory_space<vmem>>, vector<1x56x16xf32>
      %128 = vector.shape_cast %127 : vector<1x56x16xf32> to vector<56x16xf32>
      %129 = arith.addf %124, %128 : vector<56x16xf32>
      %c2_i32_48 = arith.constant 2 : i32
      %130 = arith.muli %c2_i32_48, %arg8 : i32
      %c1_i32_49 = arith.constant 1 : i32
      %131 = arith.addi %130, %c1_i32_49 : i32
      %cst_50 = arith.constant 0.000000e+00 : f32
      %132 = vector.broadcast %cst_50 : f32 to vector<56x16xf32>
      %c0_i32_51 = arith.constant 0 : i32
      %133 = arith.addi %131, %c0_i32_51 : i32
      %134 = arith.index_cast %133 : i32 to index
      %c0_52 = arith.constant 0 : index
      %c0_53 = arith.constant 0 : index
      %135 = vector.load %arg6[%134, %c0_52, %c0_53] : memref<32x60x512xf32, #tpu.memory_space<vmem>>, vector<1x56x16xf32>
      %136 = vector.shape_cast %135 : vector<1x56x16xf32> to vector<56x16xf32>
      %137 = arith.addf %132, %136 : vector<56x16xf32>
      %c0_i32_54 = arith.constant 0 : i32
      %138 = arith.addi %131, %c0_i32_54 : i32
      %139 = arith.index_cast %138 : i32 to index
      %c1_55 = arith.constant 1 : index
      %c16_56 = arith.constant 16 : index
      %140 = vector.load %arg6[%139, %c1_55, %c16_56] : memref<32x60x512xf32, #tpu.memory_space<vmem>>, vector<1x56x16xf32>
      %141 = vector.shape_cast %140 : vector<1x56x16xf32> to vector<56x16xf32>
      %142 = arith.addf %137, %141 : vector<56x16xf32>
      %c0_i32_57 = arith.constant 0 : i32
      %143 = arith.addi %131, %c0_i32_57 : i32
      %144 = arith.index_cast %143 : i32 to index
      %c2_58 = arith.constant 2 : index
      %c32_59 = arith.constant 32 : index
      %145 = vector.load %arg6[%144, %c2_58, %c32_59] : memref<32x60x512xf32, #tpu.memory_space<vmem>>, vector<1x56x16xf32>
      %146 = vector.shape_cast %145 : vector<1x56x16xf32> to vector<56x16xf32>
      %147 = arith.addf %142, %146 : vector<56x16xf32>
      %c0_i32_60 = arith.constant 0 : i32
      %148 = arith.addi %131, %c0_i32_60 : i32
      %149 = arith.index_cast %148 : i32 to index
      %c3_61 = arith.constant 3 : index
      %c48_62 = arith.constant 48 : index
      %150 = vector.load %arg6[%149, %c3_61, %c48_62] : memref<32x60x512xf32, #tpu.memory_space<vmem>>, vector<1x56x16xf32>
      %151 = vector.shape_cast %150 : vector<1x56x16xf32> to vector<56x16xf32>
      %152 = arith.addf %147, %151 : vector<56x16xf32>
      %c0_i32_63 = arith.constant 0 : i32
      %153 = arith.addi %131, %c0_i32_63 : i32
      %154 = arith.index_cast %153 : i32 to index
      %c4_64 = arith.constant 4 : index
      %c64_65 = arith.constant 64 : index
      %155 = vector.load %arg6[%154, %c4_64, %c64_65] : memref<32x60x512xf32, #tpu.memory_space<vmem>>, vector<1x56x16xf32>
      %156 = vector.shape_cast %155 : vector<1x56x16xf32> to vector<56x16xf32>
      %157 = arith.addf %152, %156 : vector<56x16xf32>
      %c1_i32_66 = arith.constant 1 : i32
      %158 = arith.addi %131, %c1_i32_66 : i32
      %159 = arith.index_cast %158 : i32 to index
      %c0_67 = arith.constant 0 : index
      %c80_68 = arith.constant 80 : index
      %160 = vector.load %arg6[%159, %c0_67, %c80_68] : memref<32x60x512xf32, #tpu.memory_space<vmem>>, vector<1x56x16xf32>
      %161 = vector.shape_cast %160 : vector<1x56x16xf32> to vector<56x16xf32>
      %162 = arith.addf %157, %161 : vector<56x16xf32>
      %c1_i32_69 = arith.constant 1 : i32
      %163 = arith.addi %131, %c1_i32_69 : i32
      %164 = arith.index_cast %163 : i32 to index
      %c1_70 = arith.constant 1 : index
      %c96_71 = arith.constant 96 : index
      %165 = vector.load %arg6[%164, %c1_70, %c96_71] : memref<32x60x512xf32, #tpu.memory_space<vmem>>, vector<1x56x16xf32>
      %166 = vector.shape_cast %165 : vector<1x56x16xf32> to vector<56x16xf32>
      %167 = arith.addf %162, %166 : vector<56x16xf32>
      %c1_i32_72 = arith.constant 1 : i32
      %168 = arith.addi %131, %c1_i32_72 : i32
      %169 = arith.index_cast %168 : i32 to index
      %c2_73 = arith.constant 2 : index
      %c112_74 = arith.constant 112 : index
      %170 = vector.load %arg6[%169, %c2_73, %c112_74] : memref<32x60x512xf32, #tpu.memory_space<vmem>>, vector<1x56x16xf32>
      %171 = vector.shape_cast %170 : vector<1x56x16xf32> to vector<56x16xf32>
      %172 = arith.addf %167, %171 : vector<56x16xf32>
      %c1_i32_75 = arith.constant 1 : i32
      %173 = arith.addi %131, %c1_i32_75 : i32
      %174 = arith.index_cast %173 : i32 to index
      %c3_76 = arith.constant 3 : index
      %c128_77 = arith.constant 128 : index
      %175 = vector.load %arg6[%174, %c3_76, %c128_77] : memref<32x60x512xf32, #tpu.memory_space<vmem>>, vector<1x56x16xf32>
      %176 = vector.shape_cast %175 : vector<1x56x16xf32> to vector<56x16xf32>
      %177 = arith.addf %172, %176 : vector<56x16xf32>
      %c1_i32_78 = arith.constant 1 : i32
      %178 = arith.addi %131, %c1_i32_78 : i32
      %179 = arith.index_cast %178 : i32 to index
      %c4_79 = arith.constant 4 : index
      %c144_80 = arith.constant 144 : index
      %180 = vector.load %arg6[%179, %c4_79, %c144_80] : memref<32x60x512xf32, #tpu.memory_space<vmem>>, vector<1x56x16xf32>
      %181 = vector.shape_cast %180 : vector<1x56x16xf32> to vector<56x16xf32>
      %182 = arith.addf %177, %181 : vector<56x16xf32>
      %c2_i32_81 = arith.constant 2 : i32
      %183 = arith.addi %131, %c2_i32_81 : i32
      %184 = arith.index_cast %183 : i32 to index
      %c0_82 = arith.constant 0 : index
      %c160_83 = arith.constant 160 : index
      %185 = vector.load %arg6[%184, %c0_82, %c160_83] : memref<32x60x512xf32, #tpu.memory_space<vmem>>, vector<1x56x16xf32>
      %186 = vector.shape_cast %185 : vector<1x56x16xf32> to vector<56x16xf32>
      %187 = arith.addf %182, %186 : vector<56x16xf32>
      %c2_i32_84 = arith.constant 2 : i32
      %188 = arith.addi %131, %c2_i32_84 : i32
      %189 = arith.index_cast %188 : i32 to index
      %c1_85 = arith.constant 1 : index
      %c176_86 = arith.constant 176 : index
      %190 = vector.load %arg6[%189, %c1_85, %c176_86] : memref<32x60x512xf32, #tpu.memory_space<vmem>>, vector<1x56x16xf32>
      %191 = vector.shape_cast %190 : vector<1x56x16xf32> to vector<56x16xf32>
      %192 = arith.addf %187, %191 : vector<56x16xf32>
      %c2_i32_87 = arith.constant 2 : i32
      %193 = arith.addi %131, %c2_i32_87 : i32
      %194 = arith.index_cast %193 : i32 to index
      %c2_88 = arith.constant 2 : index
      %c192_89 = arith.constant 192 : index
      %195 = vector.load %arg6[%194, %c2_88, %c192_89] : memref<32x60x512xf32, #tpu.memory_space<vmem>>, vector<1x56x16xf32>
      %196 = vector.shape_cast %195 : vector<1x56x16xf32> to vector<56x16xf32>
      %197 = arith.addf %192, %196 : vector<56x16xf32>
      %c2_i32_90 = arith.constant 2 : i32
      %198 = arith.addi %131, %c2_i32_90 : i32
      %199 = arith.index_cast %198 : i32 to index
      %c3_91 = arith.constant 3 : index
      %c208_92 = arith.constant 208 : index
      %200 = vector.load %arg6[%199, %c3_91, %c208_92] : memref<32x60x512xf32, #tpu.memory_space<vmem>>, vector<1x56x16xf32>
      %201 = vector.shape_cast %200 : vector<1x56x16xf32> to vector<56x16xf32>
      %202 = arith.addf %197, %201 : vector<56x16xf32>
      %c2_i32_93 = arith.constant 2 : i32
      %203 = arith.addi %131, %c2_i32_93 : i32
      %204 = arith.index_cast %203 : i32 to index
      %c4_94 = arith.constant 4 : index
      %c224_95 = arith.constant 224 : index
      %205 = vector.load %arg6[%204, %c4_94, %c224_95] : memref<32x60x512xf32, #tpu.memory_space<vmem>>, vector<1x56x16xf32>
      %206 = vector.shape_cast %205 : vector<1x56x16xf32> to vector<56x16xf32>
      %207 = arith.addf %202, %206 : vector<56x16xf32>
      %c3_i32_96 = arith.constant 3 : i32
      %208 = arith.addi %131, %c3_i32_96 : i32
      %209 = arith.index_cast %208 : i32 to index
      %c0_97 = arith.constant 0 : index
      %c240_98 = arith.constant 240 : index
      %210 = vector.load %arg6[%209, %c0_97, %c240_98] : memref<32x60x512xf32, #tpu.memory_space<vmem>>, vector<1x56x16xf32>
      %211 = vector.shape_cast %210 : vector<1x56x16xf32> to vector<56x16xf32>
      %212 = arith.addf %207, %211 : vector<56x16xf32>
      %c3_i32_99 = arith.constant 3 : i32
      %213 = arith.addi %131, %c3_i32_99 : i32
      %214 = arith.index_cast %213 : i32 to index
      %c1_100 = arith.constant 1 : index
      %c256_101 = arith.constant 256 : index
      %215 = vector.load %arg6[%214, %c1_100, %c256_101] : memref<32x60x512xf32, #tpu.memory_space<vmem>>, vector<1x56x16xf32>
      %216 = vector.shape_cast %215 : vector<1x56x16xf32> to vector<56x16xf32>
      %217 = arith.addf %212, %216 : vector<56x16xf32>
      %c3_i32_102 = arith.constant 3 : i32
      %218 = arith.addi %131, %c3_i32_102 : i32
      %219 = arith.index_cast %218 : i32 to index
      %c2_103 = arith.constant 2 : index
      %c272_104 = arith.constant 272 : index
      %220 = vector.load %arg6[%219, %c2_103, %c272_104] : memref<32x60x512xf32, #tpu.memory_space<vmem>>, vector<1x56x16xf32>
      %221 = vector.shape_cast %220 : vector<1x56x16xf32> to vector<56x16xf32>
      %222 = arith.addf %217, %221 : vector<56x16xf32>
      %c3_i32_105 = arith.constant 3 : i32
      %223 = arith.addi %131, %c3_i32_105 : i32
      %224 = arith.index_cast %223 : i32 to index
      %c3_106 = arith.constant 3 : index
      %c288_107 = arith.constant 288 : index
      %225 = vector.load %arg6[%224, %c3_106, %c288_107] : memref<32x60x512xf32, #tpu.memory_space<vmem>>, vector<1x56x16xf32>
      %226 = vector.shape_cast %225 : vector<1x56x16xf32> to vector<56x16xf32>
      %227 = arith.addf %222, %226 : vector<56x16xf32>
      %c3_i32_108 = arith.constant 3 : i32
      %228 = arith.addi %131, %c3_i32_108 : i32
      %229 = arith.index_cast %228 : i32 to index
      %c4_109 = arith.constant 4 : index
      %c304_110 = arith.constant 304 : index
      %230 = vector.load %arg6[%229, %c4_109, %c304_110] : memref<32x60x512xf32, #tpu.memory_space<vmem>>, vector<1x56x16xf32>
      %231 = vector.shape_cast %230 : vector<1x56x16xf32> to vector<56x16xf32>
      %232 = arith.addf %227, %231 : vector<56x16xf32>
      %c4_i32_111 = arith.constant 4 : i32
      %233 = arith.addi %131, %c4_i32_111 : i32
      %234 = arith.index_cast %233 : i32 to index
      %c0_112 = arith.constant 0 : index
      %c320_113 = arith.constant 320 : index
      %235 = vector.load %arg6[%234, %c0_112, %c320_113] : memref<32x60x512xf32, #tpu.memory_space<vmem>>, vector<1x56x16xf32>
      %236 = vector.shape_cast %235 : vector<1x56x16xf32> to vector<56x16xf32>
      %237 = arith.addf %232, %236 : vector<56x16xf32>
      %c4_i32_114 = arith.constant 4 : i32
      %238 = arith.addi %131, %c4_i32_114 : i32
      %239 = arith.index_cast %238 : i32 to index
      %c1_115 = arith.constant 1 : index
      %c336_116 = arith.constant 336 : index
      %240 = vector.load %arg6[%239, %c1_115, %c336_116] : memref<32x60x512xf32, #tpu.memory_space<vmem>>, vector<1x56x16xf32>
      %241 = vector.shape_cast %240 : vector<1x56x16xf32> to vector<56x16xf32>
      %242 = arith.addf %237, %241 : vector<56x16xf32>
      %c4_i32_117 = arith.constant 4 : i32
      %243 = arith.addi %131, %c4_i32_117 : i32
      %244 = arith.index_cast %243 : i32 to index
      %c2_118 = arith.constant 2 : index
      %c352_119 = arith.constant 352 : index
      %245 = vector.load %arg6[%244, %c2_118, %c352_119] : memref<32x60x512xf32, #tpu.memory_space<vmem>>, vector<1x56x16xf32>
      %246 = vector.shape_cast %245 : vector<1x56x16xf32> to vector<56x16xf32>
      %247 = arith.addf %242, %246 : vector<56x16xf32>
      %c4_i32_120 = arith.constant 4 : i32
      %248 = arith.addi %131, %c4_i32_120 : i32
      %249 = arith.index_cast %248 : i32 to index
      %c3_121 = arith.constant 3 : index
      %c368_122 = arith.constant 368 : index
      %250 = vector.load %arg6[%249, %c3_121, %c368_122] : memref<32x60x512xf32, #tpu.memory_space<vmem>>, vector<1x56x16xf32>
      %251 = vector.shape_cast %250 : vector<1x56x16xf32> to vector<56x16xf32>
      %252 = arith.addf %247, %251 : vector<56x16xf32>
      %c4_i32_123 = arith.constant 4 : i32
      %253 = arith.addi %131, %c4_i32_123 : i32
      %254 = arith.index_cast %253 : i32 to index
      %c4_124 = arith.constant 4 : index
      %c384_125 = arith.constant 384 : index
      %255 = vector.load %arg6[%254, %c4_124, %c384_125] : memref<32x60x512xf32, #tpu.memory_space<vmem>>, vector<1x56x16xf32>
      %256 = vector.shape_cast %255 : vector<1x56x16xf32> to vector<56x16xf32>
      %257 = arith.addf %252, %256 : vector<56x16xf32>
      %258 = arith.maximumf %129, %257 : vector<56x16xf32>
      %c0_126 = arith.constant 0 : index
      %c0_127 = arith.constant 0 : index
      %259 = vector.load %arg4[%c0_126, %c0_127] : memref<1x16xf32, #tpu.memory_space<vmem>>, vector<1x16xf32>
      %260 = vector.broadcast %259 : vector<1x16xf32> to vector<56x16xf32>
      %261 = arith.addf %258, %260 : vector<56x16xf32>
      %cst_128 = arith.constant 0.000000e+00 : f32
      %262 = vector.broadcast %cst_128 : f32 to vector<56x16xf32>
      %263 = arith.maximumf %261, %262 : vector<56x16xf32>
      %c0_129 = arith.constant 0 : index
      %c0_130 = arith.constant 0 : index
      %264 = vector.load %arg7[%c0_129, %c0_130] : memref<56x16xf32, #tpu.memory_space<vmem>>, vector<56x16xf32>
      tpu.vector_store %arg7[%c0_129, %c0_130], %263 {strides = array<i32>} : memref<56x16xf32, #tpu.memory_space<vmem>>, vector<56x16xf32>,
      %c0_131 = arith.constant 0 : index
      %c0_132 = arith.constant 0 : index
      %265 = tpu.strided_load %arg7[%c0_131, %c0_132] {strides = array<i32: 2, 1>} : memref<56x16xf32, #tpu.memory_space<vmem>>, vector<28x16xf32>
      %c1_133 = arith.constant 1 : index
      %c0_134 = arith.constant 0 : index
      %266 = tpu.strided_load %arg7[%c1_133, %c0_134] {strides = array<i32: 2, 1>} : memref<56x16xf32, #tpu.memory_space<vmem>>, vector<28x16xf32>
      %267 = arith.maximumf %265, %266 : vector<28x16xf32>
      %268 = arith.truncf %267 : vector<28x16xf32> to vector<28x16xbf16>
      %c0_135 = arith.constant 0 : index
      %269 = arith.index_cast %arg8 : i32 to index
      %c0_136 = arith.constant 0 : index
      %c0_137 = arith.constant 0 : index
      %270 = vector.load %arg5[%c0_135, %269, %c0_136, %c0_137] : memref<1x14x28x16xbf16, #tpu.memory_space<vmem>>, vector<1x1x28x16xbf16>
      %271 = vector.shape_cast %270 : vector<1x1x28x16xbf16> to vector<28x16xbf16>
      %272 = vector.shape_cast %268 : vector<28x16xbf16> to vector<1x1x28x16xbf16>
      tpu.vector_store %arg5[%c0_135, %269, %c0_136, %c0_137], %272 {strides = array<i32>} : memref<1x14x28x16xbf16, #tpu.memory_space<vmem>>, vector<1x1x28x16xbf16>,
    }
    %c14_i32_3 = arith.constant 14 : i32
    return
  }
  func.func @transform_0(%arg0: i32, %arg1: i32) -> (i32, i32, i32, i32) {
    %c0_i32 = arith.constant 0 : i32
    %c0_i32_0 = arith.constant 0 : i32
    %c0_i32_1 = arith.constant 0 : i32
    %c0_i32_2 = arith.constant 0 : i32
    return %arg0, %c0_i32, %c0_i32_0, %c0_i32_1 : i32, i32, i32, i32
  }
  func.func @transform_1(%arg0: i32, %arg1: i32) -> (i32, i32) {
    %c0_i32 = arith.constant 0 : i32
    %c0_i32_0 = arith.constant 0 : i32
    %c0_i32_1 = arith.constant 0 : i32
    return %c0_i32, %c0_i32_0 : i32, i32
  }
  func.func @transform_2(%arg0: i32, %arg1: i32) -> (i32, i32) {
    %c0_i32 = arith.constant 0 : i32
    %c0_i32_0 = arith.constant 0 : i32
    %c0_i32_1 = arith.constant 0 : i32
    return %c0_i32, %c0_i32_0 : i32, i32
  }
  func.func @transform_3(%arg0: i32, %arg1: i32) -> (i32, i32, i32, i32) {
    %c0_i32 = arith.constant 0 : i32
    %c0_i32_0 = arith.constant 0 : i32
    %c0_i32_1 = arith.constant 0 : i32
    return %arg0, %arg1, %c0_i32, %c0_i32_0 : i32, i32, i32, i32
  }
}

module attributes {stable_mosaic.version = 11 : i64} {
  func.func @kernel(%arg0: i32, %arg1: i32, %arg2: memref<1x12x12x512xbf16, #tpu.memory_space<vmem>>, %arg3: memref<1x12x12x512xbf16, #tpu.memory_space<vmem>>, %arg4: memref<512x32xbf16, #tpu.memory_space<vmem>>, %arg5: memref<1x32xf32, #tpu.memory_space<vmem>>, %arg6: memref<1x6x12x32xbf16, #tpu.memory_space<vmem>>) attributes {dimension_semantics = [#tpu.dimension_semantics<parallel>, #tpu.dimension_semantics<parallel>], iteration_bounds = array<i64: 2, 2>, scalar_prefetch = 0 : i64, scratch_operands = 0 : i64, tpu.core_type = #tpu.core_type<tc>, window_params = [{transform_indices = @transform_0, window_bounds = array<i64: 1, 12, 12, 512>}, {transform_indices = @transform_1, window_bounds = array<i64: 1, 12, 12, 512>}, {pipeline_mode = #tpu.pipeline_mode<synchronous>, transform_indices = @transform_2, window_bounds = array<i64: 512, 32>}, {pipeline_mode = #tpu.pipeline_mode<synchronous>, transform_indices = @transform_3, window_bounds = array<i64: 1, 32>}, {transform_indices = @transform_4, window_bounds = array<i64: 1, 6, 12, 32>}]} {
    %c0_i32 = arith.constant 0 : i32
    %c6_i32 = arith.constant 6 : i32
    %0 = arith.addi %c0_i32, %c6_i32 : i32
    %c1_i32 = arith.constant 1 : i32
    scf.for %arg7 = %c0_i32 to %0 step %c1_i32  : i32 {
      %c0 = arith.constant 0 : index
      %c0_1 = arith.constant 0 : index
      %1 = vector.load %arg4[%c0, %c0_1] : memref<512x32xbf16, #tpu.memory_space<vmem>>, vector<512x32xbf16>
      %c2_i32 = arith.constant 2 : i32
      %2 = arith.muli %c2_i32, %arg7 : i32
      %c0_2 = arith.constant 0 : index
      %3 = arith.index_cast %2 : i32 to index
      %c0_3 = arith.constant 0 : index
      %c0_4 = arith.constant 0 : index
      %4 = vector.load %arg2[%c0_2, %3, %c0_3, %c0_4] : memref<1x12x12x512xbf16, #tpu.memory_space<vmem>>, vector<1x1x12x512xbf16>
      %5 = vector.shape_cast %4 : vector<1x1x12x512xbf16> to vector<12x512xbf16>
      %cst = arith.constant dense<0.000000e+00> : vector<12x32xf32>
      %6 = tpu.matmul %5, %1, %cst {dimension_numbers = #tpu.dot_dimension_numbers<[1], [0], [0], [1], [0, 0, 1, 1], [], []>} : vector<12x512xbf16>, vector<512x32xbf16>, vector<12x32xf32> -> vector<12x32xf32>
      %c2_i32_5 = arith.constant 2 : i32
      %7 = arith.muli %c2_i32_5, %arg7 : i32
      %c0_6 = arith.constant 0 : index
      %8 = arith.index_cast %7 : i32 to index
      %c0_7 = arith.constant 0 : index
      %c0_8 = arith.constant 0 : index
      %9 = vector.load %arg3[%c0_6, %8, %c0_7, %c0_8] : memref<1x12x12x512xbf16, #tpu.memory_space<vmem>>, vector<1x1x12x512xbf16>
      %10 = vector.shape_cast %9 : vector<1x1x12x512xbf16> to vector<12x512xbf16>
      %cst_9 = arith.constant dense<0.000000e+00> : vector<12x32xf32>
      %11 = tpu.matmul %10, %1, %cst_9 {dimension_numbers = #tpu.dot_dimension_numbers<[1], [0], [0], [1], [0, 0, 1, 1], [], []>} : vector<12x512xbf16>, vector<512x32xbf16>, vector<12x32xf32> -> vector<12x32xf32>
      %c2_i32_10 = arith.constant 2 : i32
      %12 = arith.muli %c2_i32_10, %arg7 : i32
      %c1_i32_11 = arith.constant 1 : i32
      %13 = arith.addi %12, %c1_i32_11 : i32
      %c0_12 = arith.constant 0 : index
      %14 = arith.index_cast %13 : i32 to index
      %c0_13 = arith.constant 0 : index
      %c0_14 = arith.constant 0 : index
      %15 = vector.load %arg2[%c0_12, %14, %c0_13, %c0_14] : memref<1x12x12x512xbf16, #tpu.memory_space<vmem>>, vector<1x1x12x512xbf16>
      %16 = vector.shape_cast %15 : vector<1x1x12x512xbf16> to vector<12x512xbf16>
      %cst_15 = arith.constant dense<0.000000e+00> : vector<12x32xf32>
      %17 = tpu.matmul %16, %1, %cst_15 {dimension_numbers = #tpu.dot_dimension_numbers<[1], [0], [0], [1], [0, 0, 1, 1], [], []>} : vector<12x512xbf16>, vector<512x32xbf16>, vector<12x32xf32> -> vector<12x32xf32>
      %c2_i32_16 = arith.constant 2 : i32
      %18 = arith.muli %c2_i32_16, %arg7 : i32
      %c1_i32_17 = arith.constant 1 : i32
      %19 = arith.addi %18, %c1_i32_17 : i32
      %c0_18 = arith.constant 0 : index
      %20 = arith.index_cast %19 : i32 to index
      %c0_19 = arith.constant 0 : index
      %c0_20 = arith.constant 0 : index
      %21 = vector.load %arg3[%c0_18, %20, %c0_19, %c0_20] : memref<1x12x12x512xbf16, #tpu.memory_space<vmem>>, vector<1x1x12x512xbf16>
      %22 = vector.shape_cast %21 : vector<1x1x12x512xbf16> to vector<12x512xbf16>
      %cst_21 = arith.constant dense<0.000000e+00> : vector<12x32xf32>
      %23 = tpu.matmul %22, %1, %cst_21 {dimension_numbers = #tpu.dot_dimension_numbers<[1], [0], [0], [1], [0, 0, 1, 1], [], []>} : vector<12x512xbf16>, vector<512x32xbf16>, vector<12x32xf32> -> vector<12x32xf32>
      %24 = arith.maximumf %6, %11 : vector<12x32xf32>
      %25 = arith.maximumf %17, %23 : vector<12x32xf32>
      %26 = arith.maximumf %24, %25 : vector<12x32xf32>
      %c0_22 = arith.constant 0 : index
      %c0_23 = arith.constant 0 : index
      %27 = vector.load %arg5[%c0_22, %c0_23] : memref<1x32xf32, #tpu.memory_space<vmem>>, vector<1x32xf32>
      %28 = vector.broadcast %27 : vector<1x32xf32> to vector<12x32xf32>
      %29 = arith.addf %26, %28 : vector<12x32xf32>
      %cst_24 = arith.constant 0.000000e+00 : f32
      %30 = vector.broadcast %cst_24 : f32 to vector<12x32xf32>
      %31 = arith.maximumf %29, %30 : vector<12x32xf32>
      %32 = arith.truncf %31 : vector<12x32xf32> to vector<12x32xbf16>
      %c0_25 = arith.constant 0 : index
      %33 = arith.index_cast %arg7 : i32 to index
      %c0_26 = arith.constant 0 : index
      %c0_27 = arith.constant 0 : index
      %34 = vector.load %arg6[%c0_25, %33, %c0_26, %c0_27] : memref<1x6x12x32xbf16, #tpu.memory_space<vmem>>, vector<1x1x12x32xbf16>
      %35 = vector.shape_cast %34 : vector<1x1x12x32xbf16> to vector<12x32xbf16>
      %36 = vector.shape_cast %32 : vector<12x32xbf16> to vector<1x1x12x32xbf16>
      tpu.vector_store %arg6[%c0_25, %33, %c0_26, %c0_27], %36 {strides = array<i32>} : memref<1x6x12x32xbf16, #tpu.memory_space<vmem>>, vector<1x1x12x32xbf16>,
    }
    %c6_i32_0 = arith.constant 6 : i32
    return
  }
  func.func @transform_0(%arg0: i32, %arg1: i32) -> (i32, i32, i32, i32) {
    %c0_i32 = arith.constant 0 : i32
    %c0_i32_0 = arith.constant 0 : i32
    %c0_i32_1 = arith.constant 0 : i32
    return %arg0, %arg1, %c0_i32, %c0_i32_0 : i32, i32, i32, i32
  }
  func.func @transform_1(%arg0: i32, %arg1: i32) -> (i32, i32, i32, i32) {
    %c0_i32 = arith.constant 0 : i32
    %c0_i32_0 = arith.constant 0 : i32
    %c0_i32_1 = arith.constant 0 : i32
    return %arg0, %arg1, %c0_i32, %c0_i32_0 : i32, i32, i32, i32
  }
  func.func @transform_2(%arg0: i32, %arg1: i32) -> (i32, i32) {
    %c0_i32 = arith.constant 0 : i32
    %c0_i32_0 = arith.constant 0 : i32
    %c0_i32_1 = arith.constant 0 : i32
    return %c0_i32, %c0_i32_0 : i32, i32
  }
  func.func @transform_3(%arg0: i32, %arg1: i32) -> (i32, i32) {
    %c0_i32 = arith.constant 0 : i32
    %c0_i32_0 = arith.constant 0 : i32
    %c0_i32_1 = arith.constant 0 : i32
    return %c0_i32, %c0_i32_0 : i32, i32
  }
  func.func @transform_4(%arg0: i32, %arg1: i32) -> (i32, i32, i32, i32) {
    %c0_i32 = arith.constant 0 : i32
    %c0_i32_0 = arith.constant 0 : i32
    %c0_i32_1 = arith.constant 0 : i32
    return %arg0, %arg1, %c0_i32, %c0_i32_0 : i32, i32, i32, i32
  }
}

module attributes {stable_mosaic.version = 11 : i64} {
  func.func @_fc_kernel(%arg0: memref<2x4608xbf16, #tpu.memory_space<vmem>>, %arg1: memref<4608x120xbf16, #tpu.memory_space<vmem>>, %arg2: memref<1x120xf32, #tpu.memory_space<vmem>>, %arg3: memref<120x84xbf16, #tpu.memory_space<vmem>>, %arg4: memref<1x84xf32, #tpu.memory_space<vmem>>, %arg5: memref<84x2xbf16, #tpu.memory_space<vmem>>, %arg6: memref<1x2xf32, #tpu.memory_space<vmem>>, %arg7: memref<2x2xf32, #tpu.memory_space<vmem>>) attributes {dimension_semantics = [], scalar_prefetch = 0 : i64, scratch_operands = 0 : i64, tpu.core_type = #tpu.core_type<tc>} {
    %c0 = arith.constant 0 : index
    %c0_0 = arith.constant 0 : index
    %0 = vector.load %arg0[%c0, %c0_0] : memref<2x4608xbf16, #tpu.memory_space<vmem>>, vector<2x4608xbf16>
    %c0_1 = arith.constant 0 : index
    %c0_2 = arith.constant 0 : index
    %1 = vector.load %arg1[%c0_1, %c0_2] : memref<4608x120xbf16, #tpu.memory_space<vmem>>, vector<4608x120xbf16>
    %cst = arith.constant dense<0.000000e+00> : vector<2x120xf32>
    %2 = tpu.matmul %0, %1, %cst {dimension_numbers = #tpu.dot_dimension_numbers<[1], [0], [0], [1], [0, 0, 1, 1], [], []>} : vector<2x4608xbf16>, vector<4608x120xbf16>, vector<2x120xf32> -> vector<2x120xf32>
    %c0_3 = arith.constant 0 : index
    %c0_4 = arith.constant 0 : index
    %3 = vector.load %arg2[%c0_3, %c0_4] : memref<1x120xf32, #tpu.memory_space<vmem>>, vector<1x120xf32>
    %4 = vector.broadcast %3 : vector<1x120xf32> to vector<2x120xf32>
    %5 = arith.addf %2, %4 : vector<2x120xf32>
    %cst_5 = arith.constant 0.000000e+00 : f32
    %6 = vector.broadcast %cst_5 : f32 to vector<2x120xf32>
    %7 = arith.maximumf %5, %6 : vector<2x120xf32>
    %8 = arith.truncf %7 : vector<2x120xf32> to vector<2x120xbf16>
    %c0_6 = arith.constant 0 : index
    %c0_7 = arith.constant 0 : index
    %9 = vector.load %arg3[%c0_6, %c0_7] : memref<120x84xbf16, #tpu.memory_space<vmem>>, vector<120x84xbf16>
    %cst_8 = arith.constant dense<0.000000e+00> : vector<2x84xf32>
    %10 = tpu.matmul %8, %9, %cst_8 {dimension_numbers = #tpu.dot_dimension_numbers<[1], [0], [0], [1], [0, 0, 1, 1], [], []>} : vector<2x120xbf16>, vector<120x84xbf16>, vector<2x84xf32> -> vector<2x84xf32>
    %c0_9 = arith.constant 0 : index
    %c0_10 = arith.constant 0 : index
    %11 = vector.load %arg4[%c0_9, %c0_10] : memref<1x84xf32, #tpu.memory_space<vmem>>, vector<1x84xf32>
    %12 = vector.broadcast %11 : vector<1x84xf32> to vector<2x84xf32>
    %13 = arith.addf %10, %12 : vector<2x84xf32>
    %cst_11 = arith.constant 0.000000e+00 : f32
    %14 = vector.broadcast %cst_11 : f32 to vector<2x84xf32>
    %15 = arith.maximumf %13, %14 : vector<2x84xf32>
    %16 = arith.truncf %15 : vector<2x84xf32> to vector<2x84xbf16>
    %c0_12 = arith.constant 0 : index
    %c0_13 = arith.constant 0 : index
    %17 = vector.load %arg5[%c0_12, %c0_13] : memref<84x2xbf16, #tpu.memory_space<vmem>>, vector<84x2xbf16>
    %cst_14 = arith.constant dense<0.000000e+00> : vector<2x2xf32>
    %18 = tpu.matmul %16, %17, %cst_14 {dimension_numbers = #tpu.dot_dimension_numbers<[1], [0], [0], [1], [0, 0, 1, 1], [], []>} : vector<2x84xbf16>, vector<84x2xbf16>, vector<2x2xf32> -> vector<2x2xf32>
    %c0_15 = arith.constant 0 : index
    %c0_16 = arith.constant 0 : index
    %19 = vector.load %arg6[%c0_15, %c0_16] : memref<1x2xf32, #tpu.memory_space<vmem>>, vector<1x2xf32>
    %20 = vector.broadcast %19 : vector<1x2xf32> to vector<2x2xf32>
    %21 = arith.addf %18, %20 : vector<2x2xf32>
    %c0_17 = arith.constant 0 : index
    %c0_18 = arith.constant 0 : index
    %22 = vector.load %arg7[%c0_17, %c0_18] : memref<2x2xf32, #tpu.memory_space<vmem>>, vector<2x2xf32>
    tpu.vector_store %arg7[%c0_17, %c0_18], %21 {strides = array<i32>} : memref<2x2xf32, #tpu.memory_space<vmem>>, vector<2x2xf32>,
    return
  }
}

</mosaic_0001>

<bundles_post_ra>
// kernel: forward.4
= control target key start
LH: loop header
LB: loop body
LE: loop exit
PB: predicated region body
PF: predicated region fallthrough
CT: control target
= control target key end

     0   :  { %s1954_s15 = smov 0   ;;  %s1956_s16 = smov 0   ;;  %s2800_s0 = inlined_call_operand.vmem [shape: bf16[2,120,60,128], index: 0, kind: input, shape index: {}]   ;;  %s2801_s1 = inlined_call_operand.vmem [shape: bf16[2,120,60,128], index: 1, kind: input, shape index: {}]   ;;  %s2802_s2 = inlined_call_operand.vmem [shape: bf16[128,512], index: 2, kind: input, shape index: {}]   ;;  %s2803_s3 = inlined_call_operand.vmem [shape: f32[1,512], index: 3, kind: input, shape index: {}]   ;;  %s2804_s4 = inlined_call_operand.vmem [shape: bf16[2,60,60,512], index: 4, kind: output, shape index: {}]  }
   0x1   :  { %s1958_s17 = smov 0   ;;  %s1960_s18 = smov 0  }
   0x2   :  { %s1962_s19 = smov 0  }
   0x3 LB: > { %s23_s20 = sadd.s32 1, %s1914_s17  ;;  %s26_s21 = sadd.s32 1, %s1918_s18  ;;  %s1922_s19 = sphi %s1962_s19, %s14_s19   ;;  %s1918_s18 = sphi %s1960_s18, %s2976_s18   ;;  %s1914_s17 = sphi %s1958_s17, %s2975_s17   ;;  %s1910_s16 = sphi %s1956_s16, %s2974_s16   ;;  %s1906_s15 = sphi %s1954_s15, %s2973_s15  }
   0x4   : > { %p24_p0 = scmp.ge.s32.totalorder %s23_s20, 6  ;;  %p1644_p1 = scmp.ge.s32.totalorder %s1922_s19, 1 }
   0x5   : > { %p202_p2 = scmp.lt.s32.totalorder %s1922_s19, 13 }
   0x6   : > { %s2978_s20 = smov (%p24_p0, %s23_s20), 0  ;;  %s2980_s21 = smov (!%p24_p0, %s26_s21), %s1918_s18 }
   0x7   : > { %p203_p3 = pnand %p1644_p1, %p202_p2  ;;  %p28_p4 = scmp.ge.s32.totalorder %s2980_s21, 2 }
   0x8   : > { %s248_s22 = smul.u32 (!%p203_p3), 20, %s1906_s15  ;;  %p249_p5 = scmp.lt.s32.totalorder (!%p203_p3), %s1910_s16, 1 }
   0x9   : > { %s2982_s21 = smov (%p28_p4, %s2980_s21), 0  ;;  %206 = sbr.rel (%p203_p3) target bundleno = 397 (0x18d), region = 36 }
   0xa   : > { %s270_s23 = smul.u32 (!%p203_p3), 10, %s1906_s15  ;;  %p251_p6 = scmp.lt.s32.totalorder (!%p203_p3), %s248_s22, 119 }
   0xb   : > { %s1999_s15 = smov (!%p203_p3), 0  }
   0xc   : > { %p273_p7 = scmp.lt.s32.totalorder (!%p203_p3), %s270_s23, 59 }
   0xe   : > { %s2984_s16 = smov (!%p249_p5, %s1910_s16), 1  ;;  %s2986_s22 = smov (!%p251_p6, %s248_s22), 119 }
   0xf   : > { %s1765_s24 = smul.u32 960, %s2984_s16  ;;  %s2988_s23 = smov (!%p273_p7, %s270_s23), 59 }
  0x10   : > { %s1645_s25 = sshll.u32 %s2986_s22, 3  ;;  %s1766_s26 = smul.u32 1920, %s2984_s16 }
  0x11   : > { %s255_s27 = sadd.s32 %s1765_s24, %s1645_s25  ;;  %s1649_s28 = sshll.u32 %s2988_s23, 5 }
  0x12   : > { %s1646_s29 = sshll.u32 %s255_s27, 2  ;;  %s277_s30 = sadd.s32 %s1766_s26, %s1649_s28 }
  0x13   : > { %s1987_s7 = scalar_lea.vmem %s2800_s0, %s1646_s29  ;;  %s1992_s10 = scalar_lea.vmem %s2801_s1, %s1646_s29 }
  0x14   : > { %s1650_s11 = sshll.u32 %s277_s30, 2 }
  0x15   : > { %s1997_s14 = scalar_lea.vmem %s2804_s4, %s1650_s11 }
  0x16 LB: >> { %v2007_v0 = vld [vmem:[%s2802_s2 + $0xe4] ss:$16 sps:$4 sm:$0xff]   ;;  %v2012_v1 = vld [vmem:[%s2802_s2 + $0xec] ss:$16 sps:$4 sm:$0xff]   ;;  %v1928_v2 = vmov 0   ;;  %s1744_s5 = sshll.u32 %s1926_s15, 6  ;;  %s1926_s15 = sphi %s1999_s15, %s287_s15  }
  0x17   : >> { %548 = vmatprep.mubr.bf16.mxu0 %v1928_v2  ;;  %621 = vmatprep.mubr.bf16.mxu1 %v1928_v2  ;;  %v2020_v3 = vld [vmem:[%s2802_s2 + $0xe0] ss:$16 sps:$4 sm:$0xff]   ;;  %v2025_v4 = vld [vmem:[%s2802_s2 + $0xe8] ss:$16 sps:$4 sm:$0xff]   ;;  %v2031_v5 = vld [vmem:[%s2802_s2 + $0xc4] ss:$16 sps:$4 sm:$0xff]   ;;  %s2153_s16 = scalar_lea.vmem %s1987_s7, %s1744_s5  ;;  %s2180_s30 = scalar_lea.vmem %s1992_s10, %s1744_s5 }
  0x18   : >> { %516 = vmatprep.subr.bf16.mxu0 %v2007_v0  ;;  %589 = vmatprep.subr.bf16.mxu1 %v2012_v1  ;;  %v2038_v6 = vld [vmem:[%s2802_s2 + $0xcc] ss:$16 sps:$4 sm:$0xff]   ;;  %v2043_v7 = vld [vmem:[%s2802_s2 + $0xc0] ss:$16 sps:$4 sm:$0xff]   ;;  %v2049_v8 = vld [vmem:[%s2802_s2 + $0xc8] ss:$16 sps:$4 sm:$0xff]  }
  0x19   : >> { %517 = vmatpush1.bf16.msra.mxu0 %v2020_v3  ;;  %590 = vmatpush1.bf16.msra.mxu1 %v2025_v4  ;;  %v2055_v9 = vld [vmem:[%s2802_s2 + $0xa4] ss:$16 sps:$4 sm:$0xff]   ;;  %v2060_v10 = vld [vmem:[%s2802_s2 + $0xac] ss:$16 sps:$4 sm:$0xff]   ;;  %v2065_v11 = vld [vmem:[%s2802_s2 + $0xa0] ss:$16 sps:$4 sm:$0xff]  }
  0x1a   : >> { %518 = vmatprep.subr.bf16.mxu0 %v2031_v5  ;;  %591 = vmatprep.subr.bf16.mxu1 %v2038_v6  ;;  %v2070_v12 = vld [vmem:[%s2802_s2 + $0xa8] ss:$16 sps:$4 sm:$0xff]   ;;  %v2077_v13 = vld [vmem:[%s2802_s2 + $0x84] ss:$16 sps:$4 sm:$0xff]   ;;  %v2084_v14 = vld [vmem:[%s2802_s2 + $0x8c] ss:$16 sps:$4 sm:$0xff]  }
  0x1b   : >> { %v2089_v15 = vld [vmem:[%s2802_s2 + $0x80] ss:$16 sps:$4 sm:$0xff]   ;;  %v2096_v16 = vld [vmem:[%s2802_s2 + $0x88] ss:$16 sps:$4 sm:$0xff]   ;;  %v2101_v17 = vld [vmem:[%s2802_s2 + $0x64] ss:$16 sps:$4 sm:$0xff]  }
  0x1c   : >> { %v2108_v18 = vld [vmem:[%s2802_s2 + $0x6c] ss:$16 sps:$4 sm:$0xff]   ;;  %v2113_v19 = vld [vmem:[%s2802_s2 + $0x60] ss:$16 sps:$4 sm:$0xff]   ;;  %v2118_v20 = vld [vmem:[%s2802_s2 + $0x68] ss:$16 sps:$4 sm:$0xff]  }
  0x1d   : >> { %519 = vmatpush1.bf16.msra.mxu0 %v2043_v7  ;;  %592 = vmatpush1.bf16.msra.mxu1 %v2049_v8  ;;  %v2125_v21 = vld [vmem:[%s2802_s2 + $0x44] ss:$16 sps:$4 sm:$0xff]   ;;  %v2132_v22 = vld [vmem:[%s2802_s2 + $0x4c] ss:$16 sps:$4 sm:$0xff]   ;;  %v2138_v23 = vld [vmem:[%s2802_s2 + $0x40] ss:$16 sps:$4 sm:$0xff]  }
  0x1e   : >> { %520 = vmatprep.subr.bf16.mxu0 %v2055_v9  ;;  %593 = vmatprep.subr.bf16.mxu1 %v2060_v10  ;;  %v2145_v24 = vld [vmem:[%s2802_s2 + $0x48] ss:$16 sps:$4 sm:$0xff]   ;;  %v2150_v25 = vld [vmem:[%s2802_s2 + $0x24] ss:$16 sps:$4 sm:$0xff]   ;;  %v2160_v26 = vld [vmem:[%s2802_s2 + $0x2c] ss:$16 sps:$4 sm:$0xff]  }
  0x1f   : >> { %v2165_v27 = vld [vmem:[%s2802_s2 + $0x20] ss:$16 sps:$4 sm:$0xff]   ;;  %v2170_v28 = vld [vmem:[%s2802_s2 + $0x28] ss:$16 sps:$4 sm:$0xff]   ;;  %v2177_v29 = vld [vmem:[%s2802_s2 + $0x4] ss:$16 sps:$4 sm:$0xff]  }
  0x20   : >> { %v2187_v30 = vld [vmem:[%s2802_s2 + $0xc] ss:$16 sps:$4 sm:$0xff]   ;;  %v2192_v31 = vld [vmem:[%s2802_s2] ss:$16 sps:$4 sm:$0xff]   ;;  %v2199_v32 = vld [vmem:[%s2802_s2 + $0x8] ss:$16 sps:$4 sm:$0xff]  }
  0x21   : >> { %521 = vmatpush1.bf16.msra.mxu0 %v2065_v11  ;;  %594 = vmatpush1.bf16.msra.mxu1 %v2070_v12  ;;  %v1864_v33 = vld [vmem:[%s2153_s16] sm:$0xff]   ;;  %v1865_v34 = vld [vmem:[%s2153_s16 + $0x8] sm:$0xff]   ;;  %v1866_v35 = vld [vmem:[%s2153_s16 + $0x10] sm:$0xff]   ;;  %s1764_s22 = sshll.u32 %s1926_s15, 7  ;;  %s287_s15 = sadd.s32 1, %s1926_s15  }
  0x22   : >> { %522 = vmatprep.subr.bf16.mxu0 %v2077_v13  ;;  %595 = vmatprep.subr.bf16.mxu1 %v2084_v14  ;;  %v1867_v36 = vld [vmem:[%s2153_s16 + $0x18] sm:$0x3f]   ;;  %v1868_v37 = vld [vmem:[%s2180_s30] sm:$0xff]   ;;  %v1869_v38 = vld [vmem:[%s2180_s30 + $0x8] sm:$0xff]   ;;  %s2636_s23 = scalar_lea.vmem %s1997_s14, %s1764_s22  ;;  %p284_p8 = scmp.ge.s32.totalorder %s287_s15, 10  }
  0x23   : >> { %v1870_v39 = vld [vmem:[%s2180_s30 + $0x10] sm:$0xff]   ;;  %v1871_v40 = vld [vmem:[%s2180_s30 + $0x18] sm:$0x3f]   ;;  %v1872_v41 = vld [vmem:[%s2153_s16 + $0x20] sm:$0xff]  }
  0x24   : >> { %v1873_v42 = vld [vmem:[%s2153_s16 + $0x28] sm:$0xff]   ;;  %v1874_v43 = vld [vmem:[%s2153_s16 + $0x30] sm:$0xff]   ;;  %v1875_v44 = vld [vmem:[%s2153_s16 + $0x38] sm:$0x3f]  }
  0x25   : >> { %523 = vmatpush1.bf16.msra.mxu0 %v2089_v15  ;;  %596 = vmatpush1.bf16.msra.mxu1 %v2096_v16  ;;  %v1876_v45 = vld [vmem:[%s2180_s30 + $0x20] sm:$0xff]   ;;  %v1877_v46 = vld [vmem:[%s2180_s30 + $0x28] sm:$0xff]   ;;  %v1878_v47 = vld [vmem:[%s2180_s30 + $0x30] sm:$0xff]  }
  0x26   : >> { %524 = vmatprep.subr.bf16.mxu0 %v2101_v17  ;;  %597 = vmatprep.subr.bf16.mxu1 %v2108_v18  ;;  %v1879_v48 = vld [vmem:[%s2180_s30 + $0x38] sm:$0x3f]  }
  0x29   : >> { %525 = vmatpush1.bf16.msra.mxu0 %v2113_v19  ;;  %598 = vmatpush1.bf16.msra.mxu1 %v2118_v20 }
  0x2a   : >> { %526 = vmatprep.subr.bf16.mxu0 %v2125_v21  ;;  %599 = vmatprep.subr.bf16.mxu1 %v2132_v22 }
  0x2d   : >> { %527 = vmatpush1.bf16.msra.mxu0 %v2138_v23  ;;  %600 = vmatpush1.bf16.msra.mxu1 %v2145_v24 }
  0x2e   : >> { %528 = vmatprep.subr.bf16.mxu0 %v2150_v25  ;;  %601 = vmatprep.subr.bf16.mxu1 %v2160_v26 }
  0x31   : >> { %529 = vmatpush1.bf16.msra.mxu0 %v2165_v27  ;;  %602 = vmatpush1.bf16.msra.mxu1 %v2170_v28 }
  0x32   : >> { %530 = vmatprep.subr.bf16.mxu0 %v2177_v29  ;;  %603 = vmatprep.subr.bf16.mxu1 %v2187_v30 }
  0x35   : >> { %531 = vmatpush1.bf16.msra.mxu0 %v2192_v31  ;;  %604 = vmatpush1.bf16.msra.mxu1 %v2199_v32 }
  0x36   : >> { %696 = vmatprep.subr.bf16.mxu0 %v2007_v0  ;;  %769 = vmatprep.subr.bf16.mxu1 %v2012_v1 }
  0x38   : >> { %549 = vmatmul.mubr.bf16.vlgmr.msra.gmra.mxu0 %v1864_v33  ;;  %622 = vmatmul.mubr.bf16.vlgmr.msra.gmra.mxu1 %v1864_v33 }
  0x39   : >> { %697 = vmatpush1.bf16.msra.mxu0 %v2020_v3  ;;  %770 = vmatpush1.bf16.msra.mxu1 %v2025_v4 }
  0x3a   : >> { %698 = vmatprep.subr.bf16.mxu0 %v2031_v5  ;;  %771 = vmatprep.subr.bf16.mxu1 %v2038_v6 }
  0x3b   : >> { %558 = vmatprep.mubr.bf16.mxu0 %v1928_v2  ;;  %631 = vmatprep.mubr.bf16.mxu1 %v1928_v2 }
  0x3d   : >> { %699 = vmatpush1.bf16.msra.mxu0 %v2043_v7  ;;  %772 = vmatpush1.bf16.msra.mxu1 %v2049_v8 }
  0x3e   : >> { %700 = vmatprep.subr.bf16.mxu0 %v2055_v9  ;;  %773 = vmatprep.subr.bf16.mxu1 %v2060_v10 }
  0x40   : >> { %559 = vmatmul.mubr.bf16.gmra.mxu0 %v1865_v34  ;;  %632 = vmatmul.mubr.bf16.gmra.mxu1 %v1865_v34 }
  0x41   : >> { %701 = vmatpush1.bf16.msra.mxu0 %v2065_v11  ;;  %774 = vmatpush1.bf16.msra.mxu1 %v2070_v12 }
  0x42   : >> { %702 = vmatprep.subr.bf16.mxu0 %v2077_v13  ;;  %775 = vmatprep.subr.bf16.mxu1 %v2084_v14 }
  0x43   : >> { %568 = vmatprep.mubr.bf16.mxu0 %v1928_v2  ;;  %641 = vmatprep.mubr.bf16.mxu1 %v1928_v2 }
  0x45   : >> { %703 = vmatpush1.bf16.msra.mxu0 %v2089_v15  ;;  %776 = vmatpush1.bf16.msra.mxu1 %v2096_v16 }
  0x46   : >> { %704 = vmatprep.subr.bf16.mxu0 %v2101_v17  ;;  %777 = vmatprep.subr.bf16.mxu1 %v2108_v18 }
  0x48   : >> { %569 = vmatmul.mubr.bf16.gmra.mxu0 %v1866_v35  ;;  %642 = vmatmul.mubr.bf16.gmra.mxu1 %v1866_v35 }
  0x49   : >> { %705 = vmatpush1.bf16.msra.mxu0 %v2113_v19  ;;  %778 = vmatpush1.bf16.msra.mxu1 %v2118_v20 }
  0x4a   : >> { %706 = vmatprep.subr.bf16.mxu0 %v2125_v21  ;;  %779 = vmatprep.subr.bf16.mxu1 %v2132_v22 }
  0x4b   : >> { %578 = vmatprep.mubr.bf16.mxu0 %v1928_v2  ;;  %651 = vmatprep.mubr.bf16.mxu1 %v1928_v2 }
  0x4d   : >> { %707 = vmatpush1.bf16.msra.mxu0 %v2138_v23  ;;  %780 = vmatpush1.bf16.msra.mxu1 %v2145_v24 }
  0x4e   : >> { %708 = vmatprep.subr.bf16.mxu0 %v2150_v25  ;;  %781 = vmatprep.subr.bf16.mxu1 %v2160_v26 }
  0x50   : >> { %579 = vmatmul.mubr.bf16.gmra.mxu0 %v1867_v36  ;;  %652 = vmatmul.mubr.bf16.gmra.mxu1 %v1867_v36 }
  0x51   : >> { %709 = vmatpush1.bf16.msra.mxu0 %v2165_v27  ;;  %782 = vmatpush1.bf16.msra.mxu1 %v2170_v28 }
  0x52   : >> { %710 = vmatprep.subr.bf16.mxu0 %v2177_v29  ;;  %783 = vmatprep.subr.bf16.mxu1 %v2187_v30 }
  0x53   : >> { %728 = vmatprep.mubr.bf16.mxu0 %v1928_v2  ;;  %801 = vmatprep.mubr.bf16.mxu1 %v1928_v2 }
  0x55   : >> { %711 = vmatpush1.bf16.msra.mxu0 %v2192_v31  ;;  %784 = vmatpush1.bf16.msra.mxu1 %v2199_v32 }
  0x56   : >> { %878 = vmatprep.subr.bf16.mxu0 %v2007_v0  ;;  %951 = vmatprep.subr.bf16.mxu1 %v2012_v1 }
  0x58   : >> { %729 = vmatmul.mubr.bf16.vlgmr.msra.gmra.mxu0 %v1868_v37  ;;  %802 = vmatmul.mubr.bf16.vlgmr.msra.gmra.mxu1 %v1868_v37 }
  0x59   : >> { %879 = vmatpush1.bf16.msra.mxu0 %v2020_v3  ;;  %952 = vmatpush1.bf16.msra.mxu1 %v2025_v4 }
  0x5a   : >> { %880 = vmatprep.subr.bf16.mxu0 %v2031_v5  ;;  %953 = vmatprep.subr.bf16.mxu1 %v2038_v6 }
  0x5b   : >> { %738 = vmatprep.mubr.bf16.mxu0 %v1928_v2  ;;  %811 = vmatprep.mubr.bf16.mxu1 %v1928_v2 }
  0x5d   : >> { %881 = vmatpush1.bf16.msra.mxu0 %v2043_v7  ;;  %954 = vmatpush1.bf16.msra.mxu1 %v2049_v8 }
  0x5e   : >> { %882 = vmatprep.subr.bf16.mxu0 %v2055_v9  ;;  %955 = vmatprep.subr.bf16.mxu1 %v2060_v10 }
  0x60   : >> { %739 = vmatmul.mubr.bf16.gmra.mxu0 %v1869_v38  ;;  %812 = vmatmul.mubr.bf16.gmra.mxu1 %v1869_v38 }
  0x61   : >> { %883 = vmatpush1.bf16.msra.mxu0 %v2065_v11  ;;  %956 = vmatpush1.bf16.msra.mxu1 %v2070_v12 }
  0x62   : >> { %884 = vmatprep.subr.bf16.mxu0 %v2077_v13  ;;  %957 = vmatprep.subr.bf16.mxu1 %v2084_v14 }
  0x63   : >> { %748 = vmatprep.mubr.bf16.mxu0 %v1928_v2  ;;  %821 = vmatprep.mubr.bf16.mxu1 %v1928_v2 }
  0x65   : >> { %885 = vmatpush1.bf16.msra.mxu0 %v2089_v15  ;;  %958 = vmatpush1.bf16.msra.mxu1 %v2096_v16 }
  0x66   : >> { %886 = vmatprep.subr.bf16.mxu0 %v2101_v17  ;;  %959 = vmatprep.subr.bf16.mxu1 %v2108_v18 }
  0x68   : >> { %749 = vmatmul.mubr.bf16.gmra.mxu0 %v1870_v39  ;;  %822 = vmatmul.mubr.bf16.gmra.mxu1 %v1870_v39 }
  0x69   : >> { %887 = vmatpush1.bf16.msra.mxu0 %v2113_v19  ;;  %960 = vmatpush1.bf16.msra.mxu1 %v2118_v20 }
  0x6a   : >> { %888 = vmatprep.subr.bf16.mxu0 %v2125_v21  ;;  %961 = vmatprep.subr.bf16.mxu1 %v2132_v22 }
  0x6b   : >> { %758 = vmatprep.mubr.bf16.mxu0 %v1928_v2  ;;  %831 = vmatprep.mubr.bf16.mxu1 %v1928_v2 }
  0x6d   : >> { %889 = vmatpush1.bf16.msra.mxu0 %v2138_v23  ;;  %962 = vmatpush1.bf16.msra.mxu1 %v2145_v24 }
  0x6e   : >> { %890 = vmatprep.subr.bf16.mxu0 %v2150_v25  ;;  %963 = vmatprep.subr.bf16.mxu1 %v2160_v26 }
  0x70   : >> { %759 = vmatmul.mubr.bf16.gmra.mxu0 %v1871_v40  ;;  %832 = vmatmul.mubr.bf16.gmra.mxu1 %v1871_v40 }
  0x71   : >> { %891 = vmatpush1.bf16.msra.mxu0 %v2165_v27  ;;  %964 = vmatpush1.bf16.msra.mxu1 %v2170_v28 }
  0x72   : >> { %892 = vmatprep.subr.bf16.mxu0 %v2177_v29  ;;  %965 = vmatprep.subr.bf16.mxu1 %v2187_v30 }
  0x73   : >> { %910 = vmatprep.mubr.bf16.mxu0 %v1928_v2  ;;  %983 = vmatprep.mubr.bf16.mxu1 %v1928_v2 }
  0x75   : >> { %893 = vmatpush1.bf16.msra.mxu0 %v2192_v31  ;;  %966 = vmatpush1.bf16.msra.mxu1 %v2199_v32 }
  0x76   : >> { %1058 = vmatprep.subr.bf16.mxu0 %v2007_v0  ;;  %1131 = vmatprep.subr.bf16.mxu1 %v2012_v1 }
  0x78   : >> { %911 = vmatmul.mubr.bf16.vlgmr.msra.gmra.mxu0 %v1872_v41  ;;  %984 = vmatmul.mubr.bf16.vlgmr.msra.gmra.mxu1 %v1872_v41 }
  0x79   : >> { %1059 = vmatpush1.bf16.msra.mxu0 %v2020_v3  ;;  %1132 = vmatpush1.bf16.msra.mxu1 %v2025_v4 }
  0x7a   : >> { %1060 = vmatprep.subr.bf16.mxu0 %v2031_v5  ;;  %1133 = vmatprep.subr.bf16.mxu1 %v2038_v6 }
  0x7b   : >> { %920 = vmatprep.mubr.bf16.mxu0 %v1928_v2  ;;  %993 = vmatprep.mubr.bf16.mxu1 %v1928_v2 }
  0x7d   : >> { %1061 = vmatpush1.bf16.msra.mxu0 %v2043_v7  ;;  %1134 = vmatpush1.bf16.msra.mxu1 %v2049_v8 }
  0x7e   : >> { %1062 = vmatprep.subr.bf16.mxu0 %v2055_v9  ;;  %1135 = vmatprep.subr.bf16.mxu1 %v2060_v10 }
  0x80   : >> { %921 = vmatmul.mubr.bf16.gmra.mxu0 %v1873_v42  ;;  %994 = vmatmul.mubr.bf16.gmra.mxu1 %v1873_v42 }
  0x81   : >> { %1063 = vmatpush1.bf16.msra.mxu0 %v2065_v11  ;;  %1136 = vmatpush1.bf16.msra.mxu1 %v2070_v12 }
  0x82   : >> { %1064 = vmatprep.subr.bf16.mxu0 %v2077_v13  ;;  %1137 = vmatprep.subr.bf16.mxu1 %v2084_v14 }
  0x83   : >> { %930 = vmatprep.mubr.bf16.mxu0 %v1928_v2  ;;  %1003 = vmatprep.mubr.bf16.mxu1 %v1928_v2 }
  0x85   : >> { %1065 = vmatpush1.bf16.msra.mxu0 %v2089_v15  ;;  %1138 = vmatpush1.bf16.msra.mxu1 %v2096_v16 }
  0x86   : >> { %1066 = vmatprep.subr.bf16.mxu0 %v2101_v17  ;;  %1139 = vmatprep.subr.bf16.mxu1 %v2108_v18 }
  0x88   : >> { %931 = vmatmul.mubr.bf16.gmra.mxu0 %v1874_v43  ;;  %1004 = vmatmul.mubr.bf16.gmra.mxu1 %v1874_v43 }
  0x89   : >> { %1067 = vmatpush1.bf16.msra.mxu0 %v2113_v19  ;;  %1140 = vmatpush1.bf16.msra.mxu1 %v2118_v20 }
  0x8a   : >> { %1068 = vmatprep.subr.bf16.mxu0 %v2125_v21  ;;  %1141 = vmatprep.subr.bf16.mxu1 %v2132_v22 }
  0x8b   : >> { %940 = vmatprep.mubr.bf16.mxu0 %v1928_v2  ;;  %1013 = vmatprep.mubr.bf16.mxu1 %v1928_v2 }
  0x8d   : >> { %1069 = vmatpush1.bf16.msra.mxu0 %v2138_v23  ;;  %1142 = vmatpush1.bf16.msra.mxu1 %v2145_v24 }
  0x8e   : >> { %1070 = vmatprep.subr.bf16.mxu0 %v2150_v25  ;;  %1143 = vmatprep.subr.bf16.mxu1 %v2160_v26 }
  0x90   : >> { %941 = vmatmul.mubr.bf16.gmra.mxu0 %v1875_v44  ;;  %1014 = vmatmul.mubr.bf16.gmra.mxu1 %v1875_v44 }
  0x91   : >> { %1071 = vmatpush1.bf16.msra.mxu0 %v2165_v27  ;;  %1144 = vmatpush1.bf16.msra.mxu1 %v2170_v28 }
  0x92   : >> { %1072 = vmatprep.subr.bf16.mxu0 %v2177_v29  ;;  %1145 = vmatprep.subr.bf16.mxu1 %v2187_v30 }
  0x93   : >> { %1090 = vmatprep.mubr.bf16.mxu0 %v1928_v2  ;;  %1163 = vmatprep.mubr.bf16.mxu1 %v1928_v2 }
  0x95   : >> { %1073 = vmatpush1.bf16.msra.mxu0 %v2192_v31  ;;  %1146 = vmatpush1.bf16.msra.mxu1 %v2199_v32 }
  0x98   : >> { %1091 = vmatmul.mubr.bf16.vlgmr.msra.gmra.mxu0 %v1876_v45  ;;  %1164 = vmatmul.mubr.bf16.vlgmr.msra.gmra.mxu1 %v1876_v45 }
  0x99   : >> { %1100 = vmatprep.mubr.bf16.mxu0 %v1928_v2  ;;  %1173 = vmatprep.mubr.bf16.mxu1 %v1928_v2 }
  0xa0   : >> { %1101 = vmatmul.mubr.bf16.gmra.mxu0 %v1877_v46  ;;  %1174 = vmatmul.mubr.bf16.gmra.mxu1 %v1877_v46 }
  0xa1   : >> { %1110 = vmatprep.mubr.bf16.mxu0 %v1928_v2  ;;  %1183 = vmatprep.mubr.bf16.mxu1 %v1928_v2 }
  0xa8   : >> { %1111 = vmatmul.mubr.bf16.gmra.mxu0 %v1878_v47  ;;  %1184 = vmatmul.mubr.bf16.gmra.mxu1 %v1878_v47 }
  0xa9   : >> { %1120 = vmatprep.mubr.bf16.mxu0 %v1928_v2  ;;  %1193 = vmatprep.mubr.bf16.mxu1 %v1928_v2 }
  0xb0   : >> { %1121 = vmatmul.mubr.bf16.gmra.mxu0 %v1879_v48  ;;  %1194 = vmatmul.mubr.bf16.gmra.mxu1 %v1879_v48 }
  0xf8   : >> { %v2347_v49 = vpop.f32.mrf.mxu0  ;;  %v2349_v50 = vpop.f32.mrf.mxu1 }
  0xfa   : >> { %v2351_v51 = vpop.f32.mrf.mxu0  ;;  %v2353_v52 = vpop.f32.mrf.mxu1 }
  0xfc   : >> { %v2355_v53 = vpop.f32.mrf.mxu0  ;;  %v2357_v54 = vpop.f32.mrf.mxu1 }
  0xfe   : >> { %v2359_v55 = vpop.f32.mrf.mxu0  ;;  %v2361_v56 = vpop.f32.mrf.mxu1 }
 0x100   : >> { %v2363_v57 = vpop.f32.mrf.mxu0  ;;  %v2365_v58 = vpop.f32.mrf.mxu1 }
 0x102   : >> { %v2367_v59 = vpop.f32.mrf.mxu0  ;;  %v2369_v60 = vpop.f32.mrf.mxu1 }
 0x104   : >> { %v2371_v61 = vpop.f32.mrf.mxu0  ;;  %v2373_v62 = vpop.f32.mrf.mxu1 }
 0x106   : >> { %v2375_v63 = vpop.f32.mrf.mxu0  ;;  %v2377_v0 = vpop.f32.mrf.mxu1 }
 0x107   : >> { %2841 = vst [vmem:[#allocation2_spill] sm:$0xff] %v2375_v63  ;;  %2842 = vst [vmem:[#allocation3_spill] sm:$0xff] %v2377_v0 }
 0x108   : >> { %v2379_v1 = vpop.f32.mrf.mxu0  ;;  %v2381_v2 = vpop.f32.mrf.mxu1 }
 0x109   : >> { %2843 = vst [vmem:[#allocation4_spill] sm:$0xff] %v2379_v1  ;;  %2844 = vst [vmem:[#allocation5_spill] sm:$0xff] %v2381_v2 }
 0x10a   : >> { %v2383_v3 = vpop.f32.mrf.mxu0  ;;  %v2385_v4 = vpop.f32.mrf.mxu1 }
 0x10b   : >> { %2845 = vst [vmem:[#allocation6_spill] sm:$0xff] %v2383_v3  ;;  %2846 = vst [vmem:[#allocation7_spill] sm:$0xff] %v2385_v4 }
 0x10c   : >> { %v2387_v5 = vpop.f32.mrf.mxu0  ;;  %v2389_v6 = vpop.f32.mrf.mxu1 }
 0x10d   : >> { %2847 = vst [vmem:[#allocation8_spill] sm:$0xff] %v2387_v5  ;;  %2848 = vst [vmem:[#allocation9_spill] sm:$0xff] %v2389_v6 }
 0x10e   : >> { %v2391_v7 = vpop.f32.mrf.mxu0  ;;  %v2393_v8 = vpop.f32.mrf.mxu1 }
 0x10f   : >> { %2849 = vst [vmem:[#allocation10_spill] sm:$0xff] %v2391_v7  ;;  %2850 = vst [vmem:[#allocation11_spill] sm:$0xff] %v2393_v8 }
 0x110   : >> { %v2395_v9 = vpop.f32.mrf.mxu0  ;;  %v2397_v10 = vpop.f32.mrf.mxu1 }
 0x111   : >> { %2851 = vst [vmem:[#allocation12_spill] sm:$0xff] %v2395_v9  ;;  %2852 = vst [vmem:[#allocation13_spill] sm:$0xff] %v2397_v10 }
 0x112   : >> { %v2399_v11 = vpop.f32.mrf.mxu0  ;;  %v2401_v12 = vpop.f32.mrf.mxu1 }
 0x113   : >> { %2853 = vst [vmem:[#allocation14_spill] sm:$0xff] %v2399_v11  ;;  %2854 = vst [vmem:[#allocation15_spill] sm:$0xff] %v2401_v12 }
 0x114   : >> { %v2403_v13 = vpop.f32.mrf.mxu0  ;;  %v2405_v14 = vpop.f32.mrf.mxu1 }
 0x115   : >> { %2855 = vst [vmem:[#allocation16_spill] sm:$0xff] %v2403_v13  ;;  %2856 = vst [vmem:[#allocation17_spill] sm:$0xff] %v2405_v14 }
 0x116   : >> { %v2407_v15 = vpop.f32.mrf.mxu0  ;;  %v2409_v16 = vpop.f32.mrf.mxu1 }
 0x117   : >> { %2857 = vst [vmem:[#allocation18_spill] sm:$0xff] %v2407_v15  ;;  %2858 = vst [vmem:[#allocation19_spill] sm:$0xff] %v2409_v16 }
 0x118   : >> { %v2411_v17 = vpop.f32.mrf.mxu0  ;;  %v2413_v18 = vpop.f32.mrf.mxu1 }
 0x11a   : >> { %v2419_v21 = vpop.f32.mrf.mxu0  ;;  %v2421_v22 = vpop.f32.mrf.mxu1 }
 0x11c   : >> { %v2427_v25 = vpop.f32.mrf.mxu0  ;;  %v2429_v26 = vpop.f32.mrf.mxu1 }
 0x11e   : >> { %v2435_v29 = vpop.f32.mrf.mxu0  ;;  %v2437_v30 = vpop.f32.mrf.mxu1 }
 0x120   : >> { %v2443_v33 = vpop.f32.mrf.mxu0  ;;  %v2445_v34 = vpop.f32.mrf.mxu1 }
 0x122   : >> { %v2451_v37 = vpop.f32.mrf.mxu0  ;;  %v2453_v38 = vpop.f32.mrf.mxu1 }
 0x124   : >> { %v2459_v41 = vpop.f32.mrf.mxu0  ;;  %v2461_v42 = vpop.f32.mrf.mxu1 }
 0x126   : >> { %v2467_v45 = vpop.f32.mrf.mxu0  ;;  %v2469_v46 = vpop.f32.mrf.mxu1 }
 0x127   : >> { %2859 = vst [vmem:[#allocation20_spill] sm:$0xff] %v2467_v45  ;;  %2860 = vst [vmem:[#allocation21_spill] sm:$0xff] %v2469_v46  ;;  %v2891_v45 = vmax.f32 %v2347_v49, %v2411_v17  ;;  %v2894_v49 = vmax.f32 %v2353_v52, %v2421_v22  ;;  %v2896_v52 = vmax.f32 %v2357_v54, %v2429_v26 }
 0x128   : >> { %v2475_v40 = vpop.f32.mrf.mxu0  ;;  %v2477_v39 = vpop.f32.mrf.mxu1 }
 0x129   : >> { %2861 = vst [vmem:[#allocation22_spill] sm:$0xff] %v2475_v40  ;;  %2862 = vst [vmem:[#allocation23_spill] sm:$0xff] %v2477_v39 }
 0x12a   : >> { %v2483_v36 = vpop.f32.mrf.mxu0  ;;  %v2485_v35 = vpop.f32.mrf.mxu1 }
 0x12b   : >> { %2863 = vst [vmem:[#allocation24_spill] sm:$0xff] %v2483_v36  ;;  %2864 = vst [vmem:[#allocation25_spill] sm:$0xff] %v2485_v35 }
 0x12c   : >> { %v2491_v32 = vpop.f32.mrf.mxu0  ;;  %v2493_v31 = vpop.f32.mrf.mxu1 }
 0x12d   : >> { %2865 = vst [vmem:[#allocation26_spill] sm:$0xff] %v2491_v32  ;;  %2866 = vst [vmem:[#allocation27_spill] sm:$0xff] %v2493_v31  ;;  %v1302_v32 = vlaneseq }
 0x12e   : >> { %v2499_v28 = vpop.f32.mrf.mxu0  ;;  %v2501_v27 = vpop.f32.mrf.mxu1 }
 0x12f   : >> { %2867 = vst [vmem:[#allocation28_spill] sm:$0xff] %v2499_v28  ;;  %2868 = vst [vmem:[#allocation29_spill] sm:$0xff] %v2501_v27  ;;  %v1303_v3 = vshrl.u32 %v1302_v32, 7 }
 0x130   : >> { %v2507_v24 = vpop.f32.mrf.mxu0  ;;  %v2509_v23 = vpop.f32.mrf.mxu1 }
 0x131   : >> { %2869 = vst [vmem:[#allocation30_spill] sm:$0xff] %v2507_v24  ;;  %2870 = vst [vmem:[#allocation31_spill] sm:$0xff] %v2509_v23  ;;  %v1316_v32 = vsub.s32 3, %v1303_v3 }
 0x132   : >> { %v2515_v20 = vpop.f32.mrf.mxu0  ;;  %v2517_v19 = vpop.f32.mrf.mxu1 }
 0x133   : >> { %2871 = vst [vmem:[#allocation32_spill] sm:$0xff] %v2515_v20  ;;  %2872 = vst [vmem:[#allocation33_spill] sm:$0xff] %v2517_v19 }
 0x134   : >> { %v2523_v27 = vpop.f32.mrf.mxu0  ;;  %v2525_v8 = vpop.f32.mrf.mxu1 }
 0x135   : >> { %2873 = vst [vmem:[#allocation34_spill] sm:$0xff] %v2523_v27  ;;  %2874 = vst [vmem:[#allocation35_spill] sm:$0xff] %v2525_v8 }
 0x136   : >> { %v2531_v23 = vpop.f32.mrf.mxu0  ;;  %v2533_v10 = vpop.f32.mrf.mxu1 }
 0x137   : >> { %2875 = vst [vmem:[#allocation36_spill] sm:$0xff] %v2531_v23  ;;  %2876 = vst [vmem:[#allocation37_spill] sm:$0xff] %v2533_v10 }
 0x138   : >> { %v912_v19 = vpop.f32.mrf.mxu0  ;;  %v985_v12 = vpop.f32.mrf.mxu1 }
 0x13a   : >> { %v914_v20 = vpop.f32.mrf.mxu0  ;;  %v987_v11 = vpop.f32.mrf.mxu1 }
 0x13c   : >> { %v2539_v24 = vpop.f32.mrf.mxu0  ;;  %v2541_v43 = vpop.f32.mrf.mxu1 }
 0x13e   : >> { %v2543_v27 = vpop.f32.mrf.mxu0  ;;  %v2545_v44 = vpop.f32.mrf.mxu1 }
 0x140   : >> { %v2547_v8 = vpop.f32.mrf.mxu0  ;;  %v2549_v14 = vpop.f32.mrf.mxu1 }
 0x142   : >> { %v2551_v47 = vpop.f32.mrf.mxu0  ;;  %v2553_v23 = vpop.f32.mrf.mxu1 }
 0x144   : >> { %v2555_v48 = vpop.f32.mrf.mxu0  ;;  %v2557_v10 = vpop.f32.mrf.mxu1 }
 0x146   : >> { %v2559_v16 = vpop.f32.mrf.mxu0  ;;  %v2561_v15 = vpop.f32.mrf.mxu1 }
 0x148   : >> { %v2563_v13 = vpop.f32.mrf.mxu0  ;;  %v2565_v9 = vpop.f32.mrf.mxu1 }
 0x14a   : >> { %v2567_v28 = vpop.f32.mrf.mxu0  ;;  %v2569_v7 = vpop.f32.mrf.mxu1 }
 0x14b   : >> { %2877 = vst [vmem:[#allocation38_spill] sm:$0xff] %v2567_v28  ;;  %2878 = vst [vmem:[#allocation39_spill] sm:$0xff] %v2569_v7 }
 0x14c   : >> { %v2571_v31 = vpop.f32.mrf.mxu0  ;;  %v2573_v6 = vpop.f32.mrf.mxu1 }
 0x14d   : >> { %2879 = vst [vmem:[#allocation40_spill] sm:$0xff] %v2571_v31  ;;  %2880 = vst [vmem:[#allocation41_spill] sm:$0xff] %v2573_v6  ;;  %v1304_v31 = vsub.s32 0, %v1303_v3  ;;  %v1312_v6 = vsub.s32 2, %v1303_v3 }
 0x14e   : >> { %v2575_v5 = vpop.f32.mrf.mxu0  ;;  %v2577_v35 = vpop.f32.mrf.mxu1 }
 0x14f   : >> { %2881 = vst [vmem:[#allocation42_spill] sm:$0xff] %v2575_v5  ;;  %2882 = vst [vmem:[#allocation43_spill] sm:$0xff] %v2577_v35 }
 0x150   : >> { %v2579_v4 = vpop.f32.mrf.mxu0  ;;  %v2581_v36 = vpop.f32.mrf.mxu1 }
 0x151   : >> { %2883 = vst [vmem:[#allocation44_spill] sm:$0xff] %v2579_v4  ;;  %2884 = vst [vmem:[#allocation45_spill] sm:$0xff] %v2581_v36  ;;  %v1300_v4 = vld [vmem:[%s2803_s3] sm:$0xf]  ;;  %v1308_v36 = vsub.s32 1, %v1303_v3  ;;  %v2892_v3 = vmax.f32 %v2349_v50, %v2413_v18 }
 0x152   : >> { %v2583_v39 = vpop.f32.mrf.mxu0  ;;  %v2585_v2 = vpop.f32.mrf.mxu1  ;;  %v2600_v46 = vrot.slane %v1300_v4, %v1312_v6 }
 0x153   : >> { %2885 = vst [vmem:[#allocation46_spill] sm:$0xff] %v2583_v39  ;;  %2886 = vst [vmem:[#allocation47_spill] sm:$0xff] %v2585_v2  ;;  %v2598_v2 = vrot.slane %v1300_v4, %v1304_v31  ;;  %v2602_v0 = vrot.slane %v1300_v4, %v1308_v36 }
 0x154   : >> { %v2587_v28 = vpop.f32.mrf.mxu0  ;;  %v2589_v7 = vpop.f32.mrf.mxu1 }
 0x155   : >> { %2887 = vst [vmem:[#allocation48_spill] sm:$0xff] %v2587_v28  ;;  %2888 = vst [vmem:[#allocation49_spill] sm:$0xff] %v2589_v7 }
 0x156   : >> { %v2591_v40 = vpop.f32.mrf.mxu0  ;;  %v2593_v5 = vpop.f32.mrf.mxu1 }
 0x157   : >> { %2889 = vst [vmem:[#allocation50_spill] sm:$0xff] %v2591_v40  ;;  %2890 = vst [vmem:[#allocation51_spill] sm:$0xff] %v2593_v5  ;;  %v2604_v5 = vrot.slane %v1300_v4, %v1316_v32  ;;  %v2893_v4 = vmax.f32 %v2351_v51, %v2419_v21  ;;  %v2895_v51 = vmax.f32 %v2355_v53, %v2427_v25 }
 0x158   : >> { %v1092_v35 = vpop.f32.mrf.mxu0  ;;  %v1165_v39 = vpop.f32.mrf.mxu1  ;;  %v2897_v25 = vmax.f32 %v2359_v55, %v2435_v29 }
 0x159   : >> { %v1236_v1 = vmax.f32 %v912_v19, %v1092_v35  ;;  %v1238_v28 = vmax.f32 %v985_v12, %v1165_v39 }
 0x15a   : >> { %v1094_v7 = vpop.f32.mrf.mxu0  ;;  %v1167_v40 = vpop.f32.mrf.mxu1 }
 0x15b   : >> { %v1268_v63 = vmax.f32 %v2891_v45, %v1236_v1  ;;  %v1270_v19 = vmax.f32 %v2892_v3, %v1238_v28  ;;  %v1237_v31 = vmax.f32 %v914_v20, %v1094_v7  ;;  %v1239_v35 = vmax.f32 %v987_v11, %v1167_v40 }
 0x15c   : >> { %v1096_v12 = vpop.f32.mrf.mxu0  ;;  %v1169_v6 = vpop.f32.mrf.mxu1 }
 0x15d   : >> { %v1322_v39 = vadd.f32 %v2598_v2, %v1268_v63  ;;  %v1324_v36 = vadd.f32 %v2600_v46, %v1270_v19  ;;  %v1269_v32 = vmax.f32 %v2893_v4, %v1237_v31  ;;  %v1271_v1 = vmax.f32 %v2894_v49, %v1239_v35 }
 0x15e   : >> { %v1240_v17 = vmax.f32 %v2539_v24, %v1096_v12  ;;  %v1242_v50 = vmax.f32 %v2541_v43, %v1169_v6  ;;  %v1098_v7 = vpop.f32.mrf.mxu0  ;;  %v1171_v11 = vpop.f32.mrf.mxu1  ;;  %v2900_v4 = vmax.f32 %v2365_v58, %v2445_v34 }
 0x15f   : >> { %v1354_v18 = vmax.f32 %v1322_v39, 0.0  ;;  %v1356_v63 = vmax.f32 %v1324_v36, 0.0  ;;  %v1323_v20 = vadd.f32 %v2602_v0, %v1269_v32  ;;  %v1325_v28 = vadd.f32 %v2604_v5, %v1271_v1 }
 0x160   : >> { %v1272_v21 = vmax.f32 %v2895_v51, %v1240_v17  ;;  %v1274_v22 = vmax.f32 %v2896_v52, %v1242_v50  ;;  %v1241_v24 = vmax.f32 %v2543_v27, %v1098_v7  ;;  %v1243_v40 = vmax.f32 %v2545_v44, %v1171_v11  ;;  %v1102_v43 = vpop.f32.mrf.mxu0  ;;  %v1175_v45 = vpop.f32.mrf.mxu1 }
 0x161   : >> { %v1355_v3 = vmax.f32 %v1323_v20, 0.0  ;;  %v1357_v19 = vmax.f32 %v1325_v28, 0.0  ;;  %v1244_v31 = vmax.f32 %v2547_v8, %v1102_v43  ;;  %v1246_v35 = vmax.f32 %v2549_v14, %v1175_v45 }
 0x162   : >> { %v1326_v53 = vadd.f32 %v2598_v2, %v1272_v21  ;;  %v1328_v54 = vadd.f32 %v2600_v46, %v1274_v22  ;;  %v1273_v26 = vmax.f32 %v2897_v25, %v1241_v24  ;;  %v2898_v27 = vmax.f32 %v2361_v56, %v2437_v30  ;;  %v1104_v12 = vpop.f32.mrf.mxu0  ;;  %v1177_v8 = vpop.f32.mrf.mxu1 }
 0x163   : >> { %v1748_v6 = vpack.c.bf16 %v1355_v3, %v1354_v18  ;;  %v1749_v14 = vpack.c.bf16 %v1357_v19, %v1356_v63  ;;  %v2899_v39 = vmax.f32 %v2363_v57, %v2443_v33  ;;  %v1278_v32 = vmax.f32 %v2900_v4, %v1246_v35 }
 0x164   : >> { %v1275_v44 = vmax.f32 %v2898_v27, %v1243_v40  ;;  %v1358_v49 = vmax.f32 %v1326_v53, 0.0  ;;  %v1360_v55 = vmax.f32 %v1328_v54, 0.0  ;;  %v1327_v29 = vadd.f32 %v2602_v0, %v1273_v26  ;;  %v1106_v56 = vpop.f32.mrf.mxu0  ;;  %v1179_v30 = vpop.f32.mrf.mxu1  ;;  %v2905_v53 = vld [vmem:[#allocation2_spill] sm:$0xff]  ;;  %v2906_v54 = vld [vmem:[#allocation20_spill] sm:$0xff]  ;;  %v2908_v26 = vld [vmem:[#allocation3_spill] sm:$0xff] }
 0x165   : >> { %v1276_v36 = vmax.f32 %v2899_v39, %v1244_v31  ;;  %1485 = vst [vmem:[%s2636_s23] sm:$0xff] %v1748_v6  ;;  %1486 = vst [vmem:[%s2636_s23 + $0x8] sm:$0xff] %v1749_v14  ;;  %v1332_v50 = vadd.f32 %v2600_v46, %v1278_v32  ;;  %v1245_v57 = vmax.f32 %v2551_v47, %v1104_v12  ;;  %v2911_v6 = vld [vmem:[#allocation4_spill] sm:$0xff]  ;;  %v2912_v14 = vld [vmem:[#allocation22_spill] sm:$0xff] }
 0x166   : >> { %v1329_v1 = vadd.f32 %v2604_v5, %v1275_v44  ;;  %v1247_v33 = vmax.f32 %v2553_v23, %v1177_v8  ;;  %v1359_v58 = vmax.f32 %v1327_v29, 0.0  ;;  %v1248_v7 = vmax.f32 %v2555_v48, %v1106_v56  ;;  %v1108_v18 = vpop.f32.mrf.mxu0  ;;  %v1181_v63 = vpop.f32.mrf.mxu1  ;;  %v2914_v39 = vld [vmem:[#allocation5_spill] sm:$0xff] }
 0x167   : >> { %v1330_v17 = vadd.f32 %v2598_v2, %v1276_v36  ;;  %v1250_v11 = vmax.f32 %v2557_v10, %v1179_v30  ;;  %v1364_v28 = vmax.f32 %v1332_v50, 0.0  ;;  %v2901_v51 = vmax.f32 %v2367_v59, %v2451_v37  ;;  %v2915_v36 = vld [vmem:[#allocation23_spill] sm:$0xff] }
 0x168   : >> { %v1361_v34 = vmax.f32 %v1329_v1, 0.0  ;;  %v2902_v47 = vmax.f32 %v2369_v60, %v2453_v38  ;;  %v1750_v52 = vpack.c.bf16 %v1359_v58, %v1358_v49  ;;  %v2903_v48 = vmax.f32 %v2371_v61, %v2459_v41  ;;  %v1112_v43 = vpop.f32.mrf.mxu0  ;;  %v1185_v45 = vpop.f32.mrf.mxu1  ;;  %v2918_v58 = vld [vmem:[#allocation39_spill] sm:$0xff] }
 0x169   : >> { %v1362_v20 = vmax.f32 %v1330_v17, 0.0  ;;  %v1277_v21 = vmax.f32 %v2901_v51, %v1245_v57  ;;  %v2904_v24 = vmax.f32 %v2373_v62, %v2461_v42  ;;  %v1249_v37 = vmax.f32 %v2559_v16, %v1108_v18  ;;  %v2917_v57 = vld [vmem:[#allocation38_spill] sm:$0xff]  ;;  %v2920_v51 = vld [vmem:[#allocation41_spill] sm:$0xff] }
 0x16a   : >> { %v1279_v23 = vmax.f32 %v2902_v47, %v1247_v33  ;;  %v1751_v22 = vpack.c.bf16 %v1361_v34, %v1360_v55  ;;  %v1280_v10 = vmax.f32 %v2903_v48, %v1248_v7  ;;  %v1251_v60 = vmax.f32 %v2561_v15, %v1181_v63  ;;  %1487 = vst [vmem:[%s2636_s23 + $0x10] sm:$0xff] %v1750_v52  ;;  %v1114_v42 = vpop.f32.mrf.mxu0  ;;  %v1187_v19 = vpop.f32.mrf.mxu1  ;;  %v2909_v15 = vld [vmem:[#allocation21_spill] sm:$0xff]  ;;  %v2921_v52 = vld [vmem:[#allocation6_spill] sm:$0xff] }
 0x16b   : >> { %v1282_v40 = vmax.f32 %v2904_v24, %v1250_v11  ;;  %v1331_v3 = vadd.f32 %v2602_v0, %v1277_v21  ;;  %v1252_v41 = vmax.f32 %v2563_v13, %v1112_v43  ;;  %v1254_v62 = vmax.f32 %v2565_v9, %v1185_v45  ;;  %v2924_v24 = vld [vmem:[#allocation7_spill] sm:$0xff] }
 0x16c   : >> { %v1333_v59 = vadd.f32 %v2604_v5, %v1279_v23  ;;  %1488 = vst [vmem:[%s2636_s23 + $0x18] sm:$0xff] %v1751_v22  ;;  %v1334_v38 = vadd.f32 %v2598_v2, %v1280_v10  ;;  %v2907_v25 = vmax.f32 %v2905_v53, %v2906_v54  ;;  %v2910_v27 = vmax.f32 %v2908_v26, %v2909_v15  ;;  %v1116_v49 = vpop.f32.mrf.mxu0  ;;  %v1189_v55 = vpop.f32.mrf.mxu1  ;;  %v2922_v22 = vld [vmem:[#allocation24_spill] sm:$0xff]  ;;  %v2934_v26 = vld [vmem:[#allocation43_spill] sm:$0xff] }
 0x16d   : >> { %v1336_v61 = vadd.f32 %v2600_v46, %v1282_v40  ;;  %v1363_v31 = vmax.f32 %v1331_v3, 0.0  ;;  %v2913_v13 = vmax.f32 %v2911_v6, %v2912_v14  ;;  %v2916_v4 = vmax.f32 %v2914_v39, %v2915_v36  ;;  %v2925_v40 = vld [vmem:[#allocation25_spill] sm:$0xff]  ;;  %v2935_v6 = vld [vmem:[#allocation44_spill] sm:$0xff] }
 0x16e   : >> { %v1365_v35 = vmax.f32 %v1333_v59, 0.0  ;;  %v1281_v16 = vmax.f32 %v2907_v25, %v1249_v37  ;;  %v1283_v44 = vmax.f32 %v2910_v27, %v1251_v60  ;;  %v1366_v12 = vmax.f32 %v1334_v38, 0.0  ;;  %v1118_v7 = vpop.f32.mrf.mxu0  ;;  %v1191_v11 = vpop.f32.mrf.mxu1  ;;  %v2927_v38 = vld [vmem:[#allocation8_spill] sm:$0xff]  ;;  %v2933_v25 = vld [vmem:[#allocation42_spill] sm:$0xff] }
 0x16f   : >> { %v1368_v8 = vmax.f32 %v1336_v61, 0.0  ;;  %v1284_v9 = vmax.f32 %v2913_v13, %v1252_v41  ;;  %v1286_v32 = vmax.f32 %v2916_v4, %v1254_v62  ;;  %v1752_v29 = vpack.c.bf16 %v1363_v31, %v1362_v20  ;;  %v2919_v20 = vld [vmem:[#allocation40_spill] sm:$0xff]  ;;  %v2928_v61 = vld [vmem:[#allocation26_spill] sm:$0xff]  ;;  %v2936_v13 = vld [vmem:[#allocation45_spill] sm:$0xff] }
 0x170   : >> { %v1753_v1 = vpack.c.bf16 %v1365_v35, %v1364_v28  ;;  %v1335_v56 = vadd.f32 %v2602_v0, %v1281_v16  ;;  %v1337_v30 = vadd.f32 %v2604_v5, %v1283_v44  ;;  %v1253_v33 = vmax.f32 %v2917_v57, %v1114_v42  ;;  %v1122_v3 = vpop.f32.mrf.mxu0  ;;  %v1195_v59 = vpop.f32.mrf.mxu1  ;;  %v2930_v42 = vld [vmem:[#allocation9_spill] sm:$0xff]  ;;  %v2937_v4 = vld [vmem:[#allocation10_spill] sm:$0xff] }
 0x171   : >> { %v1338_v17 = vadd.f32 %v2598_v2, %v1284_v9  ;;  %v1340_v50 = vadd.f32 %v2600_v46, %v1286_v32  ;;  %v1255_v34 = vmax.f32 %v2918_v58, %v1187_v19  ;;  %1489 = vst [vmem:[%s2636_s23 + $0x20] sm:$0xff] %v1752_v29  ;;  %v1256_v28 = vmax.f32 %v2919_v20, %v1116_v49  ;;  %v2931_v19 = vld [vmem:[#allocation27_spill] sm:$0xff]  ;;  %v2938_v32 = vld [vmem:[#allocation28_spill] sm:$0xff] }
 0x172   : >> { %1490 = vst [vmem:[%s2636_s23 + $0x28] sm:$0xff] %v1753_v1  ;;  %v1367_v18 = vmax.f32 %v1335_v56, 0.0  ;;  %v1369_v63 = vmax.f32 %v1337_v30, 0.0  ;;  %v1258_v21 = vmax.f32 %v2920_v51, %v1189_v55  ;;  %v2923_v48 = vmax.f32 %v2921_v52, %v2922_v22  ;;  %v1124_v27 = vpop.f32.mrf.mxu0  ;;  %v1197_v44 = vpop.f32.mrf.mxu1  ;;  %v2940_v29 = vld [vmem:[#allocation11_spill] sm:$0xff]  ;;  %v2941_v1 = vld [vmem:[#allocation29_spill] sm:$0xff]  ;;  %v2943_v58 = vld [vmem:[#allocation12_spill] sm:$0xff] }
 0x173   : >> { %v1370_v47 = vmax.f32 %v1338_v17, 0.0  ;;  %v1372_v23 = vmax.f32 %v1340_v50, 0.0  ;;  %v2926_v43 = vmax.f32 %v2924_v24, %v2925_v40  ;;  %v2929_v41 = vmax.f32 %v2927_v38, %v2928_v61  ;;  %v2949_v24 = vld [vmem:[#allocation46_spill] sm:$0xff] }
 0x174   : >> { %v1285_v10 = vmax.f32 %v2923_v48, %v1253_v33  ;;  %v1754_v37 = vpack.c.bf16 %v1367_v18, %v1366_v12  ;;  %v1755_v60 = vpack.c.bf16 %v1369_v63, %v1368_v8  ;;  %v2932_v31 = vmax.f32 %v2930_v42, %v2931_v19  ;;  %v1126_v17 = vpop.f32.mrf.mxu0  ;;  %v1199_v50 = vpop.f32.mrf.mxu1  ;;  %v2946_v18 = vld [vmem:[#allocation13_spill] sm:$0xff]  ;;  %v2947_v63 = vld [vmem:[#allocation31_spill] sm:$0xff] }
 0x175   : >> { %v1287_v45 = vmax.f32 %v2926_v43, %v1255_v34  ;;  %v1288_v62 = vmax.f32 %v2929_v41, %v1256_v28  ;;  %v1257_v16 = vmax.f32 %v2933_v25, %v1118_v7  ;;  %v1259_v15 = vmax.f32 %v2934_v26, %v1191_v11  ;;  %v2944_v34 = vld [vmem:[#allocation30_spill] sm:$0xff]  ;;  %v2950_v43 = vld [vmem:[#allocation47_spill] sm:$0xff]  ;;  %v2959_v26 = vld [vmem:[#allocation16_spill] sm:$0xff] }
 0x176   : >> { %v1290_v35 = vmax.f32 %v2932_v31, %v1258_v21  ;;  %v1339_v53 = vadd.f32 %v2602_v0, %v1285_v10  ;;  %1491 = vst [vmem:[%s2636_s23 + $0x30] sm:$0xff] %v1754_v37  ;;  %1492 = vst [vmem:[%s2636_s23 + $0x38] sm:$0xff] %v1755_v60  ;;  %v1260_v14 = vmax.f32 %v2935_v6, %v1122_v3  ;;  %v2951_v37 = vld [vmem:[#allocation48_spill] sm:$0xff]  ;;  %v1128_v38 = vpop.f32.mrf.mxu0  ;;  %v1201_v61 = vpop.f32.mrf.mxu1  ;;  %v2953_v41 = vld [vmem:[#allocation14_spill] sm:$0xff] }
 0x177   : >> { %v1341_v54 = vadd.f32 %v2604_v5, %v1287_v45  ;;  %v1342_v12 = vadd.f32 %v2598_v2, %v1288_v62  ;;  %v1262_v9 = vmax.f32 %v2936_v13, %v1195_v59  ;;  %v2939_v49 = vmax.f32 %v2937_v4, %v2938_v32  ;;  %v2954_v62 = vld [vmem:[#allocation32_spill] sm:$0xff]  ;;  %v2956_v31 = vld [vmem:[#allocation15_spill] sm:$0xff] }
 0x178   : >> { %v1344_v8 = vadd.f32 %v2600_v46, %v1290_v35  ;;  %v1371_v39 = vmax.f32 %v1339_v53, 0.0  ;;  %v2942_v56 = vmax.f32 %v2940_v29, %v2941_v1  ;;  %v2945_v7 = vmax.f32 %v2943_v58, %v2944_v34  ;;  %v2957_v35 = vld [vmem:[#allocation33_spill] sm:$0xff]  ;;  %v2966_v4 = vld [vmem:[#allocation51_spill] sm:$0xff] }
 0x179   : >> { %v1373_v36 = vmax.f32 %v1341_v54, 0.0  ;;  %v1289_v55 = vmax.f32 %v2939_v49, %v1257_v16  ;;  %v1374_v57 = vmax.f32 %v1342_v12, 0.0  ;;  %v2948_v20 = vmax.f32 %v2946_v18, %v2947_v63  ;;  %v2962_v12 = vld [vmem:[#allocation17_spill] sm:$0xff]  ;;  %v2970_v58 = vld [vmem:[#allocation19_spill] sm:$0xff] }
 0x17a   : >> { %v1291_v30 = vmax.f32 %v2942_v56, %v1259_v15  ;;  %v1376_v33 = vmax.f32 %v1344_v8, 0.0  ;;  %v1292_v11 = vmax.f32 %v2945_v7, %v1260_v14  ;;  %v1756_v51 = vpack.c.bf16 %v1371_v39, %v1370_v47  ;;  %v2960_v15 = vld [vmem:[#allocation34_spill] sm:$0xff]  ;;  %v2963_v8 = vld [vmem:[#allocation35_spill] sm:$0xff]  ;;  %v2971_v34 = vld [vmem:[#allocation37_spill] sm:$0xff] }
 0x17b   : >> { %v1294_v28 = vmax.f32 %v2948_v20, %v1262_v9  ;;  %v1757_v21 = vpack.c.bf16 %v1373_v36, %v1372_v23  ;;  %v1343_v52 = vadd.f32 %v2602_v0, %v1289_v55  ;;  %v1261_v40 = vmax.f32 %v2949_v24, %v1124_v27  ;;  %v2952_v23 = vld [vmem:[#allocation49_spill] sm:$0xff]  ;;  %v2965_v39 = vld [vmem:[#allocation50_spill] sm:$0xff] }
 0x17c   : >> { %v1345_v22 = vadd.f32 %v2604_v5, %v1291_v30  ;;  %v1346_v48 = vadd.f32 %v2598_v2, %v1292_v11  ;;  %v1263_v45 = vmax.f32 %v2950_v43, %v1197_v44  ;;  %1493 = vst [vmem:[%s2636_s23 + $0x40] sm:$0xff] %v1756_v51  ;;  %v1264_v47 = vmax.f32 %v2951_v37, %v1126_v17  ;;  %v2967_v17 = vld [vmem:[#allocation18_spill] sm:$0xff] }
 0x17d   : >> { %v1348_v10 = vadd.f32 %v2600_v46, %v1294_v28  ;;  %1494 = vst [vmem:[%s2636_s23 + $0x48] sm:$0xff] %v1757_v21  ;;  %v1375_v3 = vmax.f32 %v1343_v52, 0.0  ;;  %v1266_v60 = vmax.f32 %v2952_v23, %v1199_v50  ;;  %v2955_v42 = vmax.f32 %v2953_v41, %v2954_v62  ;;  %v2968_v50 = vld [vmem:[#allocation36_spill] sm:$0xff] }
 0x17e   : >> { %v1377_v59 = vmax.f32 %v1345_v22, 0.0  ;;  %v2958_v53 = vmax.f32 %v2956_v31, %v2957_v35  ;;  %v2961_v27 = vmax.f32 %v2959_v26, %v2960_v15  ;;  %v2964_v6 = vmax.f32 %v2962_v12, %v2963_v8 }
 0x17f   : >> { %v1293_v19 = vmax.f32 %v2955_v42, %v1261_v40  ;;  %v1758_v25 = vpack.c.bf16 %v1375_v3, %v1374_v57  ;;  %v1265_v36 = vmax.f32 %v2965_v39, %v1128_v38  ;;  %v1267_v32 = vmax.f32 %v2966_v4, %v1201_v61 }
 0x180   : >> { %v1295_v54 = vmax.f32 %v2958_v53, %v1263_v45  ;;  %v1759_v16 = vpack.c.bf16 %v1377_v59, %v1376_v33  ;;  %v1296_v44 = vmax.f32 %v2961_v27, %v1264_v47  ;;  %v1298_v14 = vmax.f32 %v2964_v6, %v1266_v60 }
 0x181   : >> { %v1347_v13 = vadd.f32 %v2602_v0, %v1293_v19  ;;  %1495 = vst [vmem:[%s2636_s23 + $0x50] sm:$0xff] %v1758_v25  ;;  %v1378_v49 = vmax.f32 %v1346_v48, 0.0  ;;  %v1380_v55 = vmax.f32 %v1348_v10, 0.0  ;;  %v2969_v57 = vmax.f32 %v2967_v17, %v2968_v50 }
 0x182   : >> { %v1349_v9 = vadd.f32 %v2604_v5, %v1295_v54  ;;  %1496 = vst [vmem:[%s2636_s23 + $0x58] sm:$0xff] %v1759_v16  ;;  %v1350_v29 = vadd.f32 %v2598_v2, %v1296_v44  ;;  %v1352_v1 = vadd.f32 %v2600_v46, %v1298_v14  ;;  %v2972_v7 = vmax.f32 %v2970_v58, %v2971_v34 }
 0x183   : >> { %v1379_v56 = vmax.f32 %v1347_v13, 0.0  ;;  %v1297_v33 = vmax.f32 %v2969_v57, %v1265_v36 }
 0x184   : >> { %v1381_v30 = vmax.f32 %v1349_v9, 0.0  ;;  %v1299_v11 = vmax.f32 %v2972_v7, %v1267_v32  ;;  %v1382_v46 = vmax.f32 %v1350_v29, 0.0  ;;  %v1384_v28 = vmax.f32 %v1352_v1, 0.0 }
 0x185   : >> { %v1760_v18 = vpack.c.bf16 %v1379_v56, %v1378_v49  ;;  %v1351_v20 = vadd.f32 %v2602_v0, %v1297_v33 }
 0x186   : >> { %v1761_v63 = vpack.c.bf16 %v1381_v30, %v1380_v55  ;;  %v1353_v2 = vadd.f32 %v2604_v5, %v1299_v11 }
 0x187   : >> { %1497 = vst [vmem:[%s2636_s23 + $0x60] sm:$0xff] %v1760_v18  ;;  %v1383_v51 = vmax.f32 %v1351_v20, 0.0 }
 0x188   : >> { %1498 = vst [vmem:[%s2636_s23 + $0x68] sm:$0xff] %v1761_v63  ;;  %v1385_v21 = vmax.f32 %v1353_v2, 0.0  ;;  %286 = sbr.rel (!%p284_p8) target bundleno = 22 (0x16), region = 81 }
 0x189   : >> { %v1762_v52 = vpack.c.bf16 %v1383_v51, %v1382_v46 }
 0x18a   : >> { %v1763_v22 = vpack.c.bf16 %v1385_v21, %v1384_v28 }
 0x18b   : >> { %1499 = vst [vmem:[%s2636_s23 + $0x70] sm:$0x33] %v1762_v52 }
 0x18c   : >> { %1500 = vst [vmem:[%s2636_s23 + $0x78] sm:$0x33] %v1763_v22 }
 0x18d PF: > { %s14_s19 = sadd.s32 1, %s1922_s19   ;;  %s2973_s15 = smov %s1914_s17 }
 0x18e   : > { %p11_p9 = scmp.ge.s32.totalorder %s14_s19, 14   ;;  %s2974_s16 = smov %s1918_s18 }
 0x18f   : > { %s2975_s17 = smov %s2978_s20  ;;  %s2976_s18 = smov %s2982_s21 }
 0x190   :  { %13 = sbr.rel (!%p11_p9) target bundleno = 3 (0x3), region = 92 }

// kernel: forward.5
= control target key start
LH: loop header
LB: loop body
LE: loop exit
PB: predicated region body
PF: predicated region fallthrough
CT: control target
= control target key end

     0   :  { %s4417_s12 = smov 0   ;;  %s4419_s13 = smov 0   ;;  %s7046_s0 = inlined_call_operand.vmem [shape: bf16[2,60,60,512], index: 0, kind: input, shape index: {}]   ;;  %s7047_s1 = inlined_call_operand.vmem [shape: bf16[512,512], index: 1, kind: input, shape index: {}]   ;;  %s7048_s2 = inlined_call_operand.vmem [shape: f32[1,16], index: 2, kind: input, shape index: {}]   ;;  %s7049_s3 = inlined_call_operand.vmem [shape: bf16[2,28,28,16], index: 3, kind: output, shape index: {}]  }
   0x1   :  { %s4421_s14 = smov 0   ;;  %s4423_s15 = smov 0  }
   0x2   :  { %s4425_s16 = smov 0  }
   0x3 LB: > { %s22_s17 = sadd.s32 1, %s4372_s14  ;;  %s25_s18 = sadd.s32 1, %s4376_s15  ;;  %s4380_s16 = sphi %s4425_s16, %s13_s16   ;;  %s4376_s15 = sphi %s4423_s15, %s7443_s15   ;;  %s4372_s14 = sphi %s4421_s14, %s7442_s14   ;;  %s4368_s13 = sphi %s4419_s13, %s7441_s13   ;;  %s4364_s12 = sphi %s4417_s12, %s7440_s12  }
   0x4   : > { %p23_p0 = scmp.ge.s32.totalorder %s22_s17, 2  ;;  %p3706_p1 = scmp.ge.s32.totalorder %s4380_s16, 1 }
   0x5   : > { %p151_p2 = scmp.lt.s32.totalorder %s4380_s16, 5 }
   0x6   : > { %s7445_s17 = smov (%p23_p0, %s22_s17), 0  ;;  %s7447_s18 = smov (!%p23_p0, %s25_s18), %s4376_s15 }
   0x7   : > { %p152_p3 = pnand %p3706_p1, %p151_p2  ;;  %p27_p4 = scmp.ge.s32.totalorder %s7447_s18, 2 }
   0x8   : > { %p180_p5 = scmp.lt.s32.totalorder (!%p152_p3), %s4368_s13, 1  ;;  %s185_s19 = smul.u32 (!%p152_p3), 14, %s4364_s12 }
   0x9   : > { %s7449_s18 = smov (%p27_p4, %s7447_s18), 0  ;;  %155 = sbr.rel (%p152_p3) target bundleno = 1112 (0x458), region = 32 }
   0xa   : > { %s196_s20 = smul.u32 (!%p152_p3), 28, %s4364_s12  ;;  %p188_p6 = scmp.lt.s32.totalorder (!%p152_p3), %s185_s19, 27 }
   0xb   : > { %s4461_s5 = smov (!%p152_p3), 0  }
   0xe   : > { %s7451_s13 = smov (!%p180_p5, %s4368_s13), 1  ;;  %s7453_s19 = smov (!%p188_p6, %s185_s19), 27 }
   0xf   : > { %s4025_s21 = smul.u32 7680, %s7451_s13  ;;  %s3708_s26 = sshll.u32 %s7453_s19, 2 }
  0x10   : > { %s4026_s25 = smul.u32 112, %s7451_s13 }
  0x11   : > { %s4454_s24 = scalar_lea.vmem %s7046_s0, %s4025_s21 }
  0x12   : > { %s192_s27 = sadd.s32 %s4026_s25, %s3708_s26 }
  0x13   : > { %s3709_s28 = sshll.u32 %s192_s27, 2 }
  0x14   : > { %s4459_s4 = scalar_lea.vmem %s7049_s3, %s3709_s28 }
  0x15 LB: >> { %v4090_v0 = vld [vmem:[%s7047_s1 + $0xe4] ss:$16 sps:$4 sm:$0xff]   ;;  %v4094_v2 = vld [vmem:[%s7047_s1 + $0xe0] ss:$16 sps:$4 sm:$0xff]   ;;  %s203_s21 = sadd.s32 %s4384_s5, %s196_s20  ;;  %s4012_s23 = sshll.u32 %s4384_s5, 8  ;;  %s4384_s5 = sphi %s4461_s5, %s202_s5  }
  0x16   : >> { %v4092_v1 = vld [vmem:[%s7047_s1 + $0x2e4] ss:$16 sps:$4 sm:$0xff]   ;;  %1071 = vmatprep.subr.bf16.mxu0 %v4090_v0  ;;  %v4095_v3 = vld [vmem:[%s7047_s1 + $0x2e0] ss:$16 sps:$4 sm:$0xff]   ;;  %s4011_s6 = sshll.u32 %s203_s21, 7  ;;  %s4937_s25 = scalar_lea.vmem [#allocation2], %s4012_s23 }
  0x17   : >> { %1144 = vmatprep.subr.bf16.mxu1 %v4092_v1  ;;  %v4096_v4 = vld [vmem:[%s7047_s1 + $0xc4] ss:$16 sps:$4 sm:$0xff]   ;;  %1072 = vmatpush1.bf16.msra.mxu0 %v4094_v2  ;;  %v4100_v6 = vld [vmem:[%s7047_s1 + $0xc0] ss:$16 sps:$4 sm:$0xff]   ;;  %s4605_s19 = scalar_lea.vmem %s4454_s24, %s4011_s6  ;;  %v4194_v2 = vld [vmem:[%s7047_s1 + $0xec] ss:$16 sps:$4 sm:$0xff]  }
  0x18   : >> { %1145 = vmatpush1.bf16.msra.mxu1 %v4095_v3  ;;  %v4098_v5 = vld [vmem:[%s7047_s1 + $0x2c4] ss:$16 sps:$4 sm:$0xff]   ;;  %1073 = vmatprep.subr.bf16.mxu0 %v4096_v4  ;;  %v4101_v7 = vld [vmem:[%s7047_s1 + $0x2c0] ss:$16 sps:$4 sm:$0xff]   ;;  %v4626_v51 = vld [vmem:[%s4605_s19 + $0xc] ss:$16 sps:$4 sm:$0xff]  }
  0x19   : >> { %1146 = vmatprep.subr.bf16.mxu1 %v4098_v5  ;;  %v4102_v8 = vld [vmem:[%s7047_s1 + $0xa4] ss:$16 sps:$4 sm:$0xff]   ;;  %v4106_v10 = vld [vmem:[%s7047_s1 + $0xa0] ss:$16 sps:$4 sm:$0xff]   ;;  %1176 = vmatprep.mubr.bf16.mxu1 %v4626_v51  ;;  %v4197_v3 = vld [vmem:[%s7047_s1 + $0x2ec] ss:$16 sps:$4 sm:$0xff]  }
  0x1a   : >> { %v4104_v9 = vld [vmem:[%s7047_s1 + $0x2a4] ss:$16 sps:$4 sm:$0xff]   ;;  %v4107_v11 = vld [vmem:[%s7047_s1 + $0x2a0] ss:$16 sps:$4 sm:$0xff]   ;;  %v4682_v5 = vld [vmem:[%s4605_s19 + $0x8] ss:$16 sps:$4 sm:$0xff]  }
  0x1b   : >> { %1074 = vmatpush1.bf16.msra.mxu0 %v4100_v6  ;;  %v4108_v12 = vld [vmem:[%s7047_s1 + $0x84] ss:$16 sps:$4 sm:$0xff]   ;;  %v4112_v14 = vld [vmem:[%s7047_s1 + $0x80] ss:$16 sps:$4 sm:$0xff]   ;;  %v4192_v6 = vld [vmem:[%s7047_s1 + $0xe8] ss:$16 sps:$4 sm:$0xff]  }
  0x1c   : >> { %1147 = vmatpush1.bf16.msra.mxu1 %v4101_v7  ;;  %1075 = vmatprep.subr.bf16.mxu0 %v4102_v8  ;;  %v4110_v13 = vld [vmem:[%s7047_s1 + $0x284] ss:$16 sps:$4 sm:$0xff]   ;;  %v4113_v15 = vld [vmem:[%s7047_s1 + $0x280] ss:$16 sps:$4 sm:$0xff]   ;;  %v4195_v7 = vld [vmem:[%s7047_s1 + $0x2e8] ss:$16 sps:$4 sm:$0xff]  }
  0x1d   : >> { %1148 = vmatprep.subr.bf16.mxu1 %v4104_v9  ;;  %v4114_v16 = vld [vmem:[%s7047_s1 + $0x64] ss:$16 sps:$4 sm:$0xff]   ;;  %v4118_v18 = vld [vmem:[%s7047_s1 + $0x60] ss:$16 sps:$4 sm:$0xff]   ;;  %v4200_v8 = vld [vmem:[%s7047_s1 + $0xcc] ss:$16 sps:$4 sm:$0xff]  }
  0x1e   : >> { %v4116_v17 = vld [vmem:[%s7047_s1 + $0x264] ss:$16 sps:$4 sm:$0xff]   ;;  %v4119_v19 = vld [vmem:[%s7047_s1 + $0x260] ss:$16 sps:$4 sm:$0xff]   ;;  %v4203_v9 = vld [vmem:[%s7047_s1 + $0x2cc] ss:$16 sps:$4 sm:$0xff]  }
  0x1f   : >> { %1076 = vmatpush1.bf16.msra.mxu0 %v4106_v10  ;;  %v4120_v20 = vld [vmem:[%s7047_s1 + $0x44] ss:$16 sps:$4 sm:$0xff]   ;;  %v4124_v22 = vld [vmem:[%s7047_s1 + $0x40] ss:$16 sps:$4 sm:$0xff]   ;;  %v4198_v10 = vld [vmem:[%s7047_s1 + $0xc8] ss:$16 sps:$4 sm:$0xff]  }
  0x20   : >> { %1149 = vmatpush1.bf16.msra.mxu1 %v4107_v11  ;;  %1077 = vmatprep.subr.bf16.mxu0 %v4108_v12  ;;  %v4122_v21 = vld [vmem:[%s7047_s1 + $0x244] ss:$16 sps:$4 sm:$0xff]   ;;  %v4125_v23 = vld [vmem:[%s7047_s1 + $0x240] ss:$16 sps:$4 sm:$0xff]   ;;  %v4201_v11 = vld [vmem:[%s7047_s1 + $0x2c8] ss:$16 sps:$4 sm:$0xff]  }
  0x21   : >> { %1150 = vmatprep.subr.bf16.mxu1 %v4110_v13  ;;  %v4126_v24 = vld [vmem:[%s7047_s1 + $0x24] ss:$16 sps:$4 sm:$0xff]   ;;  %v4130_v26 = vld [vmem:[%s7047_s1 + $0x20] ss:$16 sps:$4 sm:$0xff]   ;;  %v4206_v12 = vld [vmem:[%s7047_s1 + $0xac] ss:$16 sps:$4 sm:$0xff]  }
  0x22   : >> { %v4128_v25 = vld [vmem:[%s7047_s1 + $0x224] ss:$16 sps:$4 sm:$0xff]   ;;  %v4131_v27 = vld [vmem:[%s7047_s1 + $0x220] ss:$16 sps:$4 sm:$0xff]   ;;  %v4209_v13 = vld [vmem:[%s7047_s1 + $0x2ac] ss:$16 sps:$4 sm:$0xff]  }
  0x23   : >> { %1078 = vmatpush1.bf16.msra.mxu0 %v4112_v14  ;;  %v4132_v28 = vld [vmem:[%s7047_s1 + $0x4] ss:$16 sps:$4 sm:$0xff]   ;;  %v4136_v30 = vld [vmem:[%s7047_s1] ss:$16 sps:$4 sm:$0xff]   ;;  %v4204_v14 = vld [vmem:[%s7047_s1 + $0xa8] ss:$16 sps:$4 sm:$0xff]  }
  0x24   : >> { %1151 = vmatpush1.bf16.msra.mxu1 %v4113_v15  ;;  %1079 = vmatprep.subr.bf16.mxu0 %v4114_v16  ;;  %v4134_v29 = vld [vmem:[%s7047_s1 + $0x204] ss:$16 sps:$4 sm:$0xff]   ;;  %v4137_v31 = vld [vmem:[%s7047_s1 + $0x200] ss:$16 sps:$4 sm:$0xff]   ;;  %v4207_v15 = vld [vmem:[%s7047_s1 + $0x2a8] ss:$16 sps:$4 sm:$0xff]  }
  0x25   : >> { %1152 = vmatprep.subr.bf16.mxu1 %v4116_v17  ;;  %v4138_v32 = vld [vmem:[%s7047_s1 + $0x1e4] ss:$16 sps:$4 sm:$0xff]   ;;  %v4142_v34 = vld [vmem:[%s7047_s1 + $0x1e0] ss:$16 sps:$4 sm:$0xff]   ;;  %v4720_v17 = vld [vmem:[%s4605_s19 + $0x2c] ss:$16 sps:$4 sm:$0xff]  }
  0x26   : >> { %v4140_v33 = vld [vmem:[%s7047_s1 + $0x3e4] ss:$16 sps:$4 sm:$0xff]   ;;  %v4143_v35 = vld [vmem:[%s7047_s1 + $0x3e0] ss:$16 sps:$4 sm:$0xff]   ;;  %s202_s5 = sadd.s32 1, %s4384_s5  }
  0x27   : >> { %1080 = vmatpush1.bf16.msra.mxu0 %v4118_v18  ;;  %v4144_v36 = vld [vmem:[%s7047_s1 + $0x1c4] ss:$16 sps:$4 sm:$0xff]   ;;  %v4148_v38 = vld [vmem:[%s7047_s1 + $0x1c0] ss:$16 sps:$4 sm:$0xff]   ;;  %p199_p7 = scmp.ge.s32.totalorder %s202_s5, 32  }
  0x28   : >> { %1153 = vmatpush1.bf16.msra.mxu1 %v4119_v19  ;;  %1081 = vmatprep.subr.bf16.mxu0 %v4120_v20  ;;  %v4146_v37 = vld [vmem:[%s7047_s1 + $0x3c4] ss:$16 sps:$4 sm:$0xff]   ;;  %v4149_v39 = vld [vmem:[%s7047_s1 + $0x3c0] ss:$16 sps:$4 sm:$0xff]   ;;  %v4726_v19 = vld [vmem:[%s4605_s19 + $0x28] ss:$16 sps:$4 sm:$0xff]  }
  0x29   : >> { %1154 = vmatprep.subr.bf16.mxu1 %v4122_v21  ;;  %v4150_v40 = vld [vmem:[%s7047_s1 + $0x1a4] ss:$16 sps:$4 sm:$0xff]   ;;  %v4154_v42 = vld [vmem:[%s7047_s1 + $0x1a0] ss:$16 sps:$4 sm:$0xff]   ;;  %v4212_v20 = vld [vmem:[%s7047_s1 + $0x8c] ss:$16 sps:$4 sm:$0xff]  }
  0x2a   : >> { %v4152_v41 = vld [vmem:[%s7047_s1 + $0x3a4] ss:$16 sps:$4 sm:$0xff]   ;;  %v4155_v43 = vld [vmem:[%s7047_s1 + $0x3a0] ss:$16 sps:$4 sm:$0xff]   ;;  %v4215_v21 = vld [vmem:[%s7047_s1 + $0x28c] ss:$16 sps:$4 sm:$0xff]  }
  0x2b   : >> { %1082 = vmatpush1.bf16.msra.mxu0 %v4124_v22  ;;  %v4156_v44 = vld [vmem:[%s7047_s1 + $0x184] ss:$16 sps:$4 sm:$0xff]   ;;  %v4160_v46 = vld [vmem:[%s7047_s1 + $0x180] ss:$16 sps:$4 sm:$0xff]   ;;  %v4210_v22 = vld [vmem:[%s7047_s1 + $0x88] ss:$16 sps:$4 sm:$0xff]  }
  0x2c   : >> { %1155 = vmatpush1.bf16.msra.mxu1 %v4125_v23  ;;  %1083 = vmatprep.subr.bf16.mxu0 %v4126_v24  ;;  %v4158_v45 = vld [vmem:[%s7047_s1 + $0x384] ss:$16 sps:$4 sm:$0xff]   ;;  %v4161_v47 = vld [vmem:[%s7047_s1 + $0x380] ss:$16 sps:$4 sm:$0xff]   ;;  %v4213_v23 = vld [vmem:[%s7047_s1 + $0x288] ss:$16 sps:$4 sm:$0xff]  }
  0x2d   : >> { %1156 = vmatprep.subr.bf16.mxu1 %v4128_v25  ;;  %v4162_v48 = vld [vmem:[%s7047_s1 + $0x164] ss:$16 sps:$4 sm:$0xff]   ;;  %v4166_v52 = vld [vmem:[%s7047_s1 + $0x160] ss:$16 sps:$4 sm:$0xff]   ;;  %v4218_v24 = vld [vmem:[%s7047_s1 + $0x6c] ss:$16 sps:$4 sm:$0xff]  }
  0x2e   : >> { %v4620_v49 = vld [vmem:[%s4605_s19 + $0x4] ss:$16 sps:$4 sm:$0xff]   ;;  %v4167_v53 = vld [vmem:[%s7047_s1 + $0x360] ss:$16 sps:$4 sm:$0xff]   ;;  %v4221_v25 = vld [vmem:[%s7047_s1 + $0x26c] ss:$16 sps:$4 sm:$0xff]  }
  0x2f   : >> { %1084 = vmatpush1.bf16.msra.mxu0 %v4130_v26  ;;  %v4164_v50 = vld [vmem:[%s7047_s1 + $0x364] ss:$16 sps:$4 sm:$0xff]   ;;  %1103 = vmatprep.mubr.bf16.mxu0 %v4620_v49  ;;  %v4172_v56 = vld [vmem:[%s7047_s1 + $0x140] ss:$16 sps:$4 sm:$0xff]   ;;  %v4216_v26 = vld [vmem:[%s7047_s1 + $0x68] ss:$16 sps:$4 sm:$0xff]  }
  0x30   : >> { %1157 = vmatpush1.bf16.msra.mxu1 %v4131_v27  ;;  %1085 = vmatprep.subr.bf16.mxu0 %v4132_v28  ;;  %v4168_v54 = vld [vmem:[%s7047_s1 + $0x144] ss:$16 sps:$4 sm:$0xff]   ;;  %v4173_v57 = vld [vmem:[%s7047_s1 + $0x340] ss:$16 sps:$4 sm:$0xff]   ;;  %v4219_v27 = vld [vmem:[%s7047_s1 + $0x268] ss:$16 sps:$4 sm:$0xff]  }
  0x31   : >> { %1158 = vmatprep.subr.bf16.mxu1 %v4134_v29  ;;  %v4170_v55 = vld [vmem:[%s7047_s1 + $0x344] ss:$16 sps:$4 sm:$0xff]   ;;  %v4178_v60 = vld [vmem:[%s7047_s1 + $0x120] ss:$16 sps:$4 sm:$0xff]   ;;  %v4760_v29 = vld [vmem:[%s4605_s19 + $0x4c] ss:$16 sps:$4 sm:$0xff]  }
  0x32   : >> { %v4174_v58 = vld [vmem:[%s7047_s1 + $0x124] ss:$16 sps:$4 sm:$0xff]   ;;  %v4179_v61 = vld [vmem:[%s7047_s1 + $0x320] ss:$16 sps:$4 sm:$0xff]  }
  0x33   : >> { %1086 = vmatpush1.bf16.msra.mxu0 %v4136_v30  ;;  %v4176_v59 = vld [vmem:[%s7047_s1 + $0x324] ss:$16 sps:$4 sm:$0xff]   ;;  %v4184_v0 = vld [vmem:[%s7047_s1 + $0x100] ss:$16 sps:$4 sm:$0xff]  }
  0x34   : >> { %1159 = vmatpush1.bf16.msra.mxu1 %v4137_v31  ;;  %1087 = vmatprep.subr.bf16.mxu0 %v4138_v32  ;;  %v4180_v62 = vld [vmem:[%s7047_s1 + $0x104] ss:$16 sps:$4 sm:$0xff]   ;;  %v4185_v1 = vld [vmem:[%s7047_s1 + $0x300] ss:$16 sps:$4 sm:$0xff]   ;;  %v4766_v31 = vld [vmem:[%s4605_s19 + $0x48] ss:$16 sps:$4 sm:$0xff]  }
  0x35   : >> { %1160 = vmatprep.subr.bf16.mxu1 %v4140_v33  ;;  %v4182_v63 = vld [vmem:[%s7047_s1 + $0x304] ss:$16 sps:$4 sm:$0xff]   ;;  %v4679_v4 = vld [vmem:[%s4605_s19] ss:$16 sps:$4 sm:$0xff]   ;;  %v4224_v32 = vld [vmem:[%s7047_s1 + $0x4c] ss:$16 sps:$4 sm:$0xff]  }
  0x36   : >> { %v4717_v16 = vld [vmem:[%s4605_s19 + $0x24] ss:$16 sps:$4 sm:$0xff]   ;;  %v4723_v18 = vld [vmem:[%s4605_s19 + $0x20] ss:$16 sps:$4 sm:$0xff]   ;;  %v4227_v33 = vld [vmem:[%s7047_s1 + $0x24c] ss:$16 sps:$4 sm:$0xff]  }
  0x37   : >> { %1088 = vmatpush2.bf16.msra.mxu0 %v4142_v34  ;;  %v4757_v28 = vld [vmem:[%s4605_s19 + $0x44] ss:$16 sps:$4 sm:$0xff]   ;;  %v4763_v30 = vld [vmem:[%s4605_s19 + $0x40] ss:$16 sps:$4 sm:$0xff]   ;;  %v4222_v34 = vld [vmem:[%s7047_s1 + $0x48] ss:$16 sps:$4 sm:$0xff]  }
  0x38   : >> { %1161 = vmatpush2.bf16.msra.mxu1 %v4143_v35  ;;  %1089 = vmatprep.subr.bf16.mxu0 %v4144_v36  ;;  %v4225_v35 = vld [vmem:[%s7047_s1 + $0x248] ss:$16 sps:$4 sm:$0xff]   ;;  %v4230_v36 = vld [vmem:[%s7047_s1 + $0x2c] ss:$16 sps:$4 sm:$0xff]  }
  0x39   : >> { %1162 = vmatprep.subr.bf16.mxu1 %v4146_v37  ;;  %v4233_v37 = vld [vmem:[%s7047_s1 + $0x22c] ss:$16 sps:$4 sm:$0xff]  }
  0x3b   : >> { %1090 = vmatpush2.bf16.msra.mxu0 %v4148_v38  ;;  %v4228_v38 = vld [vmem:[%s7047_s1 + $0x28] ss:$16 sps:$4 sm:$0xff]  }
  0x3c   : >> { %1163 = vmatpush2.bf16.msra.mxu1 %v4149_v39  ;;  %1091 = vmatprep.subr.bf16.mxu0 %v4150_v40  ;;  %v4231_v39 = vld [vmem:[%s7047_s1 + $0x228] ss:$16 sps:$4 sm:$0xff]   ;;  %v4797_v40 = vld [vmem:[%s4605_s19 + $0x64] ss:$16 sps:$4 sm:$0x3f]  }
  0x3d   : >> { %1164 = vmatprep.subr.bf16.mxu1 %v4152_v41  ;;  %v4800_v41 = vld [vmem:[%s4605_s19 + $0x6c] ss:$16 sps:$4 sm:$0x3f]  }
  0x3f   : >> { %1092 = vmatpush2.bf16.msra.mxu0 %v4154_v42  ;;  %v4803_v42 = vld [vmem:[%s4605_s19 + $0x60] ss:$16 sps:$4 sm:$0x3f]  }
  0x40   : >> { %1165 = vmatpush2.bf16.msra.mxu1 %v4155_v43  ;;  %1093 = vmatprep.subr.bf16.mxu0 %v4156_v44  ;;  %v4806_v43 = vld [vmem:[%s4605_s19 + $0x68] ss:$16 sps:$4 sm:$0x3f]   ;;  %v4236_v44 = vld [vmem:[%s7047_s1 + $0xc] ss:$16 sps:$4 sm:$0xff]   ;;  %s4974_s19 = smov (%p199_p7), 0  }
  0x41   : >> { %1166 = vmatprep.subr.bf16.mxu1 %v4158_v45  ;;  %v4239_v45 = vld [vmem:[%s7047_s1 + $0x20c] ss:$16 sps:$4 sm:$0xff]  }
  0x43   : >> { %1094 = vmatpush2.bf16.msra.mxu0 %v4160_v46  ;;  %v4234_v46 = vld [vmem:[%s7047_s1 + $0x8] ss:$16 sps:$4 sm:$0xff]  }
  0x44   : >> { %1167 = vmatpush2.bf16.msra.mxu1 %v4161_v47  ;;  %1095 = vmatprep.subr.bf16.mxu0 %v4162_v48  ;;  %v4237_v47 = vld [vmem:[%s7047_s1 + $0x208] ss:$16 sps:$4 sm:$0xff]   ;;  %v4242_v48 = vld [vmem:[%s7047_s1 + $0x1ec] ss:$16 sps:$4 sm:$0xff]  }
  0x45   : >> { %1168 = vmatprep.subr.bf16.mxu1 %v4164_v50  ;;  %v4245_v50 = vld [vmem:[%s7047_s1 + $0x3ec] ss:$16 sps:$4 sm:$0xff]  }
  0x47   : >> { %1096 = vmatpush2.bf16.msra.mxu0 %v4166_v52  ;;  %v4240_v52 = vld [vmem:[%s7047_s1 + $0x1e8] ss:$16 sps:$4 sm:$0xff]  }
  0x48   : >> { %1169 = vmatpush2.bf16.msra.mxu1 %v4167_v53  ;;  %1097 = vmatprep.subr.bf16.mxu0 %v4168_v54  ;;  %v4243_v53 = vld [vmem:[%s7047_s1 + $0x3e8] ss:$16 sps:$4 sm:$0xff]   ;;  %v4254_v54 = vld [vmem:[%s7047_s1 + $0x1cc] ss:$16 sps:$4 sm:$0xff]  }
  0x49   : >> { %1170 = vmatprep.subr.bf16.mxu1 %v4170_v55  ;;  %v4255_v55 = vld [vmem:[%s7047_s1 + $0x3c8] ss:$16 sps:$4 sm:$0xff]  }
  0x4b   : >> { %1098 = vmatpush2.bf16.msra.mxu0 %v4172_v56  ;;  %v4260_v56 = vld [vmem:[%s7047_s1 + $0x1ac] ss:$16 sps:$4 sm:$0xff]  }
  0x4c   : >> { %1171 = vmatpush2.bf16.msra.mxu1 %v4173_v57  ;;  %1099 = vmatprep.subr.bf16.mxu0 %v4174_v58  ;;  %v4263_v57 = vld [vmem:[%s7047_s1 + $0x3ac] ss:$16 sps:$4 sm:$0xff]   ;;  %v4258_v58 = vld [vmem:[%s7047_s1 + $0x1a8] ss:$16 sps:$4 sm:$0xff]  }
  0x4d   : >> { %1172 = vmatprep.subr.bf16.mxu1 %v4176_v59  ;;  %v4261_v59 = vld [vmem:[%s7047_s1 + $0x3a8] ss:$16 sps:$4 sm:$0xff]  }
  0x4f   : >> { %1100 = vmatpush2.bf16.msra.mxu0 %v4178_v60  ;;  %v4272_v60 = vld [vmem:[%s7047_s1 + $0x18c] ss:$16 sps:$4 sm:$0xff]  }
  0x50   : >> { %1173 = vmatpush2.bf16.msra.mxu1 %v4179_v61  ;;  %1101 = vmatprep.subr.bf16.mxu0 %v4180_v62  ;;  %v4275_v61 = vld [vmem:[%s7047_s1 + $0x38c] ss:$16 sps:$4 sm:$0xff]   ;;  %v4270_v62 = vld [vmem:[%s7047_s1 + $0x188] ss:$16 sps:$4 sm:$0xff]  }
  0x51   : >> { %1174 = vmatprep.subr.bf16.mxu1 %v4182_v63  ;;  %v4273_v63 = vld [vmem:[%s7047_s1 + $0x388] ss:$16 sps:$4 sm:$0xff]  }
  0x53   : >> { %1102 = vmatpush2.bf16.msra.mxu0 %v4184_v0  ;;  %v4278_v0 = vld [vmem:[%s7047_s1 + $0x16c] ss:$16 sps:$4 sm:$0xff]  }
  0x54   : >> { %1175 = vmatpush2.bf16.msra.mxu1 %v4185_v1  ;;  %1217 = vmatprep.subr.bf16.mxu0 %v4194_v2  ;;  %v4281_v1 = vld [vmem:[%s7047_s1 + $0x36c] ss:$16 sps:$4 sm:$0xff]   ;;  %v4276_v2 = vld [vmem:[%s7047_s1 + $0x168] ss:$16 sps:$4 sm:$0xff]  }
  0x55   : >> { %1290 = vmatprep.subr.bf16.mxu1 %v4197_v3  ;;  %v4279_v3 = vld [vmem:[%s7047_s1 + $0x368] ss:$16 sps:$4 sm:$0xff]  }
  0x56   : >> { %1104 = vmatmul.mubr.bf16.vlgmr.msra.gmra.mxu0 %v4679_v4 }
  0x57   : >> { %1177 = vmatmul.mubr.bf16.vlgmr.msra.gmra.mxu1 %v4682_v5  ;;  %1218 = vmatpush1.bf16.msra.mxu0 %v4192_v6  ;;  %v4290_v6 = vld [vmem:[%s7047_s1 + $0x14c] ss:$16 sps:$4 sm:$0xff]  }
  0x58   : >> { %1291 = vmatpush1.bf16.msra.mxu1 %v4195_v7  ;;  %1219 = vmatprep.subr.bf16.mxu0 %v4200_v8  ;;  %v4293_v7 = vld [vmem:[%s7047_s1 + $0x34c] ss:$16 sps:$4 sm:$0xff]   ;;  %v4288_v8 = vld [vmem:[%s7047_s1 + $0x148] ss:$16 sps:$4 sm:$0xff]  }
  0x59   : >> { %1292 = vmatprep.subr.bf16.mxu1 %v4203_v9  ;;  %1113 = vmatprep.mubr.bf16.mxu0 %v4717_v16  ;;  %v4291_v9 = vld [vmem:[%s7047_s1 + $0x348] ss:$16 sps:$4 sm:$0xff]  }
  0x5a   : >> { %1186 = vmatprep.mubr.bf16.mxu1 %v4720_v17 }
  0x5b   : >> { %1220 = vmatpush1.bf16.msra.mxu0 %v4198_v10  ;;  %v4296_v10 = vld [vmem:[%s7047_s1 + $0x12c] ss:$16 sps:$4 sm:$0xff]  }
  0x5c   : >> { %1293 = vmatpush1.bf16.msra.mxu1 %v4201_v11  ;;  %1221 = vmatprep.subr.bf16.mxu0 %v4206_v12  ;;  %v4299_v11 = vld [vmem:[%s7047_s1 + $0x32c] ss:$16 sps:$4 sm:$0xff]   ;;  %v4294_v12 = vld [vmem:[%s7047_s1 + $0x128] ss:$16 sps:$4 sm:$0xff]  }
  0x5d   : >> { %1294 = vmatprep.subr.bf16.mxu1 %v4209_v13  ;;  %v4297_v13 = vld [vmem:[%s7047_s1 + $0x328] ss:$16 sps:$4 sm:$0xff]  }
  0x5e   : >> { %1114 = vmatmul.mubr.bf16.gmra.mxu0 %v4723_v18 }
  0x5f   : >> { %1187 = vmatmul.mubr.bf16.gmra.mxu1 %v4726_v19  ;;  %1222 = vmatpush1.bf16.msra.mxu0 %v4204_v14  ;;  %v4302_v14 = vld [vmem:[%s7047_s1 + $0x10c] ss:$16 sps:$4 sm:$0xff]  }
  0x60   : >> { %1295 = vmatpush1.bf16.msra.mxu1 %v4207_v15  ;;  %1223 = vmatprep.subr.bf16.mxu0 %v4212_v20  ;;  %v4305_v15 = vld [vmem:[%s7047_s1 + $0x30c] ss:$16 sps:$4 sm:$0xff]   ;;  %v4300_v20 = vld [vmem:[%s7047_s1 + $0x108] ss:$16 sps:$4 sm:$0xff]  }
  0x61   : >> { %1296 = vmatprep.subr.bf16.mxu1 %v4215_v21  ;;  %1123 = vmatprep.mubr.bf16.mxu0 %v4757_v28  ;;  %v4303_v21 = vld [vmem:[%s7047_s1 + $0x308] ss:$16 sps:$4 sm:$0xff]  }
  0x62   : >> { %1196 = vmatprep.mubr.bf16.mxu1 %v4760_v29 }
  0x63   : >> { %1224 = vmatpush1.bf16.msra.mxu0 %v4210_v22 }
  0x64   : >> { %1297 = vmatpush1.bf16.msra.mxu1 %v4213_v23  ;;  %1225 = vmatprep.subr.bf16.mxu0 %v4218_v24 }
  0x65   : >> { %1298 = vmatprep.subr.bf16.mxu1 %v4221_v25 }
  0x66   : >> { %1124 = vmatmul.mubr.bf16.gmra.mxu0 %v4763_v30 }
  0x67   : >> { %1197 = vmatmul.mubr.bf16.gmra.mxu1 %v4766_v31  ;;  %1226 = vmatpush1.bf16.msra.mxu0 %v4216_v26 }
  0x68   : >> { %1299 = vmatpush1.bf16.msra.mxu1 %v4219_v27  ;;  %1227 = vmatprep.subr.bf16.mxu0 %v4224_v32 }
  0x69   : >> { %1300 = vmatprep.subr.bf16.mxu1 %v4227_v33  ;;  %1133 = vmatprep.mubr.bf16.mxu0 %v4797_v40 }
  0x6a   : >> { %1206 = vmatprep.mubr.bf16.mxu1 %v4800_v41 }
  0x6b   : >> { %1228 = vmatpush1.bf16.msra.mxu0 %v4222_v34 }
  0x6c   : >> { %1301 = vmatpush1.bf16.msra.mxu1 %v4225_v35  ;;  %1229 = vmatprep.subr.bf16.mxu0 %v4230_v36 }
  0x6d   : >> { %1302 = vmatprep.subr.bf16.mxu1 %v4233_v37 }
  0x6e   : >> { %1134 = vmatmul.mubr.bf16.gmra.mxu0 %v4803_v42 }
  0x6f   : >> { %1207 = vmatmul.mubr.bf16.gmra.mxu1 %v4806_v43  ;;  %1230 = vmatpush1.bf16.msra.mxu0 %v4228_v38 }
  0x70   : >> { %1303 = vmatpush1.bf16.msra.mxu1 %v4231_v39  ;;  %1231 = vmatprep.subr.bf16.mxu0 %v4236_v44 }
  0x71   : >> { %1304 = vmatprep.subr.bf16.mxu1 %v4239_v45  ;;  %1249 = vmatprep.mubr.bf16.mxu0 %v4620_v49  ;;  %v4257_v49 = vld [vmem:[%s7047_s1 + $0x3cc] ss:$16 sps:$4 sm:$0xff]  }
  0x72   : >> { %1322 = vmatprep.mubr.bf16.mxu1 %v4626_v51  ;;  %v4252_v51 = vld [vmem:[%s7047_s1 + $0x1c8] ss:$16 sps:$4 sm:$0xff]  }
  0x73   : >> { %1232 = vmatpush1.bf16.msra.mxu0 %v4234_v46 }
  0x74   : >> { %1305 = vmatpush1.bf16.msra.mxu1 %v4237_v47  ;;  %1233 = vmatprep.subr.bf16.mxu0 %v4242_v48 }
  0x75   : >> { %1306 = vmatprep.subr.bf16.mxu1 %v4245_v50 }
  0x77   : >> { %1234 = vmatpush2.bf16.msra.mxu0 %v4240_v52 }
  0x78   : >> { %1307 = vmatpush2.bf16.msra.mxu1 %v4243_v53  ;;  %1235 = vmatprep.subr.bf16.mxu0 %v4254_v54 }
  0x79   : >> { %1308 = vmatprep.subr.bf16.mxu1 %v4257_v49 }
  0x7b   : >> { %1236 = vmatpush2.bf16.msra.mxu0 %v4252_v51 }
  0x7c   : >> { %1309 = vmatpush2.bf16.msra.mxu1 %v4255_v55  ;;  %1237 = vmatprep.subr.bf16.mxu0 %v4260_v56 }
  0x7d   : >> { %1310 = vmatprep.subr.bf16.mxu1 %v4263_v57 }
  0x7f   : >> { %1238 = vmatpush2.bf16.msra.mxu0 %v4258_v58 }
  0x80   : >> { %1311 = vmatpush2.bf16.msra.mxu1 %v4261_v59  ;;  %1239 = vmatprep.subr.bf16.mxu0 %v4272_v60 }
  0x81   : >> { %1312 = vmatprep.subr.bf16.mxu1 %v4275_v61 }
  0x83   : >> { %1240 = vmatpush2.bf16.msra.mxu0 %v4270_v62 }
  0x84   : >> { %1313 = vmatpush2.bf16.msra.mxu1 %v4273_v63  ;;  %1241 = vmatprep.subr.bf16.mxu0 %v4278_v0 }
  0x85   : >> { %1314 = vmatprep.subr.bf16.mxu1 %v4281_v1 }
  0x87   : >> { %1242 = vmatpush2.bf16.msra.mxu0 %v4276_v2 }
  0x88   : >> { %1315 = vmatpush2.bf16.msra.mxu1 %v4279_v3  ;;  %1243 = vmatprep.subr.bf16.mxu0 %v4290_v6 }
  0x89   : >> { %1316 = vmatprep.subr.bf16.mxu1 %v4293_v7 }
  0x8b   : >> { %1244 = vmatpush2.bf16.msra.mxu0 %v4288_v8 }
  0x8c   : >> { %1317 = vmatpush2.bf16.msra.mxu1 %v4291_v9  ;;  %1245 = vmatprep.subr.bf16.mxu0 %v4296_v10 }
  0x8d   : >> { %1318 = vmatprep.subr.bf16.mxu1 %v4299_v11 }
  0x8f   : >> { %1246 = vmatpush2.bf16.msra.mxu0 %v4294_v12 }
  0x90   : >> { %1319 = vmatpush2.bf16.msra.mxu1 %v4297_v13  ;;  %1247 = vmatprep.subr.bf16.mxu0 %v4302_v14 }
  0x91   : >> { %1320 = vmatprep.subr.bf16.mxu1 %v4305_v15 }
  0x93   : >> { %1248 = vmatpush2.bf16.msra.mxu0 %v4300_v20 }
  0x94   : >> { %1321 = vmatpush2.bf16.msra.mxu1 %v4303_v21 }
  0x96   : >> { %1250 = vmatmul.mubr.bf16.vlgmr.msra.gmra.mxu0 %v4679_v4 }
  0x97   : >> { %1323 = vmatmul.mubr.bf16.vlgmr.msra.gmra.mxu1 %v4682_v5  ;;  %1259 = vmatprep.mubr.bf16.mxu0 %v4717_v16 }
  0x98   : >> { %1332 = vmatprep.mubr.bf16.mxu1 %v4720_v17 }
  0x9e   : >> { %1260 = vmatmul.mubr.bf16.gmra.mxu0 %v4723_v18 }
  0x9f   : >> { %1333 = vmatmul.mubr.bf16.gmra.mxu1 %v4726_v19  ;;  %1269 = vmatprep.mubr.bf16.mxu0 %v4757_v28 }
  0xa0   : >> { %1342 = vmatprep.mubr.bf16.mxu1 %v4760_v29 }
  0xa6   : >> { %1270 = vmatmul.mubr.bf16.gmra.mxu0 %v4763_v30 }
  0xa7   : >> { %1343 = vmatmul.mubr.bf16.gmra.mxu1 %v4766_v31  ;;  %1279 = vmatprep.mubr.bf16.mxu0 %v4797_v40 }
  0xa8   : >> { %1352 = vmatprep.mubr.bf16.mxu1 %v4800_v41 }
  0xae   : >> { %1280 = vmatmul.mubr.bf16.gmra.mxu0 %v4803_v42 }
  0xaf   : >> { %1353 = vmatmul.mubr.bf16.gmra.mxu1 %v4806_v43 }
 0x116   : >> { %v1105_v4 = vpop.f32.mrf.mxu0 }
 0x117   : >> { %v1178_v5 = vpop.f32.mrf.mxu1 }
 0x118   : >> { %v1179_v16 = vadd.f32 %v1178_v5, %v1105_v4  ;;  %v1107_v17 = vpop.f32.mrf.mxu0 }
 0x119   : >> { %v1180_v18 = vpop.f32.mrf.mxu1 }
 0x11a   : >> { %1366 = vst [vmem:[%s4937_s25] sm:$0xff] %v1179_v16  ;;  %v1181_v19 = vadd.f32 %v1180_v18, %v1107_v17  ;;  %v1109_v22 = vpop.f32.mrf.mxu0 }
 0x11b   : >> { %v1182_v23 = vpop.f32.mrf.mxu1 }
 0x11c   : >> { %1367 = vst [vmem:[%s4937_s25 + $0x8] sm:$0xff] %v1181_v19  ;;  %v1183_v24 = vadd.f32 %v1182_v23, %v1109_v22  ;;  %v1111_v25 = vpop.f32.mrf.mxu0 }
 0x11d   : >> { %v1184_v26 = vpop.f32.mrf.mxu1 }
 0x11e   : >> { %1370 = vst [vmem:[%s4937_s25 + $0x20] sm:$0xff] %v1183_v24  ;;  %v1185_v27 = vadd.f32 %v1184_v26, %v1111_v25  ;;  %v1115_v28 = vpop.f32.mrf.mxu0 }
 0x11f   : >> { %v1188_v29 = vpop.f32.mrf.mxu1 }
 0x120   : >> { %1371 = vst [vmem:[%s4937_s25 + $0x28] sm:$0xff] %v1185_v27  ;;  %v1189_v30 = vadd.f32 %v1188_v29, %v1115_v28  ;;  %v1117_v31 = vpop.f32.mrf.mxu0 }
 0x121   : >> { %v1190_v32 = vpop.f32.mrf.mxu1 }
 0x122   : >> { %1374 = vst [vmem:[%s4937_s25 + $0x40] sm:$0xff] %v1189_v30  ;;  %v1191_v33 = vadd.f32 %v1190_v32, %v1117_v31  ;;  %v1119_v34 = vpop.f32.mrf.mxu0 }
 0x123   : >> { %v1192_v35 = vpop.f32.mrf.mxu1 }
 0x124   : >> { %1375 = vst [vmem:[%s4937_s25 + $0x48] sm:$0xff] %v1191_v33  ;;  %v1193_v36 = vadd.f32 %v1192_v35, %v1119_v34  ;;  %v1121_v37 = vpop.f32.mrf.mxu0 }
 0x125   : >> { %v1194_v38 = vpop.f32.mrf.mxu1 }
 0x126   : >> { %1378 = vst [vmem:[%s4937_s25 + $0x60] sm:$0xff] %v1193_v36  ;;  %v1195_v39 = vadd.f32 %v1194_v38, %v1121_v37  ;;  %v1125_v40 = vpop.f32.mrf.mxu0 }
 0x127   : >> { %v1198_v41 = vpop.f32.mrf.mxu1 }
 0x128   : >> { %1379 = vst [vmem:[%s4937_s25 + $0x68] sm:$0xff] %v1195_v39  ;;  %v1199_v42 = vadd.f32 %v1198_v41, %v1125_v40  ;;  %v1127_v43 = vpop.f32.mrf.mxu0 }
 0x129   : >> { %v1200_v44 = vpop.f32.mrf.mxu1 }
 0x12a   : >> { %1382 = vst [vmem:[%s4937_s25 + $0x80] sm:$0xff] %v1199_v42  ;;  %v1201_v45 = vadd.f32 %v1200_v44, %v1127_v43  ;;  %v1129_v46 = vpop.f32.mrf.mxu0 }
 0x12b   : >> { %v1202_v47 = vpop.f32.mrf.mxu1 }
 0x12c   : >> { %1383 = vst [vmem:[%s4937_s25 + $0x88] sm:$0xff] %v1201_v45  ;;  %v1203_v48 = vadd.f32 %v1202_v47, %v1129_v46  ;;  %v1131_v50 = vpop.f32.mrf.mxu0 }
 0x12d   : >> { %v1204_v52 = vpop.f32.mrf.mxu1 }
 0x12e   : >> { %1386 = vst [vmem:[%s4937_s25 + $0xa0] sm:$0xff] %v1203_v48  ;;  %v1205_v53 = vadd.f32 %v1204_v52, %v1131_v50  ;;  %v1135_v54 = vpop.f32.mrf.mxu0 }
 0x12f   : >> { %v1208_v49 = vpop.f32.mrf.mxu1 }
 0x130   : >> { %1387 = vst [vmem:[%s4937_s25 + $0xa8] sm:$0xff] %v1205_v53  ;;  %v1209_v51 = vadd.f32 %v1208_v49, %v1135_v54  ;;  %v1137_v55 = vpop.f32.mrf.mxu0 }
 0x131   : >> { %v1210_v56 = vpop.f32.mrf.mxu1 }
 0x132   : >> { %1390 = vst [vmem:[%s4937_s25 + $0xc0] sm:$0xff] %v1209_v51  ;;  %v1211_v57 = vadd.f32 %v1210_v56, %v1137_v55  ;;  %v1139_v58 = vpop.f32.mrf.mxu0 }
 0x133   : >> { %v1212_v59 = vpop.f32.mrf.mxu1 }
 0x134   : >> { %1391 = vst [vmem:[%s4937_s25 + $0xc8] sm:$0xff] %v1211_v57  ;;  %v1213_v60 = vadd.f32 %v1212_v59, %v1139_v58  ;;  %v1141_v61 = vpop.f32.mrf.mxu0 }
 0x135   : >> { %v1214_v62 = vpop.f32.mrf.mxu1 }
 0x136   : >> { %1394 = vst [vmem:[%s4937_s25 + $0xe0] sm:$0xf] %v1213_v60  ;;  %v1215_v63 = vadd.f32 %v1214_v62, %v1141_v61 }
 0x138   : >> { %1395 = vst [vmem:[%s4937_s25 + $0xe8] sm:$0xf] %v1215_v63 }
 0x156   : >> { %v1251_v0 = vpop.f32.mrf.mxu0 }
 0x157   : >> { %v1324_v1 = vpop.f32.mrf.mxu1 }
 0x158   : >> { %v1325_v2 = vadd.f32 %v1324_v1, %v1251_v0  ;;  %v1253_v3 = vpop.f32.mrf.mxu0 }
 0x159   : >> { %v1326_v6 = vpop.f32.mrf.mxu1 }
 0x15a   : >> { %1368 = vst [vmem:[%s4937_s25 + $0x10] sm:$0xff] %v1325_v2  ;;  %v1327_v7 = vadd.f32 %v1326_v6, %v1253_v3  ;;  %v1255_v8 = vpop.f32.mrf.mxu0 }
 0x15b   : >> { %v1328_v9 = vpop.f32.mrf.mxu1 }
 0x15c   : >> { %1369 = vst [vmem:[%s4937_s25 + $0x18] sm:$0xff] %v1327_v7  ;;  %v1329_v10 = vadd.f32 %v1328_v9, %v1255_v8  ;;  %v1257_v11 = vpop.f32.mrf.mxu0 }
 0x15d   : >> { %v1330_v12 = vpop.f32.mrf.mxu1 }
 0x15e   : >> { %1372 = vst [vmem:[%s4937_s25 + $0x30] sm:$0xff] %v1329_v10  ;;  %v1331_v13 = vadd.f32 %v1330_v12, %v1257_v11  ;;  %v1261_v14 = vpop.f32.mrf.mxu0 }
 0x15f   : >> { %v1334_v15 = vpop.f32.mrf.mxu1 }
 0x160   : >> { %1373 = vst [vmem:[%s4937_s25 + $0x38] sm:$0xff] %v1331_v13  ;;  %v1335_v20 = vadd.f32 %v1334_v15, %v1261_v14  ;;  %v1263_v21 = vpop.f32.mrf.mxu0 }
 0x161   : >> { %v1336_v4 = vpop.f32.mrf.mxu1 }
 0x162   : >> { %1376 = vst [vmem:[%s4937_s25 + $0x50] sm:$0xff] %v1335_v20  ;;  %v1337_v5 = vadd.f32 %v1336_v4, %v1263_v21  ;;  %v1265_v16 = vpop.f32.mrf.mxu0 }
 0x163   : >> { %v1338_v17 = vpop.f32.mrf.mxu1 }
 0x164   : >> { %1377 = vst [vmem:[%s4937_s25 + $0x58] sm:$0xff] %v1337_v5  ;;  %v1339_v18 = vadd.f32 %v1338_v17, %v1265_v16  ;;  %v1267_v19 = vpop.f32.mrf.mxu0 }
 0x165   : >> { %v1340_v22 = vpop.f32.mrf.mxu1 }
 0x166   : >> { %1380 = vst [vmem:[%s4937_s25 + $0x70] sm:$0xff] %v1339_v18  ;;  %v1341_v23 = vadd.f32 %v1340_v22, %v1267_v19  ;;  %v1271_v24 = vpop.f32.mrf.mxu0 }
 0x167   : >> { %v1344_v25 = vpop.f32.mrf.mxu1 }
 0x168   : >> { %1381 = vst [vmem:[%s4937_s25 + $0x78] sm:$0xff] %v1341_v23  ;;  %v1345_v26 = vadd.f32 %v1344_v25, %v1271_v24  ;;  %v1273_v27 = vpop.f32.mrf.mxu0 }
 0x169   : >> { %v1346_v28 = vpop.f32.mrf.mxu1 }
 0x16a   : >> { %1384 = vst [vmem:[%s4937_s25 + $0x90] sm:$0xff] %v1345_v26  ;;  %v1347_v29 = vadd.f32 %v1346_v28, %v1273_v27  ;;  %v1275_v30 = vpop.f32.mrf.mxu0 }
 0x16b   : >> { %v1348_v31 = vpop.f32.mrf.mxu1 }
 0x16c   : >> { %1385 = vst [vmem:[%s4937_s25 + $0x98] sm:$0xff] %v1347_v29  ;;  %v1349_v32 = vadd.f32 %v1348_v31, %v1275_v30  ;;  %v1277_v33 = vpop.f32.mrf.mxu0 }
 0x16d   : >> { %v1350_v34 = vpop.f32.mrf.mxu1 }
 0x16e   : >> { %1388 = vst [vmem:[%s4937_s25 + $0xb0] sm:$0xff] %v1349_v32  ;;  %v1351_v35 = vadd.f32 %v1350_v34, %v1277_v33  ;;  %v1281_v36 = vpop.f32.mrf.mxu0 }
 0x16f   : >> { %v1354_v37 = vpop.f32.mrf.mxu1 }
 0x170   : >> { %1389 = vst [vmem:[%s4937_s25 + $0xb8] sm:$0xff] %v1351_v35  ;;  %v1355_v38 = vadd.f32 %v1354_v37, %v1281_v36  ;;  %v1283_v39 = vpop.f32.mrf.mxu0 }
 0x171   : >> { %v1356_v40 = vpop.f32.mrf.mxu1 }
 0x172   : >> { %1392 = vst [vmem:[%s4937_s25 + $0xd0] sm:$0xff] %v1355_v38  ;;  %v1357_v41 = vadd.f32 %v1356_v40, %v1283_v39  ;;  %v1285_v42 = vpop.f32.mrf.mxu0 }
 0x173   : >> { %v1358_v43 = vpop.f32.mrf.mxu1 }
 0x174   : >> { %1393 = vst [vmem:[%s4937_s25 + $0xd8] sm:$0xff] %v1357_v41  ;;  %v1359_v44 = vadd.f32 %v1358_v43, %v1285_v42  ;;  %v1287_v45 = vpop.f32.mrf.mxu0  ;;  %201 = sbr.rel (!%p199_p7) target bundleno = 21 (0x15), region = 92 }
 0x175   : >> { %v1360_v46 = vpop.f32.mrf.mxu1 }
 0x176   : >> { %1396 = vst [vmem:[%s4937_s25 + $0xf0] sm:$0xf] %v1359_v44  ;;  %v1361_v47 = vadd.f32 %v1360_v46, %v1287_v45 }
 0x178   : >> { %1397 = vst [vmem:[%s4937_s25 + $0xf8] sm:$0xf] %v1361_v47 }
 0x179 LB: >> { %s4014_s26 = sshll.u32 %s4388_s19, 9  ;;  %vm1432_vm0 = vcmask 1046528   ;;  %s4390_s12 = smov 112   ;;  %vm1480_vm1 = vcmask 1045504   ;;  %vm1528_vm2 = vcmask 1044480   ;;  %vm1576_vm3 = vcmask 1043456   ;;  %s4388_s19 = sphi %s4974_s19, %s1403_s19  }
 0x17a   : >> { %s4980_s27 = scalar_lea.vmem [#allocation2], %s4014_s26  ;;  %s4391_s20 = smov 96   ;;  %vm3520_vm4 = vcmask 130048   ;;  %vm3566_vm5 = vcmask 125952   ;;  %vm3570_vm6 = vcmask 123904  }
 0x17b   : >> { %s4392_s24 = smov 80   ;;  %s4393_s5 = smov 64  }
 0x17c   : >> { %s4394_s28 = smov 48   ;;  %s4395_s29 = smov 32  }
 0x17d   : >> { %s4396_s30 = smov 16   ;;  %s4024_s8 = sshll.u32 %s4388_s19, 4 }
 0x17e   : >> { %s3565_s9 = scalar_lea.vmem %s4459_s4, %s4024_s8  ;;  %s1403_s19 = sadd.s32 1, %s4388_s19  }
 0x17f   : >> { %v4983_v48 = vld [vmem:[%s4980_s27 + $0x40] sm:$0xff]  ;;  %p1400_p8 = scmp.ge.s32.totalorder %s1403_s19, 14  }
 0x180   : >> { %v4986_v50 = vld [vmem:[%s4980_s27 + $0x60] sm:$0xff]  ;;  %v1436_v53 = vrot.slane %v4983_v48, 1  ;;  %v1484_v12 = vrot.slane %v4983_v48, 2  ;;  %v1532_v25 = vrot.slane %v4983_v48, 3  ;;  %v1580_v44 = vrot.slane %v4983_v48, 4 }
 0x181   : >> { %v4989_v52 = vld [vmem:[%s4980_s27 + $0x20] sm:$0xff]  ;;  %v1438_v54 = vrot.slane %v4986_v50, 1  ;;  %v1486_v13 = vrot.slane %v4986_v50, 2  ;;  %v1534_v29 = vrot.slane %v4986_v50, 3  ;;  %v1582_v45 = vrot.slane %v4986_v50, 4 }
 0x182   : >> { %v1422_v49 = vld [vmem:[%s4980_s27] sm:$0xfe]  ;;  %v1434_v51 = vrot.slane %v4989_v52, 1  ;;  %v1423_v3 = vld [vmem:[%s4980_s27 + $0xe0] sm:$0x1]  ;;  %v1482_v8 = vrot.slane %v4989_v52, 2 }
 0x183   : >> { %v4996_v55 = vld [vmem:[%s4980_s27 + $0x80] sm:$0xff]  ;;  %v1433_v56 = vrot.slane %v1422_v49, 1  ;;  %v1439_v60 = vsel %vm1432_vm0, %v1436_v53, %v1438_v54  ;;  %v1446_v10 = vrot.slane %v1423_v3, 1  ;;  %v1487_v15 = vsel %vm1480_vm1, %v1484_v12, %v1486_v13 }
 0x184   : >> { %v1440_v57 = vrot.slane %v4996_v55, 1  ;;  %v5000_v58 = vld [vmem:[%s4980_s27 + $0xa0] sm:$0xff]  ;;  %1452 = vrot.lane.b32.xlu1 %v1439_v60, %s4390_s12  ;;  %v1437_v1 = vsel %vm1432_vm0, %v1434_v51, %v1436_v53  ;;  %v1488_v20 = vrot.slane %v4996_v55, 2  ;;  %v1485_v4 = vsel %vm1480_vm1, %v1482_v8, %v1484_v12 }
 0x185   : >> { %v5003_v59 = vld [vmem:[%s4980_s27 + $0xc0] sm:$0xff]  ;;  %v1435_v61 = vsel %vm1432_vm0, %v1433_v56, %v1434_v51  ;;  %v1442_v63 = vrot.slane %v5000_v58, 1  ;;  %v1490_v21 = vrot.slane %v5000_v58, 2  ;;  %v1530_v24 = vrot.slane %v4989_v52, 3 }
 0x186   : >> { %1448 = vrot.lane.b32.xlu0 %v1435_v61, %s4390_s12  ;;  %v1441_v62 = vsel %vm1432_vm0, %v1438_v54, %v1440_v57  ;;  %v1444_v0 = vrot.slane %v5003_v59, 1  ;;  %v1476_v2 = vld [vmem:[%s4980_s27] sm:$0xfc]  ;;  %v1477_v5 = vld [vmem:[%s4980_s27 + $0xe0] sm:$0x3]  ;;  %v1492_v17 = vrot.slane %v5003_v59, 2  ;;  %v1489_v19 = vsel %vm1480_vm1, %v1486_v13, %v1488_v20 }
 0x187   : >> { %v1481_v7 = vrot.slane %v1476_v2, 2  ;;  %v1443_v9 = vsel %vm1432_vm0, %v1440_v57, %v1442_v63  ;;  %v1491_v16 = vsel %vm1480_vm1, %v1488_v20, %v1490_v21  ;;  %v1494_v18 = vrot.slane %v1477_v5, 2  ;;  %v1524_v22 = vld [vmem:[%s4980_s27] sm:$0xf8]  ;;  %v1525_v37 = vld [vmem:[%s4980_s27 + $0xe0] sm:$0x7] }
 0x188   : >> { %1454 = vrot.lane.b32.xlu1 %v1441_v62, %s4390_s12  ;;  %v1445_v6 = vsel %vm1432_vm0, %v1442_v63, %v1444_v0  ;;  %v1447_v14 = vsel %vm1432_vm0, %v1444_v0, %v1446_v10  ;;  %v1493_v26 = vsel %vm1480_vm1, %v1490_v21, %v1492_v17  ;;  %v1529_v27 = vrot.slane %v1524_v22, 3  ;;  %v1572_v36 = vld [vmem:[%s4980_s27] sm:$0xf0]  ;;  %v1573_v48 = vld [vmem:[%s4980_s27 + $0xe0] sm:$0xf]  ;;  %v5129_v10 = vld [vmem:[%s4980_s27 + $0x128] sm:$0xff] }
 0x189   : >> { %v1483_v11 = vsel %vm1480_vm1, %v1481_v7, %v1482_v8  ;;  %v1495_v23 = vsel %vm1480_vm1, %v1492_v17, %v1494_v18  ;;  %v1533_v28 = vsel %vm1528_vm2, %v1530_v24, %v1532_v25  ;;  %v1536_v30 = vrot.slane %v4996_v55, 3  ;;  %v5096_v60 = vld [vmem:[%s4980_s27 + $0x160] sm:$0xff]  ;;  %7069 = vst [vmem:[#allocation4_spill] sm:$0xff] %v5129_v10  ;;  %v5153_v17 = vld [vmem:[%s4980_s27 + $0x188] sm:$0xff] }
 0x18a   : >> { %1450 = vrot.lane.b32.xlu0 %v1437_v1, %s4390_s12  ;;  %v1531_v31 = vsel %vm1528_vm2, %v1529_v27, %v1530_v24  ;;  %v1538_v33 = vrot.slane %v5000_v58, 3  ;;  %v1540_v34 = vrot.slane %v5003_v59, 3  ;;  %v1535_v35 = vsel %vm1528_vm2, %v1532_v25, %v1534_v29  ;;  %v5099_v61 = vld [vmem:[%s4980_s27 + $0x140] sm:$0xff] }
 0x18b   : >> { %v1537_v32 = vsel %vm1528_vm2, %v1534_v29, %v1536_v30  ;;  %v1577_v39 = vrot.slane %v1572_v36, 4  ;;  %v1578_v40 = vrot.slane %v4989_v52, 4  ;;  %v1542_v42 = vrot.slane %v1525_v37, 3  ;;  %v3870_v62 = vld [vmem:[%s4980_s27 + $0x100] sm:$0xfe]  ;;  %v3879_v29 = vld [vmem:[%s4980_s27 + $0x1a8] sm:$0xff] }
 0x18c   : >> { %1458 = vrot.lane.b32.xlu1 %v1445_v6, %s4390_s12  ;;  %v1541_v38 = vsel %vm1528_vm2, %v1538_v33, %v1540_v34  ;;  %v1539_v41 = vsel %vm1528_vm2, %v1536_v30, %v1538_v33  ;;  %v1583_v47 = vsel %vm1576_vm3, %v1580_v44, %v1582_v45  ;;  %v1584_v52 = vrot.slane %v4996_v55, 4  ;;  %v5107_v63 = vld [vmem:[%s4980_s27 + $0x1a0] sm:$0xff]  ;;  %v5180_v30 = vld [vmem:[%s4980_s27 + $0x1c8] sm:$0xff] }
 0x18d   : >> { %v1579_v43 = vsel %vm1576_vm3, %v1577_v39, %v1578_v40  ;;  %v1543_v46 = vsel %vm1528_vm2, %v1540_v34, %v1542_v42  ;;  %v1586_v53 = vrot.slane %v5000_v58, 4  ;;  %v1581_v54 = vsel %vm1576_vm3, %v1578_v40, %v1580_v44  ;;  %v5089_v58 = vld [vmem:[%s4980_s27 + $0x120] sm:$0xff]  ;;  %7071 = vst [vmem:[#allocation6_spill] sm:$0xff] %v5180_v30 }
 0x18e   : >> { %1456 = vrot.lane.b32.xlu0 %v1443_v9, %s4390_s12  ;;  %v1588_v49 = vrot.slane %v5003_v59, 4  ;;  %v1590_v51 = vrot.slane %v1573_v48, 4  ;;  %v1585_v55 = vsel %vm1576_vm3, %v1582_v45, %v1584_v52  ;;  %v3863_v59 = vld [vmem:[%s4980_s27 + $0x100] sm:$0xff]  ;;  %v1670_v0 = vrot.slane %v3870_v62, 1 }
 0x18f   : >> { %v1587_v50 = vsel %vm1576_vm3, %v1584_v52, %v1586_v53  ;;  %v1671_v1 = vrot.slane %v5089_v58, 1  ;;  %v5111_v2 = vld [vmem:[%s4980_s27 + $0x180] sm:$0xff]  ;;  %v1673_v6 = vrot.slane %v5099_v61, 1  ;;  %v1675_v7 = vrot.slane %v5096_v60, 1 }
 0x190   : >> { %1496 = vrot.lane.b32.xlu1 %v1483_v11, %s4391_s20  ;;  %v1591_v56 = vsel %vm1576_vm3, %v1588_v49, %v1590_v51  ;;  %v1589_v57 = vsel %vm1576_vm3, %v1586_v53, %v1588_v49  ;;  %v5123_v8 = vld [vmem:[%s4980_s27 + $0x1c0] sm:$0xff]  ;;  %v1677_v9 = vrot.slane %v5111_v2, 1  ;;  %v5132_v11 = vld [vmem:[%s4980_s27 + $0x148] sm:$0xff]  ;;  %v1679_v13 = vrot.slane %v5107_v63, 1 }
 0x191   : >> { %v5118_v3 = vsel %vm1432_vm0, %v1670_v0, %v1671_v1  ;;  %v5137_v12 = vsel %vm1432_vm0, %v1673_v6, %v1675_v7  ;;  %v1779_v20 = vrot.slane %v5132_v11, 3  ;;  %v5144_v21 = vsel %vm1432_vm0, %v1671_v1, %v1673_v6  ;;  %v3872_v25 = vld [vmem:[%s4980_s27 + $0x100] sm:$0xfc]  ;;  %v3873_v52 = vld [vmem:[%s4980_s27 + $0x1e0] sm:$0x3] }
 0x192   : >> { %1460 = vrot.lane.b32.xlu0 %v1447_v14, %s4390_s12  ;;  %v3871_v14 = vld [vmem:[%s4980_s27 + $0x1e0] sm:$0x1]  ;;  %v5158_v18 = vsel %vm1432_vm0, %v1677_v9, %v1679_v13  ;;  %v1783_v22 = vrot.slane %v5153_v17, 3  ;;  %v5168_v24 = vsel %vm1432_vm0, %v1675_v7, %v1677_v9  ;;  %v1718_v27 = vrot.slane %v5089_v58, 2  ;;  %v3883_v6 = vld [vmem:[%s4980_s27 + $0x1e8] sm:$0xf] }
 0x193   : >> { %v1683_v5 = vrot.slane %v3871_v14, 1  ;;  %v1717_v36 = vrot.slane %v3872_v25, 2  ;;  %v1722_v37 = vrot.slane %v5096_v60, 2  ;;  %v1724_v39 = vrot.slane %v5111_v2, 2 }
 0x194   : >> { %1500 = vrot.lane.b32.xlu1 %v1487_v15, %s4391_s20  ;;  %v7051_v15 = vrot.slane %v5129_v10, 3  ;;  %v1726_v44 = vrot.slane %v5107_v63, 2  ;;  %v1728_v45 = vrot.slane %v5123_v8, 2  ;;  %v1810_v48 = vrot.slane %v5129_v10, 4 }
 0x195   : >> { %v5212_v42 = vsel %vm1480_vm1, %v1717_v36, %v1718_v27  ;;  %v1730_v49 = vrot.slane %v3873_v52, 2  ;;  %v1816_v62 = vrot.slane %v5153_v17, 4  ;;  %v1818_v0 = vrot.slane %v3879_v29, 4  ;;  %v5296_v36 = vld [vmem:[%s4980_s27 + $0x288] sm:$0xff] }
 0x196   : >> { %1498 = vrot.lane.b32.xlu0 %v1485_v4, %s4391_s20  ;;  %v1681_v4 = vrot.slane %v5123_v8, 1  ;;  %v5233_v53 = vsel %vm1480_vm1, %v1726_v44, %v1728_v45  ;;  %v1820_v9 = vrot.slane %v5180_v30, 4  ;;  %v5310_v52 = vld [vmem:[%s4980_s27 + $0x2c8] sm:$0xff] }
 0x197   : >> { %v1819_v7 = vsel %vm1576_vm3, %v1816_v62, %v1818_v0 }
 0x198   : >> { %1504 = vrot.lane.b32.xlu1 %v1491_v16, %s4391_s20  ;;  %v5150_v16 = vld [vmem:[%s4980_s27 + $0x168] sm:$0xff] }
 0x19a   : >> { %1502 = vrot.lane.b32.xlu0 %v1489_v19, %s4391_s20  ;;  %v1781_v19 = vrot.slane %v5150_v16, 3 }
 0x19c   : >> { %1508 = vrot.lane.b32.xlu1 %v1495_v23, %s4391_s20  ;;  %v5165_v23 = vsel %vm1528_vm2, %v7051_v15, %v1779_v20  ;;  %v5186_v33 = vsel %vm1528_vm2, %v1779_v20, %v1781_v19  ;;  %v5189_v34 = vsel %vm1528_vm2, %v1781_v19, %v1783_v22  ;;  %v1821_v20 = vsel %vm1576_vm3, %v1818_v0, %v1820_v9  ;;  %v5280_v19 = vld [vmem:[%s4980_s27 + $0x248] sm:$0xff] }
 0x19d   : >> { %7070 = vst [vmem:[#allocation5_spill] sm:$0xff] %v5165_v23  ;;  %7072 = vst [vmem:[#allocation7_spill] sm:$0xff] %v5186_v33 }
 0x19e   : >> { %1506 = vrot.lane.b32.xlu0 %v1493_v26, %s4391_s20  ;;  %v5174_v26 = vsel %vm1432_vm0, %v1681_v4, %v1683_v5  ;;  %7073 = vst [vmem:[#allocation8_spill] sm:$0xff] %v5189_v34  ;;  %v3886_v5 = vld [vmem:[%s4980_s27 + $0x208] sm:$0xff] }
 0x19f   : >> { %v3899_v34 = vld [vmem:[%s4980_s27 + $0x208] sm:$0xf0] }
 0x1a0   : >> { %1546 = vrot.lane.b32.xlu1 %v1533_v28, %s4392_s24  ;;  %v1720_v28 = vrot.slane %v5099_v61, 2 }
 0x1a2   : >> { %1544 = vrot.lane.b32.xlu0 %v1531_v31, %s4392_s24  ;;  %v1785_v31 = vrot.slane %v3879_v29, 3 }
 0x1a4   : >> { %1550 = vrot.lane.b32.xlu1 %v1537_v32, %s4392_s24  ;;  %v7050_v32 = vrot.slane %v5180_v30, 3  ;;  %v5204_v40 = vsel %vm1528_vm2, %v1783_v22, %v1785_v31  ;;  %v3893_v22 = vld [vmem:[%s4980_s27 + $0x208] sm:$0xfe] }
 0x1a5   : >> { %7074 = vst [vmem:[#allocation9_spill] sm:$0xff] %v5204_v40  ;;  %v2007_v40 = vrot.slane %v5310_v52, 3 }
 0x1a6   : >> { %1548 = vrot.lane.b32.xlu0 %v1535_v35, %s4392_s24  ;;  %v5192_v35 = vsel %vm1432_vm0, %v1679_v13, %v1681_v4  ;;  %v5268_v4 = vld [vmem:[%s4980_s27 + $0x228] sm:$0xff] }
 0x1a7   : >> { %v1903_v29 = vrot.slane %v5268_v4, 1  ;;  %v2044_v10 = vrot.slane %v5268_v4, 4 }
 0x1a8   : >> { %1554 = vrot.lane.b32.xlu1 %v1541_v38, %s4392_s24  ;;  %v5200_v38 = vsel %vm1480_vm1, %v1718_v27, %v1720_v28  ;;  %v5290_v27 = vld [vmem:[%s4980_s27 + $0x2a8] sm:$0xff] }
 0x1aa   : >> { %1552 = vrot.lane.b32.xlu0 %v1539_v41, %s4392_s24  ;;  %v5209_v41 = vsel %vm1528_vm2, %v1785_v31, %v7050_v32 }
 0x1ab   : >> { %7075 = vst [vmem:[#allocation10_spill] sm:$0xff] %v5209_v41 }
 0x1ac   : >> { %1592 = vrot.lane.b32.xlu1 %v1579_v43, %s4393_s5  ;;  %v5219_v43 = vsel %vm1480_vm1, %v1722_v37, %v1724_v39 }
 0x1ae   : >> { %1556 = vrot.lane.b32.xlu0 %v1543_v46, %s4392_s24  ;;  %v5224_v46 = vsel %vm1480_vm1, %v1720_v28, %v1722_v37  ;;  %v1902_v28 = vrot.slane %v3893_v22, 1 }
 0x1b0   : >> { %1596 = vrot.lane.b32.xlu1 %v1583_v47, %s4393_s5  ;;  %v3882_v47 = vld [vmem:[%s4980_s27 + $0x108] sm:$0xf0] }
 0x1b2   : >> { %1594 = vrot.lane.b32.xlu0 %v1581_v54, %s4393_s5  ;;  %v1809_v54 = vrot.slane %v3882_v47, 4 }
 0x1b4   : >> { %1600 = vrot.lane.b32.xlu1 %v1587_v50, %s4393_s5  ;;  %v5237_v50 = vsel %vm1480_vm1, %v1724_v39, %v1726_v44  ;;  %v1811_v51 = vsel %vm1576_vm3, %v1809_v54, %v1810_v48  ;;  %v1904_v39 = vsel %vm1432_vm0, %v1902_v28, %v1903_v29  ;;  %v1905_v44 = vrot.slane %v5280_v19, 1 }
 0x1b6   : >> { %1598 = vrot.lane.b32.xlu0 %v1585_v55, %s4393_s5  ;;  %v1812_v55 = vrot.slane %v5132_v11, 4  ;;  %v1822_v11 = vrot.slane %v3883_v6, 4 }
 0x1b8   : >> { %1604 = vrot.lane.b32.xlu1 %v1591_v56, %s4393_s5  ;;  %v1814_v56 = vrot.slane %v5150_v16, 4  ;;  %v1813_v1 = vsel %vm1576_vm3, %v1810_v48, %v1812_v55  ;;  %v1823_v14 = vsel %vm1576_vm3, %v1820_v9, %v1822_v11  ;;  %v5275_v16 = vld [vmem:[%s4980_s27 + $0x268] sm:$0xff] }
 0x1ba   : >> { %1602 = vrot.lane.b32.xlu0 %v1589_v57, %s4393_s5  ;;  %v5247_v57 = vsel %vm1480_vm1, %v1728_v45, %v1730_v49  ;;  %v1817_v13 = vsel %vm1576_vm3, %v1814_v56, %v1816_v62  ;;  %v1907_v45 = vrot.slane %v5275_v16, 1  ;;  %v1909_v49 = vrot.slane %v5296_v36, 1 }
 0x1bc   : >> { %1640 = vrot.lane.b32.xlu1 %v5089_v58, %s4394_s28  ;;  %v1908_v48 = vsel %vm1432_vm0, %v1905_v44, %v1907_v45  ;;  %v1910_v9 = vsel %vm1432_vm0, %v1907_v45, %v1909_v49  ;;  %v1954_v45 = vrot.slane %v5275_v16, 2 }
 0x1be   : >> { %1638 = vrot.lane.b32.xlu0 %v3863_v59, %s4394_s28  ;;  %v1815_v59 = vsel %vm1576_vm3, %v1812_v55, %v1814_v56  ;;  %v1906_v56 = vsel %vm1432_vm0, %v1903_v29, %v1905_v44 }
 0x1c0   : >> { %1644 = vrot.lane.b32.xlu1 %v5096_v60, %s4394_s28 }
 0x1c2   : >> { %1642 = vrot.lane.b32.xlu0 %v5099_v61, %s4394_s28 }
 0x1c4   : >> { %1648 = vrot.lane.b32.xlu1 %v5107_v63, %s4394_s28 }
 0x1c6   : >> { %1646 = vrot.lane.b32.xlu0 %v5111_v2, %s4394_s28 }
 0x1c8   : >> { %1685 = vrot.lane.b32.xlu1 %v5118_v3, %s4395_s29 }
 0x1ca   : >> { %1650 = vrot.lane.b32.xlu0 %v5123_v8, %s4394_s28 }
 0x1cc   : >> { %1689 = vrot.lane.b32.xlu1 %v5137_v12, %s4395_s29 }
 0x1ce   : >> { %1687 = vrot.lane.b32.xlu0 %v5144_v21, %s4395_s29 }
 0x1d0   : >> { %1693 = vrot.lane.b32.xlu1 %v5158_v18, %s4395_s29 }
 0x1d2   : >> { %1691 = vrot.lane.b32.xlu0 %v5168_v24, %s4395_s29 }
 0x1d4   : >> { %1697 = vrot.lane.b32.xlu1 %v5174_v26, %s4395_s29 }
 0x1d6   : >> { %1695 = vrot.lane.b32.xlu0 %v5192_v35, %s4395_s29 }
 0x1d8   : >> { %1734 = vrot.lane.b32.xlu1 %v5200_v38, %s4396_s30 }
 0x1da   : >> { %1732 = vrot.lane.b32.xlu0 %v5212_v42, %s4396_s30 }
 0x1dc   : >> { %1738 = vrot.lane.b32.xlu1 %v5219_v43, %s4396_s30 }
 0x1de   : >> { %1736 = vrot.lane.b32.xlu0 %v5224_v46, %s4396_s30 }
 0x1e0   : >> { %1742 = vrot.lane.b32.xlu1 %v5233_v53, %s4396_s30 }
 0x1e2   : >> { %1740 = vrot.lane.b32.xlu0 %v5237_v50, %s4396_s30 }
 0x1e4   : >> { %1824 = vrot.lane.b32.xlu1 %v1811_v51, %s4390_s12  ;;  %v1911_v51 = vrot.slane %v5290_v27, 1 }
 0x1e6   : >> { %1744 = vrot.lane.b32.xlu0 %v5247_v57, %s4396_s30  ;;  %v1912_v0 = vsel %vm1432_vm0, %v1909_v49, %v1911_v51 }
 0x1e8   : >> { %1828 = vrot.lane.b32.xlu1 %v1815_v59, %s4390_s12  ;;  %v3894_v59 = vld [vmem:[%s4980_s27 + $0x2e8] sm:$0x1] }
 0x1e9   : >> { %v1915_v6 = vrot.slane %v3894_v59, 1 }
 0x1ea   : >> { %1826 = vrot.lane.b32.xlu0 %v1813_v1, %s4390_s12  ;;  %v1913_v1 = vrot.slane %v5310_v52, 1 }
 0x1ec   : >> { %1832 = vrot.lane.b32.xlu1 %v1819_v7, %s4390_s12  ;;  %v1914_v28 = vsel %vm1432_vm0, %v1911_v51, %v1913_v1 }
 0x1ee   : >> { %1830 = vrot.lane.b32.xlu0 %v1817_v13, %s4390_s12  ;;  %v3895_v13 = vld [vmem:[%s4980_s27 + $0x208] sm:$0xfc] }
 0x1ef   : >> { %v1949_v29 = vrot.slane %v3895_v13, 2  ;;  %v3897_v13 = vld [vmem:[%s4980_s27 + $0x208] sm:$0xf8] }
 0x1f0   : >> { %1836 = vrot.lane.b32.xlu1 %v1823_v14, %s4390_s12  ;;  %v1916_v14 = vsel %vm1432_vm0, %v1913_v1, %v1915_v6  ;;  %v1960_v1 = vrot.slane %v5310_v52, 2 }
 0x1f2   : >> { %1834 = vrot.lane.b32.xlu0 %v1821_v20, %s4390_s12  ;;  %v1950_v20 = vrot.slane %v5268_v4, 2 }
 0x1f4   : >> { %1872 = vrot.lane.b32.xlu1 %v5268_v4, %s4391_s20 }
 0x1f6   : >> { %1870 = vrot.lane.b32.xlu0 %v3886_v5, %s4391_s20  ;;  %v5277_v17 = vpop.permute.xlu1 %1452  ;;  %v1952_v5 = vrot.slane %v5280_v19, 2 }
 0x1f7   : >> { %7076 = vst [vmem:[#allocation11_spill] sm:$0xff] %v5277_v17  ;;  %v3919_v17 = vld [vmem:[%s4980_s27 + $0x3f0] sm:$0x3] }
 0x1f8   : >> { %v5283_v25 = vpop.permute.xlu0 %1448  ;;  %1876 = vrot.lane.b32.xlu1 %v5275_v16, %s4391_s20  ;;  %v1953_v44 = vsel %vm1480_vm1, %v1950_v20, %v1952_v5 }
 0x1f9   : >> { %7077 = vst [vmem:[#allocation12_spill] sm:$0xff] %v5283_v25 }
 0x1fa   : >> { %1874 = vrot.lane.b32.xlu0 %v5280_v19, %s4391_s20  ;;  %v5293_v31 = vpop.permute.xlu1 %1454 }
 0x1fb   : >> { %7078 = vst [vmem:[#allocation13_spill] sm:$0xff] %v5293_v31 }
 0x1fc   : >> { %v5298_v37 = vpop.permute.xlu0 %1450  ;;  %1880 = vrot.lane.b32.xlu1 %v5290_v27, %s4391_s20 }
 0x1fd   : >> { %7079 = vst [vmem:[#allocation14_spill] sm:$0xff] %v5298_v37 }
 0x1fe   : >> { %1878 = vrot.lane.b32.xlu0 %v5296_v36, %s4391_s20  ;;  %v5307_v47 = vpop.permute.xlu1 %1458 }
 0x1ff   : >> { %7080 = vst [vmem:[#allocation15_spill] sm:$0xff] %v5307_v47 }
 0x200   : >> { %v5312_v54 = vpop.permute.xlu0 %1456  ;;  %1917 = vrot.lane.b32.xlu1 %v1904_v39, %s4392_s24 }
 0x201   : >> { %7081 = vst [vmem:[#allocation16_spill] sm:$0xff] %v5312_v54  ;;  %v5566_v54 = vld [vmem:[%s4980_s27 + $0x3b0] sm:$0xff] }
 0x202   : >> { %1882 = vrot.lane.b32.xlu0 %v5310_v52, %s4391_s20  ;;  %v5320_v55 = vpop.permute.xlu1 %1496 }
 0x203   : >> { %7082 = vst [vmem:[#allocation17_spill] sm:$0xff] %v5320_v55 }
 0x204   : >> { %v5324_v62 = vpop.permute.xlu0 %1460  ;;  %1921 = vrot.lane.b32.xlu1 %v1908_v48, %s4392_s24  ;;  %v1956_v48 = vrot.slane %v5296_v36, 2 }
 0x205   : >> { %7083 = vst [vmem:[#allocation18_spill] sm:$0xff] %v5324_v62 }
 0x206   : >> { %1919 = vrot.lane.b32.xlu0 %v1906_v56, %s4392_s24  ;;  %v5330_v7 = vpop.permute.xlu1 %1500  ;;  %v1951_v56 = vsel %vm1480_vm1, %v1949_v29, %v1950_v20  ;;  %v1957_v59 = vsel %vm1480_vm1, %v1954_v45, %v1956_v48  ;;  %v3896_v20 = vld [vmem:[%s4980_s27 + $0x2e8] sm:$0x3]  ;;  %v1996_v29 = vrot.slane %v3897_v13, 3 }
 0x207   : >> { %7084 = vst [vmem:[#allocation19_spill] sm:$0xff] %v5330_v7  ;;  %v1962_v15 = vrot.slane %v3896_v20, 2  ;;  %v2005_v20 = vrot.slane %v5290_v27, 3 }
 0x208   : >> { %v5333_v11 = vpop.permute.xlu0 %1498  ;;  %1925 = vrot.lane.b32.xlu1 %v1912_v0, %s4392_s24  ;;  %v1958_v0 = vrot.slane %v5290_v27, 2 }
 0x209   : >> { %7085 = vst [vmem:[#allocation20_spill] sm:$0xff] %v5333_v11  ;;  %v1963_v13 = vsel %vm1480_vm1, %v1960_v1, %v1962_v15  ;;  %v3898_v15 = vld [vmem:[%s4980_s27 + $0x2e8] sm:$0x7] }
 0x20a   : >> { %1923 = vrot.lane.b32.xlu0 %v1910_v9, %s4392_s24  ;;  %v5341_v22 = vpop.permute.xlu1 %1504  ;;  %v1955_v9 = vsel %vm1480_vm1, %v1952_v5, %v1954_v45  ;;  %v1959_v32 = vsel %vm1480_vm1, %v1956_v48, %v1958_v0  ;;  %v1999_v45 = vrot.slane %v5280_v19, 3  ;;  %v2009_v30 = vrot.slane %v3898_v15, 3 }
 0x20b   : >> { %7086 = vst [vmem:[#allocation21_spill] sm:$0xff] %v5341_v22  ;;  %v2046_v15 = vrot.slane %v5280_v19, 4  ;;  %v2050_v19 = vrot.slane %v5296_v36, 4  ;;  %v5545_v22 = vld [vmem:[%s4980_s27 + $0x3a8] sm:$0xff] }
 0x20c   : >> { %v5344_v39 = vpop.permute.xlu0 %1502  ;;  %1929 = vrot.lane.b32.xlu1 %v1916_v14, %s4392_s24  ;;  %v5426_v23 = vsel %vm1528_vm2, %v2007_v40, %v2009_v30 }
 0x20d   : >> { %7087 = vst [vmem:[#allocation22_spill] sm:$0xff] %v5344_v39  ;;  %7104 = vst [vmem:[#allocation39_spill] sm:$0xff] %v5426_v23  ;;  %v5442_v30 = vsel %vm1576_vm3, %v2044_v10, %v2046_v15  ;;  %v2190_v39 = vrot.slane %v5566_v54, 2 }
 0x20e   : >> { %1927 = vrot.lane.b32.xlu0 %v1914_v28, %s4392_s24  ;;  %v5351_v49 = vpop.permute.xlu1 %1508  ;;  %v1961_v28 = vsel %vm1480_vm1, %v1958_v0, %v1960_v1  ;;  %v2003_v0 = vrot.slane %v5296_v36, 3  ;;  %v2054_v36 = vrot.slane %v5310_v52, 4 }
 0x20f   : >> { %7088 = vst [vmem:[#allocation23_spill] sm:$0xff] %v5351_v49  ;;  %v5538_v49 = vld [vmem:[%s4980_s27 + $0x3c8] sm:$0xff] }
 0x210   : >> { %v5354_v51 = vpop.permute.xlu0 %1506  ;;  %1966 = vrot.lane.b32.xlu1 %v1953_v44, %s4393_s5  ;;  %v1997_v44 = vrot.slane %v5268_v4, 3  ;;  %v2048_v4 = vrot.slane %v5275_v16, 4 }
 0x211   : >> { %7089 = vst [vmem:[#allocation24_spill] sm:$0xff] %v5354_v51  ;;  %v3918_v51 = vld [vmem:[%s4980_s27 + $0x310] sm:$0xfc] }
 0x212   : >> { %1964 = vrot.lane.b32.xlu0 %v1951_v56, %s4393_s5  ;;  %v5361_v6 = vpop.permute.xlu1 %1546  ;;  %v5380_v5 = vsel %vm1528_vm2, %v1996_v29, %v1997_v44  ;;  %v5400_v29 = vsel %vm1528_vm2, %v1997_v44, %v1999_v45 }
 0x213   : >> { %7090 = vst [vmem:[#allocation25_spill] sm:$0xff] %v5361_v6  ;;  %7098 = vst [vmem:[#allocation33_spill] sm:$0xff] %v5400_v29 }
 0x214   : >> { %v5365_v14 = vpop.permute.xlu0 %1544  ;;  %1970 = vrot.lane.b32.xlu1 %v1957_v59, %s4393_s5  ;;  %v2001_v59 = vrot.slane %v5275_v16, 3  ;;  %v2052_v16 = vrot.slane %v5290_v27, 4 }
 0x215   : >> { %7091 = vst [vmem:[#allocation26_spill] sm:$0xff] %v5365_v14 }
 0x216   : >> { %1968 = vrot.lane.b32.xlu0 %v1955_v9, %s4393_s5  ;;  %v5372_v56 = vpop.permute.xlu1 %1550  ;;  %v5416_v44 = vsel %vm1528_vm2, %v2001_v59, %v2003_v0  ;;  %v5475_v27 = vsel %vm1576_vm3, %v2052_v16, %v2054_v36 }
 0x217   : >> { %7092 = vst [vmem:[#allocation27_spill] sm:$0xff] %v5372_v56  ;;  %7102 = vst [vmem:[#allocation37_spill] sm:$0xff] %v5416_v44 }
 0x218   : >> { %v5375_v41 = vpop.permute.xlu0 %1548  ;;  %1974 = vrot.lane.b32.xlu1 %v1961_v28, %s4393_s5 }
 0x219   : >> { %7093 = vst [vmem:[#allocation28_spill] sm:$0xff] %v5375_v41  ;;  %v5551_v41 = vld [vmem:[%s4980_s27 + $0x390] sm:$0xff] }
 0x21a   : >> { %1972 = vrot.lane.b32.xlu0 %v1959_v32, %s4393_s5  ;;  %v5384_v9 = vpop.permute.xlu1 %1554  ;;  %v5393_v32 = vsel %vm1528_vm2, %v1999_v45, %v2001_v59  ;;  %v5433_v59 = vsel %vm1528_vm2, %v2005_v20, %v2007_v40 }
 0x21b   : >> { %7094 = vst [vmem:[#allocation29_spill] sm:$0xff] %v5384_v9  ;;  %7096 = vst [vmem:[#allocation31_spill] sm:$0xff] %v5393_v32 }
 0x21c   : >> { %v5387_v48 = vpop.permute.xlu0 %1552  ;;  %2011 = vrot.lane.b32.xlu1 %v5380_v5, %s4394_s28  ;;  %7106 = vst [vmem:[#allocation41_spill] sm:$0xff] %v5433_v59 }
 0x21d   : >> { %7095 = vst [vmem:[#allocation30_spill] sm:$0xff] %v5387_v48  ;;  %v5480_v48 = vsel %vm1576_vm3, %v2050_v19, %v2052_v16  ;;  %v5503_v16 = vld [vmem:[%s4980_s27 + $0x348] sm:$0xff] }
 0x21e   : >> { %1976 = vrot.lane.b32.xlu0 %v1963_v13, %s4393_s5  ;;  %v5397_v28 = vpop.permute.xlu1 %1592  ;;  %v5410_v13 = vsel %vm1528_vm2, %v2003_v0, %v2005_v20  ;;  %v2043_v0 = vrot.slane %v3899_v34, 4  ;;  %v5458_v20 = vsel %vm1576_vm3, %v2048_v4, %v2050_v19 }
 0x21f   : >> { %7097 = vst [vmem:[#allocation32_spill] sm:$0xff] %v5397_v28  ;;  %7100 = vst [vmem:[#allocation35_spill] sm:$0xff] %v5410_v13 }
 0x220   : >> { %v5403_v1 = vpop.permute.xlu0 %1556  ;;  %2015 = vrot.lane.b32.xlu1 %v5393_v32, %s4394_s28  ;;  %v5449_v34 = vsel %vm1576_vm3, %v2043_v0, %v2044_v10  ;;  %v5465_v10 = vsel %vm1576_vm3, %v2046_v15, %v2048_v4 }
 0x221   : >> { %7099 = vst [vmem:[#allocation34_spill] sm:$0xff] %v5403_v1 }
 0x222   : >> { %2013 = vrot.lane.b32.xlu0 %v5400_v29, %s4394_s28  ;;  %v5413_v33 = vpop.permute.xlu1 %1596  ;;  %v4314_v29 = vld [vmem:[%s4980_s27 + $0x368] sm:$0xff] }
 0x223   : >> { %7101 = vst [vmem:[#allocation36_spill] sm:$0xff] %v5413_v33  ;;  %v5528_v33 = vld [vmem:[%s4980_s27 + $0x350] sm:$0xff] }
 0x224   : >> { %v5418_v45 = vpop.permute.xlu0 %1594  ;;  %2019 = vrot.lane.b32.xlu1 %v5410_v13, %s4394_s28 }
 0x225   : >> { %7103 = vst [vmem:[#allocation38_spill] sm:$0xff] %v5418_v45  ;;  %v5548_v45 = vld [vmem:[%s4980_s27 + $0x370] sm:$0xff] }
 0x226   : >> { %2017 = vrot.lane.b32.xlu0 %v5416_v44, %s4394_s28  ;;  %v5430_v1 = vpop.permute.xlu1 %1600 }
 0x227   : >> { %7105 = vst [vmem:[#allocation40_spill] sm:$0xff] %v5430_v1 }
 0x228   : >> { %v5435_v9 = vpop.permute.xlu0 %1598  ;;  %2023 = vrot.lane.b32.xlu1 %v5426_v23, %s4394_s28 }
 0x229   : >> { %7107 = vst [vmem:[#allocation42_spill] sm:$0xff] %v5435_v9  ;;  %v2184_v9 = vrot.slane %v5528_v33, 2 }
 0x22a   : >> { %2021 = vrot.lane.b32.xlu0 %v5433_v59, %s4394_s28  ;;  %v5446_v1 = vpop.permute.xlu1 %1604 }
 0x22b   : >> { %7108 = vst [vmem:[#allocation43_spill] sm:$0xff] %v5446_v1 }
 0x22c   : >> { %v5451_v40 = vpop.permute.xlu0 %1602  ;;  %2060 = vrot.lane.b32.xlu1 %v5442_v30, %s4395_s29 }
 0x22d   : >> { %7109 = vst [vmem:[#allocation44_spill] sm:$0xff] %v5451_v40  ;;  %v3900_v40 = vld [vmem:[%s4980_s27 + $0x2e8] sm:$0xf] }
 0x22e   : >> { %2058 = vrot.lane.b32.xlu0 %v5449_v34, %s4395_s29  ;;  %v5462_v1 = vpop.permute.xlu1 %1640  ;;  %v2056_v15 = vrot.slane %v3900_v40, 4 }
 0x22f   : >> { %7110 = vst [vmem:[#allocation45_spill] sm:$0xff] %v5462_v1 }
 0x230   : >> { %v5467_v0 = vpop.permute.xlu0 %1638  ;;  %2064 = vrot.lane.b32.xlu1 %v5458_v20, %s4395_s29  ;;  %v5494_v19 = vsel %vm1576_vm3, %v2054_v36, %v2056_v15  ;;  %v5517_v36 = vld [vmem:[%s4980_s27 + $0x388] sm:$0xff] }
 0x231   : >> { %7111 = vst [vmem:[#allocation46_spill] sm:$0xff] %v5467_v0  ;;  %v5489_v0 = vld [vmem:[%s4980_s27 + $0x308] sm:$0xff] }
 0x232   : >> { %2062 = vrot.lane.b32.xlu0 %v5465_v10, %s4395_s29  ;;  %v5477_v52 = vpop.permute.xlu1 %1644 }
 0x233   : >> { %7112 = vst [vmem:[#allocation47_spill] sm:$0xff] %v5477_v52  ;;  %v5508_v52 = vld [vmem:[%s4980_s27 + $0x328] sm:$0xff] }
 0x234   : >> { %v5482_v4 = vpop.permute.xlu0 %1642  ;;  %2068 = vrot.lane.b32.xlu1 %v5475_v27, %s4395_s29 }
 0x235   : >> { %7113 = vst [vmem:[#allocation48_spill] sm:$0xff] %v5482_v4 }
 0x236   : >> { %2066 = vrot.lane.b32.xlu0 %v5480_v48, %s4395_s29  ;;  %v5491_v1 = vpop.permute.xlu1 %1648 }
 0x237   : >> { %7114 = vst [vmem:[#allocation49_spill] sm:$0xff] %v5491_v1 }
 0x238   : >> { %v5496_v40 = vpop.permute.xlu0 %1646  ;;  %2104 = vrot.lane.b32.xlu1 %v5489_v0, %s4396_s30 }
 0x239   : >> { %7115 = vst [vmem:[#allocation50_spill] sm:$0xff] %v5496_v40  ;;  %v5522_v40 = vld [vmem:[%s4980_s27 + $0x368] sm:$0xff] }
 0x23a   : >> { %2070 = vrot.lane.b32.xlu0 %v5494_v19, %s4395_s29  ;;  %v5505_v4 = vpop.permute.xlu1 %1685 }
 0x23b   : >> { %7116 = vst [vmem:[#allocation51_spill] sm:$0xff] %v5505_v4  ;;  %v5525_v4 = vld [vmem:[%s4980_s27 + $0x330] sm:$0xff] }
 0x23c   : >> { %v5510_v1 = vpop.permute.xlu0 %1650  ;;  %2108 = vrot.lane.b32.xlu1 %v5503_v16, %s4396_s30 }
 0x23d   : >> { %7117 = vst [vmem:[#allocation52_spill] sm:$0xff] %v5510_v1 }
 0x23e   : >> { %2106 = vrot.lane.b32.xlu0 %v5508_v52, %s4396_s30  ;;  %v5519_v15 = vpop.permute.xlu1 %1689 }
 0x23f   : >> { %7118 = vst [vmem:[#allocation53_spill] sm:$0xff] %v5519_v15  ;;  %v2182_v15 = vrot.slane %v5525_v4, 2 }
 0x240   : >> { %v5530_v1 = vpop.permute.xlu0 %1687  ;;  %2112 = vrot.lane.b32.xlu1 %v5517_v36, %s4396_s30 }
 0x241   : >> { %7119 = vst [vmem:[#allocation54_spill] sm:$0xff] %v5530_v1  ;;  %v2181_v1 = vrot.slane %v3918_v51, 2  ;;  %v2185_v47 = vsel %vm1480_vm1, %v2182_v15, %v2184_v9  ;;  %v2188_v51 = vrot.slane %v5551_v41, 2 }
 0x242   : >> { %2110 = vrot.lane.b32.xlu0 %v5522_v40, %s4396_s30  ;;  %v5542_v28 = vpop.permute.xlu1 %1693 }
 0x243   : >> { %7120 = vst [vmem:[#allocation55_spill] sm:$0xff] %v5542_v28  ;;  %v2186_v28 = vrot.slane %v5548_v45, 2  ;;  %v2183_v14 = vsel %vm1480_vm1, %v2181_v1, %v2182_v15  ;;  %v3920_v15 = vld [vmem:[%s4980_s27 + $0x310] sm:$0xf8]  ;;  %v2191_v25 = vsel %vm1480_vm1, %v2188_v51, %v2190_v39 }
 0x244   : >> { %v5553_v62 = vpop.permute.xlu0 %1691  ;;  %2116 = vrot.lane.b32.xlu1 %v5538_v49, %s4396_s30 }
 0x245   : >> { %7121 = vst [vmem:[#allocation56_spill] sm:$0xff] %v5553_v62  ;;  %v5569_v62 = vld [vmem:[%s4980_s27 + $0x3d0] sm:$0xff]  ;;  %v2189_v7 = vsel %vm1480_vm1, %v2186_v28, %v2188_v51  ;;  %v2187_v1 = vsel %vm1480_vm1, %v2184_v9, %v2186_v28  ;;  %v2231_v9 = vrot.slane %v5528_v33, 3  ;;  %v2233_v28 = vrot.slane %v5548_v45, 3 }
 0x246   : >> { %2114 = vrot.lane.b32.xlu0 %v5545_v22, %s4396_s30  ;;  %v5562_v56 = vpop.permute.xlu1 %1697  ;;  %v2192_v55 = vrot.slane %v5569_v62, 2 }
 0x247   : >> { %7122 = vst [vmem:[#allocation57_spill] sm:$0xff] %v5562_v56 }
 0x248   : >> { %v5571_v6 = vpop.permute.xlu0 %1695  ;;  %2198 = vrot.lane.b32.xlu1 %v2185_v47, %s4390_s12  ;;  %v2193_v47 = vsel %vm1480_vm1, %v2190_v39, %v2192_v55  ;;  %v2237_v39 = vrot.slane %v5566_v54, 3 }
 0x249   : >> { %7123 = vst [vmem:[#allocation58_spill] sm:$0xff] %v5571_v6  ;;  %v2229_v6 = vrot.slane %v5525_v4, 3 }
 0x24a   : >> { %2196 = vrot.lane.b32.xlu0 %v2183_v14, %s4390_s12  ;;  %v5578_v11 = vpop.permute.xlu1 %1734  ;;  %v2228_v14 = vrot.slane %v3920_v15, 3 }
 0x24b   : >> { %7124 = vst [vmem:[#allocation59_spill] sm:$0xff] %v5578_v11  ;;  %v2194_v11 = vrot.slane %v3919_v17, 2  ;;  %v2234_v17 = vsel %vm1528_vm2, %v2231_v9, %v2233_v28 }
 0x24c   : >> { %v5582_v56 = vpop.permute.xlu0 %1732  ;;  %2202 = vrot.lane.b32.xlu1 %v2189_v7, %s4390_s12  ;;  %v2230_v7 = vsel %vm1528_vm2, %v2228_v14, %v2229_v6  ;;  %v3921_v14 = vld [vmem:[%s4980_s27 + $0x3f0] sm:$0x7] }
 0x24d   : >> { %7125 = vst [vmem:[#allocation60_spill] sm:$0xff] %v5582_v56  ;;  %v2195_v15 = vsel %vm1480_vm1, %v2192_v55, %v2194_v11  ;;  %v2239_v11 = vrot.slane %v5569_v62, 3 }
 0x24e   : >> { %2200 = vrot.lane.b32.xlu0 %v2187_v1, %s4390_s12  ;;  %v5589_v31 = vpop.permute.xlu1 %1738 }
 0x24f   : >> { %7126 = vst [vmem:[#allocation61_spill] sm:$0xff] %v5589_v31 }
 0x250   : >> { %v5592_v37 = vpop.permute.xlu0 %1736  ;;  %2206 = vrot.lane.b32.xlu1 %v2193_v47, %s4390_s12  ;;  %v2232_v47 = vsel %vm1528_vm2, %v2229_v6, %v2231_v9  ;;  %v2276_v9 = vrot.slane %v5525_v4, 4  ;;  %v2282_v4 = vrot.slane %v5551_v41, 4 }
 0x251   : >> { %7127 = vst [vmem:[#allocation62_spill] sm:$0xff] %v5592_v37 }
 0x252   : >> { %2204 = vrot.lane.b32.xlu0 %v2191_v25, %s4390_s12  ;;  %v5599_v1 = vpop.permute.xlu1 %1742  ;;  %v2235_v25 = vrot.slane %v5551_v41, 3 }
 0x253   : >> { %7128 = vst [vmem:[#allocation63_spill] sm:$0xff] %v5599_v1 }
 0x254   : >> { %v5602_v31 = vpop.permute.xlu0 %1740  ;;  %2243 = vrot.lane.b32.xlu1 %v2230_v7, %s4391_s20  ;;  %v2238_v55 = vsel %vm1528_vm2, %v2235_v25, %v2237_v39  ;;  %v2241_v7 = vrot.slane %v3921_v14, 3  ;;  %v2240_v14 = vsel %vm1528_vm2, %v2237_v39, %v2239_v11 }
 0x255   : >> { %7129 = vst [vmem:[#allocation64_spill] sm:$0xff] %v5602_v31  ;;  %v2236_v31 = vsel %vm1528_vm2, %v2233_v28, %v2235_v25  ;;  %v2280_v28 = vrot.slane %v5548_v45, 4 }
 0x256   : >> { %2208 = vrot.lane.b32.xlu0 %v2195_v15, %s4390_s12  ;;  %v5609_v51 = vpop.permute.xlu1 %1824  ;;  %v2242_v6 = vsel %vm1528_vm2, %v2239_v11, %v2241_v7  ;;  %v2286_v11 = vrot.slane %v5569_v62, 4 }
 0x257   : >> { %7130 = vst [vmem:[#allocation65_spill] sm:$0xff] %v5609_v51  ;;  %v3922_v51 = vld [vmem:[%s4980_s27 + $0x310] sm:$0xf0]  ;;  %v2283_v39 = vsel %vm1576_vm3, %v2280_v28, %v2282_v4 }
 0x258   : >> { %v5613_v1 = vpop.permute.xlu0 %1744  ;;  %2247 = vrot.lane.b32.xlu1 %v2234_v17, %s4391_s20  ;;  %v2278_v17 = vrot.slane %v5528_v33, 4 }
 0x259   : >> { %7131 = vst [vmem:[#allocation66_spill] sm:$0xff] %v5613_v1 }
 0x25a   : >> { %2245 = vrot.lane.b32.xlu0 %v2232_v47, %s4391_s20  ;;  %v5619_v15 = vpop.permute.xlu1 %1828  ;;  %v2281_v41 = vsel %vm1576_vm3, %v2278_v17, %v2280_v28 }
 0x25b   : >> { %7132 = vst [vmem:[#allocation67_spill] sm:$0xff] %v5619_v15  ;;  %v2275_v15 = vrot.slane %v3922_v51, 4  ;;  %v2284_v51 = vrot.slane %v5566_v54, 4 }
 0x25c   : >> { %v5622_v37 = vpop.permute.xlu0 %1826  ;;  %2251 = vrot.lane.b32.xlu1 %v2238_v55, %s4391_s20 }
 0x25d   : >> { %7133 = vst [vmem:[#allocation68_spill] sm:$0xff] %v5622_v37  ;;  %v2277_v33 = vsel %vm1576_vm3, %v2275_v15, %v2276_v9  ;;  %v3923_v15 = vld [vmem:[%s4980_s27 + $0x3f0] sm:$0xf]  ;;  %v2285_v54 = vsel %vm1576_vm3, %v2282_v4, %v2284_v51 }
 0x25e   : >> { %2249 = vrot.lane.b32.xlu0 %v2236_v31, %s4391_s20  ;;  %v5630_v47 = vpop.permute.xlu1 %1832  ;;  %v2279_v31 = vsel %vm1576_vm3, %v2276_v9, %v2278_v17  ;;  %v2288_v62 = vrot.slane %v3923_v15, 4  ;;  %v3926_v17 = vld [vmem:[%s4980_s27 + $0x410] sm:$0xff] }
 0x25f   : >> { %7134 = vst [vmem:[#allocation69_spill] sm:$0xff] %v5630_v47  ;;  %v5675_v4 = vld [vmem:[%s4980_s27 + $0x450] sm:$0xff] }
 0x260   : >> { %v5633_v1 = vpop.permute.xlu0 %1830  ;;  %2255 = vrot.lane.b32.xlu1 %v2242_v6, %s4391_s20  ;;  %v2287_v6 = vsel %vm1576_vm3, %v2284_v51, %v2286_v11  ;;  %v2289_v28 = vsel %vm1576_vm3, %v2286_v11, %v2288_v62  ;;  %v5680_v51 = vld [vmem:[%s4980_s27 + $0x430] sm:$0xff] }
 0x261   : >> { %7135 = vst [vmem:[#allocation70_spill] sm:$0xff] %v5633_v1  ;;  %v5689_v11 = vld [vmem:[%s4980_s27 + $0x490] sm:$0xff]  ;;  %v2416_v37 = vrot.slane %v5680_v51, 2 }
 0x262   : >> { %2253 = vrot.lane.b32.xlu0 %v2240_v14, %s4391_s20  ;;  %v5640_v25 = vpop.permute.xlu1 %1836  ;;  %v3933_v62 = vld [vmem:[%s4980_s27 + $0x410] sm:$0xfe] }
 0x263   : >> { %7136 = vst [vmem:[#allocation71_spill] sm:$0xff] %v5640_v25 }
 0x264   : >> { %v5643_v55 = vpop.permute.xlu0 %1834  ;;  %2292 = vrot.lane.b32.xlu1 %v2279_v31, %s4392_s24 }
 0x265   : >> { %7137 = vst [vmem:[#allocation72_spill] sm:$0xff] %v5643_v55 }
 0x266   : >> { %2290 = vrot.lane.b32.xlu0 %v2277_v33, %s4392_s24  ;;  %v5650_v45 = vpop.permute.xlu1 %1872 }
 0x267   : >> { %7138 = vst [vmem:[#allocation73_spill] sm:$0xff] %v5650_v45 }
 0x268   : >> { %v5653_v7 = vpop.permute.xlu0 %1870  ;;  %2296 = vrot.lane.b32.xlu1 %v2283_v39, %s4392_s24 }
 0x269   : >> { %7139 = vst [vmem:[#allocation74_spill] sm:$0xff] %v5653_v7 }
 0x26a   : >> { %2294 = vrot.lane.b32.xlu0 %v2281_v41, %s4392_s24  ;;  %v5659_v9 = vpop.permute.xlu1 %1876 }
 0x26b   : >> { %7140 = vst [vmem:[#allocation75_spill] sm:$0xff] %v5659_v9 }
 0x26c   : >> { %v5662_v14 = vpop.permute.xlu0 %1874  ;;  %2300 = vrot.lane.b32.xlu1 %v2287_v6, %s4392_s24  ;;  %v5694_v6 = vld [vmem:[%s4980_s27 + $0x470] sm:$0xff] }
 0x26d   : >> { %7141 = vst [vmem:[#allocation76_spill] sm:$0xff] %v5662_v14 }
 0x26e   : >> { %2298 = vrot.lane.b32.xlu0 %v2285_v54, %s4392_s24  ;;  %v5667_v31 = vpop.permute.xlu1 %1880 }
 0x26f   : >> { %7142 = vst [vmem:[#allocation77_spill] sm:$0xff] %v5667_v31 }
 0x270   : >> { %v5670_v33 = vpop.permute.xlu0 %1878  ;;  %2336 = vrot.lane.b32.xlu1 %v3926_v17, %s4393_s5  ;;  %v5704_v17 = vld [vmem:[%s4980_s27 + $0x4d0] sm:$0xff] }
 0x271   : >> { %7143 = vst [vmem:[#allocation78_spill] sm:$0xff] %v5670_v33  ;;  %v5711_v33 = vld [vmem:[%s4980_s27 + $0x4b0] sm:$0xff]  ;;  %v2379_v9 = vrot.slane %v5704_v17, 1 }
 0x272   : >> { %2302 = vrot.lane.b32.xlu0 %v2289_v28, %s4392_s24  ;;  %v5677_v39 = vpop.permute.xlu1 %1917  ;;  %v2369_v28 = vrot.slane %v5680_v51, 1  ;;  %v2377_v14 = vrot.slane %v5711_v33, 1 }
 0x273   : >> { %7144 = vst [vmem:[#allocation79_spill] sm:$0xff] %v5677_v39  ;;  %v2373_v39 = vrot.slane %v5694_v6, 1 }
 0x274   : >> { %v5682_v41 = vpop.permute.xlu0 %1882  ;;  %2340 = vrot.lane.b32.xlu1 %v5675_v4, %s4393_s5  ;;  %v5754_v45 = vsel %vm1432_vm0, %v2377_v14, %v2379_v9 }
 0x275   : >> { %7145 = vst [vmem:[#allocation80_spill] sm:$0xff] %v5682_v41  ;;  %v2371_v41 = vrot.slane %v5675_v4, 1  ;;  %7158 = vst [vmem:[#allocation93_spill] sm:$0xff] %v5754_v45 }
 0x276   : >> { %2338 = vrot.lane.b32.xlu0 %v5680_v51, %s4393_s5  ;;  %v5691_v15 = vpop.permute.xlu1 %1921 }
 0x277   : >> { %7146 = vst [vmem:[#allocation81_spill] sm:$0xff] %v5691_v15  ;;  %v2368_v15 = vrot.slane %v3933_v62, 1  ;;  %v5720_v25 = vsel %vm1432_vm0, %v2369_v28, %v2371_v41 }
 0x278   : >> { %v5696_v54 = vpop.permute.xlu0 %1919  ;;  %2344 = vrot.lane.b32.xlu1 %v5689_v11, %s4393_s5  ;;  %7150 = vst [vmem:[#allocation85_spill] sm:$0xff] %v5720_v25 }
 0x279   : >> { %7147 = vst [vmem:[#allocation82_spill] sm:$0xff] %v5696_v54  ;;  %v5727_v62 = vsel %vm1432_vm0, %v2368_v15, %v2369_v28  ;;  %v5743_v15 = vsel %vm1432_vm0, %v2371_v41, %v2373_v39  ;;  %v3935_v28 = vld [vmem:[%s4980_s27 + $0x410] sm:$0xfc] }
 0x27a   : >> { %2342 = vrot.lane.b32.xlu0 %v5694_v6, %s4393_s5  ;;  %v5708_v31 = vpop.permute.xlu1 %1925  ;;  %7152 = vst [vmem:[#allocation87_spill] sm:$0xff] %v5727_v62  ;;  %7156 = vst [vmem:[#allocation91_spill] sm:$0xff] %v5743_v15  ;;  %v2415_v1 = vrot.slane %v3935_v28, 2  ;;  %v2418_v28 = vrot.slane %v5675_v4, 2 }
 0x27b   : >> { %7148 = vst [vmem:[#allocation83_spill] sm:$0xff] %v5708_v31  ;;  %v2375_v31 = vrot.slane %v5689_v11, 1 }
 0x27c   : >> { %v5713_v55 = vpop.permute.xlu0 %1923  ;;  %2348 = vrot.lane.b32.xlu1 %v5704_v17, %s4393_s5  ;;  %v5769_v56 = vsel %vm1480_vm1, %v2415_v1, %v2416_v37 }
 0x27d   : >> { %7149 = vst [vmem:[#allocation84_spill] sm:$0xff] %v5713_v55  ;;  %v5736_v54 = vsel %vm1432_vm0, %v2373_v39, %v2375_v31  ;;  %v5760_v39 = vsel %vm1432_vm0, %v2375_v31, %v2377_v14  ;;  %v2422_v31 = vrot.slane %v5689_v11, 2 }
 0x27e   : >> { %2346 = vrot.lane.b32.xlu0 %v5711_v33, %s4393_s5  ;;  %v5724_v47 = vpop.permute.xlu1 %1929  ;;  %7154 = vst [vmem:[#allocation89_spill] sm:$0xff] %v5736_v54  ;;  %7160 = vst [vmem:[#allocation95_spill] sm:$0xff] %v5760_v39 }
 0x27f   : >> { %7151 = vst [vmem:[#allocation86_spill] sm:$0xff] %v5724_v47  ;;  %v3934_v47 = vld [vmem:[%s4980_s27 + $0x4f0] sm:$0x1] }
 0x280   : >> { %v5729_v55 = vpop.permute.xlu0 %1927  ;;  %2385 = vrot.lane.b32.xlu1 %v5720_v25, %s4394_s28  ;;  %v2381_v41 = vrot.slane %v3934_v47, 1 }
 0x281   : >> { %7153 = vst [vmem:[#allocation88_spill] sm:$0xff] %v5729_v55 }
 0x282   : >> { %2383 = vrot.lane.b32.xlu0 %v5727_v62, %s4394_s28  ;;  %v5740_v7 = vpop.permute.xlu1 %1966  ;;  %v5776_v47 = vsel %vm1432_vm0, %v2379_v9, %v2381_v41  ;;  %v5792_v9 = vsel %vm1480_vm1, %v2416_v37, %v2418_v28  ;;  %v3936_v41 = vld [vmem:[%s4980_s27 + $0x4f0] sm:$0x3]  ;;  %v2467_v62 = vrot.slane %v5694_v6, 3 }
 0x283   : >> { %7155 = vst [vmem:[#allocation90_spill] sm:$0xff] %v5740_v7  ;;  %7163 = vst [vmem:[#allocation98_spill] sm:$0xff] %v5776_v47 }
 0x284   : >> { %v5746_v55 = vpop.permute.xlu0 %1964  ;;  %2389 = vrot.lane.b32.xlu1 %v5736_v54, %s4394_s28 }
 0x285   : >> { %7157 = vst [vmem:[#allocation92_spill] sm:$0xff] %v5746_v55 }
 0x286   : >> { %2387 = vrot.lane.b32.xlu0 %v5743_v15, %s4394_s28  ;;  %v5757_v7 = vpop.permute.xlu1 %1970  ;;  %v2463_v15 = vrot.slane %v5680_v51, 3 }
 0x287   : >> { %7159 = vst [vmem:[#allocation94_spill] sm:$0xff] %v5757_v7  ;;  %v2420_v7 = vrot.slane %v5694_v6, 2 }
 0x288   : >> { %v5762_v55 = vpop.permute.xlu0 %1968  ;;  %2393 = vrot.lane.b32.xlu1 %v5754_v45, %s4394_s28 }
 0x289   : >> { %7161 = vst [vmem:[#allocation96_spill] sm:$0xff] %v5762_v55  ;;  %v5785_v1 = vsel %vm1480_vm1, %v2418_v28, %v2420_v7  ;;  %v2424_v55 = vrot.slane %v5711_v33, 2  ;;  %v5808_v37 = vsel %vm1480_vm1, %v2420_v7, %v2422_v31 }
 0x28a   : >> { %2391 = vrot.lane.b32.xlu0 %v5760_v39, %s4394_s28  ;;  %v5773_v54 = vpop.permute.xlu1 %1974  ;;  %v2428_v39 = vrot.slane %v3936_v41, 2  ;;  %v2465_v41 = vrot.slane %v5675_v4, 3 }
 0x28b   : >> { %7162 = vst [vmem:[#allocation97_spill] sm:$0xff] %v5773_v54  ;;  %v5802_v45 = vsel %vm1480_vm1, %v2422_v31, %v2424_v55 }
 0x28c   : >> { %v5778_v14 = vpop.permute.xlu0 %1972  ;;  %2430 = vrot.lane.b32.xlu1 %v5769_v56, %s4395_s29 }
 0x28d   : >> { %7164 = vst [vmem:[#allocation99_spill] sm:$0xff] %v5778_v14 }
 0x28e   : >> { %2395 = vrot.lane.b32.xlu0 %v5776_v47, %s4394_s28  ;;  %v5789_v54 = vpop.permute.xlu1 %2011  ;;  %v2426_v47 = vrot.slane %v5704_v17, 2 }
 0x28f   : >> { %7165 = vst [vmem:[#allocation100_spill] sm:$0xff] %v5789_v54 }
 0x290   : >> { %v5795_v14 = vpop.permute.xlu0 %1976  ;;  %2434 = vrot.lane.b32.xlu1 %v5785_v1, %s4395_s29  ;;  %v5818_v54 = vsel %vm1480_vm1, %v2426_v47, %v2428_v39  ;;  %v5825_v7 = vsel %vm1480_vm1, %v2424_v55, %v2426_v47  ;;  %v5834_v39 = vsel %vm1528_vm2, %v2463_v15, %v2465_v41 }
 0x291   : >> { %7166 = vst [vmem:[#allocation101_spill] sm:$0xff] %v5795_v14  ;;  %v3937_v14 = vld [vmem:[%s4980_s27 + $0x410] sm:$0xf8] }
 0x292   : >> { %2432 = vrot.lane.b32.xlu0 %v5792_v9, %s4395_s29  ;;  %v5805_v25 = vpop.permute.xlu1 %2015  ;;  %v2462_v31 = vrot.slane %v3937_v14, 3 }
 0x293   : >> { %7167 = vst [vmem:[#allocation102_spill] sm:$0xff] %v5805_v25 }
 0x294   : >> { %v5810_v28 = vpop.permute.xlu0 %2013  ;;  %2438 = vrot.lane.b32.xlu1 %v5802_v45, %s4395_s29  ;;  %v5841_v55 = vsel %vm1528_vm2, %v2462_v31, %v2463_v15  ;;  %v5857_v15 = vsel %vm1528_vm2, %v2465_v41, %v2467_v62 }
 0x295   : >> { %7168 = vst [vmem:[#allocation103_spill] sm:$0xff] %v5810_v28 }
 0x296   : >> { %2436 = vrot.lane.b32.xlu0 %v5808_v37, %s4395_s29  ;;  %v5822_v25 = vpop.permute.xlu1 %2019 }
 0x297   : >> { %7169 = vst [vmem:[#allocation104_spill] sm:$0xff] %v5822_v25  ;;  %v2469_v25 = vrot.slane %v5689_v11, 3  ;;  %v2473_v11 = vrot.slane %v5704_v17, 3 }
 0x298   : >> { %v5827_v28 = vpop.permute.xlu0 %2017  ;;  %2442 = vrot.lane.b32.xlu1 %v5818_v54, %s4395_s29 }
 0x299   : >> { %7170 = vst [vmem:[#allocation105_spill] sm:$0xff] %v5827_v28  ;;  %v5850_v14 = vsel %vm1528_vm2, %v2467_v62, %v2469_v25  ;;  %v2471_v28 = vrot.slane %v5711_v33, 3 }
 0x29a   : >> { %2440 = vrot.lane.b32.xlu0 %v5825_v7, %s4395_s29  ;;  %v5838_v59 = vpop.permute.xlu1 %2023 }
 0x29b   : >> { %7171 = vst [vmem:[#allocation106_spill] sm:$0xff] %v5838_v59  ;;  %v5867_v59 = vsel %vm1528_vm2, %v2471_v28, %v2473_v11  ;;  %v5872_v17 = vsel %vm1528_vm2, %v2469_v25, %v2471_v28 }
 0x29c   : >> { %v5843_v47 = vpop.permute.xlu0 %2021  ;;  %2479 = vrot.lane.b32.xlu1 %v5834_v39, %s4396_s30 }
 0x29d   : >> { %7172 = vst [vmem:[#allocation107_spill] sm:$0xff] %v5843_v47  ;;  %v3938_v47 = vld [vmem:[%s4980_s27 + $0x4f0] sm:$0x7] }
 0x29e   : >> { %2477 = vrot.lane.b32.xlu0 %v5841_v55, %s4396_s30  ;;  %v5854_v23 = vpop.permute.xlu1 %2060 }
 0x29f   : >> { %7173 = vst [vmem:[#allocation108_spill] sm:$0xff] %v5854_v23  ;;  %v2475_v23 = vrot.slane %v3938_v47, 3 }
 0x2a0   : >> { %v5859_v31 = vpop.permute.xlu0 %2058  ;;  %2483 = vrot.lane.b32.xlu1 %v5850_v14, %s4396_s30 }
 0x2a1   : >> { %7174 = vst [vmem:[#allocation109_spill] sm:$0xff] %v5859_v31  ;;  %v5883_v31 = vsel %vm1528_vm2, %v2473_v11, %v2475_v23 }
 0x2a2   : >> { %2481 = vrot.lane.b32.xlu0 %v5857_v15, %s4396_s30  ;;  %v5869_v33 = vpop.permute.xlu1 %2064  ;;  %7178 = vst [vmem:[#allocation113_spill] sm:$0xff] %v5883_v31 }
 0x2a3   : >> { %7175 = vst [vmem:[#allocation110_spill] sm:$0xff] %v5869_v33 }
 0x2a4   : >> { %v5874_v62 = vpop.permute.xlu0 %2062  ;;  %2487 = vrot.lane.b32.xlu1 %v5867_v59, %s4396_s30 }
 0x2a5   : >> { %7176 = vst [vmem:[#allocation111_spill] sm:$0xff] %v5874_v62 }
 0x2a6   : >> { %2485 = vrot.lane.b32.xlu0 %v5872_v17, %s4396_s30  ;;  %v5880_v41 = vpop.permute.xlu1 %2068 }
 0x2a7   : >> { %7177 = vst [vmem:[#allocation112_spill] sm:$0xff] %v5880_v41 }
 0x2a8   : >> { %v5885_v44 = vpop.permute.xlu0 %2066  ;;  %2557 = vrot.lane.b32.xlu1 %v5118_v3, %s4390_s12 }
 0x2a9   : >> { %7179 = vst [vmem:[#allocation114_spill] sm:$0xff] %v5885_v44 }
 0x2aa   : >> { %2489 = vrot.lane.b32.xlu0 %v5883_v31, %s4396_s30  ;;  %v5891_v25 = vpop.permute.xlu1 %2104 }
 0x2ab   : >> { %7180 = vst [vmem:[#allocation115_spill] sm:$0xff] %v5891_v25 }
 0x2ac   : >> { %v5893_v28 = vpop.permute.xlu0 %2070  ;;  %2561 = vrot.lane.b32.xlu1 %v5137_v12, %s4390_s12 }
 0x2ad   : >> { %7181 = vst [vmem:[#allocation116_spill] sm:$0xff] %v5893_v28 }
 0x2ae   : >> { %2559 = vrot.lane.b32.xlu0 %v5144_v21, %s4390_s12  ;;  %v5899_v23 = vpop.permute.xlu1 %2108 }
 0x2af   : >> { %7182 = vst [vmem:[#allocation117_spill] sm:$0xff] %v5899_v23 }
 0x2b0   : >> { %v5901_v47 = vpop.permute.xlu0 %2106  ;;  %2565 = vrot.lane.b32.xlu1 %v5158_v18, %s4390_s12 }
 0x2b1   : >> { %7183 = vst [vmem:[#allocation118_spill] sm:$0xff] %v5901_v47  ;;  %v3960_v47 = vld [vmem:[%s4980_s27 + $0x200] sm:$0xfc] }
 0x2b2   : >> { %2563 = vrot.lane.b32.xlu0 %v5168_v24, %s4390_s12  ;;  %v5907_v3 = vpop.permute.xlu1 %2112  ;;  %v3947_v24 = vld [vmem:[%s4980_s27 + $0x100] sm:$0xf8] }
 0x2b3   : >> { %7184 = vst [vmem:[#allocation119_spill] sm:$0xff] %v5907_v3 }
 0x2b4   : >> { %v5909_v11 = vpop.permute.xlu0 %2110  ;;  %2569 = vrot.lane.b32.xlu1 %v5174_v26, %s4390_s12  ;;  %v2617_v26 = vrot.slane %v3947_v24, 3 }
 0x2b5   : >> { %7185 = vst [vmem:[#allocation120_spill] sm:$0xff] %v5909_v11 }
 0x2b6   : >> { %2567 = vrot.lane.b32.xlu0 %v5192_v35, %s4390_s12  ;;  %v5915_v12 = vpop.permute.xlu1 %2116  ;;  %v2618_v35 = vrot.slane %v5089_v58, 3 }
 0x2b7   : >> { %7186 = vst [vmem:[#allocation121_spill] sm:$0xff] %v5915_v12 }
 0x2b8   : >> { %v5917_v21 = vpop.permute.xlu0 %2114  ;;  %2587 = vrot.lane.b32.xlu1 %v5200_v38, %s4391_s20 }
 0x2b9   : >> { %7187 = vst [vmem:[#allocation122_spill] sm:$0xff] %v5917_v21 }
 0x2ba   : >> { %2585 = vrot.lane.b32.xlu0 %v5212_v42, %s4391_s20  ;;  %v5923_v18 = vpop.permute.xlu1 %2198  ;;  %v2619_v42 = vsel %vm1528_vm2, %v2617_v26, %v2618_v35  ;;  %v2626_v26 = vrot.slane %v5107_v63, 3 }
 0x2bb   : >> { %7188 = vst [vmem:[#allocation123_spill] sm:$0xff] %v5923_v18 }
 0x2bc   : >> { %v5926_v3 = vpop.permute.xlu0 %2196  ;;  %2591 = vrot.lane.b32.xlu1 %v5219_v43, %s4391_s20  ;;  %v2620_v43 = vrot.slane %v5099_v61, 3  ;;  %v3948_v61 = vld [vmem:[%s4980_s27 + $0x1e0] sm:$0x7] }
 0x2bd   : >> { %7189 = vst [vmem:[#allocation124_spill] sm:$0xff] %v5926_v3 }
 0x2be   : >> { %2589 = vrot.lane.b32.xlu0 %v5224_v46, %s4391_s20  ;;  %v5933_v21 = vpop.permute.xlu1 %2202  ;;  %v2622_v46 = vrot.slane %v5096_v60, 3  ;;  %v2621_v60 = vsel %vm1528_vm2, %v2618_v35, %v2620_v43  ;;  %v3949_v35 = vld [vmem:[%s4980_s27 + $0x100] sm:$0xf0] }
 0x2bf   : >> { %7190 = vst [vmem:[#allocation125_spill] sm:$0xff] %v5933_v21  ;;  %v6010_v21 = vld [vmem:[%s4980_s27 + $0x1c0] sm:$0xff] }
 0x2c0   : >> { %v5935_v38 = vpop.permute.xlu0 %2200  ;;  %2595 = vrot.lane.b32.xlu1 %v5233_v53, %s4391_s20  ;;  %v2623_v53 = vsel %vm1528_vm2, %v2620_v43, %v2622_v46  ;;  %v2675_v3 = vrot.slane %v6010_v21, 4 }
 0x2c1   : >> { %7191 = vst [vmem:[#allocation126_spill] sm:$0xff] %v5935_v38 }
 0x2c2   : >> { %2593 = vrot.lane.b32.xlu0 %v5237_v50, %s4391_s20  ;;  %v5944_v24 = vpop.permute.xlu1 %2206  ;;  %v2624_v50 = vrot.slane %v5111_v2, 3  ;;  %v2630_v2 = vrot.slane %v3948_v61, 3 }
 0x2c3   : >> { %7192 = vst [vmem:[#allocation127_spill] sm:$0xff] %v5944_v24 }
 0x2c4   : >> { %v5946_v58 = vpop.permute.xlu0 %2204  ;;  %2632 = vrot.lane.b32.xlu1 %v2619_v42, %s4392_s24  ;;  %v2628_v42 = vrot.slane %v5123_v8, 3  ;;  %v2625_v63 = vsel %vm1528_vm2, %v2622_v46, %v2624_v50 }
 0x2c5   : >> { %7193 = vst [vmem:[#allocation128_spill] sm:$0xff] %v5946_v58 }
 0x2c6   : >> { %2597 = vrot.lane.b32.xlu0 %v5247_v57, %s4391_s20  ;;  %v5954_v38 = vpop.permute.xlu1 %2243  ;;  %v2627_v57 = vsel %vm1528_vm2, %v2624_v50, %v2626_v26  ;;  %v2631_v43 = vsel %vm1528_vm2, %v2628_v42, %v2630_v2  ;;  %v2629_v50 = vsel %vm1528_vm2, %v2626_v26, %v2628_v42 }
 0x2c7   : >> { %7194 = vst [vmem:[#allocation129_spill] sm:$0xff] %v5954_v38 }
 0x2c8   : >> { %v5958_v24 = vpop.permute.xlu0 %2208  ;;  %2636 = vrot.lane.b32.xlu1 %v2623_v53, %s4392_s24  ;;  %v5974_v53 = vld [vmem:[%s4980_s27 + $0x120] sm:$0xff] }
 0x2c9   : >> { %7195 = vst [vmem:[#allocation130_spill] sm:$0xff] %v5958_v24  ;;  %v2665_v8 = vrot.slane %v5974_v53, 4  ;;  %v2664_v24 = vrot.slane %v3949_v35, 4 }
 0x2ca   : >> { %2634 = vrot.lane.b32.xlu0 %v2621_v60, %s4392_s24  ;;  %v5964_v58 = vpop.permute.xlu1 %2247  ;;  %v5978_v60 = vld [vmem:[%s4980_s27 + $0x140] sm:$0xff] }
 0x2cb   : >> { %7196 = vst [vmem:[#allocation131_spill] sm:$0xff] %v5964_v58  ;;  %v2667_v61 = vrot.slane %v5978_v60, 4  ;;  %v2666_v35 = vsel %vm1576_vm3, %v2664_v24, %v2665_v8 }
 0x2cc   : >> { %v5967_v38 = vpop.permute.xlu0 %2245  ;;  %2640 = vrot.lane.b32.xlu1 %v2627_v57, %s4392_s24 }
 0x2cd   : >> { %7197 = vst [vmem:[#allocation132_spill] sm:$0xff] %v5967_v38  ;;  %v2668_v2 = vsel %vm1576_vm3, %v2665_v8, %v2667_v61  ;;  %v5994_v38 = vld [vmem:[%s4980_s27 + $0x180] sm:$0xff] }
 0x2ce   : >> { %2638 = vrot.lane.b32.xlu0 %v2625_v63, %s4392_s24  ;;  %v5981_v46 = vpop.permute.xlu1 %2251  ;;  %v5990_v63 = vld [vmem:[%s4980_s27 + $0x160] sm:$0xff]  ;;  %v2671_v26 = vrot.slane %v5994_v38, 4 }
 0x2cf   : >> { %7198 = vst [vmem:[#allocation133_spill] sm:$0xff] %v5981_v46  ;;  %v2669_v58 = vrot.slane %v5990_v63, 4 }
 0x2d0   : >> { %v5984_v57 = vpop.permute.xlu0 %2249  ;;  %2644 = vrot.lane.b32.xlu1 %v2631_v43, %s4392_s24 }
 0x2d1   : >> { %7199 = vst [vmem:[#allocation134_spill] sm:$0xff] %v5984_v57  ;;  %v2672_v43 = vsel %vm1576_vm3, %v2669_v58, %v2671_v26  ;;  %v2670_v24 = vsel %vm1576_vm3, %v2667_v61, %v2669_v58  ;;  %v3951_v58 = vld [vmem:[%s4980_s27 + $0x200] sm:$0xff] }
 0x2d2   : >> { %2642 = vrot.lane.b32.xlu0 %v2629_v50, %s4392_s24  ;;  %v5997_v42 = vpop.permute.xlu1 %2255  ;;  %v6006_v50 = vld [vmem:[%s4980_s27 + $0x1a0] sm:$0xff] }
 0x2d3   : >> { %7200 = vst [vmem:[#allocation135_spill] sm:$0xff] %v5997_v42  ;;  %v2673_v57 = vrot.slane %v6006_v50, 4 }
 0x2d4   : >> { %v6000_v46 = vpop.permute.xlu0 %2253  ;;  %2681 = vrot.lane.b32.xlu1 %v2668_v2, %s4393_s5  ;;  %v3950_v2 = vld [vmem:[%s4980_s27 + $0x1e0] sm:$0xf] }
 0x2d5   : >> { %7201 = vst [vmem:[#allocation136_spill] sm:$0xff] %v6000_v46  ;;  %v2674_v18 = vsel %vm1576_vm3, %v2671_v26, %v2673_v57  ;;  %v2677_v12 = vrot.slane %v3950_v2, 4  ;;  %v3952_v2 = vld [vmem:[%s4980_s27 + $0x220] sm:$0xff] }
 0x2d6   : >> { %2679 = vrot.lane.b32.xlu0 %v2666_v35, %s4393_s5  ;;  %v6013_v42 = vpop.permute.xlu1 %2292  ;;  %v2676_v35 = vsel %vm1576_vm3, %v2673_v57, %v2675_v3  ;;  %v6038_v57 = vld [vmem:[%s4980_s27 + $0x240] sm:$0xff] }
 0x2d7   : >> { %7202 = vst [vmem:[#allocation137_spill] sm:$0xff] %v6013_v42 }
 0x2d8   : >> { %v6016_v8 = vpop.permute.xlu0 %2290  ;;  %2685 = vrot.lane.b32.xlu1 %v2672_v43, %s4393_s5  ;;  %v2678_v43 = vsel %vm1576_vm3, %v2675_v3, %v2677_v12  ;;  %v6049_v3 = vld [vmem:[%s4980_s27 + $0x280] sm:$0xff] }
 0x2d9   : >> { %7203 = vst [vmem:[#allocation138_spill] sm:$0xff] %v6016_v8 }
 0x2da   : >> { %2683 = vrot.lane.b32.xlu0 %v2670_v24, %s4393_s5  ;;  %v6022_v46 = vpop.permute.xlu1 %2296 }
 0x2db   : >> { %7204 = vst [vmem:[#allocation139_spill] sm:$0xff] %v6022_v46 }
 0x2dc   : >> { %v6025_v42 = vpop.permute.xlu0 %2294  ;;  %2689 = vrot.lane.b32.xlu1 %v2676_v35, %s4393_s5  ;;  %v6054_v35 = vld [vmem:[%s4980_s27 + $0x260] sm:$0xff] }
 0x2dd   : >> { %7205 = vst [vmem:[#allocation140_spill] sm:$0xff] %v6025_v42  ;;  %v3956_v42 = vld [vmem:[%s4980_s27 + $0x2a0] sm:$0xff]  ;;  %v2758_v8 = vrot.slane %v6054_v35, 1 }
 0x2de   : >> { %2687 = vrot.lane.b32.xlu0 %v2674_v18, %s4393_s5  ;;  %v6030_v61 = vpop.permute.xlu1 %2300  ;;  %v2762_v44 = vrot.slane %v3956_v42, 1 }
 0x2df   : >> { %7206 = vst [vmem:[#allocation141_spill] sm:$0xff] %v6030_v61  ;;  %v2756_v61 = vrot.slane %v6038_v57, 1 }
 0x2e0   : >> { %v6033_v24 = vpop.permute.xlu0 %2298  ;;  %2721 = vrot.lane.b32.xlu1 %v3951_v58, %s4394_s28 }
 0x2e1   : >> { %7207 = vst [vmem:[#allocation142_spill] sm:$0xff] %v6033_v24  ;;  %v6065_v24 = vld [vmem:[%s4980_s27 + $0x2c0] sm:$0xff]  ;;  %v2759_v25 = vsel %vm1432_vm0, %v2756_v61, %v2758_v8 }
 0x2e2   : >> { %2691 = vrot.lane.b32.xlu0 %v2678_v43, %s4393_s5  ;;  %v6040_v26 = vpop.permute.xlu1 %2336  ;;  %v3958_v43 = vld [vmem:[%s4980_s27 + $0x200] sm:$0xfe] }
 0x2e3   : >> { %7208 = vst [vmem:[#allocation143_spill] sm:$0xff] %v6040_v26 }
 0x2e4   : >> { %v6043_v18 = vpop.permute.xlu0 %2302  ;;  %2725 = vrot.lane.b32.xlu1 %v6038_v57, %s4394_s28 }
 0x2e5   : >> { %7209 = vst [vmem:[#allocation144_spill] sm:$0xff] %v6043_v18  ;;  %v2754_v18 = vrot.slane %v3952_v2, 1 }
 0x2e6   : >> { %2723 = vrot.lane.b32.xlu0 %v3952_v2, %s4394_s28  ;;  %v6051_v12 = vpop.permute.xlu1 %2340 }
 0x2e7   : >> { %7210 = vst [vmem:[#allocation145_spill] sm:$0xff] %v6051_v12  ;;  %v2753_v12 = vrot.slane %v3958_v43, 1  ;;  %v2757_v28 = vsel %vm1432_vm0, %v2754_v18, %v2756_v61 }
 0x2e8   : >> { %v6056_v58 = vpop.permute.xlu0 %2338  ;;  %2729 = vrot.lane.b32.xlu1 %v6049_v3, %s4394_s28 }
 0x2e9   : >> { %7211 = vst [vmem:[#allocation146_spill] sm:$0xff] %v6056_v58  ;;  %v2760_v58 = vrot.slane %v6049_v3, 1 }
 0x2ea   : >> { %2727 = vrot.lane.b32.xlu0 %v6054_v35, %s4394_s28  ;;  %v6067_v26 = vpop.permute.xlu1 %2344 }
 0x2eb   : >> { %7212 = vst [vmem:[#allocation147_spill] sm:$0xff] %v6067_v26  ;;  %v2755_v26 = vsel %vm1432_vm0, %v2753_v12, %v2754_v18  ;;  %v2761_v23 = vsel %vm1432_vm0, %v2758_v8, %v2760_v58  ;;  %v2801_v18 = vrot.slane %v3952_v2, 2  ;;  %v2800_v12 = vrot.slane %v3960_v47, 2 }
 0x2ec   : >> { %v6070_v46 = vpop.permute.xlu0 %2342  ;;  %2733 = vrot.lane.b32.xlu1 %v6065_v24, %s4394_s28  ;;  %v2803_v8 = vrot.slane %v6038_v57, 2 }
 0x2ed   : >> { %7213 = vst [vmem:[#allocation148_spill] sm:$0xff] %v6070_v46  ;;  %v2764_v46 = vrot.slane %v6065_v24, 1 }
 0x2ee   : >> { %2731 = vrot.lane.b32.xlu0 %v3956_v42, %s4394_s28  ;;  %v6078_v41 = vpop.permute.xlu1 %2348 }
 0x2ef   : >> { %7214 = vst [vmem:[#allocation149_spill] sm:$0xff] %v6078_v41  ;;  %v3959_v41 = vld [vmem:[%s4980_s27 + $0x2e0] sm:$0x1] }
 0x2f0   : >> { %v6081_v43 = vpop.permute.xlu0 %2346  ;;  %2770 = vrot.lane.b32.xlu1 %v2757_v28, %s4395_s29  ;;  %v2765_v28 = vsel %vm1432_vm0, %v2762_v44, %v2764_v46  ;;  %v2766_v33 = vrot.slane %v3959_v41, 1  ;;  %v2809_v41 = vrot.slane %v3956_v42, 2 }
 0x2f1   : >> { %7215 = vst [vmem:[#allocation150_spill] sm:$0xff] %v6081_v43 }
 0x2f2   : >> { %2768 = vrot.lane.b32.xlu0 %v2755_v26, %s4395_s29  ;;  %v6087_v11 = vpop.permute.xlu1 %2385  ;;  %v2763_v26 = vsel %vm1432_vm0, %v2760_v58, %v2762_v44  ;;  %v2767_v47 = vsel %vm1432_vm0, %v2764_v46, %v2766_v33  ;;  %v2807_v44 = vrot.slane %v6049_v3, 2  ;;  %v2804_v58 = vsel %vm1480_vm1, %v2801_v18, %v2803_v8 }
 0x2f3   : >> { %7216 = vst [vmem:[#allocation151_spill] sm:$0xff] %v6087_v11  ;;  %v2811_v33 = vrot.slane %v6065_v24, 2 }
 0x2f4   : >> { %v6091_v62 = vpop.permute.xlu0 %2383  ;;  %2774 = vrot.lane.b32.xlu1 %v2761_v23, %s4395_s29  ;;  %v2805_v23 = vrot.slane %v6054_v35, 2  ;;  %v2810_v46 = vsel %vm1480_vm1, %v2807_v44, %v2809_v41 }
 0x2f5   : >> { %7217 = vst [vmem:[#allocation152_spill] sm:$0xff] %v6091_v62  ;;  %v2812_v24 = vsel %vm1480_vm1, %v2809_v41, %v2811_v33 }
 0x2f6   : >> { %2772 = vrot.lane.b32.xlu0 %v2759_v25, %s4395_s29  ;;  %v6097_v43 = vpop.permute.xlu1 %2389  ;;  %v2802_v25 = vsel %vm1480_vm1, %v2800_v12, %v2801_v18  ;;  %v2806_v57 = vsel %vm1480_vm1, %v2803_v8, %v2805_v23 }
 0x2f7   : >> { %7218 = vst [vmem:[#allocation153_spill] sm:$0xff] %v6097_v43  ;;  %v3966_v43 = vld [vmem:[%s4980_s27 + $0x308] sm:$0xf8] }
 0x2f8   : >> { %v6100_v11 = vpop.permute.xlu0 %2387  ;;  %2778 = vrot.lane.b32.xlu1 %v2765_v28, %s4395_s29  ;;  %v3961_v28 = vld [vmem:[%s4980_s27 + $0x2e0] sm:$0x3]  ;;  %v3011_v62 = vrot.slane %v3966_v43, 3 }
 0x2f9   : >> { %7219 = vst [vmem:[#allocation154_spill] sm:$0xff] %v6100_v11  ;;  %v2813_v42 = vrot.slane %v3961_v28, 2 }
 0x2fa   : >> { %2776 = vrot.lane.b32.xlu0 %v2763_v26, %s4395_s29  ;;  %v6107_v61 = vpop.permute.xlu1 %2393  ;;  %v2808_v26 = vsel %vm1480_vm1, %v2805_v23, %v2807_v44 }
 0x2fb   : >> { %7220 = vst [vmem:[#allocation155_spill] sm:$0xff] %v6107_v61  ;;  %v2814_v18 = vsel %vm1480_vm1, %v2811_v33, %v2813_v42  ;;  %v3962_v33 = vld [vmem:[%s4980_s27 + $0x308] sm:$0xfe] }
 0x2fc   : >> { %v6110_v2 = vpop.permute.xlu0 %2391  ;;  %2815 = vrot.lane.b32.xlu1 %v2802_v25, %s4396_s30  ;;  %v2917_v42 = vrot.slane %v3962_v33, 1 }
 0x2fd   : >> { %7221 = vst [vmem:[#allocation156_spill] sm:$0xff] %v6110_v2  ;;  %v3964_v2 = vld [vmem:[%s4980_s27 + $0x308] sm:$0xfc] }
 0x2fe   : >> { %2780 = vrot.lane.b32.xlu0 %v2767_v47, %s4395_s29  ;;  %v6116_v35 = vpop.permute.xlu1 %2430 }
 0x2ff   : >> { %7222 = vst [vmem:[#allocation157_spill] sm:$0xff] %v6116_v35 }
 0x300   : >> { %v6120_v12 = vpop.permute.xlu0 %2395  ;;  %2819 = vrot.lane.b32.xlu1 %v2806_v57, %s4396_s30 }
 0x301   : >> { %7223 = vst [vmem:[#allocation158_spill] sm:$0xff] %v6120_v12 }
 0x302   : >> { %2817 = vrot.lane.b32.xlu0 %v2804_v58, %s4396_s30  ;;  %v6126_v3 = vpop.permute.xlu1 %2434 }
 0x303   : >> { %7224 = vst [vmem:[#allocation159_spill] sm:$0xff] %v6126_v3 }
 0x304   : >> { %v6129_v25 = vpop.permute.xlu0 %2432  ;;  %2823 = vrot.lane.b32.xlu1 %v2810_v46, %s4396_s30 }
 0x305   : >> { %7225 = vst [vmem:[#allocation160_spill] sm:$0xff] %v6129_v25 }
 0x306   : >> { %2821 = vrot.lane.b32.xlu0 %v2808_v26, %s4396_s30  ;;  %v6134_v8 = vpop.permute.xlu1 %2438 }
 0x307   : >> { %7226 = vst [vmem:[#allocation161_spill] sm:$0xff] %v6134_v8  ;;  %v2928_v8 = vrot.slane %v5538_v49, 1 }
 0x308   : >> { %v6137_v47 = vpop.permute.xlu0 %2436  ;;  %2827 = vrot.lane.b32.xlu1 %v2814_v18, %s4396_s30 }
 0x309   : >> { %7227 = vst [vmem:[#allocation162_spill] sm:$0xff] %v6137_v47 }
 0x30a   : >> { %2825 = vrot.lane.b32.xlu0 %v2812_v24, %s4396_s30  ;;  %v6141_v57 = vpop.permute.xlu1 %2442  ;;  %v2922_v24 = vrot.slane %v5522_v40, 1 }
 0x30b   : >> { %7228 = vst [vmem:[#allocation163_spill] sm:$0xff] %v6141_v57  ;;  %v2926_v57 = vrot.slane %v5545_v22, 1 }
 0x30c   : >> { %v6143_v23 = vpop.permute.xlu0 %2440  ;;  %2859 = vrot.lane.b32.xlu1 %v5442_v30, %s4390_s12 }
 0x30d   : >> { %7229 = vst [vmem:[#allocation164_spill] sm:$0xff] %v6143_v23 }
 0x30e   : >> { %2857 = vrot.lane.b32.xlu0 %v5449_v34, %s4390_s12  ;;  %v6149_v44 = vpop.permute.xlu1 %2479 }
 0x30f   : >> { %7230 = vst [vmem:[#allocation165_spill] sm:$0xff] %v6149_v44 }
 0x310   : >> { %v6151_v58 = vpop.permute.xlu0 %2477  ;;  %2863 = vrot.lane.b32.xlu1 %v5458_v20, %s4390_s12 }
 0x311   : >> { %7231 = vst [vmem:[#allocation166_spill] sm:$0xff] %v6151_v58 }
 0x312   : >> { %2861 = vrot.lane.b32.xlu0 %v5465_v10, %s4390_s12  ;;  %v6157_v41 = vpop.permute.xlu1 %2483 }
 0x313   : >> { %7232 = vst [vmem:[#allocation167_spill] sm:$0xff] %v6157_v41 }
 0x314   : >> { %v6159_v28 = vpop.permute.xlu0 %2481  ;;  %2867 = vrot.lane.b32.xlu1 %v5475_v27, %s4390_s12 }
 0x315   : >> { %7233 = vst [vmem:[#allocation168_spill] sm:$0xff] %v6159_v28 }
 0x316   : >> { %2865 = vrot.lane.b32.xlu0 %v5480_v48, %s4390_s12  ;;  %v6165_v30 = vpop.permute.xlu1 %2487 }
 0x317   : >> { %7234 = vst [vmem:[#allocation169_spill] sm:$0xff] %v6165_v30 }
 0x318   : >> { %v6167_v34 = vpop.permute.xlu0 %2485  ;;  %2885 = vrot.lane.b32.xlu1 %v5489_v0, %s4391_s20  ;;  %v2918_v0 = vrot.slane %v5508_v52, 1 }
 0x319   : >> { %7235 = vst [vmem:[#allocation170_spill] sm:$0xff] %v6167_v34 }
 0x31a   : >> { %2869 = vrot.lane.b32.xlu0 %v5494_v19, %s4390_s12  ;;  %v6173_v20 = vpop.permute.xlu1 %2557  ;;  %v2920_v19 = vrot.slane %v5503_v16, 1  ;;  %v2919_v33 = vsel %vm1432_vm0, %v2917_v42, %v2918_v0  ;;  %v2929_v42 = vsel %vm1432_vm0, %v2926_v57, %v2928_v8 }
 0x31c   : >> { %v6175_v10 = vpop.permute.xlu0 %2489  ;;  %2889 = vrot.lane.b32.xlu1 %v5503_v16, %s4391_s20  ;;  %v2921_v18 = vsel %vm1432_vm0, %v2918_v0, %v2920_v19  ;;  %v2923_v12 = vsel %vm1432_vm0, %v2920_v19, %v2922_v24  ;;  %v3963_v0 = vld [vmem:[%s4980_s27 + $0x3e8] sm:$0x1] }
 0x31d   : >> { %7236 = vst [vmem:[#allocation171_spill] sm:$0xff] %v6175_v10  ;;  %v2924_v10 = vrot.slane %v5517_v36, 1  ;;  %v2930_v44 = vrot.slane %v3963_v0, 1 }
 0x31e   : >> { %2887 = vrot.lane.b32.xlu0 %v5508_v52, %s4391_s20  ;;  %v6181_v48 = vpop.permute.xlu1 %2561 }
 0x31f   : >> { %v2925_v23 = vsel %vm1432_vm0, %v2922_v24, %v2924_v10  ;;  %v2927_v58 = vsel %vm1432_vm0, %v2924_v10, %v2926_v57  ;;  %v2931_v24 = vsel %vm1432_vm0, %v2928_v8, %v2930_v44  ;;  %v2973_v10 = vrot.slane %v5545_v22, 2 }
 0x320   : >> { %v6183_v27 = vpop.permute.xlu0 %2559  ;;  %2893 = vrot.lane.b32.xlu1 %v5517_v36, %s4391_s20  ;;  %v2975_v44 = vrot.slane %v5538_v49, 2 }
 0x322   : >> { %2891 = vrot.lane.b32.xlu0 %v5522_v40, %s4391_s20  ;;  %v6192_v46 = vpop.permute.xlu1 %2565 }
 0x324   : >> { %v6194_v26 = vpop.permute.xlu0 %2563  ;;  %2897 = vrot.lane.b32.xlu1 %v5538_v49, %s4391_s20 }
 0x326   : >> { %2895 = vrot.lane.b32.xlu0 %v5545_v22, %s4391_s20  ;;  %v6203_v34 = vpop.permute.xlu1 %2569 }
 0x328   : >> { %v6206_v30 = vpop.permute.xlu0 %2567  ;;  %2934 = vrot.lane.b32.xlu1 %v2921_v18, %s4392_s24  ;;  %v2964_v18 = vrot.slane %v3964_v2, 2  ;;  %v2969_v2 = vrot.slane %v5522_v40, 2 }
 0x32a   : >> { %2932 = vrot.lane.b32.xlu0 %v2919_v33, %s4392_s24  ;;  %v6213_v28 = vpop.permute.xlu1 %2587  ;;  %v2965_v33 = vrot.slane %v5508_v52, 2 }
 0x32c   : >> { %v6217_v61 = vpop.permute.xlu0 %2585  ;;  %2938 = vrot.lane.b32.xlu1 %v2925_v23, %s4392_s24  ;;  %v2966_v23 = vsel %vm1480_vm1, %v2964_v18, %v2965_v33  ;;  %v3965_v18 = vld [vmem:[%s4980_s27 + $0x3e8] sm:$0x3] }
 0x32e   : >> { %2936 = vrot.lane.b32.xlu0 %v2923_v12, %s4392_s24  ;;  %v6224_v41 = vpop.permute.xlu1 %2591  ;;  %v2967_v12 = vrot.slane %v5503_v16, 2 }
 0x330   : >> { %v6227_v3 = vpop.permute.xlu0 %2589  ;;  %2942 = vrot.lane.b32.xlu1 %v2929_v42, %s4392_s24  ;;  %v2970_v57 = vsel %vm1480_vm1, %v2967_v12, %v2969_v2  ;;  %v2968_v42 = vsel %vm1480_vm1, %v2965_v33, %v2967_v12  ;;  %v3012_v12 = vrot.slane %v5508_v52, 3  ;;  %v3018_v52 = vrot.slane %v5517_v36, 3 }
 0x332   : >> { %2940 = vrot.lane.b32.xlu0 %v2927_v58, %s4392_s24  ;;  %v6234_v19 = vpop.permute.xlu1 %2595  ;;  %v2971_v58 = vrot.slane %v5517_v36, 2 }
 0x334   : >> { %v6237_v47 = vpop.permute.xlu0 %2593  ;;  %2979 = vrot.lane.b32.xlu1 %v2966_v23, %s4393_s5  ;;  %v2974_v8 = vsel %vm1480_vm1, %v2971_v58, %v2973_v10  ;;  %v2977_v23 = vrot.slane %v3965_v18, 2  ;;  %v2972_v25 = vsel %vm1480_vm1, %v2969_v2, %v2971_v58  ;;  %v2976_v18 = vsel %vm1480_vm1, %v2973_v10, %v2975_v44 }
 0x335   : >> { %v3016_v2 = vrot.slane %v5522_v40, 3  ;;  %v3013_v58 = vsel %vm1528_vm2, %v3011_v62, %v3012_v12 }
 0x336   : >> { %2944 = vrot.lane.b32.xlu0 %v2931_v24, %s4392_s24  ;;  %v6244_v0 = vpop.permute.xlu1 %2632  ;;  %v2978_v33 = vsel %vm1480_vm1, %v2975_v44, %v2977_v23  ;;  %v3022_v44 = vrot.slane %v5538_v49, 3  ;;  %v3968_v23 = vld [vmem:[%s4980_s27 + $0x308] sm:$0xf0] }
 0x337   : >> { %v3019_v10 = vsel %vm1528_vm2, %v3016_v2, %v3018_v52 }
 0x338   : >> { %v6248_v35 = vpop.permute.xlu0 %2597  ;;  %2983 = vrot.lane.b32.xlu1 %v2970_v57, %s4393_s5  ;;  %v3014_v57 = vrot.slane %v5503_v16, 3 }
 0x33a   : >> { %2981 = vrot.lane.b32.xlu0 %v2968_v42, %s4393_s5  ;;  %v6254_v24 = vpop.permute.xlu1 %2636  ;;  %v3017_v36 = vsel %vm1528_vm2, %v3014_v57, %v3016_v2 }
 0x33c   : >> { %v6257_v11 = vpop.permute.xlu0 %2634  ;;  %2987 = vrot.lane.b32.xlu1 %v2974_v8, %s4393_s5  ;;  %v3020_v8 = vrot.slane %v5545_v22, 3  ;;  %v4312_v22 = vld [vmem:[%s4980_s27 + $0x328] sm:$0xff] }
 0x33e   : >> { %2985 = vrot.lane.b32.xlu0 %v2972_v25, %s4393_s5  ;;  %v6265_v42 = vpop.permute.xlu1 %2640  ;;  %v3015_v25 = vsel %vm1528_vm2, %v3012_v12, %v3014_v57  ;;  %v3023_v12 = vsel %vm1528_vm2, %v3020_v8, %v3022_v44 }
 0x340   : >> { %v6268_v13 = vpop.permute.xlu0 %2638  ;;  %2991 = vrot.lane.b32.xlu1 %v2978_v33, %s4393_s5  ;;  %v3967_v33 = vld [vmem:[%s4980_s27 + $0x3e8] sm:$0x7] }
 0x341   : >> { %v3024_v57 = vrot.slane %v3967_v33, 3 }
 0x342   : >> { %2989 = vrot.lane.b32.xlu0 %v2976_v18, %s4393_s5  ;;  %v6275_v16 = vpop.permute.xlu1 %2644  ;;  %v3058_v18 = vrot.slane %v3968_v23, 4 }
 0x344   : >> { %v6278_v43 = vpop.permute.xlu0 %2642  ;;  %3028 = vrot.lane.b32.xlu1 %v3015_v25, %s4394_s28  ;;  %v3059_v25 = vrot.slane %v4312_v22, 4  ;;  %v3063_v22 = vrot.slane %v4314_v29, 4 }
 0x345   : >> { %7237 = vst [vmem:[#allocation172_spill] sm:$0xff] %v6278_v43 }
 0x346   : >> { %3026 = vrot.lane.b32.xlu0 %v3013_v58, %s4394_s28  ;;  %v6285_v40 = vpop.permute.xlu1 %2681  ;;  %v3021_v58 = vsel %vm1528_vm2, %v3018_v52, %v3020_v8  ;;  %v3025_v52 = vsel %vm1528_vm2, %v3022_v44, %v3024_v57  ;;  %v4317_v57 = vld [vmem:[%s4980_s27 + $0x3c8] sm:$0xff] }
 0x348   : >> { %v6289_v62 = vpop.permute.xlu0 %2679  ;;  %3032 = vrot.lane.b32.xlu1 %v3019_v10, %s4394_s28  ;;  %v3060_v10 = vsel %vm1576_vm3, %v3058_v18, %v3059_v25 }
 0x34a   : >> { %3030 = vrot.lane.b32.xlu0 %v3017_v36, %s4394_s28  ;;  %v6296_v49 = vpop.permute.xlu1 %2685  ;;  %v4313_v36 = vld [vmem:[%s4980_s27 + $0x348] sm:$0xff] }
 0x34b   : >> { %v3061_v23 = vrot.slane %v4313_v36, 4 }
 0x34c   : >> { %v6299_v2 = vpop.permute.xlu0 %2683  ;;  %3036 = vrot.lane.b32.xlu1 %v3023_v12, %s4394_s28  ;;  %v4315_v12 = vld [vmem:[%s4980_s27 + $0x388] sm:$0xff] }
 0x34d   : >> { %v3064_v33 = vsel %vm1576_vm3, %v3061_v23, %v3063_v22  ;;  %v3065_v18 = vrot.slane %v4315_v12, 4  ;;  %v3062_v29 = vsel %vm1576_vm3, %v3059_v25, %v3061_v23 }
 0x34e   : >> { %3034 = vrot.lane.b32.xlu0 %v3021_v58, %s4394_s28  ;;  %v6306_v32 = vpop.permute.xlu1 %2689  ;;  %v4316_v58 = vld [vmem:[%s4980_s27 + $0x3a8] sm:$0xff] }
 0x34f   : >> { %7238 = vst [vmem:[#allocation173_spill] sm:$0xff] %v6306_v32  ;;  %v3067_v31 = vrot.slane %v4316_v58, 4  ;;  %v3969_v32 = vld [vmem:[%s4980_s27 + $0x3e8] sm:$0xf]  ;;  %v3066_v58 = vsel %vm1576_vm3, %v3063_v22, %v3065_v18 }
 0x350   : >> { %v6309_v8 = vpop.permute.xlu0 %2687  ;;  %3073 = vrot.lane.b32.xlu1 %v3060_v10, %s4395_s29  ;;  %v3069_v10 = vrot.slane %v4317_v57, 4  ;;  %v3971_v22 = vld [vmem:[%s4980_s27 + $0x428] sm:$0xff] }
 0x351   : >> { %v3068_v44 = vsel %vm1576_vm3, %v3065_v18, %v3067_v31 }
 0x352   : >> { %3038 = vrot.lane.b32.xlu0 %v3025_v52, %s4394_s28  ;;  %v6316_v36 = vpop.permute.xlu1 %2721  ;;  %v3071_v52 = vrot.slane %v3969_v32, 4 }
 0x354   : >> { %v6320_v43 = vpop.permute.xlu0 %2691  ;;  %3077 = vrot.lane.b32.xlu1 %v3064_v33, %s4395_s29  ;;  %v3072_v23 = vsel %vm1576_vm3, %v3069_v10, %v3071_v52  ;;  %v3972_v52 = vld [vmem:[%s4980_s27 + $0x448] sm:$0xff] }
 0x355   : >> { %7239 = vst [vmem:[#allocation174_spill] sm:$0xff] %v6320_v43 }
 0x356   : >> { %3075 = vrot.lane.b32.xlu0 %v3062_v29, %s4395_s29  ;;  %v6326_v12 = vpop.permute.xlu1 %2725  ;;  %v3070_v29 = vsel %vm1576_vm3, %v3067_v31, %v3069_v10  ;;  %v3973_v31 = vld [vmem:[%s4980_s27 + $0x468] sm:$0xff] }
 0x358   : >> { %v6329_v25 = vpop.permute.xlu0 %2723  ;;  %3081 = vrot.lane.b32.xlu1 %v3068_v44, %s4395_s29  ;;  %v3970_v44 = vld [vmem:[%s4980_s27 + $0x408] sm:$0xff] }
 0x35a   : >> { %3079 = vrot.lane.b32.xlu0 %v3066_v58, %s4395_s29  ;;  %v6334_v33 = vpop.permute.xlu1 %2729 }
 0x35c   : >> { %v6337_v32 = vpop.permute.xlu0 %2727  ;;  %3085 = vrot.lane.b32.xlu1 %v3072_v23, %s4395_s29  ;;  %v3975_v23 = vld [vmem:[%s4980_s27 + $0x4a8] sm:$0xff] }
 0x35e   : >> { %3083 = vrot.lane.b32.xlu0 %v3070_v29, %s4395_s29  ;;  %v6342_v18 = vpop.permute.xlu1 %2733 }
 0x35f   : >> { %7240 = vst [vmem:[#allocation175_spill] sm:$0xff] %v6342_v18  ;;  %v3974_v18 = vld [vmem:[%s4980_s27 + $0x488] sm:$0xff] }
 0x360   : >> { %v6345_v57 = vpop.permute.xlu0 %2731  ;;  %3117 = vrot.lane.b32.xlu1 %v3971_v22, %s4396_s30 }
 0x361   : >> { %7241 = vst [vmem:[#allocation176_spill] sm:$0xff] %v6345_v57 }
 0x362   : >> { %3115 = vrot.lane.b32.xlu0 %v3970_v44, %s4396_s30  ;;  %v6350_v10 = vpop.permute.xlu1 %2770  ;;  %v3976_v44 = vld [vmem:[%s4980_s27 + $0x4c8] sm:$0xff] }
 0x364   : >> { %v2769_v58 = vpop.permute.xlu0 %2768  ;;  %3121 = vrot.lane.b32.xlu1 %v3973_v31, %s4396_s30 }
 0x366   : >> { %3119 = vrot.lane.b32.xlu0 %v3972_v52, %s4396_s30  ;;  %v6356_v29 = vpop.permute.xlu1 %2774 }
 0x368   : >> { %v6359_v43 = vpop.permute.xlu0 %2772  ;;  %3125 = vrot.lane.b32.xlu1 %v3975_v23, %s4396_s30 }
 0x36a   : >> { %3123 = vrot.lane.b32.xlu0 %v3974_v18, %s4396_s30  ;;  %v6363_v22 = vpop.permute.xlu1 %2778 }
 0x36b   : >> { %7242 = vst [vmem:[#allocation177_spill] sm:$0xff] %v6363_v22 }
 0x36c   : >> { %v6366_v57 = vpop.permute.xlu0 %2776  ;;  %3157 = vrot.lane.b32.xlu1 %v5769_v56, %s4390_s12 }
 0x36e   : >> { %3127 = vrot.lane.b32.xlu0 %v3976_v44, %s4396_s30  ;;  %v2816_v31 = vpop.permute.xlu1 %2815  ;;  %v4318_v44 = vld [vmem:[%s4980_s27 + $0x100] sm:$0xff] }
 0x36f   : >> { %v2578_v22 = vadd.f32 %v4318_v44, %v6173_v20  ;;  %v3977_v20 = vld [vmem:[%s4980_s27 + $0x410] sm:$0xf0]  ;;  %v2579_v44 = vadd.f32 %v5974_v53, %v6183_v27  ;;  %v2582_v53 = vadd.f32 %v5994_v38, %v6192_v46 }
 0x370   : >> { %v6371_v52 = vpop.permute.xlu0 %2780  ;;  %3161 = vrot.lane.b32.xlu1 %v5785_v1, %s4390_s12 }
 0x371   : >> { %7243 = vst [vmem:[#allocation178_spill] sm:$0xff] %v6371_v52 }
 0x372   : >> { %3159 = vrot.lane.b32.xlu0 %v5792_v9, %s4390_s12  ;;  %v6377_v18 = vpop.permute.xlu1 %2819  ;;  %v2606_v9 = vadd.f32 %v6217_v61, %v2578_v22 }
 0x374   : >> { %v6379_v23 = vpop.permute.xlu0 %2817  ;;  %3165 = vrot.lane.b32.xlu1 %v5802_v45, %s4390_s12  ;;  %v2580_v45 = vadd.f32 %v5978_v60, %v6181_v48  ;;  %v2607_v60 = vadd.f32 %v6213_v28, %v2579_v44  ;;  %v3217_v48 = vrot.slane %v3977_v20, 4  ;;  %v2610_v28 = vadd.f32 %v6237_v47, %v2582_v53  ;;  %v7248_v20 = vld [vmem:[#allocation173_spill] sm:$0xff] }
 0x376   : >> { %3163 = vrot.lane.b32.xlu0 %v5808_v37, %s4390_s12  ;;  %v6385_v56 = vpop.permute.xlu1 %2823  ;;  %v2653_v37 = vadd.f32 %v6244_v0, %v2606_v9  ;;  %v3218_v0 = vrot.slane %v5680_v51, 4 }
 0x377   : >> { %7244 = vst [vmem:[#allocation179_spill] sm:$0xff] %v6385_v56 }
 0x378   : >> { %v6389_v1 = vpop.permute.xlu0 %2821  ;;  %3169 = vrot.lane.b32.xlu1 %v5818_v54, %s4390_s12  ;;  %v2608_v54 = vadd.f32 %v6227_v3, %v2580_v45  ;;  %v7246_v45 = vld [vmem:[#allocation174_spill] sm:$0xff] }
 0x37a   : >> { %3167 = vrot.lane.b32.xlu0 %v5825_v7, %s4390_s12  ;;  %v6396_v52 = vpop.permute.xlu1 %2827  ;;  %v2700_v7 = vadd.f32 %v6289_v62, %v2653_v37  ;;  %v2655_v27 = vadd.f32 %v6254_v24, %v2608_v54  ;;  %v2581_v62 = vadd.f32 %v5990_v63, %v6194_v26  ;;  %v3219_v63 = vsel %vm1576_vm3, %v3217_v48, %v3218_v0 }
 0x37c   : >> { %v6401_v56 = vpop.permute.xlu0 %2825  ;;  %3187 = vrot.lane.b32.xlu1 %v5834_v39, %s4391_s20  ;;  %v2742_v39 = vadd.f32 %v6316_v36, %v2700_v7  ;;  %v2702_v51 = vadd.f32 %v6299_v2, %v2655_v27  ;;  %v2609_v38 = vadd.f32 %v6224_v41, %v2581_v62  ;;  %v3220_v36 = vrot.slane %v5675_v4, 4  ;;  %v4319_v4 = vld [vmem:[%s4980_s27 + $0x490] sm:$0xff] }
 0x37d   : >> { %v3978_v7 = vld [vmem:[%s4980_s27 + $0x4f0] sm:$0xf] }
 0x37e   : >> { %3185 = vrot.lane.b32.xlu0 %v5841_v55, %s4391_s20  ;;  %v6413_v61 = vpop.permute.xlu1 %2859  ;;  %v2654_v55 = vadd.f32 %v6257_v11, %v2607_v60  ;;  %v2789_v22 = vadd.f32 %v2769_v58, %v2742_v39  ;;  %v2584_v11 = vadd.f32 %v6010_v21, %v6203_v34  ;;  %v2744_v47 = vadd.f32 %v6326_v12, %v2702_v51  ;;  %v7245_v58 = vld [vmem:[#allocation172_spill] sm:$0xff]  ;;  %v7249_v60 = vld [vmem:[#allocation175_spill] sm:$0xff] }
 0x37f   : >> { %v2656_v41 = vadd.f32 %v6268_v13, %v2609_v38  ;;  %v7250_v53 = vld [vmem:[#allocation179_spill] sm:$0xff] }
 0x380   : >> { %v2858_v3 = vpop.permute.xlu0 %2857  ;;  %3191 = vrot.lane.b32.xlu1 %v5850_v14, %s4391_s20  ;;  %v2701_v46 = vadd.f32 %v6285_v40, %v2654_v55  ;;  %v2657_v14 = vadd.f32 %v6265_v42, %v2610_v28  ;;  %v2836_v26 = vadd.f32 %v2816_v31, %v2789_v22  ;;  %v2612_v21 = vadd.f32 %v6248_v35, %v2584_v11  ;;  %v4320_v31 = vld [vmem:[%s4980_s27 + $0x4b0] sm:$0xff]  ;;  %v7252_v55 = vld [vmem:[#allocation176_spill] sm:$0xff]  ;;  %v7253_v22 = vld [vmem:[#allocation33_spill] sm:$0xff] }
 0x381   : >> { %v2791_v42 = vadd.f32 %v6359_v43, %v2744_v47  ;;  %v3224_v35 = vrot.slane %v4319_v4, 4  ;;  %v3226_v9 = vrot.slane %v4320_v31, 4  ;;  %v4321_v11 = vld [vmem:[%s4980_s27 + $0x4d0] sm:$0xff]  ;;  %v3230_v47 = vrot.slane %v3978_v7, 4 }
 0x382   : >> { %3189 = vrot.lane.b32.xlu0 %v5857_v15, %s4391_s20  ;;  %v6431_v24 = vpop.permute.xlu1 %2863  ;;  %v2583_v15 = vadd.f32 %v6006_v50, %v6206_v30  ;;  %v2743_v40 = vadd.f32 %v6329_v25, %v2701_v46  ;;  %v2704_v34 = vadd.f32 %v6309_v8, %v2657_v14  ;;  %v3222_v50 = vrot.slane %v5694_v6, 4 }
 0x383   : >> { %v2703_v30 = vadd.f32 %v6296_v49, %v2656_v41  ;;  %v2659_v8 = vadd.f32 %v6275_v16, %v2612_v21  ;;  %v2838_v25 = vadd.f32 %v6377_v18, %v2791_v42  ;;  %v7247_v18 = vld [vmem:[#allocation113_spill] sm:$0xff]  ;;  %v3228_v14 = vrot.slane %v4321_v11, 4  ;;  %v7256_v21 = vld [vmem:[#allocation35_spill] sm:$0xff] }
 0x384   : >> { %v2862_v2 = vpop.permute.xlu0 %2861  ;;  %3195 = vrot.lane.b32.xlu1 %v5867_v59, %s4391_s20  ;;  %v2611_v13 = vadd.f32 %v6234_v19, %v2583_v15  ;;  %v2790_v59 = vadd.f32 %v6350_v10, %v2743_v40  ;;  %v2746_v43 = vadd.f32 %v6334_v33, %v2704_v34 }
 0x385   : >> { %v2745_v49 = vadd.f32 %v6337_v32, %v2703_v30  ;;  %v2706_v16 = vadd.f32 %v7246_v45, %v2659_v8  ;;  %v7257_v30 = vld [vmem:[#allocation37_spill] sm:$0xff] }
 0x386   : >> { %3193 = vrot.lane.b32.xlu0 %v5872_v17, %s4391_s20  ;;  %v6454_v12 = vpop.permute.xlu1 %2867  ;;  %v2850_v17 = vadd.f32 %v2836_v26, %v5380_v5  ;;  %v2658_v19 = vadd.f32 %v7245_v58, %v2611_v13  ;;  %v2837_v10 = vadd.f32 %v6379_v23, %v2790_v59  ;;  %v2793_v33 = vadd.f32 %v6366_v57, %v2746_v43  ;;  %v7251_v57 = vld [vmem:[#allocation31_spill] sm:$0xff]  ;;  %v7255_v26 = vld [vmem:[#allocation177_spill] sm:$0xff] }
 0x387   : >> { %v3223_v5 = vsel %vm1576_vm3, %v3220_v36, %v3222_v50  ;;  %v2792_v32 = vadd.f32 %v6356_v29, %v2745_v49  ;;  %v3221_v23 = vsel %vm1576_vm3, %v3218_v0, %v3220_v36  ;;  %v2748_v48 = vadd.f32 %v7249_v60, %v2706_v16  ;;  %v7254_v0 = vld [vmem:[#allocation178_spill] sm:$0xff]  ;;  %v7258_v43 = vld [vmem:[#allocation39_spill] sm:$0xff]  ;;  %v7259_v58 = vld [vmem:[#allocation41_spill] sm:$0xff] }
 0x388   : >> { %v2866_v6 = vpop.permute.xlu0 %2865  ;;  %3232 = vrot.lane.b32.xlu1 %v3219_v63, %s4392_s24  ;;  %v2878_v37 = vadd.f32 %v2858_v3, %v2850_v17  ;;  %v2705_v44 = vadd.f32 %v7248_v20, %v2658_v19  ;;  %v2840_v27 = vadd.f32 %v7250_v53, %v2793_v33  ;;  %v2852_v39 = vadd.f32 %v2838_v25, %v7251_v57  ;;  %v3988_v20 = vld [vmem:[%s4980_s27 + $0x510] sm:$0xfe] }
 0x389   : >> { %v2839_v51 = vadd.f32 %v6389_v1, %v2792_v32  ;;  %v2851_v38 = vadd.f32 %v2837_v10, %v7253_v22  ;;  %v3227_v29 = vsel %vm1576_vm3, %v3224_v35, %v3226_v9  ;;  %v2795_v46 = vadd.f32 %v7254_v0, %v2748_v48  ;;  %v6503_v10 = vld [vmem:[%s4980_s27 + $0x530] sm:$0xff] }
 0x38a   : >> { %3197 = vrot.lane.b32.xlu0 %v7247_v18, %s4391_s20  ;;  %v2886_v54 = vpop.permute.xlu1 %2885  ;;  %v2747_v28 = vadd.f32 %v7252_v55, %v2705_v44  ;;  %v2880_v63 = vadd.f32 %v2862_v2, %v2852_v39  ;;  %v3225_v1 = vsel %vm1576_vm3, %v3222_v50, %v3224_v35  ;;  %v2854_v34 = vadd.f32 %v2840_v27, %v7256_v21  ;;  %v6526_v48 = vld [vmem:[%s4980_s27 + $0x590] sm:$0xff] }
 0x38b   : >> { %v2906_v3 = vadd.f32 %v2886_v54, %v2878_v37  ;;  %v2879_v41 = vadd.f32 %v6413_v61, %v2851_v38  ;;  %v2842_v36 = vadd.f32 %v6396_v52, %v2795_v46  ;;  %v2853_v59 = vadd.f32 %v2839_v51, %v7257_v30  ;;  %v6511_v37 = vld [vmem:[%s4980_s27 + $0x570] sm:$0xff] }
 0x38c   : >> { %v2870_v62 = vpop.permute.xlu0 %2869  ;;  %3236 = vrot.lane.b32.xlu1 %v3223_v5, %s4392_s24  ;;  %v2794_v15 = vadd.f32 %v7255_v26, %v2747_v28  ;;  %v2882_v8 = vadd.f32 %v2866_v6, %v2854_v34  ;;  %v3231_v61 = vsel %vm1576_vm3, %v3228_v14, %v3230_v47  ;;  %v3229_v35 = vsel %vm1576_vm3, %v3226_v9, %v3228_v14  ;;  %v3981_v9 = vld [vmem:[%s4980_s27 + $0x510] sm:$0xff] }
 0x38d   : >> { %v2881_v52 = vadd.f32 %v6431_v24, %v2853_v59  ;;  %v2856_v25 = vadd.f32 %v2842_v36, %v7258_v43  ;;  %v6514_v5 = vld [vmem:[%s4980_s27 + $0x550] sm:$0xff]  ;;  %v3311_v54 = vrot.slane %v6503_v10, 1  ;;  %v3310_v7 = vrot.slane %v3988_v20, 1 }
 0x38e   : >> { %3234 = vrot.lane.b32.xlu0 %v3221_v23, %s4392_s24  ;;  %v2890_v40 = vpop.permute.xlu1 %2889  ;;  %v2841_v2 = vadd.f32 %v6401_v56, %v2794_v15  ;;  %v6523_v23 = vld [vmem:[%s4980_s27 + $0x5b0] sm:$0xff]  ;;  %v3315_v39 = vrot.slane %v6511_v37, 1  ;;  %v3317_v0 = vrot.slane %v6526_v48, 1  ;;  %v3358_v30 = vrot.slane %v6503_v10, 2 }
 0x38f   : >> { %v2908_v42 = vadd.f32 %v2890_v40, %v2880_v63  ;;  %v2884_v6 = vadd.f32 %v2870_v62, %v2856_v25  ;;  %v3312_v62 = vsel %vm1432_vm0, %v3310_v7, %v3311_v54  ;;  %v6536_v28 = vld [vmem:[%s4980_s27 + $0x5d0] sm:$0xff]  ;;  %v3360_v59 = vrot.slane %v6514_v5, 2 }
 0x390   : >> { %v2888_v13 = vpop.permute.xlu0 %2887  ;;  %3240 = vrot.lane.b32.xlu1 %v3227_v29, %s4392_s24  ;;  %v2855_v19 = vadd.f32 %v2841_v2, %v7259_v58  ;;  %v3319_v29 = vrot.slane %v6523_v23, 1  ;;  %v3989_v14 = vld [vmem:[%s4980_s27 + $0x5f0] sm:$0x1]  ;;  %v3318_v21 = vsel %vm1432_vm0, %v3315_v39, %v3317_v0  ;;  %v3362_v25 = vrot.slane %v6511_v37, 2 }
 0x391   : >> { %v2907_v4 = vadd.f32 %v2888_v13, %v2879_v41  ;;  %v3321_v41 = vrot.slane %v6536_v28, 1  ;;  %v3990_v13 = vld [vmem:[%s4980_s27 + $0x510] sm:$0xfc] }
 0x392   : >> { %3238 = vrot.lane.b32.xlu0 %v3225_v1, %s4392_s24  ;;  %v2894_v50 = vpop.permute.xlu1 %2893  ;;  %v2883_v24 = vadd.f32 %v6454_v12, %v2855_v19  ;;  %v3320_v40 = vsel %vm1432_vm0, %v3317_v0, %v3319_v29  ;;  %v3323_v1 = vrot.slane %v3989_v14, 1 }
 0x393   : >> { %v2910_v56 = vadd.f32 %v2894_v50, %v2882_v8 }
 0x394   : >> { %v2892_v17 = vpop.permute.xlu0 %2891  ;;  %3244 = vrot.lane.b32.xlu1 %v3231_v61, %s4392_s24  ;;  %v3322_v61 = vsel %vm1432_vm0, %v3319_v29, %v3321_v41 }
 0x395   : >> { %v2909_v49 = vadd.f32 %v2892_v17, %v2881_v52  ;;  %v3357_v52 = vrot.slane %v3990_v13, 2  ;;  %v3361_v17 = vsel %vm1480_vm1, %v3358_v30, %v3360_v59 }
 0x396   : >> { %3242 = vrot.lane.b32.xlu0 %v3229_v35, %s4392_s24  ;;  %v2898_v31 = vpop.permute.xlu1 %2897 }
 0x397   : >> { %v2912_v45 = vadd.f32 %v2898_v31, %v2884_v6  ;;  %v3359_v19 = vsel %vm1480_vm1, %v3357_v52, %v3358_v30  ;;  %v3366_v31 = vrot.slane %v6523_v23, 2 }
 0x398   : >> { %v2896_v16 = vpop.permute.xlu0 %2895  ;;  %3280 = vrot.lane.b32.xlu1 %v6503_v10, %s4393_s5 }
 0x399   : >> { %v2911_v33 = vadd.f32 %v2896_v16, %v2883_v24 }
 0x39a   : >> { %3278 = vrot.lane.b32.xlu0 %v3981_v9, %s4393_s5  ;;  %v2935_v18 = vpop.permute.xlu1 %2934  ;;  %v3368_v9 = vrot.slane %v6536_v28, 2 }
 0x39b   : >> { %v2954_v44 = vadd.f32 %v2935_v18, %v2907_v4  ;;  %v3324_v4 = vsel %vm1432_vm0, %v3321_v41, %v3323_v1  ;;  %v3992_v18 = vld [vmem:[%s4980_s27 + $0x510] sm:$0xf8] }
 0x39c   : >> { %v2933_v12 = vpop.permute.xlu0 %2932  ;;  %3284 = vrot.lane.b32.xlu1 %v6511_v37, %s4393_s5  ;;  %v3369_v7 = vsel %vm1480_vm1, %v3366_v31, %v3368_v9 }
 0x39d   : >> { %v2953_v32 = vadd.f32 %v2933_v12, %v2906_v3  ;;  %v3313_v3 = vrot.slane %v6514_v5, 1  ;;  %v3991_v12 = vld [vmem:[%s4980_s27 + $0x5f0] sm:$0x3] }
 0x39e   : >> { %3282 = vrot.lane.b32.xlu0 %v6514_v5, %s4393_s5  ;;  %v2939_v60 = vpop.permute.xlu1 %2938 }
 0x39f   : >> { %v2956_v53 = vadd.f32 %v2939_v60, %v2909_v49  ;;  %v3316_v46 = vsel %vm1432_vm0, %v3313_v3, %v3315_v39  ;;  %v3314_v11 = vsel %vm1432_vm0, %v3311_v54, %v3313_v3  ;;  %v3405_v54 = vrot.slane %v6503_v10, 3 }
 0x3a0   : >> { %v2937_v27 = vpop.permute.xlu0 %2936  ;;  %3288 = vrot.lane.b32.xlu1 %v6523_v23, %s4393_s5  ;;  %v3404_v60 = vrot.slane %v3992_v18, 3 }
 0x3a1   : >> { %v2955_v57 = vadd.f32 %v2937_v27, %v2908_v42 }
 0x3a2   : >> { %3286 = vrot.lane.b32.xlu0 %v6526_v48, %s4393_s5  ;;  %v2943_v55 = vpop.permute.xlu1 %2942  ;;  %v3406_v10 = vsel %vm1528_vm2, %v3404_v60, %v3405_v54 }
 0x3a3   : >> { %v2958_v51 = vadd.f32 %v2943_v55, %v2911_v33  ;;  %v3363_v33 = vsel %vm1480_vm1, %v3360_v59, %v3362_v25  ;;  %v3409_v55 = vrot.slane %v6511_v37, 3 }
 0x3a4   : >> { %v2941_v22 = vpop.permute.xlu0 %2940  ;;  %3325 = vrot.lane.b32.xlu1 %v3312_v62, %s4394_s28 }
 0x3a5   : >> { %v2957_v38 = vadd.f32 %v2941_v22, %v2910_v56  ;;  %v3364_v56 = vrot.slane %v6526_v48, 2 }
 0x3a6   : >> { %3290 = vrot.lane.b32.xlu0 %v6536_v28, %s4393_s5  ;;  %v2980_v63 = vpop.permute.xlu1 %2979 }
 0x3a7   : >> { %v3000_v47 = vadd.f32 %v2980_v63, %v2953_v32  ;;  %v3367_v27 = vsel %vm1480_vm1, %v3364_v56, %v3366_v31  ;;  %v3413_v63 = vrot.slane %v6523_v23, 3 }
 0x3a8   : >> { %v2945_v26 = vpop.permute.xlu0 %2944  ;;  %3329 = vrot.lane.b32.xlu1 %v3316_v46, %s4394_s28 }
 0x3a9   : >> { %v2959_v15 = vadd.f32 %v2945_v26, %v2912_v45  ;;  %v3365_v45 = vsel %vm1480_vm1, %v3362_v25, %v3364_v56 }
 0x3aa   : >> { %3327 = vrot.lane.b32.xlu0 %v3314_v11, %s4394_s28  ;;  %v2984_v36 = vpop.permute.xlu1 %2983  ;;  %v3411_v11 = vrot.slane %v6526_v48, 3 }
 0x3ab   : >> { %v3002_v34 = vadd.f32 %v2984_v36, %v2955_v57  ;;  %v3370_v57 = vrot.slane %v3991_v12, 2  ;;  %v7261_v12 = vld [vmem:[#allocation91_spill] sm:$0xff] }
 0x3ac   : >> { %v2982_v42 = vpop.permute.xlu0 %2981  ;;  %3333 = vrot.lane.b32.xlu1 %v3320_v40, %s4394_s28  ;;  %v3415_v40 = vrot.slane %v6536_v28, 3  ;;  %v3414_v23 = vsel %vm1528_vm2, %v3411_v11, %v3413_v63  ;;  %v3412_v36 = vsel %vm1528_vm2, %v3409_v55, %v3411_v11 }
 0x3ad   : >> { %v3001_v2 = vadd.f32 %v2982_v42, %v2954_v44 }
 0x3ae   : >> { %3331 = vrot.lane.b32.xlu0 %v3318_v21, %s4394_s28  ;;  %v2988_v8 = vpop.permute.xlu1 %2987  ;;  %v3416_v28 = vsel %vm1528_vm2, %v3413_v63, %v3415_v40  ;;  %v7266_v63 = vld [vmem:[#allocation93_spill] sm:$0xff] }
 0x3af   : >> { %v3004_v50 = vadd.f32 %v2988_v8, %v2957_v38  ;;  %v3371_v38 = vsel %vm1480_vm1, %v3368_v9, %v3370_v57 }
 0x3b0   : >> { %v2986_v35 = vpop.permute.xlu0 %2985  ;;  %3337 = vrot.lane.b32.xlu1 %v3324_v4, %s4394_s28 }
 0x3b1   : >> { %v3003_v43 = vadd.f32 %v2986_v35, %v2956_v53 }
 0x3b2   : >> { %3335 = vrot.lane.b32.xlu0 %v3322_v61, %s4394_s28  ;;  %v2992_v58 = vpop.permute.xlu1 %2991 }
 0x3b3   : >> { %v3006_v49 = vadd.f32 %v2992_v58, %v2959_v15 }
 0x3b4   : >> { %v2990_v6 = vpop.permute.xlu0 %2989  ;;  %3374 = vrot.lane.b32.xlu1 %v3361_v17, %s4395_s29 }
 0x3b5   : >> { %v3005_v24 = vadd.f32 %v2990_v6, %v2958_v51  ;;  %v3407_v51 = vrot.slane %v6514_v5, 3 }
 0x3b6   : >> { %3372 = vrot.lane.b32.xlu0 %v3359_v19, %s4395_s29  ;;  %v3029_v16 = vpop.permute.xlu1 %3028 }
 0x3b7   : >> { %v3048_v20 = vadd.f32 %v3029_v16, %v3001_v2  ;;  %v3410_v37 = vsel %vm1528_vm2, %v3407_v51, %v3409_v55  ;;  %v3408_v14 = vsel %vm1528_vm2, %v3405_v54, %v3407_v51  ;;  %v7264_v55 = vld [vmem:[#allocation89_spill] sm:$0xff] }
 0x3b8   : >> { %v3027_v44 = vpop.permute.xlu0 %3026  ;;  %3378 = vrot.lane.b32.xlu1 %v3365_v45, %s4395_s29  ;;  %v7260_v45 = vld [vmem:[#allocation87_spill] sm:$0xff] }
 0x3b9   : >> { %v3047_v32 = vadd.f32 %v3027_v44, %v3000_v47  ;;  %v3993_v47 = vld [vmem:[%s4980_s27 + $0x5f0] sm:$0x7] }
 0x3ba   : >> { %3376 = vrot.lane.b32.xlu0 %v3363_v33, %s4395_s29  ;;  %v3033_v53 = vpop.permute.xlu1 %3032  ;;  %v3417_v48 = vrot.slane %v3993_v47, 3 }
 0x3bb   : >> { %v3050_v39 = vadd.f32 %v3033_v53, %v3003_v43 }
 0x3bc   : >> { %v3031_v3 = vpop.permute.xlu0 %3030  ;;  %3382 = vrot.lane.b32.xlu1 %v3369_v7, %s4395_s29  ;;  %v3418_v13 = vsel %vm1528_vm2, %v3415_v40, %v3417_v48  ;;  %v7262_v7 = vld [vmem:[#allocation85_spill] sm:$0xff] }
 0x3bd   : >> { %v3049_v62 = vadd.f32 %v3031_v3, %v3002_v34  ;;  %v1408_v40 = vld [vmem:[%s4980_s27] sm:$0xff] }
 0x3be   : >> { %3380 = vrot.lane.b32.xlu0 %v3367_v27, %s4395_s29  ;;  %v3037_v22 = vpop.permute.xlu1 %3036 }
 0x3bf   : >> { %v3052_v29 = vadd.f32 %v3037_v22, %v3005_v24 }
 0x3c0   : >> { %v3035_v0 = vpop.permute.xlu0 %3034  ;;  %3419 = vrot.lane.b32.xlu1 %v3406_v10, %s4396_s30 }
 0x3c1   : >> { %v3051_v46 = vadd.f32 %v3035_v0, %v3004_v50 }
 0x3c2   : >> { %3384 = vrot.lane.b32.xlu0 %v3371_v38, %s4395_s29  ;;  %v3074_v5 = vpop.permute.xlu1 %3073 }
 0x3c3   : >> { %v3094_v26 = vadd.f32 %v3074_v5, %v3047_v32 }
 0x3c4   : >> { %v3039_v15 = vpop.permute.xlu0 %3038  ;;  %3423 = vrot.lane.b32.xlu1 %v3410_v37, %s4396_s30 }
 0x3c5   : >> { %v3053_v41 = vadd.f32 %v3039_v15, %v3006_v49 }
 0x3c6   : >> { %3421 = vrot.lane.b32.xlu0 %v3408_v14, %s4396_s30  ;;  %v3078_v1 = vpop.permute.xlu1 %3077 }
 0x3c7   : >> { %v3096_v21 = vadd.f32 %v3078_v1, %v3049_v62  ;;  %v4322_v1 = vld [vmem:[%s4980_s27 + $0x20] sm:$0xff] }
 0x3c8   : >> { %v3076_v34 = vpop.permute.xlu0 %3075  ;;  %3427 = vrot.lane.b32.xlu1 %v3414_v23, %s4396_s30 }
 0x3c9   : >> { %v3095_v42 = vadd.f32 %v3076_v34, %v3048_v20  ;;  %v7268_v34 = vld [vmem:[#allocation12_spill] sm:$0xff] }
 0x3ca   : >> { %3425 = vrot.lane.b32.xlu0 %v3412_v36, %s4396_s30  ;;  %v3082_v2 = vpop.permute.xlu1 %3081  ;;  %v7267_v36 = vld [vmem:[#allocation14_spill] sm:$0xff] }
 0x3cb   : >> { %v3098_v30 = vadd.f32 %v3082_v2, %v3051_v46  ;;  %v7269_v2 = vld [vmem:[#allocation13_spill] sm:$0xff] }
 0x3cc   : >> { %v3080_v59 = vpop.permute.xlu0 %3079  ;;  %3431 = vrot.lane.b32.xlu1 %v3418_v13, %s4396_s30  ;;  %v4323_v13 = vld [vmem:[%s4980_s27 + $0x60] sm:$0xff] }
 0x3cd   : >> { %v3097_v4 = vadd.f32 %v3080_v59, %v3050_v39  ;;  %v7263_v39 = vld [vmem:[#allocation95_spill] sm:$0xff] }
 0x3ce   : >> { %3429 = vrot.lane.b32.xlu0 %v3416_v28, %s4396_s30  ;;  %v3086_v8 = vpop.permute.xlu1 %3085  ;;  %v1472_v28 = vadd.f32 %v4323_v13, %v7269_v2  ;;  %v7270_v59 = vld [vmem:[#allocation11_spill] sm:$0xff]  ;;  %v7290_v2 = vld [vmem:[#allocation30_spill] sm:$0xff] }
 0x3cf   : >> { %v3100_v61 = vadd.f32 %v3086_v8, %v3053_v41  ;;  %v7271_v8 = vld [vmem:[#allocation20_spill] sm:$0xff] }
 0x3d0   : >> { %v3084_v52 = vpop.permute.xlu0 %3083 }
 0x3d1   : >> { %v3099_v50 = vadd.f32 %v3084_v52, %v3052_v29  ;;  %v7265_v29 = vld [vmem:[#allocation98_spill] sm:$0xff] }
 0x3d2   : >> { %v3118_v35 = vpop.permute.xlu1 %3117 }
 0x3d3   : >> { %v3137_v43 = vadd.f32 %v3118_v35, %v3095_v42  ;;  %v1469_v42 = vadd.f32 %v7268_v34, %v1408_v40 }
 0x3d4   : >> { %v3116_v25 = vpop.permute.xlu0 %3115 }
 0x3d5   : >> { %v3136_v56 = vadd.f32 %v3116_v25, %v3094_v26  ;;  %v3151_v60 = vadd.f32 %v3137_v43, %v7262_v7  ;;  %v7273_v43 = vld [vmem:[#allocation22_spill] sm:$0xff] }
 0x3d6   : >> { %v3122_v17 = vpop.permute.xlu1 %3121  ;;  %v1520_v25 = vadd.f32 %v7273_v43, %v1472_v28  ;;  %v7294_v43 = vld [vmem:[#allocation34_spill] sm:$0xff] }
 0x3d7   : >> { %v3139_v58 = vadd.f32 %v3122_v17, %v3097_v4  ;;  %v3150_v16 = vadd.f32 %v3136_v56, %v7260_v45  ;;  %v7274_v17 = vld [vmem:[#allocation19_spill] sm:$0xff] }
 0x3d8   : >> { %v3120_v19 = vpop.permute.xlu0 %3119 }
 0x3d9   : >> { %v3138_v49 = vadd.f32 %v3120_v19, %v3096_v21  ;;  %v3153_v51 = vadd.f32 %v3139_v58, %v7264_v55  ;;  %v1470_v21 = vadd.f32 %v4322_v1, %v7267_v36  ;;  %v7275_v19 = vld [vmem:[#allocation25_spill] sm:$0xff]  ;;  %v7287_v1 = vld [vmem:[#allocation24_spill] sm:$0xff] }
 0x3da   : >> { %v3126_v6 = vpop.permute.xlu1 %3125 }
 0x3db   : >> { %v3141_v24 = vadd.f32 %v3126_v6, %v3099_v50  ;;  %v3152_v32 = vadd.f32 %v3138_v49, %v7261_v12  ;;  %v7272_v50 = vld [vmem:[#allocation17_spill] sm:$0xff] }
 0x3dc   : >> { %v3124_v31 = vpop.permute.xlu0 %3123  ;;  %v1517_v35 = vadd.f32 %v7272_v50, %v1469_v42  ;;  %v4325_v6 = vld [vmem:[%s4980_s27 + $0x80] sm:$0xff] }
 0x3dd   : >> { %v3140_v9 = vadd.f32 %v3124_v31, %v3098_v30  ;;  %v3155_v11 = vadd.f32 %v3141_v24, %v7266_v63  ;;  %v4324_v30 = vld [vmem:[%s4980_s27 + $0x40] sm:$0xff]  ;;  %v7276_v24 = vld [vmem:[#allocation16_spill] sm:$0xff] }
 0x3de   : >> { %v3158_v33 = vpop.permute.xlu1 %3157  ;;  %v1471_v4 = vadd.f32 %v4324_v30, %v7270_v59  ;;  %v1473_v31 = vadd.f32 %v4325_v6, %v7276_v24  ;;  %v7289_v42 = vld [vmem:[#allocation45_spill] sm:$0xff]  ;;  %v7291_v30 = vld [vmem:[#allocation46_spill] sm:$0xff]  ;;  %v7297_v24 = vld [vmem:[#allocation40_spill] sm:$0xff] }
 0x3df   : >> { %v6602_v18 = vadd.f32 %v3158_v33, %v3150_v16  ;;  %v3154_v3 = vadd.f32 %v3140_v9, %v7263_v39  ;;  %v7277_v9 = vld [vmem:[#allocation26_spill] sm:$0xff]  ;;  %v7278_v16 = vld [vmem:[#allocation27_spill] sm:$0xff]  ;;  %v7293_v50 = vld [vmem:[#allocation29_spill] sm:$0xff] }
 0x3e0   : >> { %v3128_v20 = vpop.permute.xlu0 %3127  ;;  %v1519_v58 = vadd.f32 %v7274_v17, %v1471_v4  ;;  %v1565_v45 = vadd.f32 %v7277_v9, %v1517_v35  ;;  %v1568_v33 = vadd.f32 %v7278_v16, %v1520_v25  ;;  %v7282_v39 = vld [vmem:[#allocation38_spill] sm:$0xff]  ;;  %v7292_v4 = vld [vmem:[#allocation47_spill] sm:$0xff]  ;;  %v7295_v17 = vld [vmem:[#allocation48_spill] sm:$0xff] }
 0x3e1   : >> { %v3142_v44 = vadd.f32 %v3128_v20, %v3100_v61  ;;  %v1518_v61 = vadd.f32 %v7271_v8, %v1470_v21  ;;  %v4326_v20 = vld [vmem:[%s4980_s27 + $0xa0] sm:$0xff]  ;;  %v7288_v21 = vld [vmem:[#allocation36_spill] sm:$0xff]  ;;  %v7298_v9 = vld [vmem:[#allocation51_spill] sm:$0xff] }
 0x3e2   : >> { %v3162_v54 = vpop.permute.xlu1 %3161  ;;  %v7299_v16 = vld [vmem:[#allocation56_spill] sm:$0xff] }
 0x3e3   : >> { %v6606_v53 = vadd.f32 %v3162_v54, %v3152_v32  ;;  %v3156_v0 = vadd.f32 %v3142_v44, %v7265_v29  ;;  %v1566_v49 = vadd.f32 %v7275_v19, %v1518_v61  ;;  %v7279_v44 = vld [vmem:[#allocation15_spill] sm:$0xff]  ;;  %v4327_v32 = vld [vmem:[%s4980_s27 + $0xc0] sm:$0xff]  ;;  %v7280_v54 = vld [vmem:[#allocation18_spill] sm:$0xff] }
 0x3e4   : >> { %v3160_v27 = vpop.permute.xlu0 %3159  ;;  %v1474_v12 = vadd.f32 %v4326_v20, %v7279_v44  ;;  %v1475_v7 = vadd.f32 %v4327_v32, %v7280_v54  ;;  %v7284_v29 = vld [vmem:[#allocation32_spill] sm:$0xff]  ;;  %v7296_v19 = vld [vmem:[#allocation54_spill] sm:$0xff]  ;;  %v7300_v44 = vld [vmem:[#allocation43_spill] sm:$0xff] }
 0x3e5   : >> { %v6608_v57 = vadd.f32 %v3160_v27, %v3151_v60  ;;  %v7281_v60 = vld [vmem:[#allocation28_spill] sm:$0xff] }
 0x3e6   : >> { %v3166_v62 = vpop.permute.xlu1 %3165  ;;  %v1567_v27 = vadd.f32 %v7281_v60, %v1519_v58  ;;  %v1522_v36 = vadd.f32 %v7287_v1, %v1474_v12  ;;  %v7301_v32 = vld [vmem:[#allocation44_spill] sm:$0xff] }
 0x3e7   : >> { %v6612_v10 = vadd.f32 %v3166_v62, %v3154_v3  ;;  %v1614_v3 = vadd.f32 %v7282_v39, %v1566_v49  ;;  %v3874_v62 = vld [vmem:[%s4980_s27 + $0x108] sm:$0xf8]  ;;  %v7308_v1 = vld [vmem:[#allocation52_spill] sm:$0xff] }
 0x3e8   : >> { %v3164_v22 = vpop.permute.xlu0 %3163  ;;  %v1615_v34 = vadd.f32 %v7288_v21, %v1567_v27  ;;  %v1776_v61 = vrot.slane %v3874_v62, 3  ;;  %v1570_v35 = vadd.f32 %v7293_v50, %v1522_v36  ;;  %v7303_v27 = vld [vmem:[#allocation59_spill] sm:$0xff]  ;;  %v7309_v21 = vld [vmem:[#allocation62_spill] sm:$0xff] }
 0x3e9   : >> { %v6614_v38 = vadd.f32 %v3164_v22, %v3153_v51  ;;  %v7283_v51 = vld [vmem:[#allocation21_spill] sm:$0xff]  ;;  %v1660_v13 = vadd.f32 %v7289_v42, %v1614_v3  ;;  %v3881_v3 = vld [vmem:[%s4980_s27 + $0x1e8] sm:$0x7]  ;;  %v3910_v62 = vld [vmem:[%s4980_s27 + $0x310] sm:$0xfe] }
 0x3ea   : >> { %v3170_v46 = vpop.permute.xlu1 %3169  ;;  %v1521_v22 = vadd.f32 %v7283_v51, %v1473_v31  ;;  %v1661_v58 = vadd.f32 %v7295_v17, %v1615_v34  ;;  %v1618_v54 = vadd.f32 %v7301_v32, %v1570_v35  ;;  %v7304_v51 = vld [vmem:[#allocation50_spill] sm:$0xff]  ;;  %v7310_v42 = vld [vmem:[#allocation4_spill] sm:$0xff]  ;;  %v2148_v35 = vrot.slane %v3910_v62, 1 }
 0x3eb   : >> { %v6618_v37 = vadd.f32 %v3170_v46, %v3156_v0  ;;  %v1613_v0 = vadd.f32 %v7284_v29, %v1565_v45  ;;  %v7285_v46 = vld [vmem:[#allocation42_spill] sm:$0xff]  ;;  %v1707_v49 = vadd.f32 %v7296_v19, %v1660_v13  ;;  %v7305_v29 = vld [vmem:[#allocation60_spill] sm:$0xff]  ;;  %v7311_v13 = vrot.slane %v7310_v42, 3 }
 0x3ec   : >> { %v3168_v5 = vpop.permute.xlu0 %3167  ;;  %v1616_v63 = vadd.f32 %v7285_v46, %v1568_v33  ;;  %v1569_v28 = vadd.f32 %v7290_v2, %v1521_v22  ;;  %v7306_v46 = vld [vmem:[#allocation61_spill] sm:$0xff] }
 0x3ed   : >> { %v6620_v14 = vadd.f32 %v3168_v5, %v3155_v11  ;;  %v7286_v5 = vld [vmem:[#allocation23_spill] sm:$0xff]  ;;  %v1659_v59 = vadd.f32 %v7291_v30, %v1613_v0  ;;  %v1754_v39 = vadd.f32 %v7303_v27, %v1707_v49  ;;  %v1778_v2 = vsel %vm1528_vm2, %v1776_v61, %v7311_v13  ;;  %v7316_v49 = vld [vmem:[#allocation5_spill] sm:$0xff]  ;;  %v7317_v61 = vld [vmem:[#allocation64_spill] sm:$0xff] }
 0x3ee   : >> { %v6622_v47 = vpop.permute.xlu1 %3187  ;;  %v1523_v40 = vadd.f32 %v7286_v5, %v1475_v7  ;;  %v1662_v8 = vadd.f32 %v7292_v4, %v1616_v63  ;;  %v1617_v31 = vadd.f32 %v7297_v24, %v1569_v28  ;;  %v7302_v7 = vld [vmem:[#allocation53_spill] sm:$0xff]  ;;  %v7312_v30 = vld [vmem:[#allocation55_spill] sm:$0xff]  ;;  %v1789_v4 = vrot.slane %v3881_v3, 3 }
 0x3ef   : >> { %v1706_v45 = vadd.f32 %v7298_v9, %v1659_v59  ;;  %v1708_v60 = vadd.f32 %v7302_v7, %v1661_v58  ;;  %v7307_v5 = vld [vmem:[#allocation49_spill] sm:$0xff]  ;;  %v7315_v58 = vld [vmem:[#allocation58_spill] sm:$0xff]  ;;  %v1799_v24 = vadd.f32 %v7316_v49, %v1754_v39  ;;  %v7321_v3 = vld [vmem:[#allocation7_spill] sm:$0xff] }
 0x3f0   : >> { %v6624_v26 = vpop.permute.xlu0 %3185  ;;  %v1571_v25 = vadd.f32 %v7294_v43, %v1523_v40  ;;  %v1709_v33 = vadd.f32 %v7299_v16, %v1662_v8  ;;  %v1663_v22 = vadd.f32 %v7304_v51, %v1617_v31  ;;  %v1664_v40 = vadd.f32 %v7307_v5, %v1618_v54  ;;  %v4328_v8 = vld [vmem:[%s4980_s27 + $0x330] sm:$0xff]  ;;  %v7322_v51 = vld [vmem:[#allocation68_spill] sm:$0xff]  ;;  %v7324_v5 = vld [vmem:[#allocation70_spill] sm:$0xff] }
 0x3f1   : >> { %v1753_v0 = vadd.f32 %v7305_v29, %v1706_v45  ;;  %v1755_v34 = vadd.f32 %v7309_v21, %v1708_v60  ;;  %v2149_v50 = vrot.slane %v4328_v8, 1  ;;  %v4329_v31 = vld [vmem:[%s4980_s27 + $0x350] sm:$0xff]  ;;  %v7320_v60 = vld [vmem:[#allocation66_spill] sm:$0xff]  ;;  %v7323_v29 = vld [vmem:[#allocation65_spill] sm:$0xff] }
 0x3f2   : >> { %v6626_v15 = vpop.permute.xlu1 %3191  ;;  %v1619_v12 = vadd.f32 %v7300_v44, %v1571_v25  ;;  %v1756_v63 = vadd.f32 %v7306_v46, %v1709_v33  ;;  %v1710_v59 = vadd.f32 %v7312_v30, %v1663_v22  ;;  %v7314_v25 = vld [vmem:[#allocation57_spill] sm:$0xff]  ;;  %v1711_v19 = vadd.f32 %v7315_v58, %v1664_v40  ;;  %v7318_v33 = vld [vmem:[#allocation8_spill] sm:$0xff]  ;;  %v7319_v54 = vld [vmem:[#allocation63_spill] sm:$0xff] }
 0x3f3   : >> { %v2151_v9 = vrot.slane %v4329_v31, 1  ;;  %v1798_v16 = vadd.f32 %v1778_v2, %v1753_v0  ;;  %v1800_v62 = vadd.f32 %v7321_v3, %v1755_v34  ;;  %v1846_v22 = vadd.f32 %v7322_v51, %v1799_v24  ;;  %v7325_v40 = vld [vmem:[#allocation6_spill] sm:$0xff]  ;;  %v7327_v21 = vld [vmem:[#allocation67_spill] sm:$0xff]  ;;  %v7328_v13 = vld [vmem:[#allocation73_spill] sm:$0xff] }
 0x3f4   : >> { %v6628_v41 = vpop.permute.xlu0 %3189  ;;  %v1665_v36 = vadd.f32 %v7308_v1, %v1619_v12  ;;  %v1757_v45 = vadd.f32 %v7317_v61, %v1710_v59  ;;  %v1801_v44 = vadd.f32 %v7318_v33, %v1756_v63  ;;  %v6715_v12 = vld [vmem:[%s4980_s27 + $0x370] sm:$0xff]  ;;  %v1758_v7 = vadd.f32 %v7319_v54, %v1711_v19  ;;  %v7329_v59 = vld [vmem:[#allocation9_spill] sm:$0xff]  ;;  %v7332_v24 = vld [vmem:[#allocation10_spill] sm:$0xff] }
 0x3f5   : >> { %v2153_v32 = vrot.slane %v6715_v12, 1  ;;  %v1845_v46 = vadd.f32 %v7323_v29, %v1798_v16  ;;  %v7326_v63 = vrot.slane %v7325_v40, 3  ;;  %v1847_v42 = vadd.f32 %v7327_v21, %v1800_v62  ;;  %v7331_v58 = vld [vmem:[#allocation75_spill] sm:$0xff]  ;;  %v7333_v61 = vld [vmem:[#allocation76_spill] sm:$0xff]  ;;  %v7334_v33 = vld [vmem:[#allocation82_spill] sm:$0xff] }
 0x3f6   : >> { %v6631_v23 = vpop.permute.xlu1 %3195  ;;  %v1712_v17 = vadd.f32 %v7314_v25, %v1665_v36  ;;  %v1848_v0 = vadd.f32 %v7324_v5, %v1801_v44  ;;  %v1892_v2 = vadd.f32 %v7328_v13, %v1846_v22  ;;  %v6734_v34 = vsel %vm1432_vm0, %v2149_v50, %v2151_v9  ;;  %v7330_v25 = vld [vmem:[#allocation74_spill] sm:$0xff]  ;;  %v7336_v54 = vld [vmem:[#allocation79_spill] sm:$0xff]  ;;  %v7337_v3 = vld [vmem:[#allocation84_spill] sm:$0xff] }
 0x3f7   : >> { %v1790_v1 = vsel %vm1528_vm2, %v7326_v63, %v1789_v4  ;;  %v6737_v30 = vsel %vm1432_vm0, %v2148_v35, %v2149_v50  ;;  %v1802_v8 = vadd.f32 %v7329_v59, %v1757_v45  ;;  %v6745_v4 = vsel %vm1432_vm0, %v2151_v9, %v2153_v32  ;;  %v7335_v45 = vld [vmem:[#allocation69_spill] sm:$0xff]  ;;  %v4331_v51 = vld [vmem:[%s4980_s27 + $0x390] sm:$0xff]  ;;  %v7339_v29 = vld [vmem:[#allocation72_spill] sm:$0xff] }
 0x3f8   : >> { %v6633_v48 = vpop.permute.xlu0 %3193  ;;  %v1759_v27 = vadd.f32 %v7320_v60, %v1712_v17  ;;  %v1891_v17 = vadd.f32 %v7330_v25, %v1845_v46  ;;  %v1894_v19 = vadd.f32 %v7331_v58, %v1848_v0  ;;  %v1803_v31 = vadd.f32 %v7332_v24, %v1758_v7  ;;  %v7340_v5 = vld [vmem:[#allocation81_spill] sm:$0xff]  ;;  %v7341_v40 = vld [vmem:[#allocation90_spill] sm:$0xff] }
 0x3f9   : >> { %v1893_v16 = vadd.f32 %v7333_v61, %v1847_v42  ;;  %v1939_v50 = vadd.f32 %v7334_v33, %v1892_v2  ;;  %v1849_v44 = vadd.f32 %v7335_v45, %v1802_v8  ;;  %v2155_v9 = vrot.slane %v4331_v51, 1  ;;  %v7343_v42 = vld [vmem:[#allocation92_spill] sm:$0xff]  ;;  %v7344_v2 = vld [vmem:[#allocation94_spill] sm:$0xff]  ;;  %v4332_v8 = vld [vmem:[%s4980_s27 + $0x3b0] sm:$0xff] }
 0x3fa   : >> { %v6643_v52 = vpop.permute.xlu1 %3232  ;;  %v1804_v49 = vadd.f32 %v1790_v1, %v1759_v27  ;;  %v1938_v60 = vadd.f32 %v7336_v54, %v1891_v17  ;;  %v1941_v62 = vadd.f32 %v7337_v3, %v1894_v19  ;;  %v7338_v27 = vld [vmem:[#allocation71_spill] sm:$0xff]  ;;  %v1850_v46 = vadd.f32 %v7339_v29, %v1803_v31  ;;  %v7342_v1 = vld [vmem:[#allocation78_spill] sm:$0xff]  ;;  %v7345_v17 = vld [vmem:[#allocation77_spill] sm:$0xff] }
 0x3fb   : >> { %v1940_v0 = vadd.f32 %v7340_v5, %v1893_v16  ;;  %v1986_v63 = vadd.f32 %v7341_v40, %v1939_v50  ;;  %v1895_v21 = vadd.f32 %v7342_v1, %v1849_v44  ;;  %v2157_v25 = vrot.slane %v4332_v8, 1  ;;  %v7346_v19 = vld [vmem:[#allocation80_spill] sm:$0xff]  ;;  %v7348_v31 = vld [vmem:[#allocation103_spill] sm:$0xff]  ;;  %v7355_v40 = vld [vmem:[#allocation102_spill] sm:$0xff] }
 0x3fc   : >> { %v6647_v56 = vpop.permute.xlu0 %3197  ;;  %v1851_v7 = vadd.f32 %v7338_v27, %v1804_v49  ;;  %v1985_v13 = vadd.f32 %v7343_v42, %v1938_v60  ;;  %v1988_v59 = vadd.f32 %v7344_v2, %v1941_v62  ;;  %v1896_v58 = vadd.f32 %v7345_v17, %v1850_v46  ;;  %v7347_v49 = vld [vmem:[#allocation96_spill] sm:$0xff]  ;;  %v3917_v16 = vld [vmem:[%s4980_s27 + $0x3f0] sm:$0x1]  ;;  %v7352_v60 = vld [vmem:[#allocation105_spill] sm:$0xff] }
 0x3fd   : >> { %v1987_v61 = vadd.f32 %v7347_v49, %v1940_v0  ;;  %v2033_v33 = vadd.f32 %v7348_v31, %v1986_v63  ;;  %v7350_v50 = vld [vmem:[#allocation83_spill] sm:$0xff]  ;;  %v7351_v44 = vld [vmem:[#allocation100_spill] sm:$0xff]  ;;  %v7353_v46 = vld [vmem:[#allocation86_spill] sm:$0xff] }
 0x3fe   : >> { %v6662_v55 = vpop.permute.xlu1 %3236  ;;  %v1897_v24 = vadd.f32 %v7346_v19, %v1851_v7  ;;  %v1942_v54 = vadd.f32 %v7350_v50, %v1895_v21  ;;  %v2032_v3 = vadd.f32 %v7351_v44, %v1985_v13  ;;  %v2035_v51 = vadd.f32 %v7352_v60, %v1988_v59  ;;  %v4333_v62 = vld [vmem:[%s4980_s27 + $0x3d0] sm:$0xff]  ;;  %v7354_v5 = vld [vmem:[#allocation88_spill] sm:$0xff]  ;;  %v7358_v8 = vld [vmem:[#allocation109_spill] sm:$0xff] }
 0x3ff   : >> { %v2159_v27 = vrot.slane %v4333_v62, 1  ;;  %v1943_v0 = vadd.f32 %v7354_v5, %v1896_v58  ;;  %v2034_v63 = vadd.f32 %v7355_v40, %v1987_v61  ;;  %v7356_v1 = vld [vmem:[#allocation108_spill] sm:$0xff]  ;;  %v7357_v2 = vld [vmem:[#allocation99_spill] sm:$0xff]  ;;  %v7359_v17 = vld [vmem:[#allocation110_spill] sm:$0xff]  ;;  %v2161_v19 = vrot.slane %v3917_v16, 1 }
 0x400   : >> { %v6667_v11 = vpop.permute.xlu0 %3234  ;;  %v1944_v7 = vadd.f32 %v7353_v46, %v1897_v24  ;;  %v2080_v42 = vadd.f32 %v7356_v1, %v2033_v33  ;;  %v1989_v21 = vadd.f32 %v7357_v2, %v1942_v54  ;;  %v2079_v13 = vadd.f32 %v7358_v8, %v2032_v3  ;;  %v7360_v49 = vld [vmem:[#allocation97_spill] sm:$0xff]  ;;  %v7362_v24 = vld [vmem:[#allocation111_spill] sm:$0xff]  ;;  %v7363_v58 = vld [vmem:[#allocation118_spill] sm:$0xff] }
 0x401   : >> { %v2082_v59 = vadd.f32 %v7359_v17, %v2035_v51  ;;  %v1990_v31 = vadd.f32 %v7360_v49, %v1943_v0  ;;  %v7361_v50 = vld [vmem:[#allocation101_spill] sm:$0xff]  ;;  %v2081_v60 = vadd.f32 %v7362_v24, %v2034_v63  ;;  %v3940_v61 = vld [vmem:[%s4980_s27 + $0x438] sm:$0xff]  ;;  %v7365_v54 = vld [vmem:[#allocation115_spill] sm:$0xff]  ;;  %v2156_v16 = vsel %vm1432_vm0, %v2153_v32, %v2155_v9 }
 0x402   : >> { %v6680_v6 = vpop.permute.xlu1 %3240  ;;  %v1991_v44 = vadd.f32 %v7361_v50, %v1944_v7  ;;  %v2126_v62 = vadd.f32 %v7363_v58, %v2080_v42  ;;  %v7364_v33 = vld [vmem:[#allocation104_spill] sm:$0xff]  ;;  %v2125_v40 = vadd.f32 %v7365_v54, %v2079_v13  ;;  %v7368_v0 = vld [vmem:[#allocation106_spill] sm:$0xff]  ;;  %v7369_v42 = vld [vmem:[#allocation107_spill] sm:$0xff]  ;;  %v2158_v13 = vsel %vm1432_vm0, %v2155_v9, %v2157_v25 }
 0x403   : >> { %v2036_v5 = vadd.f32 %v7364_v33, %v1989_v21  ;;  %v7366_v3 = vld [vmem:[#allocation120_spill] sm:$0xff]  ;;  %v2037_v2 = vadd.f32 %v7369_v42, %v1990_v31  ;;  %v7370_v8 = vld [vmem:[#allocation117_spill] sm:$0xff]  ;;  %v2160_v12 = vsel %vm1432_vm0, %v2157_v25, %v2159_v27  ;;  %v2162_v32 = vsel %vm1432_vm0, %v2159_v27, %v2161_v19 }
 0x404   : >> { %v6685_v20 = vpop.permute.xlu0 %3238  ;;  %v2128_v1 = vadd.f32 %v7366_v3, %v2082_v59  ;;  %v6800_v51 = vld [vmem:[%s4980_s27 + $0x458] sm:$0xff]  ;;  %v2038_v63 = vadd.f32 %v7368_v0, %v1991_v44  ;;  %v2127_v21 = vadd.f32 %v7370_v8, %v2081_v60  ;;  %v7371_v59 = vld [vmem:[#allocation114_spill] sm:$0xff]  ;;  %v2522_v50 = vrot.slane %v3940_v61, 4  ;;  %v7375_v42 = vld [vmem:[#allocation121_spill] sm:$0xff] }
 0x405   : >> { %v3939_v17 = vld [vmem:[%s4980_s27 + $0x418] sm:$0xf0]  ;;  %v2083_v49 = vadd.f32 %v7371_v59, %v2036_v5  ;;  %v2171_v44 = vadd.f32 %v6734_v34, %v2126_v62  ;;  %v7374_v5 = vld [vmem:[#allocation119_spill] sm:$0xff]  ;;  %v2170_v25 = vadd.f32 %v6737_v30, %v2125_v40  ;;  %v7379_v31 = vld [vmem:[#allocation125_spill] sm:$0xff] }
 0x406   : >> { %v6702_v28 = vpop.permute.xlu1 %3244  ;;  %v7372_v24 = vld [vmem:[#allocation112_spill] sm:$0xff]  ;;  %v2173_v27 = vadd.f32 %v2156_v16, %v2128_v1  ;;  %v2521_v19 = vrot.slane %v3939_v17, 4  ;;  %v7377_v62 = vld [vmem:[#allocation123_spill] sm:$0xff]  ;;  %v2172_v59 = vadd.f32 %v6745_v4, %v2127_v21  ;;  %v7380_v40 = vld [vmem:[#allocation126_spill] sm:$0xff] }
 0x407   : >> { %v2084_v58 = vadd.f32 %v7372_v24, %v2037_v2  ;;  %v7373_v33 = vld [vmem:[#allocation116_spill] sm:$0xff]  ;;  %v2129_v0 = vadd.f32 %v7374_v5, %v2083_v49  ;;  %v7376_v2 = vld [vmem:[#allocation122_spill] sm:$0xff]  ;;  %v2218_v8 = vadd.f32 %v7377_v62, %v2171_v44  ;;  %v7384_v21 = vld [vmem:[#allocation129_spill] sm:$0xff] }
 0x408   : >> { %v6706_v43 = vpop.permute.xlu0 %3242  ;;  %v2085_v54 = vadd.f32 %v7373_v33, %v2038_v63  ;;  %v6817_v3 = vld [vmem:[%s4980_s27 + $0x478] sm:$0xff]  ;;  %v2219_v1 = vadd.f32 %v7380_v40, %v2172_v59  ;;  %v7387_v62 = vld [vmem:[#allocation131_spill] sm:$0xff]  ;;  %v7388_v59 = vld [vmem:[#allocation137_spill] sm:$0xff] }
 0x409   : >> { %7313 = vst [vmem:[#allocation172_spill] sm:$0xff] %v6706_v43  ;;  %v6820_v60 = vld [vmem:[%s4980_s27 + $0x498] sm:$0xff]  ;;  %v2130_v34 = vadd.f32 %v7376_v2, %v2084_v58  ;;  %v2526_v49 = vrot.slane %v6817_v3, 4  ;;  %v2174_v4 = vadd.f32 %v2158_v13, %v2129_v0  ;;  %v6848_v3 = vsel %vm1576_vm3, %v2521_v19, %v2522_v50  ;;  %v7390_v13 = vld [vmem:[#allocation138_spill] sm:$0xff] }
 0x40a   : >> { %v6722_v39 = vpop.permute.xlu1 %3280  ;;  %v2131_v63 = vadd.f32 %v7375_v42, %v2085_v54  ;;  %v7378_v24 = vld [vmem:[#allocation124_spill] sm:$0xff]  ;;  %v7068_v30 = vrot.slane %v6820_v60, 4  ;;  %v7382_v54 = vrot.slane %v6800_v51, 4 }
 0x40b   : >> { %v2217_v33 = vadd.f32 %v7378_v24, %v2170_v25  ;;  %v7381_v16 = vld [vmem:[#allocation132_spill] sm:$0xff]  ;;  %v2175_v42 = vadd.f32 %v2160_v12, %v2130_v34  ;;  %v7393_v12 = vld [vmem:[#allocation130_spill] sm:$0xff] }
 0x40c   : >> { %v6729_v36 = vpop.permute.xlu0 %3278  ;;  %v2265_v17 = vadd.f32 %v7381_v16, %v2218_v8  ;;  %v6841_v58 = vsel %vm1576_vm3, %v2522_v50, %v7382_v54  ;;  %v2176_v2 = vadd.f32 %v2162_v32, %v2131_v63  ;;  %v2266_v8 = vadd.f32 %v7387_v62, %v2219_v1  ;;  %v3944_v40 = vld [vmem:[%s4980_s27 + $0x4b8] sm:$0xff]  ;;  %v7392_v50 = vld [vmem:[#allocation127_spill] sm:$0xff]  ;;  %v7395_v1 = vld [vmem:[#allocation146_spill] sm:$0xff] }
 0x40d   : >> { %v2264_v5 = vadd.f32 %v7384_v21, %v2217_v33  ;;  %v7389_v16 = vld [vmem:[#allocation128_spill] sm:$0xff]  ;;  %v7391_v33 = vld [vmem:[#allocation139_spill] sm:$0xff]  ;;  %v2222_v19 = vadd.f32 %v7392_v50, %v2175_v42 }
 0x40e   : >> { %v6750_v35 = vpop.permute.xlu1 %3284  ;;  %v2312_v24 = vadd.f32 %v7388_v59, %v2265_v17  ;;  %v2221_v54 = vadd.f32 %v7389_v16, %v2174_v4  ;;  %v2223_v32 = vadd.f32 %v7393_v12, %v2176_v2  ;;  %v7394_v63 = vld [vmem:[#allocation140_spill] sm:$0xff]  ;;  %v7397_v4 = vld [vmem:[#allocation133_spill] sm:$0xff]  ;;  %v7398_v59 = vld [vmem:[#allocation143_spill] sm:$0xff] }
 0x40f   : >> { %v2311_v0 = vadd.f32 %v7390_v13, %v2264_v5  ;;  %v2313_v34 = vadd.f32 %v7394_v63, %v2266_v8  ;;  %v7399_v16 = vld [vmem:[#allocation148_spill] sm:$0xff]  ;;  %v7403_v12 = vld [vmem:[#allocation145_spill] sm:$0xff]  ;;  %v7404_v63 = vld [vmem:[#allocation151_spill] sm:$0xff] }
 0x410   : >> { %v6756_v22 = vpop.permute.xlu0 %3282  ;;  %v2358_v17 = vadd.f32 %v7395_v1, %v2312_v24  ;;  %v2268_v5 = vadd.f32 %v7397_v4, %v2221_v54  ;;  %v7402_v50 = vld [vmem:[#allocation136_spill] sm:$0xff]  ;;  %v7407_v4 = vld [vmem:[#allocation153_spill] sm:$0xff] }
 0x411   : >> { %v2269_v2 = vadd.f32 %v7402_v50, %v2222_v19  ;;  %v2359_v8 = vadd.f32 %v7403_v12, %v2313_v34  ;;  %v3946_v1 = vld [vmem:[%s4980_s27 + $0x4f8] sm:$0xf]  ;;  %v7412_v34 = vld [vmem:[#allocation147_spill] sm:$0xff]  ;;  %v7413_v12 = vld [vmem:[#allocation157_spill] sm:$0xff] }
 0x412   : >> { %v6771_v45 = vpop.permute.xlu1 %3288  ;;  %v2405_v24 = vadd.f32 %v7404_v63, %v2358_v17  ;;  %v7406_v43 = vld [vmem:[#allocation152_spill] sm:$0xff] }
 0x413   : >> { %7349 = vst [vmem:[#allocation174_spill] sm:$0xff] %v6771_v45  ;;  %v2220_v45 = vadd.f32 %v7379_v31, %v2173_v27  ;;  %v7385_v31 = vld [vmem:[#allocation134_spill] sm:$0xff] }
 0x414   : >> { %v6777_v29 = vpop.permute.xlu0 %3286 }
 0x415   : >> { %v2267_v25 = vadd.f32 %v7385_v31, %v2220_v45  ;;  %v2529_v45 = vsel %vm1576_vm3, %v2526_v49, %v7068_v30  ;;  %v3945_v31 = vld [vmem:[%s4980_s27 + $0x4d8] sm:$0xff] }
 0x416   : >> { %v6791_v46 = vpop.permute.xlu1 %3325 }
 0x417   : >> { %v2314_v21 = vadd.f32 %v7391_v33, %v2267_v25  ;;  %v2357_v25 = vadd.f32 %v7398_v59, %v2311_v0  ;;  %v2530_v33 = vrot.slane %v3944_v40, 4  ;;  %v2532_v59 = vrot.slane %v3945_v31, 4 }
 0x418   : >> { %v6802_v7 = vpop.permute.xlu0 %3290 }
 0x419   : >> { %7367 = vst [vmem:[#allocation113_spill] sm:$0xff] %v6802_v7  ;;  %v2360_v13 = vadd.f32 %v7399_v16, %v2314_v21  ;;  %v7401_v7 = vld [vmem:[#allocation135_spill] sm:$0xff]  ;;  %v2404_v54 = vadd.f32 %v7406_v43, %v2357_v25  ;;  %v7408_v21 = vld [vmem:[#allocation141_spill] sm:$0xff]  ;;  %v7409_v16 = vld [vmem:[#allocation144_spill] sm:$0xff]  ;;  %v2534_v43 = vrot.slane %v3946_v1, 4  ;;  %v3206_v1 = vadd.f32 %v6624_v26, %v6602_v18 }
 0x41a   : >> { %v6822_v9 = vpop.permute.xlu1 %3329  ;;  %v2270_v42 = vadd.f32 %v7401_v7, %v2223_v32  ;;  %v2316_v40 = vadd.f32 %v7408_v21, %v2269_v2  ;;  %v7411_v32 = vld [vmem:[#allocation160_spill] sm:$0xff]  ;;  %v7417_v21 = vld [vmem:[#allocation159_spill] sm:$0xff] }
 0x41b   : >> { %v2407_v0 = vadd.f32 %v7407_v4, %v2360_v13  ;;  %v2452_v19 = vadd.f32 %v7411_v32, %v2405_v24  ;;  %v2451_v63 = vadd.f32 %v7413_v12, %v2404_v54  ;;  %v7415_v13 = vld [vmem:[#allocation149_spill] sm:$0xff]  ;;  %v7416_v4 = vld [vmem:[#allocation150_spill] sm:$0xff]  ;;  %v7420_v32 = vld [vmem:[#allocation167_spill] sm:$0xff]  ;;  %v7421_v54 = vrot.slane %v6800_v51, 4 }
 0x41c   : >> { %v6826_v61 = vpop.permute.xlu0 %3327  ;;  %v2362_v2 = vadd.f32 %v7416_v4, %v2316_v40  ;;  %v7423_v40 = vld [vmem:[#allocation156_spill] sm:$0xff]  ;;  %v7424_v12 = vld [vmem:[#allocation158_spill] sm:$0xff]  ;;  %v7426_v51 = vrot.slane %v6820_v60, 4  ;;  %v6916_v18 = vsel %vm1576_vm3, %v2532_v59, %v2534_v43  ;;  %v3253_v26 = vadd.f32 %v6643_v52, %v3206_v1 }
 0x41d   : >> { %v3995_v4 = vld [vmem:[%s4980_s27 + $0x538] sm:$0xff]  ;;  %v3208_v52 = vadd.f32 %v6628_v41, %v6606_v53 }
 0x41e   : >> { %v6843_v44 = vpop.permute.xlu1 %3333  ;;  %v3299_v1 = vadd.f32 %v6729_v36, %v3253_v26  ;;  %v7430_v36 = vld [vmem:[#allocation169_spill] sm:$0xff] }
 0x41f   : >> { %7383 = vst [vmem:[#allocation173_spill] sm:$0xff] %v6843_v44  ;;  %v7410_v44 = vld [vmem:[#allocation154_spill] sm:$0xff] }
 0x420   : >> { %v6850_v27 = vpop.permute.xlu0 %3331  ;;  %v2406_v7 = vadd.f32 %v7410_v44, %v2359_v8  ;;  %v7419_v8 = vld [vmem:[#allocation166_spill] sm:$0xff] }
 0x421   : >> { %7386 = vst [vmem:[#allocation175_spill] sm:$0xff] %v6850_v27  ;;  %v7405_v27 = vld [vmem:[#allocation142_spill] sm:$0xff]  ;;  %v2498_v24 = vadd.f32 %v7419_v8, %v2451_v63  ;;  %v7429_v8 = vld [vmem:[#allocation164_spill] sm:$0xff] }
 0x422   : >> { %v6866_v62 = vpop.permute.xlu1 %3337 }
 0x423   : >> { %7396 = vst [vmem:[#allocation179_spill] sm:$0xff] %v6866_v62  ;;  %v2315_v62 = vadd.f32 %v7405_v27, %v2268_v5  ;;  %v7414_v27 = vld [vmem:[#allocation162_spill] sm:$0xff] }
 0x424   : >> { %v6871_v30 = vpop.permute.xlu0 %3335  ;;  %v2454_v5 = vadd.f32 %v7414_v27, %v2407_v0  ;;  %v2527_v0 = vsel %vm1576_vm3, %v7421_v54, %v2526_v49  ;;  %v7425_v27 = vld [vmem:[#allocation168_spill] sm:$0xff]  ;;  %v6913_v49 = vsel %vm1576_vm3, %v7426_v51, %v2530_v33 }
 0x425   : >> { %7400 = vst [vmem:[#allocation31_spill] sm:$0xff] %v6871_v30  ;;  %v2317_v30 = vadd.f32 %v7409_v16, %v2270_v42  ;;  %v2361_v17 = vadd.f32 %v7412_v34, %v2315_v62  ;;  %v2453_v42 = vadd.f32 %v7417_v21, %v2406_v7  ;;  %v7418_v16 = vld [vmem:[#allocation165_spill] sm:$0xff]  ;;  %v3997_v54 = vld [vmem:[%s4980_s27 + $0x578] sm:$0xff] }
 0x426   : >> { %v6885_v50 = vpop.permute.xlu1 %3374  ;;  %v2499_v44 = vadd.f32 %v7418_v16, %v2452_v19  ;;  %v2501_v62 = vadd.f32 %v7420_v32, %v2454_v5  ;;  %v6908_v5 = vsel %vm1576_vm3, %v2530_v33, %v2532_v59  ;;  %v3996_v32 = vld [vmem:[%s4980_s27 + $0x558] sm:$0xff]  ;;  %v2543_v59 = vadd.f32 %v6848_v3, %v2498_v24 }
 0x427   : >> { %v2363_v31 = vadd.f32 %v7415_v13, %v2317_v30  ;;  %v7422_v30 = vld [vmem:[#allocation155_spill] sm:$0xff]  ;;  %v2408_v7 = vadd.f32 %v7423_v40, %v2361_v17  ;;  %v2500_v13 = vadd.f32 %v7425_v27, %v2453_v42  ;;  %v6939_v40 = vld [vmem:[%s4980_s27 + $0x5b8] sm:$0xff]  ;;  %v3255_v3 = vadd.f32 %v6662_v55, %v3208_v52 }
 0x428   : >> { %v3373_v25 = vpop.permute.xlu0 %3372  ;;  %v2409_v34 = vadd.f32 %v7422_v30, %v2362_v2  ;;  %v7427_v2 = vld [vmem:[#allocation161_spill] sm:$0xff]  ;;  %v7428_v42 = vld [vmem:[#allocation163_spill] sm:$0xff]  ;;  %v6927_v33 = vadd.f32 %v6841_v58, %v2499_v44  ;;  %v6932_v43 = vadd.f32 %v2529_v45, %v2501_v62  ;;  %v3998_v30 = vld [vmem:[%s4980_s27 + $0x598] sm:$0xff]  ;;  %v3207_v58 = vadd.f32 %v6622_v47, %v6608_v57 }
 0x429   : >> { %v2410_v19 = vadd.f32 %v7424_v12, %v2363_v31  ;;  %v3994_v31 = vld [vmem:[%s4980_s27 + $0x518] sm:$0xf0]  ;;  %v2455_v21 = vadd.f32 %v7427_v2, %v2408_v7  ;;  %v6941_v7 = vadd.f32 %v2527_v0, %v2500_v13  ;;  %v3464_v12 = vrot.slane %v3995_v4, 4  ;;  %v7431_v57 = vld [vmem:[#allocation170_spill] sm:$0xff] }
 0x42a   : >> { %v6905_v63 = vpop.permute.xlu1 %3378  ;;  %v2456_v60 = vadd.f32 %v7429_v8, %v2409_v34  ;;  %v3463_v34 = vrot.slane %v3994_v31, 4  ;;  %v3346_v45 = vadd.f32 %v6791_v46, %v3299_v1  ;;  %v3466_v53 = vrot.slane %v3996_v32, 4  ;;  %v4000_v8 = vld [vmem:[%s4980_s27 + $0x5d8] sm:$0xff]  ;;  %v6982_v32 = vld [vmem:[%s7048_s2] ss:$0 sm:$0xff] }
 0x42b   : >> { %v6923_v16 = vadd.f32 %v7428_v42, %v2410_v19  ;;  %v3468_v41 = vrot.slane %v3997_v54, 4  ;;  %v3254_v0 = vadd.f32 %v6667_v11, %v3207_v58  ;;  %v3470_v19 = vrot.slane %v3998_v30, 4  ;;  %v7434_v58 = vld [vmem:[#allocation175_spill] sm:$0xff] }
 0x42c   : >> { %v3377_v17 = vpop.permute.xlu0 %3376  ;;  %v6950_v62 = vadd.f32 %v7430_v36, %v2456_v60  ;;  %v3472_v27 = vrot.slane %v6939_v40, 4  ;;  %v2502_v47 = vadd.f32 %v7431_v57, %v2455_v21  ;;  %v3210_v13 = vadd.f32 %v6633_v48, %v6612_v10 }
 0x42d   : >> { %v3301_v55 = vadd.f32 %v6756_v22, %v3255_v3  ;;  %v3393_v51 = vadd.f32 %v3373_v25, %v3346_v45  ;;  %v3209_v46 = vadd.f32 %v6626_v15, %v6614_v38  ;;  %v3300_v26 = vadd.f32 %v6722_v39, %v3254_v0  ;;  %v7435_v3 = vld [vmem:[#allocation113_spill] sm:$0xff]  ;;  %v7436_v0 = vld [vmem:[#allocation174_spill] sm:$0xff] }
 0x42e   : >> { %v6945_v44 = vpop.permute.xlu1 %3382  ;;  %v3465_v31 = vsel %vm1576_vm3, %v3463_v34, %v3464_v12  ;;  %v3257_v4 = vadd.f32 %v6680_v6, %v3210_v13  ;;  %v3469_v10 = vsel %vm1576_vm3, %v3466_v53, %v3468_v41  ;;  %v3467_v38 = vsel %vm1576_vm3, %v3464_v12, %v3466_v53 }
 0x42f   : >> { %v3348_v2 = vadd.f32 %v6822_v9, %v3301_v55  ;;  %v3256_v48 = vadd.f32 %v6685_v20, %v3209_v46  ;;  %v3347_v22 = vadd.f32 %v6826_v61, %v3300_v26  ;;  %v3473_v15 = vsel %vm1576_vm3, %v3470_v19, %v3472_v27  ;;  %v7437_v55 = vld [vmem:[#allocation179_spill] sm:$0xff] }
 0x430   : >> { %v3381_v24 = vpop.permute.xlu0 %3380  ;;  %v3212_v39 = vadd.f32 %v6647_v56, %v6618_v37  ;;  %v3303_v6 = vadd.f32 %v6777_v29, %v3257_v4  ;;  %v3211_v20 = vadd.f32 %v6631_v23, %v6620_v14  ;;  %v3471_v37 = vsel %vm1576_vm3, %v3468_v41, %v3470_v19  ;;  %v7432_v29 = vld [vmem:[#allocation173_spill] sm:$0xff]  ;;  %v4001_v14 = vld [vmem:[%s4980_s27 + $0x5f8] sm:$0xf] }
 0x431   : >> { %v3395_v9 = vadd.f32 %v3377_v17, %v3348_v2  ;;  %v3302_v61 = vadd.f32 %v6750_v35, %v3256_v48  ;;  %v3394_v60 = vadd.f32 %v6885_v50, %v3347_v22  ;;  %v7433_v23 = vld [vmem:[#allocation172_spill] sm:$0xff]  ;;  %v3474_v12 = vrot.slane %v4000_v8, 4  ;;  %v7439_v48 = vld [vmem:[#allocation171_spill] sm:$0xff] }
 0x432   : >> { %v3420_v11 = vpop.permute.xlu1 %3419  ;;  %v3259_v56 = vadd.f32 %v6702_v28, %v3212_v39  ;;  %v3350_v17 = vadd.f32 %v7432_v29, %v3303_v6  ;;  %v3258_v35 = vadd.f32 %v7433_v23, %v3211_v20  ;;  %v3476_v13 = vrot.slane %v4001_v14, 4 }
 0x433   : >> { %v3440_v21 = vadd.f32 %v3420_v11, %v3393_v51  ;;  %v3349_v50 = vadd.f32 %v7434_v58, %v3302_v61  ;;  %v2547_v4 = vadd.f32 %v6913_v49, %v2502_v47 }
 0x434   : >> { %v3385_v42 = vpop.permute.xlu0 %3384  ;;  %v3305_v45 = vadd.f32 %v7435_v3, %v3259_v56  ;;  %v3397_v53 = vadd.f32 %v3381_v24, %v3350_v17  ;;  %v3304_v28 = vadd.f32 %v7436_v0, %v3258_v35  ;;  %v7438_v24 = vld [vmem:[#allocation31_spill] sm:$0xff]  ;;  %v3477_v49 = vsel %vm1576_vm3, %v3474_v12, %v3476_v13 }
 0x435   : >> { %v3485_v25 = vadd.f32 %v3465_v31, %v3440_v21  ;;  %v3396_v19 = vadd.f32 %v6905_v63, %v3349_v50  ;;  %v2504_v63 = vadd.f32 %v7439_v48, %v6923_v16  ;;  %v3475_v16 = vsel %vm1576_vm3, %v3472_v27, %v3474_v12 }
 0x436   : >> { %v3424_v54 = vpop.permute.xlu1 %3423  ;;  %v3352_v51 = vadd.f32 %v7437_v55, %v3305_v45  ;;  %v3351_v2 = vadd.f32 %v7438_v24, %v3304_v28 }
 0x437   : >> { %v3492_v52 = vmax.f32 %v2543_v59, %v3485_v25  ;;  %v3442_v1 = vadd.f32 %v3424_v54, %v3395_v9 }
 0x438   : >> { %v3422_v30 = vpop.permute.xlu0 %3421  ;;  %v3399_v22 = vadd.f32 %v3385_v42, %v3352_v51 }
 0x439   : >> { %v3441_v34 = vadd.f32 %v3422_v30, %v3394_v60  ;;  %v3506_v36 = vadd.f32 %v6982_v32, %v3492_v52  ;;  %v3487_v41 = vadd.f32 %v3469_v10, %v3442_v1 }
 0x43a   : >> { %v3428_v57 = vpop.permute.xlu1 %3427 }
 0x43b   : >> { %v3486_v59 = vadd.f32 %v3467_v38, %v3441_v34  ;;  %v3513_v46 = vmax.f32 %v3506_v36, 0.0  ;;  %v3494_v26 = vmax.f32 %v6941_v7, %v3487_v41  ;;  %v3444_v31 = vadd.f32 %v3428_v57, %v3397_v53 }
 0x43c   : >> { %v3426_v11 = vpop.permute.xlu0 %3425  ;;  %v3398_v7 = vadd.f32 %v6945_v44, %v3351_v2  ;;  %v2549_v44 = vadd.f32 %v6916_v18, %v2504_v63 }
 0x43d   : >> { %v3493_v21 = vmax.f32 %v6927_v33, %v3486_v59  ;;  %v3443_v10 = vadd.f32 %v3426_v11, %v3396_v19  ;;  %3521 = vst.msk [vmem:[#allocation3] sm:$0xff] %vm3520_vm4, %v3513_v46  ;;  %v3508_v38 = vadd.f32 %v6982_v32, %v3494_v26  ;;  %v3489_v39 = vadd.f32 %v3473_v15, %v3444_v31 }
 0x43e   : >> { %v3432_v47 = vpop.permute.xlu1 %3431 }
 0x43f   : >> { %v3507_v6 = vadd.f32 %v6982_v32, %v3493_v21  ;;  %v3488_v9 = vadd.f32 %v3471_v37, %v3443_v10  ;;  %v3515_v25 = vmax.f32 %v3508_v38, 0.0  ;;  %v3496_v33 = vmax.f32 %v2547_v4, %v3489_v39 }
 0x440   : >> { %v3446_v8 = vadd.f32 %v3432_v47, %v3399_v22  ;;  %v3430_v20 = vpop.permute.xlu0 %3429  ;;  %v2548_v37 = vadd.f32 %v6908_v5, %v6950_v62 }
 0x441   : >> { %v3514_v42 = vmax.f32 %v3507_v6, 0.0  ;;  %v3495_v61 = vmax.f32 %v6932_v43, %v3488_v9  ;;  %v3445_v15 = vadd.f32 %v3430_v20, %v3398_v7  ;;  %3523 = vst.msk [vmem:[#allocation3 + $0x10] sm:$0xff] %vm3520_vm4, %v3515_v25  ;;  %v3510_v60 = vadd.f32 %v6982_v32, %v3496_v33 }
 0x442   : >> { %v3491_v54 = vadd.f32 %v3477_v49, %v3446_v8 }
 0x443   : >> { %3522 = vst.msk [vmem:[#allocation3 + $0x8] sm:$0xff] %vm3520_vm4, %v3514_v42  ;;  %v3509_v40 = vadd.f32 %v6982_v32, %v3495_v61  ;;  %v3490_v27 = vadd.f32 %v3475_v16, %v3445_v15  ;;  %v3517_v56 = vmax.f32 %v3510_v60, 0.0 }
 0x444   : >> { %v3498_v43 = vmax.f32 %v2549_v44, %v3491_v54 }
 0x445   : >> { %v3516_v29 = vmax.f32 %v3509_v40, 0.0  ;;  %v3497_v17 = vmax.f32 %v2548_v37, %v3490_v27  ;;  %3525 = vst.msk [vmem:[#allocation3 + $0x20] sm:$0xff] %vm3520_vm4, %v3517_v56 }
 0x446   : >> { %v3512_v18 = vadd.f32 %v6982_v32, %v3498_v43 }
 0x447   : >> { %3524 = vst.msk [vmem:[#allocation3 + $0x18] sm:$0xff] %vm3520_vm4, %v3516_v29  ;;  %v3511_v52 = vadd.f32 %v6982_v32, %v3497_v17 }
 0x448   : >> { %v3519_v1 = vmax.f32 %v3512_v18, 0.0 }
 0x449   : >> { %v3518_v5 = vmax.f32 %v3511_v52, 0.0 }
 0x44a   : >> { %v3528_v62 = vld [vmem:[#allocation3] ss:$2 sm:$0xff]  ;;  %v3536_v30 = vld [vmem:[#allocation3 + $0x1] ss:$2 sm:$0xff]  ;;  %3527 = vst.msk [vmem:[#allocation3 + $0x30] sm:$0xff] %vm3520_vm4, %v3519_v1 }
 0x44b   : >> { %v3543_v14 = vmax.f32 %v3528_v62, %v3536_v30  ;;  %3526 = vst.msk [vmem:[#allocation3 + $0x28] sm:$0xff] %vm3520_vm4, %v3518_v5 }
 0x44d   : >> { %v4020_v23 = vpack.c.bf16 %v3543_v14, %v3543_v14 }
 0x44e   : >> { %v3530_v35 = vld [vmem:[#allocation3 + $0x10] ss:$2 sm:$0xff]  ;;  %v3538_v58 = vld [vmem:[#allocation3 + $0x11] ss:$2 sm:$0xff] }
 0x44f   : >> { %3567 = vst.msk [vmem:[%s3565_s9] sm:$0xf] %vm3566_vm5, %v4020_v23  ;;  %v3544_v50 = vmax.f32 %v3530_v35, %v3538_v58 }
 0x451   : >> { %v4021_v34 = vpack.c.bf16 %v3544_v50, %v3544_v50  ;;  %v3534_v32 = vld [vmem:[#allocation3 + $0x30] ss:$2 sm:$0xf]  ;;  %v3542_v12 = vld [vmem:[#allocation3 + $0x31] ss:$2 sm:$0xf] }
 0x452   : >> { %v3546_v3 = vmax.f32 %v3534_v32, %v3542_v12  ;;  %v3532_v45 = vld [vmem:[#allocation3 + $0x20] ss:$2 sm:$0xff]  ;;  %v3540_v53 = vld [vmem:[#allocation3 + $0x21] ss:$2 sm:$0xff] }
 0x453   : >> { %3568 = vst.msk [vmem:[%s3565_s9 + $0x4] sm:$0xf] %vm3566_vm5, %v4021_v34  ;;  %v3545_v36 = vmax.f32 %v3532_v45, %v3540_v53  ;;  %1402 = sbr.rel (!%p1400_p8) target bundleno = 377 (0x179), region = 103 }
 0x454   : >> { %v4023_v41 = vpack.c.bf16 %v3546_v3, %v3546_v3 }
 0x455   : >> { %v4022_v0 = vpack.c.bf16 %v3545_v36, %v3545_v36 }
 0x456   : >> { %3571 = vst.msk [vmem:[%s3565_s9 + $0xc] sm:$0x3] %vm3570_vm6, %v4023_v41 }
 0x457   : >> { %3569 = vst.msk [vmem:[%s3565_s9 + $0x8] sm:$0xf] %vm3566_vm5, %v4022_v0 }
 0x458 PF: > { %s13_s16 = sadd.s32 1, %s4380_s16   ;;  %s7440_s12 = smov %s4372_s14 }
 0x459   : > { %p10_p9 = scmp.ge.s32.totalorder %s13_s16, 6   ;;  %s7441_s13 = smov %s4376_s15 }
 0x45a   : > { %s7442_s14 = smov %s7445_s17  ;;  %s7443_s15 = smov %s7449_s18 }
 0x45b   :  { %12 = sbr.rel (!%p10_p9) target bundleno = 3 (0x3), region = 114 }

// kernel: forward.6
= control target key start
LH: loop header
LB: loop body
LE: loop exit
PB: predicated region body
PF: predicated region fallthrough
CT: control target
= control target key end

     0   :  { %s1594_s15 = smov 0   ;;  %s1596_s16 = smov 0   ;;  %s1978_s0 = inlined_call_operand.vmem [shape: bf16[2,24,12,512], index: 0, kind: input, shape index: {}]   ;;  %s1979_s1 = inlined_call_operand.vmem [shape: bf16[2,24,12,512], index: 1, kind: input, shape index: {}]   ;;  %s1980_s2 = inlined_call_operand.vmem [shape: bf16[512,32], index: 2, kind: input, shape index: {}]   ;;  %s1981_s3 = inlined_call_operand.vmem [shape: f32[1,32], index: 3, kind: input, shape index: {}]   ;;  %s1982_s4 = inlined_call_operand.vmem [shape: bf16[2,12,12,32], index: 4, kind: output, shape index: {}]  }
   0x1   :  { %s1598_s17 = smov 0   ;;  %s1600_s18 = smov 0  }
   0x2   :  { %s1602_s19 = smov 0  }
   0x3 LB: > { %s23_s20 = sadd.s32 1, %s1555_s17  ;;  %s26_s21 = sadd.s32 1, %s1559_s18  ;;  %s1563_s19 = sphi %s1602_s19, %s14_s19   ;;  %s1559_s18 = sphi %s1600_s18, %s1986_s18   ;;  %s1555_s17 = sphi %s1598_s17, %s1985_s17   ;;  %s1551_s16 = sphi %s1596_s16, %s1984_s16   ;;  %s1547_s15 = sphi %s1594_s15, %s1983_s15  }
   0x4   : > { %p24_p0 = scmp.ge.s32.totalorder %s23_s20, 2  ;;  %p1154_p1 = scmp.ge.s32.totalorder %s1563_s19, 1 }
   0x5   : > { %p202_p2 = scmp.lt.s32.totalorder %s1563_s19, 5 }
   0x6   : > { %s1988_s20 = smov (%p24_p0, %s23_s20), 0  ;;  %s1990_s21 = smov (!%p24_p0, %s26_s21), %s1559_s18 }
   0x7   : > { %p203_p3 = pnand %p1154_p1, %p202_p2  ;;  %p28_p4 = scmp.ge.s32.totalorder %s1990_s21, 2 }
   0x8   : > { %s248_s22 = smul.u32 (!%p203_p3), 12, %s1547_s15  ;;  %p249_p5 = scmp.lt.s32.totalorder (!%p203_p3), %s1551_s16, 1 }
   0x9   : > { %s1992_s21 = smov (%p28_p4, %s1990_s21), 0  ;;  %206 = sbr.rel (%p203_p3) target bundleno = 367 (0x16f), region = 36 }
   0xa   : > { %s270_s23 = smul.u32 (!%p203_p3), 6, %s1547_s15  ;;  %p251_p6 = scmp.lt.s32.totalorder (!%p203_p3), %s248_s22, 23 }
   0xb   : > { %s1639_s15 = smov (!%p203_p3), 0  }
   0xc   : > { %p273_p7 = scmp.lt.s32.totalorder (!%p203_p3), %s270_s23, 11 }
   0xe   : > { %s1994_s16 = smov (!%p249_p5, %s1551_s16), 1  ;;  %s1996_s22 = smov (!%p251_p6, %s248_s22), 23 }
   0xf   : > { %s1415_s24 = smul.u32 192, %s1994_s16  ;;  %s1998_s23 = smov (!%p273_p7, %s270_s23), 11 }
  0x10   : > { %s1155_s25 = sshll.u32 %s1996_s22, 3  ;;  %s1416_s26 = smul.u32 24, %s1994_s16 }
  0x11   : > { %s255_s27 = sadd.s32 %s1415_s24, %s1155_s25  ;;  %s1159_s28 = sshll.u32 %s1998_s23, 1 }
  0x12   : > { %s1156_s29 = sshll.u32 %s255_s27, 2  ;;  %s277_s30 = sadd.s32 %s1416_s26, %s1159_s28 }
  0x13   : > { %s1627_s7 = scalar_lea.vmem %s1978_s0, %s1156_s29  ;;  %s1632_s10 = scalar_lea.vmem %s1979_s1, %s1156_s29 }
  0x14   : > { %s1160_s11 = sshll.u32 %s277_s30, 2 }
  0x15   : > { %s1637_s14 = scalar_lea.vmem %s1982_s4, %s1160_s11 }
  0x16 LB: >> { %v1647_v0 = vld [vmem:[%s1980_s2 + $0x78] sm:$0xff]   ;;  %v1670_v4 = vld [vmem:[%s1980_s2 + $0x70] sm:$0xff]   ;;  %v1694_v8 = vld [vmem:[%s1980_s2 + $0x68] sm:$0xff]   ;;  %s1232_s24 = sshll.u32 %s1567_s15, 6  ;;  %s1238_s22 = sshll.u32 %s1567_s15, 3  ;;  %vm1007_vm0 = vcmask 257024   ;;  %s1567_s15 = sphi %s1639_s15, %s287_s15  }
  0x17   : >> { %v1652_v1 = vld [vmem:[%s1980_s2 + $0xf8] sm:$0xff]   ;;  %1239 = vmatprep.subr.bf16.mxu0 %v1647_v0  ;;  %v1676_v5 = vld [vmem:[%s1980_s2 + $0xf0] sm:$0xff]   ;;  %v1700_v9 = vld [vmem:[%s1980_s2 + $0xe8] sm:$0xff]   ;;  %s1824_s5 = scalar_lea.vmem %s1627_s7, %s1232_s24  ;;  %s1843_s12 = scalar_lea.vmem %s1632_s10, %s1232_s24  ;;  %vm1009_vm1 = vcmask 254976  }
  0x18   : >> { %v1658_v2 = vld [vmem:[%s1980_s2 + $0x38] sm:$0xff]   ;;  %1261 = vmatprep.subr.bf16.mxu1 %v1652_v1  ;;  %v1682_v6 = vld [vmem:[%s1980_s2 + $0x30] sm:$0xff]   ;;  %v1706_v10 = vld [vmem:[%s1980_s2 + $0x28] sm:$0xff]   ;;  %s1006_s23 = scalar_lea.vmem %s1637_s14, %s1238_s22  ;;  %s287_s15 = sadd.s32 1, %s1567_s15  }
  0x19   : >> { %v1664_v3 = vld [vmem:[%s1980_s2 + $0xb8] sm:$0xff]   ;;  %1240 = vmatpush3.bf16.msra.mxu0 %v1658_v2  ;;  %v1688_v7 = vld [vmem:[%s1980_s2 + $0xb0] sm:$0xff]   ;;  %v1712_v11 = vld [vmem:[%s1980_s2 + $0xa8] sm:$0xff]   ;;  %p284_p8 = scmp.ge.s32.totalorder %s287_s15, 6  }
  0x1a   : >> { %1262 = vmatpush3.bf16.msra.mxu1 %v1664_v3  ;;  %1241 = vmatprep.subr.bf16.mxu0 %v1670_v4  ;;  %v1718_v12 = vld [vmem:[%s1980_s2 + $0x60] sm:$0xff]   ;;  %v1742_v16 = vld [vmem:[%s1980_s2 + $0x58] sm:$0xff]   ;;  %v1766_v20 = vld [vmem:[%s1980_s2 + $0x50] sm:$0xff]  }
  0x1b   : >> { %1263 = vmatprep.subr.bf16.mxu1 %v1676_v5  ;;  %v1724_v13 = vld [vmem:[%s1980_s2 + $0xe0] sm:$0xff]   ;;  %v1748_v17 = vld [vmem:[%s1980_s2 + $0xd8] sm:$0xff]   ;;  %v1772_v21 = vld [vmem:[%s1980_s2 + $0xd0] sm:$0xff]  }
  0x1c   : >> { %v1730_v14 = vld [vmem:[%s1980_s2 + $0x20] sm:$0xff]   ;;  %v1754_v18 = vld [vmem:[%s1980_s2 + $0x18] sm:$0xff]   ;;  %v1778_v22 = vld [vmem:[%s1980_s2 + $0x10] sm:$0xff]  }
  0x1d   : >> { %1242 = vmatpush3.bf16.msra.mxu0 %v1682_v6  ;;  %v1736_v15 = vld [vmem:[%s1980_s2 + $0xa0] sm:$0xff]   ;;  %v1760_v19 = vld [vmem:[%s1980_s2 + $0x98] sm:$0xff]   ;;  %v1784_v23 = vld [vmem:[%s1980_s2 + $0x90] sm:$0xff]  }
  0x1e   : >> { %1264 = vmatpush3.bf16.msra.mxu1 %v1688_v7  ;;  %1243 = vmatprep.subr.bf16.mxu0 %v1694_v8  ;;  %v1790_v24 = vld [vmem:[%s1980_s2 + $0x48] sm:$0xff]   ;;  %v1815_v28 = vld [vmem:[%s1980_s2 + $0x40] sm:$0xff]  }
  0x1f   : >> { %1265 = vmatprep.subr.bf16.mxu1 %v1700_v9  ;;  %v1796_v25 = vld [vmem:[%s1980_s2 + $0xc8] sm:$0xff]   ;;  %v1821_v29 = vld [vmem:[%s1980_s2 + $0xc0] sm:$0xff]  }
  0x20   : >> { %v1802_v26 = vld [vmem:[%s1980_s2 + $0x8] sm:$0xff]   ;;  %v1830_v30 = vld [vmem:[%s1980_s2] sm:$0xff]  }
  0x21   : >> { %1244 = vmatpush3.bf16.msra.mxu0 %v1706_v10  ;;  %v1809_v27 = vld [vmem:[%s1980_s2 + $0x88] sm:$0xff]   ;;  %v1836_v31 = vld [vmem:[%s1980_s2 + $0x80] sm:$0xff]  }
  0x22   : >> { %1266 = vmatpush3.bf16.msra.mxu1 %v1712_v11  ;;  %1245 = vmatprep.subr.bf16.mxu0 %v1718_v12  ;;  %v1497_v32 = vld [vmem:[%s1824_s5] ss:$16 sps:$4 sm:$0x3f]   ;;  %v1499_v33 = vld [vmem:[%s1824_s5 + $0x4] ss:$16 sps:$4 sm:$0x3f]  }
  0x23   : >> { %1267 = vmatprep.subr.bf16.mxu1 %v1724_v13  ;;  %v1500_v34 = vld [vmem:[%s1824_s5 + $0x8] ss:$16 sps:$4 sm:$0x3f]   ;;  %v1502_v35 = vld [vmem:[%s1824_s5 + $0xc] ss:$16 sps:$4 sm:$0x3f]   ;;  %604 = vmatprep.mubr.bf16.mxu0 %v1499_v33 }
  0x24   : >> { %645 = vmatprep.mubr.bf16.mxu1 %v1502_v35  ;;  %v1505_v36 = vld [vmem:[%s1843_s12 + $0x4] ss:$16 sps:$4 sm:$0x3f]   ;;  %v1508_v37 = vld [vmem:[%s1843_s12 + $0xc] ss:$16 sps:$4 sm:$0x3f]  }
  0x25   : >> { %1246 = vmatpush3.bf16.msra.mxu0 %v1730_v14  ;;  %v1503_v38 = vld [vmem:[%s1843_s12] ss:$16 sps:$4 sm:$0x3f]   ;;  %v1506_v39 = vld [vmem:[%s1843_s12 + $0x8] ss:$16 sps:$4 sm:$0x3f]  }
  0x26   : >> { %1268 = vmatpush3.bf16.msra.mxu1 %v1736_v15  ;;  %1247 = vmatprep.subr.bf16.mxu0 %v1742_v16  ;;  %v1511_v40 = vld [vmem:[%s1824_s5 + $0x24] ss:$16 sps:$4 sm:$0x3f]   ;;  %v1514_v41 = vld [vmem:[%s1824_s5 + $0x2c] ss:$16 sps:$4 sm:$0x3f]  }
  0x27   : >> { %1269 = vmatprep.subr.bf16.mxu1 %v1748_v17  ;;  %v1509_v42 = vld [vmem:[%s1824_s5 + $0x20] ss:$16 sps:$4 sm:$0x3f]   ;;  %v1512_v43 = vld [vmem:[%s1824_s5 + $0x28] ss:$16 sps:$4 sm:$0x3f]  }
  0x28   : >> { %v1517_v44 = vld [vmem:[%s1843_s12 + $0x24] ss:$16 sps:$4 sm:$0x3f]   ;;  %v1520_v45 = vld [vmem:[%s1843_s12 + $0x2c] ss:$16 sps:$4 sm:$0x3f]  }
  0x29   : >> { %1248 = vmatpush3.bf16.msra.mxu0 %v1754_v18  ;;  %v1515_v46 = vld [vmem:[%s1843_s12 + $0x20] ss:$16 sps:$4 sm:$0x3f]   ;;  %v1518_v47 = vld [vmem:[%s1843_s12 + $0x28] ss:$16 sps:$4 sm:$0x3f]  }
  0x2a   : >> { %1270 = vmatpush3.bf16.msra.mxu1 %v1760_v19  ;;  %1249 = vmatprep.subr.bf16.mxu0 %v1766_v20 }
  0x2b   : >> { %1271 = vmatprep.subr.bf16.mxu1 %v1772_v21 }
  0x2d   : >> { %1250 = vmatpush3.bf16.msra.mxu0 %v1778_v22 }
  0x2e   : >> { %1272 = vmatpush3.bf16.msra.mxu1 %v1784_v23  ;;  %1251 = vmatprep.subr.bf16.mxu0 %v1790_v24 }
  0x2f   : >> { %1273 = vmatprep.subr.bf16.mxu1 %v1796_v25 }
  0x31   : >> { %1252 = vmatpush3.bf16.msra.mxu0 %v1802_v26 }
  0x32   : >> { %1274 = vmatpush3.bf16.msra.mxu1 %v1809_v27  ;;  %1253 = vmatprep.subr.bf16.mxu0 %v1815_v28 }
  0x33   : >> { %1275 = vmatprep.subr.bf16.mxu1 %v1821_v29 }
  0x35   : >> { %1254 = vmatpush3.bf16.msra.mxu0 %v1830_v30 }
  0x36   : >> { %1276 = vmatpush3.bf16.msra.mxu1 %v1836_v31  ;;  %1283 = vmatprep.subr.bf16.mxu0 %v1647_v0 }
  0x37   : >> { %1305 = vmatprep.subr.bf16.mxu1 %v1652_v1 }
  0x38   : >> { %605 = vmatmul.mubr.bf16.vlgmr.msra.gmra.mxu0 %v1497_v32 }
  0x39   : >> { %646 = vmatmul.mubr.bf16.vlgmr.msra.gmra.mxu1 %v1500_v34  ;;  %1284 = vmatpush3.bf16.msra.mxu0 %v1658_v2 }
  0x3a   : >> { %1306 = vmatpush3.bf16.msra.mxu1 %v1664_v3  ;;  %1285 = vmatprep.subr.bf16.mxu0 %v1670_v4 }
  0x3b   : >> { %1307 = vmatprep.subr.bf16.mxu1 %v1676_v5  ;;  %712 = vmatprep.mubr.bf16.mxu0 %v1505_v36 }
  0x3c   : >> { %753 = vmatprep.mubr.bf16.mxu1 %v1508_v37 }
  0x3d   : >> { %1286 = vmatpush3.bf16.msra.mxu0 %v1682_v6 }
  0x3e   : >> { %1308 = vmatpush3.bf16.msra.mxu1 %v1688_v7  ;;  %1287 = vmatprep.subr.bf16.mxu0 %v1694_v8 }
  0x3f   : >> { %1309 = vmatprep.subr.bf16.mxu1 %v1700_v9 }
  0x41   : >> { %1288 = vmatpush3.bf16.msra.mxu0 %v1706_v10 }
  0x42   : >> { %1310 = vmatpush3.bf16.msra.mxu1 %v1712_v11  ;;  %1289 = vmatprep.subr.bf16.mxu0 %v1718_v12 }
  0x43   : >> { %1311 = vmatprep.subr.bf16.mxu1 %v1724_v13 }
  0x45   : >> { %1290 = vmatpush3.bf16.msra.mxu0 %v1730_v14 }
  0x46   : >> { %1312 = vmatpush3.bf16.msra.mxu1 %v1736_v15  ;;  %1291 = vmatprep.subr.bf16.mxu0 %v1742_v16 }
  0x47   : >> { %1313 = vmatprep.subr.bf16.mxu1 %v1748_v17 }
  0x49   : >> { %1292 = vmatpush3.bf16.msra.mxu0 %v1754_v18 }
  0x4a   : >> { %1314 = vmatpush3.bf16.msra.mxu1 %v1760_v19  ;;  %1293 = vmatprep.subr.bf16.mxu0 %v1766_v20 }
  0x4b   : >> { %1315 = vmatprep.subr.bf16.mxu1 %v1772_v21 }
  0x4d   : >> { %1294 = vmatpush3.bf16.msra.mxu0 %v1778_v22 }
  0x4e   : >> { %1316 = vmatpush3.bf16.msra.mxu1 %v1784_v23  ;;  %1295 = vmatprep.subr.bf16.mxu0 %v1790_v24 }
  0x4f   : >> { %1317 = vmatprep.subr.bf16.mxu1 %v1796_v25 }
  0x51   : >> { %1296 = vmatpush3.bf16.msra.mxu0 %v1802_v26 }
  0x52   : >> { %1318 = vmatpush3.bf16.msra.mxu1 %v1809_v27  ;;  %1297 = vmatprep.subr.bf16.mxu0 %v1815_v28 }
  0x53   : >> { %1319 = vmatprep.subr.bf16.mxu1 %v1821_v29 }
  0x55   : >> { %1298 = vmatpush3.bf16.msra.mxu0 %v1830_v30 }
  0x56   : >> { %1320 = vmatpush3.bf16.msra.mxu1 %v1836_v31  ;;  %1327 = vmatprep.subr.bf16.mxu0 %v1647_v0 }
  0x57   : >> { %1349 = vmatprep.subr.bf16.mxu1 %v1652_v1 }
  0x58   : >> { %713 = vmatmul.mubr.bf16.vlgmr.msra.gmra.mxu0 %v1503_v38 }
  0x59   : >> { %754 = vmatmul.mubr.bf16.vlgmr.msra.gmra.mxu1 %v1506_v39  ;;  %1328 = vmatpush3.bf16.msra.mxu0 %v1658_v2  ;;  %v1225_v39 = vld [vmem:[%s1981_s3] ss:$0 sm:$0xff] }
  0x5a   : >> { %1350 = vmatpush3.bf16.msra.mxu1 %v1664_v3  ;;  %1329 = vmatprep.subr.bf16.mxu0 %v1670_v4 }
  0x5b   : >> { %1351 = vmatprep.subr.bf16.mxu1 %v1676_v5  ;;  %822 = vmatprep.mubr.bf16.mxu0 %v1511_v40 }
  0x5c   : >> { %863 = vmatprep.mubr.bf16.mxu1 %v1514_v41 }
  0x5d   : >> { %1330 = vmatpush3.bf16.msra.mxu0 %v1682_v6 }
  0x5e   : >> { %1352 = vmatpush3.bf16.msra.mxu1 %v1688_v7  ;;  %1331 = vmatprep.subr.bf16.mxu0 %v1694_v8 }
  0x5f   : >> { %1353 = vmatprep.subr.bf16.mxu1 %v1700_v9 }
  0x61   : >> { %1332 = vmatpush3.bf16.msra.mxu0 %v1706_v10 }
  0x62   : >> { %1354 = vmatpush3.bf16.msra.mxu1 %v1712_v11  ;;  %1333 = vmatprep.subr.bf16.mxu0 %v1718_v12 }
  0x63   : >> { %1355 = vmatprep.subr.bf16.mxu1 %v1724_v13 }
  0x65   : >> { %1334 = vmatpush3.bf16.msra.mxu0 %v1730_v14 }
  0x66   : >> { %1356 = vmatpush3.bf16.msra.mxu1 %v1736_v15  ;;  %1335 = vmatprep.subr.bf16.mxu0 %v1742_v16 }
  0x67   : >> { %1357 = vmatprep.subr.bf16.mxu1 %v1748_v17 }
  0x69   : >> { %1336 = vmatpush3.bf16.msra.mxu0 %v1754_v18 }
  0x6a   : >> { %1358 = vmatpush3.bf16.msra.mxu1 %v1760_v19  ;;  %1337 = vmatprep.subr.bf16.mxu0 %v1766_v20 }
  0x6b   : >> { %1359 = vmatprep.subr.bf16.mxu1 %v1772_v21 }
  0x6d   : >> { %1338 = vmatpush3.bf16.msra.mxu0 %v1778_v22 }
  0x6e   : >> { %1360 = vmatpush3.bf16.msra.mxu1 %v1784_v23  ;;  %1339 = vmatprep.subr.bf16.mxu0 %v1790_v24 }
  0x6f   : >> { %1361 = vmatprep.subr.bf16.mxu1 %v1796_v25 }
  0x71   : >> { %1340 = vmatpush3.bf16.msra.mxu0 %v1802_v26 }
  0x72   : >> { %1362 = vmatpush3.bf16.msra.mxu1 %v1809_v27  ;;  %1341 = vmatprep.subr.bf16.mxu0 %v1815_v28 }
  0x73   : >> { %1363 = vmatprep.subr.bf16.mxu1 %v1821_v29 }
  0x75   : >> { %1342 = vmatpush3.bf16.msra.mxu0 %v1830_v30 }
  0x76   : >> { %1364 = vmatpush3.bf16.msra.mxu1 %v1836_v31  ;;  %1371 = vmatprep.subr.bf16.mxu0 %v1647_v0 }
  0x77   : >> { %1393 = vmatprep.subr.bf16.mxu1 %v1652_v1 }
  0x78   : >> { %823 = vmatmul.mubr.bf16.vlgmr.msra.gmra.mxu0 %v1509_v42 }
  0x79   : >> { %864 = vmatmul.mubr.bf16.vlgmr.msra.gmra.mxu1 %v1512_v43  ;;  %1372 = vmatpush3.bf16.msra.mxu0 %v1658_v2 }
  0x7a   : >> { %1394 = vmatpush3.bf16.msra.mxu1 %v1664_v3  ;;  %1373 = vmatprep.subr.bf16.mxu0 %v1670_v4 }
  0x7b   : >> { %1395 = vmatprep.subr.bf16.mxu1 %v1676_v5  ;;  %930 = vmatprep.mubr.bf16.mxu0 %v1517_v44 }
  0x7c   : >> { %971 = vmatprep.mubr.bf16.mxu1 %v1520_v45 }
  0x7d   : >> { %1374 = vmatpush3.bf16.msra.mxu0 %v1682_v6 }
  0x7e   : >> { %1396 = vmatpush3.bf16.msra.mxu1 %v1688_v7  ;;  %1375 = vmatprep.subr.bf16.mxu0 %v1694_v8 }
  0x7f   : >> { %1397 = vmatprep.subr.bf16.mxu1 %v1700_v9 }
  0x81   : >> { %1376 = vmatpush3.bf16.msra.mxu0 %v1706_v10 }
  0x82   : >> { %1398 = vmatpush3.bf16.msra.mxu1 %v1712_v11  ;;  %1377 = vmatprep.subr.bf16.mxu0 %v1718_v12 }
  0x83   : >> { %1399 = vmatprep.subr.bf16.mxu1 %v1724_v13 }
  0x85   : >> { %1378 = vmatpush3.bf16.msra.mxu0 %v1730_v14 }
  0x86   : >> { %1400 = vmatpush3.bf16.msra.mxu1 %v1736_v15  ;;  %1379 = vmatprep.subr.bf16.mxu0 %v1742_v16 }
  0x87   : >> { %1401 = vmatprep.subr.bf16.mxu1 %v1748_v17 }
  0x89   : >> { %1380 = vmatpush3.bf16.msra.mxu0 %v1754_v18 }
  0x8a   : >> { %1402 = vmatpush3.bf16.msra.mxu1 %v1760_v19  ;;  %1381 = vmatprep.subr.bf16.mxu0 %v1766_v20 }
  0x8b   : >> { %1403 = vmatprep.subr.bf16.mxu1 %v1772_v21 }
  0x8d   : >> { %1382 = vmatpush3.bf16.msra.mxu0 %v1778_v22 }
  0x8e   : >> { %1404 = vmatpush3.bf16.msra.mxu1 %v1784_v23  ;;  %1383 = vmatprep.subr.bf16.mxu0 %v1790_v24 }
  0x8f   : >> { %1405 = vmatprep.subr.bf16.mxu1 %v1796_v25 }
  0x91   : >> { %1384 = vmatpush3.bf16.msra.mxu0 %v1802_v26 }
  0x92   : >> { %1406 = vmatpush3.bf16.msra.mxu1 %v1809_v27  ;;  %1385 = vmatprep.subr.bf16.mxu0 %v1815_v28 }
  0x93   : >> { %1407 = vmatprep.subr.bf16.mxu1 %v1821_v29 }
  0x95   : >> { %1386 = vmatpush3.bf16.msra.mxu0 %v1830_v30 }
  0x96   : >> { %1408 = vmatpush3.bf16.msra.mxu1 %v1836_v31 }
  0x98   : >> { %931 = vmatmul.mubr.bf16.vlgmr.msra.gmra.mxu0 %v1515_v46 }
  0x99   : >> { %972 = vmatmul.mubr.bf16.vlgmr.msra.gmra.mxu1 %v1518_v47 }
  0xf8   : >> { %v1255_v48 = vpop.f32.mrf.mxu0 }
  0xf9   : >> { %v1277_v49 = vpop.f32.mrf.mxu1 }
  0xfa   : >> { %v1256_v50 = vpop.f32.mrf.mxu0 }
  0xfb   : >> { %v1278_v51 = vpop.f32.mrf.mxu1  ;;  %v1257_v11 = vadd.f32 %v1256_v50, %v1255_v48 }
  0xfc   : >> { %v1258_v52 = vpop.f32.mrf.mxu0  ;;  %v1279_v12 = vadd.f32 %v1278_v51, %v1277_v49 }
  0xfd   : >> { %v1280_v53 = vpop.f32.mrf.mxu1 }
  0xfe   : >> { %v1259_v54 = vpop.f32.mrf.mxu0  ;;  %v648_v24 = vadd.f32 %v1279_v12, %v1257_v11 }
  0xff   : >> { %v1281_v55 = vpop.f32.mrf.mxu1  ;;  %v1260_v25 = vadd.f32 %v1259_v54, %v1258_v52 }
 0x100   : >> { %v1282_v26 = vadd.f32 %v1281_v55, %v1280_v53 }
 0x102   : >> { %v651_v40 = vadd.f32 %v1282_v26, %v1260_v25 }
 0x118   : >> { %v1299_v56 = vpop.f32.mrf.mxu0 }
 0x119   : >> { %v1321_v57 = vpop.f32.mrf.mxu1 }
 0x11a   : >> { %v1300_v58 = vpop.f32.mrf.mxu0 }
 0x11b   : >> { %v1322_v59 = vpop.f32.mrf.mxu1  ;;  %v1301_v8 = vadd.f32 %v1300_v58, %v1299_v56 }
 0x11c   : >> { %v1302_v60 = vpop.f32.mrf.mxu0  ;;  %v1323_v9 = vadd.f32 %v1322_v59, %v1321_v57 }
 0x11d   : >> { %v1324_v61 = vpop.f32.mrf.mxu1 }
 0x11e   : >> { %v1303_v62 = vpop.f32.mrf.mxu0  ;;  %v756_v19 = vadd.f32 %v1323_v9, %v1301_v8 }
 0x11f   : >> { %v1325_v63 = vpop.f32.mrf.mxu1  ;;  %v1304_v20 = vadd.f32 %v1303_v62, %v1302_v60 }
 0x120   : >> { %v1326_v21 = vadd.f32 %v1325_v63, %v1324_v61  ;;  %v980_v35 = vmax.f32 %v648_v24, %v756_v19 }
 0x122   : >> { %v759_v36 = vadd.f32 %v1326_v21, %v1304_v20 }
 0x124   : >> { %v981_v44 = vmax.f32 %v651_v40, %v759_v36 }
 0x138   : >> { %v1343_v0 = vpop.f32.mrf.mxu0 }
 0x139   : >> { %v1365_v1 = vpop.f32.mrf.mxu1 }
 0x13a   : >> { %v1344_v2 = vpop.f32.mrf.mxu0 }
 0x13b   : >> { %v1366_v3 = vpop.f32.mrf.mxu1  ;;  %v1345_v14 = vadd.f32 %v1344_v2, %v1343_v0 }
 0x13c   : >> { %v1346_v4 = vpop.f32.mrf.mxu0  ;;  %v1367_v15 = vadd.f32 %v1366_v3, %v1365_v1 }
 0x13d   : >> { %v1368_v5 = vpop.f32.mrf.mxu1 }
 0x13e   : >> { %v1347_v6 = vpop.f32.mrf.mxu0  ;;  %v866_v28 = vadd.f32 %v1367_v15, %v1345_v14 }
 0x13f   : >> { %v1369_v7 = vpop.f32.mrf.mxu1  ;;  %v1348_v29 = vadd.f32 %v1347_v6, %v1346_v4 }
 0x140   : >> { %v1370_v30 = vadd.f32 %v1369_v7, %v1368_v5 }
 0x142   : >> { %v869_v41 = vadd.f32 %v1370_v30, %v1348_v29 }
 0x158   : >> { %v1387_v10 = vpop.f32.mrf.mxu0 }
 0x159   : >> { %v1409_v13 = vpop.f32.mrf.mxu1 }
 0x15a   : >> { %v1388_v16 = vpop.f32.mrf.mxu0 }
 0x15b   : >> { %v1389_v17 = vadd.f32 %v1388_v16, %v1387_v10  ;;  %v1410_v18 = vpop.f32.mrf.mxu1 }
 0x15c   : >> { %v1411_v22 = vadd.f32 %v1410_v18, %v1409_v13  ;;  %v1390_v23 = vpop.f32.mrf.mxu0 }
 0x15d   : >> { %v1412_v27 = vpop.f32.mrf.mxu1 }
 0x15e   : >> { %v974_v31 = vadd.f32 %v1411_v22, %v1389_v17  ;;  %v1391_v32 = vpop.f32.mrf.mxu0 }
 0x15f   : >> { %v1392_v33 = vadd.f32 %v1391_v32, %v1390_v23  ;;  %v1413_v34 = vpop.f32.mrf.mxu1 }
 0x160   : >> { %v982_v37 = vmax.f32 %v866_v28, %v974_v31  ;;  %v1414_v38 = vadd.f32 %v1413_v34, %v1412_v27 }
 0x162   : >> { %v984_v42 = vmax.f32 %v980_v35, %v982_v37  ;;  %v977_v43 = vadd.f32 %v1414_v38, %v1392_v33 }
 0x164   : >> { %v993_v45 = vadd.f32 %v1225_v39, %v984_v42  ;;  %v983_v46 = vmax.f32 %v869_v41, %v977_v43 }
 0x166   : >> { %v995_v47 = vmax.f32 %v993_v45, 0.0  ;;  %v985_v48 = vmax.f32 %v981_v44, %v983_v46 }
 0x168   : >> { %v1236_v49 = vpack.c.bf16 %v995_v47, %v995_v47  ;;  %v994_v50 = vadd.f32 %v1225_v39, %v985_v48 }
 0x16a   : >> { %1008 = vst.msk [vmem:[%s1006_s23] sm:$0xf] %vm1007_vm0, %v1236_v49  ;;  %v996_v51 = vmax.f32 %v994_v50, 0.0  ;;  %286 = sbr.rel (!%p284_p8) target bundleno = 22 (0x16), region = 81 }
 0x16c   : >> { %v1237_v52 = vpack.c.bf16 %v996_v51, %v996_v51 }
 0x16e   : >> { %1010 = vst.msk [vmem:[%s1006_s23 + $0x4] sm:$0x3] %vm1009_vm1, %v1237_v52 }
 0x16f PF: > { %s14_s19 = sadd.s32 1, %s1563_s19   ;;  %s1983_s15 = smov %s1555_s17 }
 0x170   : > { %p11_p9 = scmp.ge.s32.totalorder %s14_s19, 6   ;;  %s1984_s16 = smov %s1559_s18 }
 0x171   : > { %s1985_s17 = smov %s1988_s20  ;;  %s1986_s18 = smov %s1992_s21 }
 0x172   :  { %13 = sbr.rel (!%p11_p9) target bundleno = 3 (0x3), region = 92 }

// kernel: forward.7
= control target key start
LH: loop header
LB: loop body
LE: loop exit
PB: predicated region body
PF: predicated region fallthrough
CT: control target
= control target key end

     0   :  { %v625_v28 = vlaneseq  ;;  %v4647_v36 = vmov 1966171168   ;;  %s5691_s0 = inlined_call_operand.vmem [shape: bf16[2,4608], index: 0, kind: input, shape index: {}]   ;;  %s5692_s1 = inlined_call_operand.vmem [shape: bf16[4608,120], index: 1, kind: input, shape index: {}]   ;;  %s5693_s2 = inlined_call_operand.vmem [shape: f32[1,120], index: 2, kind: input, shape index: {}]   ;;  %s5694_s3 = inlined_call_operand.vmem [shape: bf16[120,84], index: 3, kind: input, shape index: {}]   ;;  %s5695_s4 = inlined_call_operand.vmem [shape: f32[1,84], index: 4, kind: input, shape index: {}]   ;;  %s5696_s5 = inlined_call_operand.vmem [shape: bf16[84,2], index: 5, kind: input, shape index: {}]   ;;  %s5697_s6 = inlined_call_operand.vmem [shape: f32[1,2], index: 6, kind: input, shape index: {}]   ;;  %s5698_s7 = inlined_call_operand.hbm [shape: f32[2,2], index: 7, kind: output, shape index: {}]  }
   0x1   :  { %v4319_v0 = vld [vmem:[%s5692_s1 + $0x78] sm:$0xff]   ;;  %v4323_v4 = vld [vmem:[%s5692_s1 + $0x70] sm:$0xff]   ;;  %v4327_v8 = vld [vmem:[%s5692_s1 + $0x68] sm:$0xff]   ;;  %v623_v37 = vunpack.c.l.s4 %v4647_v36 }
   0x2   :  { %v4320_v1 = vld [vmem:[%s5692_s1 + $0xf8] sm:$0xff]   ;;  %3867 = vmatprep.subr.bf16.mxu0 %v4319_v0  ;;  %v4324_v5 = vld [vmem:[%s5692_s1 + $0xf0] sm:$0xff]   ;;  %v4328_v9 = vld [vmem:[%s5692_s1 + $0xe8] sm:$0xff]   ;;  %v626_v33 = vshrl.u32 %v625_v28, 7 }
   0x3   :  { %v4321_v2 = vld [vmem:[%s5692_s1 + $0x38] sm:$0xff]   ;;  %3889 = vmatprep.subr.bf16.mxu1 %v4320_v1  ;;  %v4325_v6 = vld [vmem:[%s5692_s1 + $0x30] sm:$0xff]   ;;  %v4329_v10 = vld [vmem:[%s5692_s1 + $0x28] sm:$0xff]   ;;  %v624_v40 = vunpack.c.0.s8 %v623_v37 }
   0x4   :  { %v4322_v3 = vld [vmem:[%s5692_s1 + $0xb8] sm:$0xff]   ;;  %3868 = vmatpush3.bf16.msra.mxu0 %v4321_v2  ;;  %v4326_v7 = vld [vmem:[%s5692_s1 + $0xb0] sm:$0xff]   ;;  %v4330_v11 = vld [vmem:[%s5692_s1 + $0xa8] sm:$0xff]  }
   0x5   :  { %3890 = vmatpush3.bf16.msra.mxu1 %v4322_v3  ;;  %3869 = vmatprep.subr.bf16.mxu0 %v4323_v4  ;;  %v4331_v12 = vld [vmem:[%s5692_s1 + $0x60] sm:$0xff]   ;;  %v4335_v16 = vld [vmem:[%s5692_s1 + $0x58] sm:$0xff]   ;;  %v4339_v20 = vld [vmem:[%s5692_s1 + $0x50] sm:$0xff]   ;;  %v4796_v41 = vsub.s32 %v624_v40, %v626_v33 }
   0x6   :  { %3891 = vmatprep.subr.bf16.mxu1 %v4324_v5  ;;  %v4332_v13 = vld [vmem:[%s5692_s1 + $0xe0] sm:$0xff]   ;;  %v4336_v17 = vld [vmem:[%s5692_s1 + $0xd8] sm:$0xff]   ;;  %v4340_v21 = vld [vmem:[%s5692_s1 + $0xd0] sm:$0xff]  }
   0x7   :  { %v4333_v14 = vld [vmem:[%s5692_s1 + $0x20] sm:$0xff]   ;;  %v4337_v18 = vld [vmem:[%s5692_s1 + $0x18] sm:$0xff]   ;;  %v4341_v22 = vld [vmem:[%s5692_s1 + $0x10] sm:$0xff]  }
   0x8   :  { %3870 = vmatpush3.bf16.msra.mxu0 %v4325_v6  ;;  %v4334_v15 = vld [vmem:[%s5692_s1 + $0xa0] sm:$0xff]   ;;  %v4338_v19 = vld [vmem:[%s5692_s1 + $0x98] sm:$0xff]   ;;  %v4342_v23 = vld [vmem:[%s5692_s1 + $0x90] sm:$0xff]  }
   0x9   :  { %3892 = vmatpush3.bf16.msra.mxu1 %v4326_v7  ;;  %3871 = vmatprep.subr.bf16.mxu0 %v4327_v8  ;;  %v4343_v24 = vld [vmem:[%s5692_s1 + $0x48] sm:$0xff]   ;;  %v4347_v29 = vld [vmem:[%s5692_s1 + $0x40] sm:$0xff]   ;;  %v4352_v35 = vld [vmem:[%s5692_s1 + $0x178] sm:$0xff]  }
   0xa   :  { %3893 = vmatprep.subr.bf16.mxu1 %v4328_v9  ;;  %v4344_v25 = vld [vmem:[%s5692_s1 + $0xc8] sm:$0xff]   ;;  %v4348_v30 = vld [vmem:[%s5692_s1 + $0xc0] sm:$0xff]   ;;  %v4353_v38 = vld [vmem:[%s5692_s1 + $0x1f8] sm:$0xff]  }
   0xb   :  { %v4345_v26 = vld [vmem:[%s5692_s1 + $0x8] sm:$0xff]   ;;  %v4349_v31 = vld [vmem:[%s5692_s1] sm:$0xff]   ;;  %v4354_v47 = vld [vmem:[%s5692_s1 + $0x138] sm:$0xff]  }
   0xc   :  { %3872 = vmatpush3.bf16.msra.mxu0 %v4329_v10  ;;  %v4346_v27 = vld [vmem:[%s5692_s1 + $0x88] sm:$0xff]   ;;  %v4350_v32 = vld [vmem:[%s5692_s1 + $0x80] sm:$0xff]   ;;  %v4355_v49 = vld [vmem:[%s5692_s1 + $0x1b8] sm:$0xff]  }
   0xd   :  { %3894 = vmatpush3.bf16.msra.mxu1 %v4330_v11  ;;  %3873 = vmatprep.subr.bf16.mxu0 %v4331_v12  ;;  %v28_v34 = vld [vmem:[%s5691_s0] sm:$0xff]  ;;  %v4356_v52 = vld [vmem:[%s5692_s1 + $0x170] sm:$0xff]   ;;  %v4360_v58 = vld [vmem:[%s5692_s1 + $0x168] sm:$0xff]  }
   0xe   :  { %3895 = vmatprep.subr.bf16.mxu1 %v4332_v13  ;;  %v621_v39 = vcombine.high %v28_v34, %v28_v34  ;;  %v628_v42 = vrot.slane %v28_v34, %v4796_v41  ;;  %v4357_v54 = vld [vmem:[%s5692_s1 + $0x1f0] sm:$0xff]   ;;  %v4361_v59 = vld [vmem:[%s5692_s1 + $0x1e8] sm:$0xff]   ;;  %v4364_v62 = vld [vmem:[%s5692_s1 + $0x160] sm:$0xff]  }
   0xf   :  { %v4358_v55 = vld [vmem:[%s5692_s1 + $0x130] sm:$0xff]   ;;  %v4362_v60 = vld [vmem:[%s5692_s1 + $0x128] sm:$0xff]   ;;  %v4365_v63 = vld [vmem:[%s5692_s1 + $0x1e0] sm:$0xff]  }
  0x10   :  { %3874 = vmatpush3.bf16.msra.mxu0 %v4333_v14  ;;  %v4800_v43 = vrot.slane %v621_v39, %v4796_v41  ;;  %v636_v44 = vcombine.high %v628_v42, %v628_v42  ;;  %v644_v45 = vrot.slane %v628_v42, %v4796_v41  ;;  %v4359_v57 = vld [vmem:[%s5692_s1 + $0x1b0] sm:$0xff]   ;;  %v4363_v61 = vld [vmem:[%s5692_s1 + $0x1a8] sm:$0xff]   ;;  %v4366_v0 = vld [vmem:[%s5692_s1 + $0x120] sm:$0xff]  }
  0x11   :  { %3896 = vmatpush3.bf16.msra.mxu1 %v4334_v15  ;;  %3875 = vmatprep.subr.bf16.mxu0 %v4335_v16  ;;  %v4367_v1 = vld [vmem:[%s5692_s1 + $0x1a0] sm:$0xff]   ;;  %v4368_v2 = vld [vmem:[%s5692_s1 + $0x158] sm:$0xff]   ;;  %v4372_v6 = vld [vmem:[%s5692_s1 + $0x150] sm:$0xff]  }
  0x12   :  { %3897 = vmatprep.subr.bf16.mxu1 %v4336_v17  ;;  %v637_v46 = vcombine.high %v4800_v43, %v4800_v43  ;;  %v658_v48 = vrot.slane %v636_v44, %v4796_v41  ;;  %v666_v51 = vcombine.high %v644_v45, %v644_v45  ;;  %v4369_v3 = vld [vmem:[%s5692_s1 + $0x1d8] sm:$0xff]   ;;  %v4373_v7 = vld [vmem:[%s5692_s1 + $0x1d0] sm:$0xff]   ;;  %v4376_v10 = vld [vmem:[%s5692_s1 + $0x148] sm:$0xff]  }
  0x13   :  { %v4370_v4 = vld [vmem:[%s5692_s1 + $0x118] sm:$0xff]   ;;  %v4374_v8 = vld [vmem:[%s5692_s1 + $0x110] sm:$0xff]   ;;  %v4377_v11 = vld [vmem:[%s5692_s1 + $0x1c8] sm:$0xff]  }
  0x14   :  { %3876 = vmatpush3.bf16.msra.mxu0 %v4337_v18  ;;  %v665_v50 = vrot.slane %v637_v46, %v4796_v41  ;;  %2637 = vmatprep.mubr.bf16.mxu0 %v658_v48  ;;  %v668_v53 = vcombine.high %v658_v48, %v658_v48  ;;  %v4371_v5 = vld [vmem:[%s5692_s1 + $0x198] sm:$0xff]   ;;  %v4375_v9 = vld [vmem:[%s5692_s1 + $0x190] sm:$0xff]   ;;  %v4378_v12 = vld [vmem:[%s5692_s1 + $0x108] sm:$0xff]   ;;  %v651_v18 = vrot.slane %v4800_v43, %v4796_v41 }
  0x15   :  { %3898 = vmatpush3.bf16.msra.mxu1 %v4338_v19  ;;  %3877 = vmatprep.subr.bf16.mxu0 %v4339_v20  ;;  %v4379_v13 = vld [vmem:[%s5692_s1 + $0x188] sm:$0xff]   ;;  %v4380_v14 = vld [vmem:[%s5692_s1 + $0x140] sm:$0xff]   ;;  %v4384_v19 = vld [vmem:[%s5692_s1 + $0x278] sm:$0xff]  }
  0x16   :  { %3899 = vmatprep.subr.bf16.mxu1 %v4340_v21  ;;  %v669_v56 = vcombine.high %v665_v50, %v665_v50  ;;  %2677 = vmatprep.mubr.bf16.mxu1 %v668_v53  ;;  %v4381_v15 = vld [vmem:[%s5692_s1 + $0x1c0] sm:$0xff]   ;;  %v4385_v20 = vld [vmem:[%s5692_s1 + $0x2f8] sm:$0xff]   ;;  %v4392_v28 = vld [vmem:[%s5692_s1 + $0x268] sm:$0xff]  }
  0x17   :  { %v4382_v16 = vld [vmem:[%s5692_s1 + $0x100] sm:$0xff]   ;;  %v4386_v21 = vld [vmem:[%s5692_s1 + $0x238] sm:$0xff]   ;;  %v4404_v40 = vld [vmem:[%s5692_s1 + $0x250] sm:$0xff]  }
  0x18   :  { %3878 = vmatpush3.bf16.msra.mxu0 %v4341_v22  ;;  %v4383_v17 = vld [vmem:[%s5692_s1 + $0x180] sm:$0xff]   ;;  %v4387_v22 = vld [vmem:[%s5692_s1 + $0x2b8] sm:$0xff]   ;;  %v4405_v42 = vld [vmem:[%s5692_s1 + $0x2d0] sm:$0xff]  }
  0x19   :  { %3900 = vmatpush3.bf16.msra.mxu1 %v4342_v23  ;;  %3879 = vmatprep.subr.bf16.mxu0 %v4343_v24  ;;  %v667_v23 = vcombine.high %v651_v18, %v651_v18  ;;  %v4388_v24 = vld [vmem:[%s5692_s1 + $0x270] sm:$0xff]   ;;  %v4397_v33 = vld [vmem:[%s5692_s1 + $0x2e0] sm:$0xff]   ;;  %v4400_v36 = vld [vmem:[%s5692_s1 + $0x258] sm:$0xff]  }
  0x1a   :  { %3901 = vmatprep.subr.bf16.mxu1 %v4344_v25  ;;  %v4389_v25 = vld [vmem:[%s5692_s1 + $0x2f0] sm:$0xff]   ;;  %v4398_v34 = vld [vmem:[%s5692_s1 + $0x220] sm:$0xff]   ;;  %v4401_v37 = vld [vmem:[%s5692_s1 + $0x2d8] sm:$0xff]  }
  0x1b   :  { %v4403_v39 = vld [vmem:[%s5692_s1 + $0x298] sm:$0xff]   ;;  %v4406_v43 = vld [vmem:[%s5692_s1 + $0x210] sm:$0xff]   ;;  %v29_v46 = vld [vmem:[%s5691_s0 + $0x8] sm:$0xff] }
  0x1c   :  { %3880 = vmatpush3.bf16.msra.mxu0 %v4345_v26  ;;  %v4390_v26 = vld [vmem:[%s5692_s1 + $0x230] sm:$0xff]   ;;  %v677_v48 = vrot.slane %v29_v46, %v4796_v41 }
  0x1d   :  { %3902 = vmatpush3.bf16.msra.mxu1 %v4346_v27  ;;  %3881 = vmatprep.subr.bf16.mxu0 %v4347_v29  ;;  %v4391_v27 = vld [vmem:[%s5692_s1 + $0x2b0] sm:$0xff]   ;;  %v4393_v29 = vld [vmem:[%s5692_s1 + $0x2e8] sm:$0xff]  }
  0x1e   :  { %3903 = vmatprep.subr.bf16.mxu1 %v4348_v30  ;;  %v4394_v30 = vld [vmem:[%s5692_s1 + $0x228] sm:$0xff]   ;;  %v4407_v44 = vld [vmem:[%s5692_s1 + $0x290] sm:$0xff]  }
  0x20   :  { %3882 = vmatpush3.bf16.msra.mxu0 %v4349_v31  ;;  %v4395_v31 = vld [vmem:[%s5692_s1 + $0x2a8] sm:$0xff]  }
  0x21   :  { %3904 = vmatpush3.bf16.msra.mxu1 %v4350_v32  ;;  %3911 = vmatprep.subr.bf16.mxu0 %v4352_v35  ;;  %v4396_v32 = vld [vmem:[%s5692_s1 + $0x260] sm:$0xff]  }
  0x22   :  { %3933 = vmatprep.subr.bf16.mxu1 %v4353_v38  ;;  %v4399_v35 = vld [vmem:[%s5692_s1 + $0x2a0] sm:$0xff]   ;;  %v4402_v38 = vld [vmem:[%s5692_s1 + $0x218] sm:$0xff]  }
  0x23   :  { %2638 = vmatmul.mubr.bf16.vlgmr.msra.gmra.mxu0 %v644_v45  ;;  %v4408_v45 = vld [vmem:[%s5692_s1 + $0x248] sm:$0xff]  }
  0x24   :  { %3912 = vmatpush3.bf16.msra.mxu0 %v4354_v47  ;;  %2678 = vmatmul.mubr.bf16.vlgmr.msra.gmra.mxu1 %v666_v51  ;;  %v4409_v47 = vld [vmem:[%s5692_s1 + $0x2c8] sm:$0xff]  }
  0x25   :  { %3913 = vmatprep.subr.bf16.mxu0 %v4356_v52  ;;  %3934 = vmatpush3.bf16.msra.mxu1 %v4355_v49  ;;  %v670_v49 = vcombine.high %v29_v46, %v29_v46  ;;  %v4411_v51 = vld [vmem:[%s5692_s1 + $0x288] sm:$0xff]   ;;  %v685_v52 = vcombine.high %v677_v48, %v677_v48 }
  0x26   :  { %2717 = vmatprep.mubr.bf16.mxu0 %v665_v50  ;;  %3935 = vmatprep.subr.bf16.mxu1 %v4357_v54  ;;  %v4410_v50 = vld [vmem:[%s5692_s1 + $0x208] sm:$0xff]   ;;  %v4412_v54 = vld [vmem:[%s5692_s1 + $0x240] sm:$0xff]  }
  0x27   :  { %2757 = vmatprep.mubr.bf16.mxu1 %v669_v56  ;;  %v4988_v53 = vrot.slane %v670_v49, %v4796_v41  ;;  %v707_v56 = vrot.slane %v685_v52, %v4796_v41  ;;  %v4459_v46 = vld [vmem:[%s5692_s1 + $0x428] sm:$0xff]   ;;  %v4462_v49 = vld [vmem:[%s5692_s1 + $0x4e0] sm:$0xff]   ;;  %v4465_v52 = vld [vmem:[%s5692_s1 + $0x458] sm:$0xff]  }
  0x28   :  { %3914 = vmatpush3.bf16.msra.mxu0 %v4358_v55  ;;  %v4413_v55 = vld [vmem:[%s5692_s1 + $0x2c0] sm:$0xff]  }
  0x29   :  { %3915 = vmatprep.subr.bf16.mxu0 %v4360_v58  ;;  %3936 = vmatpush3.bf16.msra.mxu1 %v4359_v57  ;;  %v686_v57 = vcombine.high %v4988_v53, %v4988_v53  ;;  %v4414_v58 = vld [vmem:[%s5692_s1 + $0x200] sm:$0xff]  }
  0x2a   :  { %3937 = vmatprep.subr.bf16.mxu1 %v4361_v59  ;;  %v4415_v59 = vld [vmem:[%s5692_s1 + $0x280] sm:$0xff]  }
  0x2c   :  { %3916 = vmatpush3.bf16.msra.mxu0 %v4362_v60  ;;  %v717_v60 = vcombine.high %v707_v56, %v707_v56 }
  0x2d   :  { %3917 = vmatprep.subr.bf16.mxu0 %v4364_v62  ;;  %3938 = vmatpush3.bf16.msra.mxu1 %v4363_v61  ;;  %v693_v61 = vrot.slane %v677_v48, %v4796_v41  ;;  %v4416_v62 = vld [vmem:[%s5692_s1 + $0x378] sm:$0xff]   ;;  %v4461_v48 = vld [vmem:[%s5692_s1 + $0x460] sm:$0xff]  }
  0x2e   :  { %3939 = vmatprep.subr.bf16.mxu1 %v4365_v63  ;;  %v4417_v63 = vld [vmem:[%s5692_s1 + $0x3f8] sm:$0xff]  }
  0x30   :  { %3918 = vmatpush3.bf16.msra.mxu0 %v4366_v0  ;;  %v714_v0 = vrot.slane %v686_v57, %v4796_v41  ;;  %v4470_v57 = vld [vmem:[%s5692_s1 + $0x4d0] sm:$0xff]  }
  0x31   :  { %3919 = vmatprep.subr.bf16.mxu0 %v4368_v2  ;;  %3940 = vmatpush3.bf16.msra.mxu1 %v4367_v1  ;;  %v4418_v1 = vld [vmem:[%s5692_s1 + $0x338] sm:$0xff]  }
  0x32   :  { %3941 = vmatprep.subr.bf16.mxu1 %v4369_v3  ;;  %v4419_v2 = vld [vmem:[%s5692_s1 + $0x3b8] sm:$0xff]   ;;  %v715_v3 = vcombine.high %v693_v61, %v693_v61 }
  0x34   :  { %3920 = vmatpush3.bf16.msra.mxu0 %v4370_v4  ;;  %v4420_v4 = vld [vmem:[%s5692_s1 + $0x370] sm:$0xff]  }
  0x35   :  { %3921 = vmatprep.subr.bf16.mxu0 %v4372_v6  ;;  %3942 = vmatpush3.bf16.msra.mxu1 %v4371_v5  ;;  %v4421_v5 = vld [vmem:[%s5692_s1 + $0x3f0] sm:$0xff]   ;;  %v718_v6 = vcombine.high %v714_v0, %v714_v0 }
  0x36   :  { %3943 = vmatprep.subr.bf16.mxu1 %v4373_v7  ;;  %v4422_v7 = vld [vmem:[%s5692_s1 + $0x330] sm:$0xff]  }
  0x38   :  { %3922 = vmatpush3.bf16.msra.mxu0 %v4374_v8  ;;  %v4423_v8 = vld [vmem:[%s5692_s1 + $0x3b0] sm:$0xff]  }
  0x39   :  { %3923 = vmatprep.subr.bf16.mxu0 %v4376_v10  ;;  %3944 = vmatpush3.bf16.msra.mxu1 %v4375_v9  ;;  %v4424_v9 = vld [vmem:[%s5692_s1 + $0x368] sm:$0xff]  }
  0x3a   :  { %3945 = vmatprep.subr.bf16.mxu1 %v4377_v11  ;;  %v4425_v10 = vld [vmem:[%s5692_s1 + $0x3e8] sm:$0xff]  }
  0x3b   :  { %v4426_v11 = vld [vmem:[%s5692_s1 + $0x328] sm:$0xff]  }
  0x3c   :  { %3924 = vmatpush3.bf16.msra.mxu0 %v4378_v12  ;;  %v4427_v12 = vld [vmem:[%s5692_s1 + $0x3a8] sm:$0xff]  }
  0x3d   :  { %3925 = vmatprep.subr.bf16.mxu0 %v4380_v14  ;;  %3946 = vmatpush3.bf16.msra.mxu1 %v4379_v13  ;;  %v4428_v13 = vld [vmem:[%s5692_s1 + $0x360] sm:$0xff]  }
  0x3e   :  { %3947 = vmatprep.subr.bf16.mxu1 %v4381_v15  ;;  %v4429_v14 = vld [vmem:[%s5692_s1 + $0x3e0] sm:$0xff]  }
  0x3f   :  { %v4430_v15 = vld [vmem:[%s5692_s1 + $0x320] sm:$0xff]  }
  0x40   :  { %3926 = vmatpush3.bf16.msra.mxu0 %v4382_v16  ;;  %v4431_v16 = vld [vmem:[%s5692_s1 + $0x3a0] sm:$0xff]  }
  0x41   :  { %3955 = vmatprep.subr.bf16.mxu0 %v4384_v19  ;;  %3948 = vmatpush3.bf16.msra.mxu1 %v4383_v17  ;;  %v4432_v17 = vld [vmem:[%s5692_s1 + $0x358] sm:$0xff]  }
  0x42   :  { %3977 = vmatprep.subr.bf16.mxu1 %v4385_v20  ;;  %v4434_v19 = vld [vmem:[%s5692_s1 + $0x318] sm:$0xff]  }
  0x43   :  { %2718 = vmatmul.mubr.bf16.vlgmr.msra.gmra.mxu0 %v651_v18  ;;  %v4433_v18 = vld [vmem:[%s5692_s1 + $0x3d8] sm:$0xff]  }
  0x44   :  { %3956 = vmatpush3.bf16.msra.mxu0 %v4386_v21  ;;  %2758 = vmatmul.mubr.bf16.vlgmr.msra.gmra.mxu1 %v667_v23  ;;  %v4435_v20 = vld [vmem:[%s5692_s1 + $0x398] sm:$0xff]   ;;  %v4436_v21 = vld [vmem:[%s5692_s1 + $0x350] sm:$0xff]  }
  0x45   :  { %3957 = vmatprep.subr.bf16.mxu0 %v4388_v24  ;;  %3978 = vmatpush3.bf16.msra.mxu1 %v4387_v22  ;;  %v4437_v22 = vld [vmem:[%s5692_s1 + $0x3d0] sm:$0xff]  }
  0x46   :  { %3979 = vmatprep.subr.bf16.mxu1 %v4389_v25  ;;  %2797 = vmatprep.mubr.bf16.mxu0 %v707_v56  ;;  %v4438_v23 = vld [vmem:[%s5692_s1 + $0x310] sm:$0xff]   ;;  %v4440_v25 = vld [vmem:[%s5692_s1 + $0x348] sm:$0xff]  }
  0x47   :  { %2837 = vmatprep.mubr.bf16.mxu1 %v717_v60  ;;  %v4439_v24 = vld [vmem:[%s5692_s1 + $0x390] sm:$0xff]   ;;  %v4473_v60 = vld [vmem:[%s5692_s1 + $0x448] sm:$0xff]  }
  0x48   :  { %3958 = vmatpush3.bf16.msra.mxu0 %v4390_v26  ;;  %v4441_v26 = vld [vmem:[%s5692_s1 + $0x3c8] sm:$0xff]   ;;  %v4469_v56 = vld [vmem:[%s5692_s1 + $0x450] sm:$0xff]  }
  0x49   :  { %3959 = vmatprep.subr.bf16.mxu0 %v4392_v28  ;;  %3980 = vmatpush3.bf16.msra.mxu1 %v4391_v27  ;;  %v4442_v27 = vld [vmem:[%s5692_s1 + $0x308] sm:$0xff]  }
  0x4a   :  { %3981 = vmatprep.subr.bf16.mxu1 %v4393_v29  ;;  %v4443_v28 = vld [vmem:[%s5692_s1 + $0x388] sm:$0xff]   ;;  %v4444_v29 = vld [vmem:[%s5692_s1 + $0x340] sm:$0xff]  }
  0x4c   :  { %3960 = vmatpush3.bf16.msra.mxu0 %v4394_v30  ;;  %v4445_v30 = vld [vmem:[%s5692_s1 + $0x3c0] sm:$0xff]  }
  0x4d   :  { %3961 = vmatprep.subr.bf16.mxu0 %v4396_v32  ;;  %3982 = vmatpush3.bf16.msra.mxu1 %v4395_v31  ;;  %v4446_v31 = vld [vmem:[%s5692_s1 + $0x300] sm:$0xff]  }
  0x4e   :  { %3983 = vmatprep.subr.bf16.mxu1 %v4397_v33  ;;  %v4447_v32 = vld [vmem:[%s5692_s1 + $0x380] sm:$0xff]   ;;  %v700_v33 = vrot.slane %v4988_v53, %v4796_v41  ;;  %v4466_v53 = vld [vmem:[%s5692_s1 + $0x4d8] sm:$0xff]  }
  0x50   :  { %3962 = vmatpush3.bf16.msra.mxu0 %v4398_v34  ;;  %v4449_v34 = vld [vmem:[%s5692_s1 + $0x478] sm:$0xff]  }
  0x51   :  { %3963 = vmatprep.subr.bf16.mxu0 %v4400_v36  ;;  %3984 = vmatpush3.bf16.msra.mxu1 %v4399_v35  ;;  %v4450_v35 = vld [vmem:[%s5692_s1 + $0x4f8] sm:$0xff]  }
  0x52   :  { %3985 = vmatprep.subr.bf16.mxu1 %v4401_v37  ;;  %v4451_v36 = vld [vmem:[%s5692_s1 + $0x438] sm:$0xff]  }
  0x53   :  { %v4452_v37 = vld [vmem:[%s5692_s1 + $0x4b8] sm:$0xff]  }
  0x54   :  { %3964 = vmatpush3.bf16.msra.mxu0 %v4402_v38  ;;  %v716_v38 = vcombine.high %v700_v33, %v700_v33 }
  0x55   :  { %3965 = vmatprep.subr.bf16.mxu0 %v4404_v40  ;;  %3986 = vmatpush3.bf16.msra.mxu1 %v4403_v39  ;;  %v4453_v39 = vld [vmem:[%s5692_s1 + $0x470] sm:$0xff]  }
  0x56   :  { %3987 = vmatprep.subr.bf16.mxu1 %v4405_v42  ;;  %v4454_v40 = vld [vmem:[%s5692_s1 + $0x4f0] sm:$0xff]  }
  0x57   :  { %v4455_v42 = vld [vmem:[%s5692_s1 + $0x430] sm:$0xff]  }
  0x58   :  { %3966 = vmatpush3.bf16.msra.mxu0 %v4406_v43  ;;  %v4456_v43 = vld [vmem:[%s5692_s1 + $0x4b0] sm:$0xff]  }
  0x59   :  { %3967 = vmatprep.subr.bf16.mxu0 %v4408_v45  ;;  %3988 = vmatpush3.bf16.msra.mxu1 %v4407_v44  ;;  %v4457_v44 = vld [vmem:[%s5692_s1 + $0x468] sm:$0xff]  }
  0x5a   :  { %3989 = vmatprep.subr.bf16.mxu1 %v4409_v47  ;;  %v4458_v45 = vld [vmem:[%s5692_s1 + $0x4e8] sm:$0xff]  }
  0x5b   :  { %v4460_v47 = vld [vmem:[%s5692_s1 + $0x4a8] sm:$0xff]  }
  0x5c   :  { %3968 = vmatpush3.bf16.msra.mxu0 %v4410_v50  ;;  %v4463_v50 = vld [vmem:[%s5692_s1 + $0x420] sm:$0xff]  }
  0x5d   :  { %3969 = vmatprep.subr.bf16.mxu0 %v4412_v54  ;;  %3990 = vmatpush3.bf16.msra.mxu1 %v4411_v51  ;;  %v4464_v51 = vld [vmem:[%s5692_s1 + $0x4a0] sm:$0xff]   ;;  %v4467_v54 = vld [vmem:[%s5692_s1 + $0x418] sm:$0xff]  }
  0x5e   :  { %3991 = vmatprep.subr.bf16.mxu1 %v4413_v55  ;;  %v4468_v55 = vld [vmem:[%s5692_s1 + $0x498] sm:$0xff]  }
  0x60   :  { %3970 = vmatpush3.bf16.msra.mxu0 %v4414_v58  ;;  %v4471_v58 = vld [vmem:[%s5692_s1 + $0x410] sm:$0xff]  }
  0x61   :  { %3999 = vmatprep.subr.bf16.mxu0 %v4416_v62  ;;  %3992 = vmatpush3.bf16.msra.mxu1 %v4415_v59  ;;  %v4472_v59 = vld [vmem:[%s5692_s1 + $0x490] sm:$0xff]   ;;  %v4474_v62 = vld [vmem:[%s5692_s1 + $0x4c8] sm:$0xff]  }
  0x62   :  { %4021 = vmatprep.subr.bf16.mxu1 %v4417_v63 }
  0x63   :  { %2798 = vmatmul.mubr.bf16.vlgmr.msra.gmra.mxu0 %v693_v61  ;;  %v30_v61 = vld [vmem:[%s5691_s0 + $0x10] sm:$0xff] }
  0x64   :  { %4000 = vmatpush3.bf16.msra.mxu0 %v4418_v1  ;;  %2877 = vmatprep.mubr.bf16.mxu0 %v714_v0  ;;  %v726_v63 = vrot.slane %v30_v61, %v4796_v41  ;;  %v719_v0 = vcombine.high %v30_v61, %v30_v61  ;;  %v4475_v1 = vld [vmem:[%s5692_s1 + $0x408] sm:$0xff]  }
  0x65   :  { %2838 = vmatmul.mubr.bf16.vlgmr.msra.gmra.mxu1 %v715_v3  ;;  %4001 = vmatprep.subr.bf16.mxu0 %v4420_v4  ;;  %v4524_v61 = vld [vmem:[%s5692_s1 + $0x628] sm:$0xff]  }
  0x66   :  { %4022 = vmatpush3.bf16.msra.mxu1 %v4419_v2  ;;  %2917 = vmatprep.mubr.bf16.mxu1 %v718_v6  ;;  %v4476_v2 = vld [vmem:[%s5692_s1 + $0x488] sm:$0xff]   ;;  %v734_v3 = vcombine.high %v726_v63, %v726_v63  ;;  %v5194_v4 = vrot.slane %v719_v0, %v4796_v41  ;;  %v4478_v6 = vld [vmem:[%s5692_s1 + $0x4c0] sm:$0xff]  }
  0x67   :  { %4023 = vmatprep.subr.bf16.mxu1 %v4421_v5  ;;  %v4477_v5 = vld [vmem:[%s5692_s1 + $0x440] sm:$0xff]  }
  0x68   :  { %4002 = vmatpush3.bf16.msra.mxu0 %v4422_v7  ;;  %v756_v7 = vrot.slane %v734_v3, %v4796_v41  ;;  %v4527_v0 = vld [vmem:[%s5692_s1 + $0x6e0] sm:$0xff]   ;;  %v4530_v3 = vld [vmem:[%s5692_s1 + $0x658] sm:$0xff]  }
  0x69   :  { %4003 = vmatprep.subr.bf16.mxu0 %v4424_v9  ;;  %v4479_v9 = vld [vmem:[%s5692_s1 + $0x400] sm:$0xff]  }
  0x6a   :  { %4024 = vmatpush3.bf16.msra.mxu1 %v4423_v8  ;;  %v735_v8 = vcombine.high %v5194_v4, %v5194_v4 }
  0x6b   :  { %4025 = vmatprep.subr.bf16.mxu1 %v4425_v10  ;;  %v4480_v10 = vld [vmem:[%s5692_s1 + $0x480] sm:$0xff]  }
  0x6c   :  { %4004 = vmatpush3.bf16.msra.mxu0 %v4426_v11  ;;  %v766_v11 = vcombine.high %v756_v7, %v756_v7 }
  0x6d   :  { %4005 = vmatprep.subr.bf16.mxu0 %v4428_v13  ;;  %v4481_v13 = vld [vmem:[%s5692_s1 + $0x578] sm:$0xff]  }
  0x6e   :  { %4026 = vmatpush3.bf16.msra.mxu1 %v4427_v12  ;;  %v742_v12 = vrot.slane %v726_v63, %v4796_v41  ;;  %v4526_v63 = vld [vmem:[%s5692_s1 + $0x660] sm:$0xff]  }
  0x6f   :  { %4027 = vmatprep.subr.bf16.mxu1 %v4429_v14  ;;  %v4482_v14 = vld [vmem:[%s5692_s1 + $0x5f8] sm:$0xff]  }
  0x70   :  { %4006 = vmatpush3.bf16.msra.mxu0 %v4430_v15  ;;  %v763_v15 = vrot.slane %v735_v8, %v4796_v41  ;;  %v4535_v8 = vld [vmem:[%s5692_s1 + $0x6d0] sm:$0xff]  }
  0x71   :  { %4007 = vmatprep.subr.bf16.mxu0 %v4432_v17  ;;  %v4484_v17 = vld [vmem:[%s5692_s1 + $0x5b8] sm:$0xff]  }
  0x72   :  { %4028 = vmatpush3.bf16.msra.mxu1 %v4431_v16  ;;  %v4483_v16 = vld [vmem:[%s5692_s1 + $0x538] sm:$0xff]  }
  0x73   :  { %4029 = vmatprep.subr.bf16.mxu1 %v4433_v18  ;;  %v764_v18 = vcombine.high %v742_v12, %v742_v12 }
  0x74   :  { %4008 = vmatpush3.bf16.msra.mxu0 %v4434_v19  ;;  %v4485_v19 = vld [vmem:[%s5692_s1 + $0x570] sm:$0xff]  }
  0x75   :  { %4009 = vmatprep.subr.bf16.mxu0 %v4436_v21  ;;  %v767_v21 = vcombine.high %v763_v15, %v763_v15 }
  0x76   :  { %4030 = vmatpush3.bf16.msra.mxu1 %v4435_v20  ;;  %v4486_v20 = vld [vmem:[%s5692_s1 + $0x5f0] sm:$0xff]  }
  0x77   :  { %4031 = vmatprep.subr.bf16.mxu1 %v4437_v22  ;;  %v4487_v22 = vld [vmem:[%s5692_s1 + $0x530] sm:$0xff]  }
  0x78   :  { %4010 = vmatpush3.bf16.msra.mxu0 %v4438_v23  ;;  %v4488_v23 = vld [vmem:[%s5692_s1 + $0x5b0] sm:$0xff]  }
  0x79   :  { %4011 = vmatprep.subr.bf16.mxu0 %v4440_v25  ;;  %v4490_v25 = vld [vmem:[%s5692_s1 + $0x5e8] sm:$0xff]  }
  0x7a   :  { %4032 = vmatpush3.bf16.msra.mxu1 %v4439_v24  ;;  %v4489_v24 = vld [vmem:[%s5692_s1 + $0x568] sm:$0xff]  }
  0x7b   :  { %4033 = vmatprep.subr.bf16.mxu1 %v4441_v26  ;;  %v4491_v26 = vld [vmem:[%s5692_s1 + $0x528] sm:$0xff]  }
  0x7c   :  { %4012 = vmatpush3.bf16.msra.mxu0 %v4442_v27  ;;  %v4492_v27 = vld [vmem:[%s5692_s1 + $0x5a8] sm:$0xff]  }
  0x7d   :  { %4013 = vmatprep.subr.bf16.mxu0 %v4444_v29  ;;  %v4494_v29 = vld [vmem:[%s5692_s1 + $0x5e0] sm:$0xff]  }
  0x7e   :  { %4034 = vmatpush3.bf16.msra.mxu1 %v4443_v28  ;;  %v4493_v28 = vld [vmem:[%s5692_s1 + $0x560] sm:$0xff]  }
  0x7f   :  { %4035 = vmatprep.subr.bf16.mxu1 %v4445_v30  ;;  %v4495_v30 = vld [vmem:[%s5692_s1 + $0x520] sm:$0xff]  }
  0x80   :  { %4014 = vmatpush3.bf16.msra.mxu0 %v4446_v31  ;;  %v4496_v31 = vld [vmem:[%s5692_s1 + $0x5a0] sm:$0xff]  }
  0x81   :  { %4043 = vmatprep.subr.bf16.mxu0 %v4449_v34  ;;  %v4499_v34 = vld [vmem:[%s5692_s1 + $0x518] sm:$0xff]  }
  0x82   :  { %4036 = vmatpush3.bf16.msra.mxu1 %v4447_v32  ;;  %v4497_v32 = vld [vmem:[%s5692_s1 + $0x558] sm:$0xff]  }
  0x83   :  { %2878 = vmatmul.mubr.bf16.vlgmr.msra.gmra.mxu0 %v700_v33  ;;  %4065 = vmatprep.subr.bf16.mxu1 %v4450_v35  ;;  %v4498_v33 = vld [vmem:[%s5692_s1 + $0x5d8] sm:$0xff]  }
  0x84   :  { %4044 = vmatpush3.bf16.msra.mxu0 %v4451_v36  ;;  %2957 = vmatprep.mubr.bf16.mxu0 %v756_v7  ;;  %v4500_v35 = vld [vmem:[%s5692_s1 + $0x598] sm:$0xff]   ;;  %v4501_v36 = vld [vmem:[%s5692_s1 + $0x550] sm:$0xff]  }
  0x85   :  { %2918 = vmatmul.mubr.bf16.vlgmr.msra.gmra.mxu1 %v716_v38  ;;  %4045 = vmatprep.subr.bf16.mxu0 %v4453_v39  ;;  %v4503_v38 = vld [vmem:[%s5692_s1 + $0x510] sm:$0xff]  }
  0x86   :  { %4066 = vmatpush3.bf16.msra.mxu1 %v4452_v37  ;;  %2997 = vmatprep.mubr.bf16.mxu1 %v766_v11  ;;  %v4502_v37 = vld [vmem:[%s5692_s1 + $0x5d0] sm:$0xff]   ;;  %v4538_v11 = vld [vmem:[%s5692_s1 + $0x648] sm:$0xff]  }
  0x87   :  { %4067 = vmatprep.subr.bf16.mxu1 %v4454_v40  ;;  %v4504_v39 = vld [vmem:[%s5692_s1 + $0x590] sm:$0xff]   ;;  %v4505_v40 = vld [vmem:[%s5692_s1 + $0x548] sm:$0xff]  }
  0x88   :  { %4046 = vmatpush3.bf16.msra.mxu0 %v4455_v42  ;;  %v4506_v42 = vld [vmem:[%s5692_s1 + $0x5c8] sm:$0xff]   ;;  %v4534_v7 = vld [vmem:[%s5692_s1 + $0x650] sm:$0xff]  }
  0x89   :  { %4047 = vmatprep.subr.bf16.mxu0 %v4457_v44  ;;  %v4508_v44 = vld [vmem:[%s5692_s1 + $0x588] sm:$0xff]  }
  0x8a   :  { %4068 = vmatpush3.bf16.msra.mxu1 %v4456_v43  ;;  %v4507_v43 = vld [vmem:[%s5692_s1 + $0x508] sm:$0xff]  }
  0x8b   :  { %4069 = vmatprep.subr.bf16.mxu1 %v4458_v45  ;;  %v4509_v45 = vld [vmem:[%s5692_s1 + $0x540] sm:$0xff]  }
  0x8c   :  { %4048 = vmatpush3.bf16.msra.mxu0 %v4459_v46  ;;  %v4510_v46 = vld [vmem:[%s5692_s1 + $0x5c0] sm:$0xff]  }
  0x8d   :  { %4049 = vmatprep.subr.bf16.mxu0 %v4461_v48  ;;  %v4512_v48 = vld [vmem:[%s5692_s1 + $0x580] sm:$0xff]  }
  0x8e   :  { %4070 = vmatpush3.bf16.msra.mxu1 %v4460_v47  ;;  %v4511_v47 = vld [vmem:[%s5692_s1 + $0x500] sm:$0xff]  }
  0x8f   :  { %4071 = vmatprep.subr.bf16.mxu1 %v4462_v49  ;;  %v749_v49 = vrot.slane %v5194_v4, %v4796_v41  ;;  %v4531_v4 = vld [vmem:[%s5692_s1 + $0x6d8] sm:$0xff]  }
  0x90   :  { %4050 = vmatpush3.bf16.msra.mxu0 %v4463_v50  ;;  %v4514_v50 = vld [vmem:[%s5692_s1 + $0x678] sm:$0xff]  }
  0x91   :  { %4051 = vmatprep.subr.bf16.mxu0 %v4465_v52  ;;  %v4516_v52 = vld [vmem:[%s5692_s1 + $0x638] sm:$0xff]  }
  0x92   :  { %4072 = vmatpush3.bf16.msra.mxu1 %v4464_v51  ;;  %v4515_v51 = vld [vmem:[%s5692_s1 + $0x6f8] sm:$0xff]  }
  0x93   :  { %4073 = vmatprep.subr.bf16.mxu1 %v4466_v53  ;;  %v4517_v53 = vld [vmem:[%s5692_s1 + $0x6b8] sm:$0xff]  }
  0x94   :  { %4052 = vmatpush3.bf16.msra.mxu0 %v4467_v54  ;;  %v765_v54 = vcombine.high %v749_v49, %v749_v49 }
  0x95   :  { %4053 = vmatprep.subr.bf16.mxu0 %v4469_v56  ;;  %v4519_v56 = vld [vmem:[%s5692_s1 + $0x6f0] sm:$0xff]  }
  0x96   :  { %4074 = vmatpush3.bf16.msra.mxu1 %v4468_v55  ;;  %v4518_v55 = vld [vmem:[%s5692_s1 + $0x670] sm:$0xff]  }
  0x97   :  { %4075 = vmatprep.subr.bf16.mxu1 %v4470_v57  ;;  %v4520_v57 = vld [vmem:[%s5692_s1 + $0x630] sm:$0xff]  }
  0x98   :  { %4054 = vmatpush3.bf16.msra.mxu0 %v4471_v58  ;;  %v4521_v58 = vld [vmem:[%s5692_s1 + $0x6b0] sm:$0xff]  }
  0x99   :  { %4055 = vmatprep.subr.bf16.mxu0 %v4473_v60  ;;  %v4523_v60 = vld [vmem:[%s5692_s1 + $0x6e8] sm:$0xff]  }
  0x9a   :  { %4076 = vmatpush3.bf16.msra.mxu1 %v4472_v59  ;;  %v4522_v59 = vld [vmem:[%s5692_s1 + $0x668] sm:$0xff]  }
  0x9b   :  { %4077 = vmatprep.subr.bf16.mxu1 %v4474_v62  ;;  %v4525_v62 = vld [vmem:[%s5692_s1 + $0x6a8] sm:$0xff]  }
  0x9c   :  { %4056 = vmatpush3.bf16.msra.mxu0 %v4475_v1  ;;  %v4528_v1 = vld [vmem:[%s5692_s1 + $0x620] sm:$0xff]  }
  0x9d   :  { %4057 = vmatprep.subr.bf16.mxu0 %v4477_v5  ;;  %v4532_v5 = vld [vmem:[%s5692_s1 + $0x618] sm:$0xff]  }
  0x9e   :  { %4078 = vmatpush3.bf16.msra.mxu1 %v4476_v2  ;;  %v4529_v2 = vld [vmem:[%s5692_s1 + $0x6a0] sm:$0xff]  }
  0x9f   :  { %4079 = vmatprep.subr.bf16.mxu1 %v4478_v6  ;;  %v4533_v6 = vld [vmem:[%s5692_s1 + $0x698] sm:$0xff]  }
  0xa0   :  { %4058 = vmatpush3.bf16.msra.mxu0 %v4479_v9  ;;  %v4536_v9 = vld [vmem:[%s5692_s1 + $0x610] sm:$0xff]  }
  0xa1   :  { %4087 = vmatprep.subr.bf16.mxu0 %v4481_v13  ;;  %v4539_v13 = vld [vmem:[%s5692_s1 + $0x6c8] sm:$0xff]  }
  0xa2   :  { %4080 = vmatpush3.bf16.msra.mxu1 %v4480_v10  ;;  %v4537_v10 = vld [vmem:[%s5692_s1 + $0x690] sm:$0xff]  }
  0xa3   :  { %2958 = vmatmul.mubr.bf16.vlgmr.msra.gmra.mxu0 %v742_v12  ;;  %4109 = vmatprep.subr.bf16.mxu1 %v4482_v14  ;;  %v31_v12 = vld [vmem:[%s5691_s0 + $0x18] sm:$0xff] }
  0xa4   :  { %4088 = vmatpush3.bf16.msra.mxu0 %v4483_v16  ;;  %3037 = vmatprep.mubr.bf16.mxu0 %v763_v15  ;;  %v775_v14 = vrot.slane %v31_v12, %v4796_v41  ;;  %v768_v15 = vcombine.high %v31_v12, %v31_v12  ;;  %v4540_v16 = vld [vmem:[%s5692_s1 + $0x608] sm:$0xff]   ;;  %v4577_v12 = vld [vmem:[%s5692_s1 + $0x780] sm:$0xff]  }
  0xa5   :  { %2998 = vmatmul.mubr.bf16.vlgmr.msra.gmra.mxu1 %v764_v18  ;;  %4089 = vmatprep.subr.bf16.mxu0 %v4485_v19 }
  0xa6   :  { %4110 = vmatpush3.bf16.msra.mxu1 %v4484_v17  ;;  %3077 = vmatprep.mubr.bf16.mxu1 %v767_v21  ;;  %v4542_v17 = vld [vmem:[%s5692_s1 + $0x640] sm:$0xff]   ;;  %v783_v18 = vcombine.high %v775_v14, %v775_v14  ;;  %v5400_v19 = vrot.slane %v768_v15, %v4796_v41  ;;  %v4580_v15 = vld [vmem:[%s5692_s1 + $0x8f8] sm:$0xff]  }
  0xa7   :  { %4111 = vmatprep.subr.bf16.mxu1 %v4486_v20  ;;  %v4541_v20 = vld [vmem:[%s5692_s1 + $0x688] sm:$0xff]   ;;  %v4543_v21 = vld [vmem:[%s5692_s1 + $0x6c0] sm:$0xff]  }
  0xa8   :  { %4090 = vmatpush3.bf16.msra.mxu0 %v4487_v22  ;;  %v4544_v22 = vld [vmem:[%s5692_s1 + $0x600] sm:$0xff]  }
  0xa9   :  { %4091 = vmatprep.subr.bf16.mxu0 %v4489_v24  ;;  %v784_v24 = vcombine.high %v5400_v19, %v5400_v19 }
  0xaa   :  { %4112 = vmatpush3.bf16.msra.mxu1 %v4488_v23  ;;  %v805_v23 = vrot.slane %v783_v18, %v4796_v41 }
  0xab   :  { %4113 = vmatprep.subr.bf16.mxu1 %v4490_v25  ;;  %v4545_v25 = vld [vmem:[%s5692_s1 + $0x680] sm:$0xff]  }
  0xac   :  { %4092 = vmatpush3.bf16.msra.mxu0 %v4491_v26  ;;  %v815_v26 = vcombine.high %v805_v23, %v805_v23 }
  0xad   :  { %4093 = vmatprep.subr.bf16.mxu0 %v4493_v28  ;;  %v4546_v28 = vld [vmem:[%s5692_s1 + $0x778] sm:$0xff]  }
  0xae   :  { %4114 = vmatpush3.bf16.msra.mxu1 %v4492_v27  ;;  %v791_v27 = vrot.slane %v775_v14, %v4796_v41  ;;  %v4579_v14 = vld [vmem:[%s5692_s1 + $0x878] sm:$0xff]  }
  0xaf   :  { %4115 = vmatprep.subr.bf16.mxu1 %v4494_v29  ;;  %v4547_v29 = vld [vmem:[%s5692_s1 + $0x7f8] sm:$0xff]  }
  0xb0   :  { %4094 = vmatpush3.bf16.msra.mxu0 %v4495_v30  ;;  %v812_v30 = vrot.slane %v784_v24, %v4796_v41 }
  0xb1   :  { %4095 = vmatprep.subr.bf16.mxu0 %v4497_v32  ;;  %v4549_v32 = vld [vmem:[%s5692_s1 + $0x7b8] sm:$0xff]  }
  0xb2   :  { %4116 = vmatpush3.bf16.msra.mxu1 %v4496_v31  ;;  %v4548_v31 = vld [vmem:[%s5692_s1 + $0x738] sm:$0xff]  }
  0xb3   :  { %4117 = vmatprep.subr.bf16.mxu1 %v4498_v33  ;;  %v813_v33 = vcombine.high %v791_v27, %v791_v27 }
  0xb4   :  { %4096 = vmatpush3.bf16.msra.mxu0 %v4499_v34  ;;  %v4550_v34 = vld [vmem:[%s5692_s1 + $0x770] sm:$0xff]  }
  0xb5   :  { %4097 = vmatprep.subr.bf16.mxu0 %v4501_v36  ;;  %v816_v36 = vcombine.high %v812_v30, %v812_v30 }
  0xb6   :  { %4118 = vmatpush3.bf16.msra.mxu1 %v4500_v35  ;;  %v4551_v35 = vld [vmem:[%s5692_s1 + $0x7f0] sm:$0xff]  }
  0xb7   :  { %4119 = vmatprep.subr.bf16.mxu1 %v4502_v37 }
  0xb8   :  { %4098 = vmatpush3.bf16.msra.mxu0 %v4503_v38  ;;  %v3559_v38 = vld [vmem:[%s5693_s2] ss:$0 sm:$0xff] }
  0xb9   :  { %4099 = vmatprep.subr.bf16.mxu0 %v4505_v40  ;;  %v4553_v40 = vld [vmem:[%s5692_s1 + $0x7b0] sm:$0xff]  }
  0xba   :  { %4120 = vmatpush3.bf16.msra.mxu1 %v4504_v39  ;;  %v4552_v39 = vld [vmem:[%s5692_s1 + $0x730] sm:$0xff]  }
  0xbb   :  { %4121 = vmatprep.subr.bf16.mxu1 %v4506_v42 }
  0xbc   :  { %4100 = vmatpush3.bf16.msra.mxu0 %v4507_v43 }
  0xbd   :  { %4101 = vmatprep.subr.bf16.mxu0 %v4509_v45 }
  0xbe   :  { %4122 = vmatpush3.bf16.msra.mxu1 %v4508_v44  ;;  %v4554_v44 = vld [vmem:[%s5692_s1 + $0x768] sm:$0xff]  }
  0xbf   :  { %4123 = vmatprep.subr.bf16.mxu1 %v4510_v46  ;;  %v4555_v46 = vld [vmem:[%s5692_s1 + $0x7e8] sm:$0xff]  }
  0xc0   :  { %4102 = vmatpush3.bf16.msra.mxu0 %v4511_v47 }
  0xc1   :  { %4131 = vmatprep.subr.bf16.mxu0 %v4514_v50 }
  0xc2   :  { %4124 = vmatpush3.bf16.msra.mxu1 %v4512_v48 }
  0xc3   :  { %3038 = vmatmul.mubr.bf16.vlgmr.msra.gmra.mxu0 %v749_v49  ;;  %4153 = vmatprep.subr.bf16.mxu1 %v4515_v51  ;;  %v4556_v49 = vld [vmem:[%s5692_s1 + $0x728] sm:$0xff]  }
  0xc4   :  { %4132 = vmatpush3.bf16.msra.mxu0 %v4516_v52  ;;  %3117 = vmatprep.mubr.bf16.mxu0 %v805_v23  ;;  %v4557_v52 = vld [vmem:[%s5692_s1 + $0x7a8] sm:$0xff]   ;;  %v4586_v23 = vld [vmem:[%s5692_s1 + $0x8b0] sm:$0xff]  }
  0xc5   :  { %3078 = vmatmul.mubr.bf16.vlgmr.msra.gmra.mxu1 %v765_v54  ;;  %4133 = vmatprep.subr.bf16.mxu0 %v4518_v55  ;;  %v4558_v55 = vld [vmem:[%s5692_s1 + $0x760] sm:$0xff]  }
  0xc6   :  { %4154 = vmatpush3.bf16.msra.mxu1 %v4517_v53  ;;  %3157 = vmatprep.mubr.bf16.mxu1 %v815_v26  ;;  %v4587_v26 = vld [vmem:[%s5692_s1 + $0x868] sm:$0xff]  }
  0xc7   :  { %4155 = vmatprep.subr.bf16.mxu1 %v4519_v56 }
  0xc8   :  { %4134 = vmatpush3.bf16.msra.mxu0 %v4520_v57  ;;  %v4559_v57 = vld [vmem:[%s5692_s1 + $0x7e0] sm:$0xff]  }
  0xc9   :  { %4135 = vmatprep.subr.bf16.mxu0 %v4522_v59  ;;  %v4560_v59 = vld [vmem:[%s5692_s1 + $0x720] sm:$0xff]  }
  0xca   :  { %4156 = vmatpush3.bf16.msra.mxu1 %v4521_v58 }
  0xcb   :  { %4157 = vmatprep.subr.bf16.mxu1 %v4523_v60  ;;  %v4561_v60 = vld [vmem:[%s5692_s1 + $0x7a0] sm:$0xff]  }
  0xcc   :  { %4136 = vmatpush3.bf16.msra.mxu0 %v4524_v61  ;;  %v4562_v61 = vld [vmem:[%s5692_s1 + $0x758] sm:$0xff]  }
  0xcd   :  { %4137 = vmatprep.subr.bf16.mxu0 %v4526_v63  ;;  %v4564_v63 = vld [vmem:[%s5692_s1 + $0x718] sm:$0xff]  }
  0xce   :  { %4158 = vmatpush3.bf16.msra.mxu1 %v4525_v62  ;;  %v4563_v62 = vld [vmem:[%s5692_s1 + $0x7d8] sm:$0xff]  }
  0xcf   :  { %4159 = vmatprep.subr.bf16.mxu1 %v4527_v0  ;;  %v4565_v0 = vld [vmem:[%s5692_s1 + $0x798] sm:$0xff]  }
  0xd0   :  { %4138 = vmatpush3.bf16.msra.mxu0 %v4528_v1  ;;  %v4566_v1 = vld [vmem:[%s5692_s1 + $0x750] sm:$0xff]  }
  0xd1   :  { %4139 = vmatprep.subr.bf16.mxu0 %v4530_v3  ;;  %v4568_v3 = vld [vmem:[%s5692_s1 + $0x710] sm:$0xff]  }
  0xd2   :  { %4160 = vmatpush3.bf16.msra.mxu1 %v4529_v2  ;;  %v4567_v2 = vld [vmem:[%s5692_s1 + $0x7d0] sm:$0xff]  }
  0xd3   :  { %4161 = vmatprep.subr.bf16.mxu1 %v4531_v4  ;;  %v4569_v4 = vld [vmem:[%s5692_s1 + $0x790] sm:$0xff]  }
  0xd4   :  { %4140 = vmatpush3.bf16.msra.mxu0 %v4532_v5  ;;  %v4570_v5 = vld [vmem:[%s5692_s1 + $0x748] sm:$0xff]  }
  0xd5   :  { %4141 = vmatprep.subr.bf16.mxu0 %v4534_v7  ;;  %v4572_v7 = vld [vmem:[%s5692_s1 + $0x708] sm:$0xff]  }
  0xd6   :  { %4162 = vmatpush3.bf16.msra.mxu1 %v4533_v6  ;;  %v4571_v6 = vld [vmem:[%s5692_s1 + $0x7c8] sm:$0xff]  }
  0xd7   :  { %4163 = vmatprep.subr.bf16.mxu1 %v4535_v8  ;;  %v4573_v8 = vld [vmem:[%s5692_s1 + $0x788] sm:$0xff]  }
  0xd8   :  { %4142 = vmatpush3.bf16.msra.mxu0 %v4536_v9  ;;  %v4574_v9 = vld [vmem:[%s5692_s1 + $0x740] sm:$0xff]  }
  0xd9   :  { %4143 = vmatprep.subr.bf16.mxu0 %v4538_v11  ;;  %v4576_v11 = vld [vmem:[%s5692_s1 + $0x700] sm:$0xff]  }
  0xda   :  { %4164 = vmatpush3.bf16.msra.mxu1 %v4537_v10  ;;  %v4575_v10 = vld [vmem:[%s5692_s1 + $0x7c0] sm:$0xff]  }
  0xdb   :  { %4165 = vmatprep.subr.bf16.mxu1 %v4539_v13  ;;  %v798_v13 = vrot.slane %v5400_v19, %v4796_v41  ;;  %v4583_v19 = vld [vmem:[%s5692_s1 + $0x870] sm:$0xff]  }
  0xdc   :  { %4144 = vmatpush3.bf16.msra.mxu0 %v4540_v16  ;;  %v4581_v16 = vld [vmem:[%s5692_s1 + $0x838] sm:$0xff]  }
  0xdd   :  { %4145 = vmatprep.subr.bf16.mxu0 %v4542_v17  ;;  %v4582_v17 = vld [vmem:[%s5692_s1 + $0x8b8] sm:$0xff]   ;;  %v814_v18 = vcombine.high %v798_v13, %v798_v13 }
  0xde   :  { %4166 = vmatpush3.bf16.msra.mxu1 %v4541_v20  ;;  %v4584_v20 = vld [vmem:[%s5692_s1 + $0x8f0] sm:$0xff]  }
  0xdf   :  { %4167 = vmatprep.subr.bf16.mxu1 %v4543_v21 }
  0xe0   :  { %4146 = vmatpush3.bf16.msra.mxu0 %v4544_v22  ;;  %v4585_v22 = vld [vmem:[%s5692_s1 + $0x830] sm:$0xff]  }
  0xe1   :  { %4175 = vmatprep.subr.bf16.mxu0 %v4546_v28  ;;  %v4588_v28 = vld [vmem:[%s5692_s1 + $0x8e8] sm:$0xff]  }
  0xe2   :  { %4168 = vmatpush3.bf16.msra.mxu1 %v4545_v25 }
  0xe3   :  { %v3883_v37 = vpop.f32.mrf.mxu0  ;;  %3118 = vmatmul.mubr.bf16.vlgmr.msra.gmra.mxu0 %v791_v27  ;;  %4197 = vmatprep.subr.bf16.mxu1 %v4547_v29 }
  0xe4   :  { %4176 = vmatpush3.bf16.msra.mxu0 %v4548_v31  ;;  %3197 = vmatprep.mubr.bf16.mxu0 %v812_v30  ;;  %v3905_v42 = vpop.f32.mrf.mxu1  ;;  %v4589_v31 = vld [vmem:[%s5692_s1 + $0x828] sm:$0xff]  }
  0xe5   :  { %3158 = vmatmul.mubr.bf16.vlgmr.msra.gmra.mxu1 %v813_v33  ;;  %v3884_v43 = vpop.f32.mrf.mxu0  ;;  %4177 = vmatprep.subr.bf16.mxu0 %v4550_v34  ;;  %v4590_v34 = vld [vmem:[%s5692_s1 + $0x8a8] sm:$0xff]  }
  0xe6   :  { %4198 = vmatpush3.bf16.msra.mxu1 %v4549_v32  ;;  %v3885_v45 = vadd.f32 %v3884_v43, %v3883_v37  ;;  %3237 = vmatprep.mubr.bf16.mxu1 %v816_v36  ;;  %v3906_v47 = vpop.f32.mrf.mxu1  ;;  %v4591_v37 = vld [vmem:[%s5692_s1 + $0x860] sm:$0xff]  }
  0xe7   :  { %v3886_v48 = vpop.f32.mrf.mxu0  ;;  %4199 = vmatprep.subr.bf16.mxu1 %v4551_v35  ;;  %v3907_v51 = vadd.f32 %v3906_v47, %v3905_v42  ;;  %v4593_v42 = vld [vmem:[%s5692_s1 + $0x820] sm:$0xff]   ;;  %v4598_v47 = vld [vmem:[%s5692_s1 + $0x898] sm:$0xff]  }
  0xe8   :  { %v2640_v50 = vadd.f32 %v3885_v45, %v3559_v38  ;;  %4178 = vmatpush3.bf16.msra.mxu0 %v4552_v39  ;;  %v3908_v53 = vpop.f32.mrf.mxu1  ;;  %v4592_v39 = vld [vmem:[%s5692_s1 + $0x8e0] sm:$0xff]   ;;  %v4596_v45 = vld [vmem:[%s5692_s1 + $0x8d8] sm:$0xff]   ;;  %v4599_v48 = vld [vmem:[%s5692_s1 + $0x850] sm:$0xff]  }
  0xe9   :  { %v3887_v54 = vpop.f32.mrf.mxu0  ;;  %4179 = vmatprep.subr.bf16.mxu0 %v4554_v44  ;;  %v4594_v43 = vld [vmem:[%s5692_s1 + $0x8a0] sm:$0xff]   ;;  %v4595_v44 = vld [vmem:[%s5692_s1 + $0x858] sm:$0xff]   ;;  %v4604_v53 = vld [vmem:[%s5692_s1 + $0x8c8] sm:$0xff]  }
  0xea   :  { %v5461_v56 = vadd.f32 %v3907_v51, %v2640_v50  ;;  %4200 = vmatpush3.bf16.msra.mxu1 %v4553_v40  ;;  %v3909_v58 = vpop.f32.mrf.mxu1  ;;  %v4601_v50 = vld [vmem:[%s5692_s1 + $0x810] sm:$0xff]   ;;  %v4605_v54 = vld [vmem:[%s5692_s1 + $0x808] sm:$0xff]  }
  0xeb   :  { %4201 = vmatprep.subr.bf16.mxu1 %v4555_v46  ;;  %v4597_v46 = vld [vmem:[%s5692_s1 + $0x818] sm:$0xff]   ;;  %v4602_v51 = vld [vmem:[%s5692_s1 + $0x890] sm:$0xff]  }
  0xec   :  { %4180 = vmatpush3.bf16.msra.mxu0 %v4556_v49  ;;  %v4600_v49 = vld [vmem:[%s5692_s1 + $0x8d0] sm:$0xff]  }
  0xed   :  { %4181 = vmatprep.subr.bf16.mxu0 %v4558_v55  ;;  %v4607_v55 = vld [vmem:[%s5692_s1 + $0x840] sm:$0xff]  }
  0xee   :  { %4202 = vmatpush3.bf16.msra.mxu1 %v4557_v52  ;;  %v4603_v52 = vld [vmem:[%s5692_s1 + $0x848] sm:$0xff]  }
  0xef   :  { %4203 = vmatprep.subr.bf16.mxu1 %v4559_v57  ;;  %v4606_v57 = vld [vmem:[%s5692_s1 + $0x888] sm:$0xff]  }
  0xf0   :  { %4182 = vmatpush3.bf16.msra.mxu0 %v4560_v59  ;;  %v4608_v59 = vld [vmem:[%s5692_s1 + $0x8c0] sm:$0xff]  }
  0xf1   :  { %4183 = vmatprep.subr.bf16.mxu0 %v4562_v61 }
  0xf2   :  { %4204 = vmatpush3.bf16.msra.mxu1 %v4561_v60  ;;  %v4609_v60 = vld [vmem:[%s5692_s1 + $0x800] sm:$0xff]  }
  0xf3   :  { %4205 = vmatprep.subr.bf16.mxu1 %v4563_v62  ;;  %v4610_v62 = vld [vmem:[%s5692_s1 + $0x880] sm:$0xff]  }
  0xf4   :  { %4184 = vmatpush3.bf16.msra.mxu0 %v4564_v63 }
  0xf5   :  { %4185 = vmatprep.subr.bf16.mxu0 %v4566_v1 }
  0xf6   :  { %4206 = vmatpush3.bf16.msra.mxu1 %v4565_v0 }
  0xf7   :  { %4207 = vmatprep.subr.bf16.mxu1 %v4567_v2 }
  0xf8   :  { %4186 = vmatpush3.bf16.msra.mxu0 %v4568_v3 }
  0xf9   :  { %4187 = vmatprep.subr.bf16.mxu0 %v4570_v5 }
  0xfa   :  { %4208 = vmatpush3.bf16.msra.mxu1 %v4569_v4 }
  0xfb   :  { %4209 = vmatprep.subr.bf16.mxu1 %v4571_v6 }
  0xfc   :  { %4188 = vmatpush3.bf16.msra.mxu0 %v4572_v7 }
  0xfd   :  { %4189 = vmatprep.subr.bf16.mxu0 %v4574_v9 }
  0xfe   :  { %4210 = vmatpush3.bf16.msra.mxu1 %v4573_v8 }
  0xff   :  { %4211 = vmatprep.subr.bf16.mxu1 %v4575_v10 }
 0x100   :  { %4190 = vmatpush3.bf16.msra.mxu0 %v4576_v11 }
 0x101   :  { %4219 = vmatprep.subr.bf16.mxu0 %v4579_v14 }
 0x102   :  { %4212 = vmatpush3.bf16.msra.mxu1 %v4577_v12 }
 0x103   :  { %v3927_v21 = vpop.f32.mrf.mxu0  ;;  %3198 = vmatmul.mubr.bf16.vlgmr.msra.gmra.mxu0 %v798_v13  ;;  %4241 = vmatprep.subr.bf16.mxu1 %v4580_v15 }
 0x104   :  { %4220 = vmatpush3.bf16.msra.mxu0 %v4581_v16  ;;  %v3949_v24 = vpop.f32.mrf.mxu1 }
 0x105   :  { %3238 = vmatmul.mubr.bf16.vlgmr.msra.gmra.mxu1 %v814_v18  ;;  %v3928_v25 = vpop.f32.mrf.mxu0  ;;  %4221 = vmatprep.subr.bf16.mxu0 %v4583_v19 }
 0x106   :  { %4242 = vmatpush3.bf16.msra.mxu1 %v4582_v17  ;;  %v3929_v27 = vadd.f32 %v3928_v25, %v3927_v21  ;;  %v3950_v29 = vpop.f32.mrf.mxu1 }
 0x107   :  { %v3930_v30 = vpop.f32.mrf.mxu0  ;;  %4243 = vmatprep.subr.bf16.mxu1 %v4584_v20  ;;  %v3951_v33 = vadd.f32 %v3950_v29, %v3949_v24 }
 0x108   :  { %v2720_v32 = vadd.f32 %v3929_v27, %v5461_v56  ;;  %4222 = vmatpush3.bf16.msra.mxu0 %v4585_v22  ;;  %v3952_v35 = vpop.f32.mrf.mxu1  ;;  %v3560_v56 = vld.sshfl [vmem:[%s5691_s0 + $0x20] sm:$0x33 pattern:$0x75316420] }
 0x109   :  { %v3931_v36 = vpop.f32.mrf.mxu0  ;;  %4223 = vmatprep.subr.bf16.mxu0 %v4587_v26  ;;  %v824_v58 = vcombine.high %v3560_v56, %v3560_v56  ;;  %v831_v0 = vrot.slane %v3560_v56, %v4796_v41 }
 0x10a   :  { %v2760_v38 = vadd.f32 %v3951_v33, %v2720_v32  ;;  %4244 = vmatpush3.bf16.msra.mxu1 %v4586_v23  ;;  %v3953_v40 = vpop.f32.mrf.mxu1 }
 0x10b   :  { %4245 = vmatprep.subr.bf16.mxu1 %v4588_v28  ;;  %v838_v61 = vrot.slane %v824_v58, %v4796_v41 }
 0x10c   :  { %4224 = vmatpush3.bf16.msra.mxu0 %v4589_v31 }
 0x10d   :  { %4225 = vmatprep.subr.bf16.mxu0 %v4591_v37  ;;  %3277 = vmatprep.mubr.bf16.mxu0 %v838_v61  ;;  %v840_v63 = vcombine.high %v838_v61, %v838_v61 }
 0x10e   :  { %4246 = vmatpush3.bf16.msra.mxu1 %v4590_v34 }
 0x10f   :  { %4247 = vmatprep.subr.bf16.mxu1 %v4592_v39  ;;  %3317 = vmatprep.mubr.bf16.mxu1 %v840_v63 }
 0x110   :  { %4226 = vmatpush3.bf16.msra.mxu0 %v4593_v42 }
 0x111   :  { %4227 = vmatprep.subr.bf16.mxu0 %v4595_v44 }
 0x112   :  { %4248 = vmatpush3.bf16.msra.mxu1 %v4594_v43 }
 0x113   :  { %4249 = vmatprep.subr.bf16.mxu1 %v4596_v45 }
 0x114   :  { %4228 = vmatpush3.bf16.msra.mxu0 %v4597_v46 }
 0x115   :  { %4229 = vmatprep.subr.bf16.mxu0 %v4599_v48 }
 0x116   :  { %4250 = vmatpush3.bf16.msra.mxu1 %v4598_v47 }
 0x117   :  { %4251 = vmatprep.subr.bf16.mxu1 %v4600_v49 }
 0x118   :  { %4230 = vmatpush3.bf16.msra.mxu0 %v4601_v50 }
 0x119   :  { %4231 = vmatprep.subr.bf16.mxu0 %v4603_v52 }
 0x11a   :  { %4252 = vmatpush3.bf16.msra.mxu1 %v4602_v51 }
 0x11b   :  { %4253 = vmatprep.subr.bf16.mxu1 %v4604_v53 }
 0x11c   :  { %4232 = vmatpush3.bf16.msra.mxu0 %v4605_v54 }
 0x11d   :  { %4233 = vmatprep.subr.bf16.mxu0 %v4607_v55 }
 0x11e   :  { %4254 = vmatpush3.bf16.msra.mxu1 %v4606_v57 }
 0x11f   :  { %4255 = vmatprep.subr.bf16.mxu1 %v4608_v59 }
 0x120   :  { %4234 = vmatpush3.bf16.msra.mxu0 %v4609_v60 }
 0x121   :  { %12 = vsyncpa [#allocation3], 0  ;;  %v839_v1 = vcombine.high %v831_v0, %v831_v0  ;;  %v4611_v25 = vld [vmem:[%s5694_s3 + $0x38] ss:$0 sps:$4 sm:$0xff]   ;;  %vm3398_vm0 = vcmask 1043456   ;;  %v4648_v26 = vmov 0.0  }
 0x122   :  { %4256 = vmatpush3.bf16.msra.mxu1 %v4610_v62  ;;  %4279 = vmatprep.subr.bf16.mxu0 %v4648_v26  ;;  %v3400_v27 = vsel %vm3398_vm0, %v4611_v25, 0  ;;  %v4612_v28 = vld [vmem:[%s5694_s3 + $0x30] sm:$0xff]   ;;  %v4613_v29 = vld [vmem:[%s5694_s3 + $0x28] sm:$0xff]   ;;  %v4614_v30 = vld [vmem:[%s5694_s3 + $0x20] sm:$0xff]   ;;  %vm4649_vm1 = vmmov 0   ;;  %vm3499_vm2 = vcmask 1041408  }
 0x123   :  { %v3971_v2 = vpop.f32.mrf.mxu0  ;;  %3278 = vmatmul.mubr.bf16.vlgmr.msra.gmra.mxu0 %v831_v0  ;;  %4299 = vmatprep.subr.bf16.mxu1 %v4648_v26  ;;  %v4615_v31 = vld [vmem:[%s5694_s3 + $0x18] sm:$0xff]   ;;  %v4616_v35 = vld [vmem:[%s5694_s3 + $0x10] sm:$0xff]   ;;  %v4617_v44 = vld [vmem:[%s5694_s3 + $0x8] sm:$0xff]   ;;  %vm3394_vm3 = vcmask 982016   ;;  %vm3495_vm4 = vcmask 687104   ;;  %s4650_s12 = smov [#allocation2]  }
 0x124   :  { %4280 = vmatpush3.bf16.msra.mxu0 %v3400_v27  ;;  %v4618_v47 = vld [vmem:[%s5694_s3] sm:$0xff]   ;;  %4295 = vmatprep.mubr.msk.bf16.mxu0 %vm4649_vm1, %v4648_v26  ;;  %v4619_v48 = vld [vmem:[%s5696_s5 + $0x28] ss:$0 sps:$4 sm:$0x33]   ;;  %v4621_v51 = vld [vmem:[%s5696_s5 + $0x18] sm:$0xff]   ;;  %vm3543_vm5 = vcmask 9216  }
 0x125   :  { %v3993_v3 = vpop.f32.mrf.mxu1  ;;  %3318 = vmatmul.mubr.bf16.vlgmr.msra.gmra.mxu1 %v839_v1  ;;  %v3972_v4 = vpop.f32.mrf.mxu0  ;;  %4281 = vmatprep.subr.bf16.mxu0 %v4648_v26  ;;  %v3501_v49 = vsel %vm3499_vm2, %v4619_v48, 0  ;;  %v4620_v50 = vld [vmem:[%s5696_s5 + $0x20] sm:$0xff]   ;;  %v4622_v52 = vld [vmem:[%s5696_s5 + $0x10] sm:$0xff]  }
 0x126   :  { %v3973_v5 = vadd.f32 %v3972_v4, %v3971_v2  ;;  %4311 = vmatprep.mubr.msk.bf16.mxu1 %vm4649_vm1, %v4648_v26  ;;  %4300 = vmatpush3.bf16.msra.mxu1 %v3501_v49 }
 0x127   :  { %v3994_v6 = vpop.f32.mrf.mxu1  ;;  %v3974_v7 = vpop.f32.mrf.mxu0  ;;  %4301 = vmatprep.subr.bf16.mxu1 %v4648_v26 }
 0x128   :  { %v2800_v8 = vadd.f32 %v3973_v5, %v2760_v38  ;;  %v3995_v9 = vadd.f32 %v3994_v6, %v3993_v3  ;;  %4282 = vmatpush3.bf16.msra.mxu0 %v4612_v28 }
 0x129   :  { %v3996_v10 = vpop.f32.mrf.mxu1  ;;  %v3975_v11 = vpop.f32.mrf.mxu0  ;;  %4283 = vmatprep.subr.bf16.mxu0 %v4648_v26 }
 0x12a   :  { %v2840_v41 = vadd.f32 %v3995_v9, %v2800_v8  ;;  %4302 = vmatpush3.bf16.msra.mxu1 %v4620_v50 }
 0x12b   :  { %v3997_v12 = vpop.f32.mrf.mxu1  ;;  %4303 = vmatprep.subr.bf16.mxu1 %v4648_v26 }
 0x12c   :  { %4284 = vmatpush3.bf16.msra.mxu0 %v4613_v29 }
 0x12d   :  { %4285 = vmatprep.subr.bf16.mxu0 %v4648_v26 }
 0x12e   :  { %4304 = vmatpush3.bf16.msra.mxu1 %v4621_v51 }
 0x12f   :  { %4305 = vmatprep.subr.bf16.mxu1 %v4648_v26 }
 0x130   :  { %4286 = vmatpush3.bf16.msra.mxu0 %v4614_v30 }
 0x131   :  { %4287 = vmatprep.subr.bf16.mxu0 %v4648_v26 }
 0x132   :  { %4306 = vmatpush3.bf16.msra.mxu1 %v4622_v52 }
 0x133   :  { %4307 = vmatprep.subr.bf16.mxu1 %v4648_v26 }
 0x134   :  { %4288 = vmatpush3.bf16.msra.mxu0 %v4615_v31 }
 0x135   :  { %4289 = vmatprep.subr.bf16.mxu0 %v4648_v26 }
 0x138   :  { %4290 = vmatpush3.bf16.msra.mxu0 %v4616_v35 }
 0x139   :  { %4291 = vmatprep.subr.bf16.mxu0 %v4648_v26 }
 0x13c   :  { %4292 = vmatpush3.bf16.msra.mxu0 %v4617_v44 }
 0x13d   :  { %4293 = vmatprep.subr.bf16.mxu0 %v4648_v26 }
 0x140   :  { %4294 = vmatpush3.bf16.msra.mxu0 %v4618_v47 }
 0x143   :  { %v4015_v13 = vpop.f32.mrf.mxu0 }
 0x145   :  { %v4037_v14 = vpop.f32.mrf.mxu1  ;;  %v4016_v15 = vpop.f32.mrf.mxu0 }
 0x146   :  { %v4017_v16 = vadd.f32 %v4016_v15, %v4015_v13 }
 0x147   :  { %v4038_v17 = vpop.f32.mrf.mxu1  ;;  %v4018_v18 = vpop.f32.mrf.mxu0 }
 0x148   :  { %v2880_v19 = vadd.f32 %v4017_v16, %v2840_v41  ;;  %v4039_v20 = vadd.f32 %v4038_v17, %v4037_v14 }
 0x149   :  { %v4040_v21 = vpop.f32.mrf.mxu1  ;;  %v4019_v22 = vpop.f32.mrf.mxu0 }
 0x14a   :  { %v2920_v23 = vadd.f32 %v4039_v20, %v2880_v19 }
 0x14b   :  { %v4041_v24 = vpop.f32.mrf.mxu1 }
 0x163   :  { %v4059_v32 = vpop.f32.mrf.mxu0 }
 0x165   :  { %v4081_v33 = vpop.f32.mrf.mxu1  ;;  %v4060_v34 = vpop.f32.mrf.mxu0 }
 0x166   :  { %v4061_v36 = vadd.f32 %v4060_v34, %v4059_v32 }
 0x167   :  { %v4082_v37 = vpop.f32.mrf.mxu1  ;;  %v4062_v38 = vpop.f32.mrf.mxu0 }
 0x168   :  { %v2960_v39 = vadd.f32 %v4061_v36, %v2920_v23  ;;  %v4083_v40 = vadd.f32 %v4082_v37, %v4081_v33 }
 0x169   :  { %v4084_v42 = vpop.f32.mrf.mxu1  ;;  %v4063_v43 = vpop.f32.mrf.mxu0 }
 0x16a   :  { %v3000_v45 = vadd.f32 %v4083_v40, %v2960_v39  ;;  %v4623_v39 = vld [vmem:[%s5696_s5 + $0x8] sm:$0xff]   ;;  %v4624_v40 = vld [vmem:[%s5696_s5] sm:$0xff]   ;;  %s3551_s5 = sshll.u32 %s4650_s12, 4  ;;  %s3552_s5 = int_to_ptr.vmem [resolvable:$true] %s3551_s5 }
 0x16b   :  { %v4085_v46 = vpop.f32.mrf.mxu1  ;;  %4308 = vmatpush3.bf16.msra.mxu1 %v4623_v39  ;;  %v3849_v42 = vld [vmem:[%s5695_s4] ss:$0 sm:$0xff]  ;;  %s4625_s4 = scalar_lea.vmem %s3552_s5, 32  ;;  %p4630_p1 = scmp.lt.s32.totalorder %s3552_s5, %s3552_s5 }
 0x16c   :  { %4309 = vmatprep.subr.bf16.mxu1 %v4648_v26  ;;  %v3859_v26 = vld [vmem:[%s5697_s6] ss:$0 sm:$0xff]  ;;  %p4626_p0 = scmp.ne.s32.totalorder %s3552_s5, %s4625_s4  ;;  %p4631_p2 = scmp.lt.s32.totalorder %s4625_s4, %s4625_s4 }
 0x16e   :  { %p4632_p3 = por %p4631_p2, %p4630_p1 }
 0x16f   :  { %4310 = vmatpush3.bf16.msra.mxu1 %v4624_v40 }
 0x170   :  { %p4633_p4 = pnand %p4632_p3, %p4626_p0 }
 0x183   :  { %v4103_v53 = vpop.f32.mrf.mxu0 }
 0x185   :  { %v4125_v54 = vpop.f32.mrf.mxu1  ;;  %v4104_v55 = vpop.f32.mrf.mxu0 }
 0x186   :  { %v4105_v56 = vadd.f32 %v4104_v55, %v4103_v53 }
 0x187   :  { %v4126_v57 = vpop.f32.mrf.mxu1  ;;  %v4106_v58 = vpop.f32.mrf.mxu0 }
 0x188   :  { %v3040_v59 = vadd.f32 %v4105_v56, %v3000_v45  ;;  %v4127_v60 = vadd.f32 %v4126_v57, %v4125_v54 }
 0x189   :  { %v4128_v61 = vpop.f32.mrf.mxu1  ;;  %v4107_v62 = vpop.f32.mrf.mxu0 }
 0x18a   :  { %v3080_v63 = vadd.f32 %v4127_v60, %v3040_v59 }
 0x18b   :  { %v4129_v0 = vpop.f32.mrf.mxu1 }
 0x1a3   :  { %v4147_v1 = vpop.f32.mrf.mxu0 }
 0x1a5   :  { %v4169_v2 = vpop.f32.mrf.mxu1  ;;  %v4148_v3 = vpop.f32.mrf.mxu0 }
 0x1a6   :  { %v4149_v16 = vadd.f32 %v4148_v3, %v4147_v1 }
 0x1a7   :  { %v4170_v4 = vpop.f32.mrf.mxu1  ;;  %v4150_v5 = vpop.f32.mrf.mxu0 }
 0x1a8   :  { %v3120_v17 = vadd.f32 %v4149_v16, %v3080_v63  ;;  %v4171_v18 = vadd.f32 %v4170_v4, %v4169_v2 }
 0x1a9   :  { %v4172_v6 = vpop.f32.mrf.mxu1  ;;  %v4151_v7 = vpop.f32.mrf.mxu0 }
 0x1aa   :  { %v3160_v20 = vadd.f32 %v4171_v18, %v3120_v17 }
 0x1ab   :  { %v4173_v8 = vpop.f32.mrf.mxu1 }
 0x1c3   :  { %v4191_v9 = vpop.f32.mrf.mxu0 }
 0x1c5   :  { %v4213_v10 = vpop.f32.mrf.mxu1  ;;  %v4192_v11 = vpop.f32.mrf.mxu0 }
 0x1c6   :  { %v4193_v19 = vadd.f32 %v4192_v11, %v4191_v9 }
 0x1c7   :  { %v4214_v41 = vpop.f32.mrf.mxu1  ;;  %v4194_v12 = vpop.f32.mrf.mxu0 }
 0x1c8   :  { %v3200_v21 = vadd.f32 %v4193_v19, %v3160_v20  ;;  %v4215_v22 = vadd.f32 %v4214_v41, %v4213_v10 }
 0x1c9   :  { %v4216_v13 = vpop.f32.mrf.mxu1  ;;  %v4195_v14 = vpop.f32.mrf.mxu0 }
 0x1ca   :  { %v3240_v27 = vadd.f32 %v4215_v22, %v3200_v21 }
 0x1cb   :  { %v4217_v15 = vpop.f32.mrf.mxu1 }
 0x1e3   :  { %v4235_v23 = vpop.f32.mrf.mxu0 }
 0x1e5   :  { %v4257_v24 = vpop.f32.mrf.mxu1  ;;  %v4236_v25 = vpop.f32.mrf.mxu0 }
 0x1e6   :  { %v4237_v28 = vadd.f32 %v4236_v25, %v4235_v23 }
 0x1e7   :  { %v4258_v29 = vpop.f32.mrf.mxu1  ;;  %v4238_v30 = vpop.f32.mrf.mxu0 }
 0x1e8   :  { %v3280_v31 = vadd.f32 %v4237_v28, %v3240_v27  ;;  %v4259_v32 = vadd.f32 %v4258_v29, %v4257_v24 }
 0x1e9   :  { %v4260_v33 = vpop.f32.mrf.mxu1  ;;  %v4239_v34 = vpop.f32.mrf.mxu0 }
 0x1ea   :  { %v3320_v35 = vadd.f32 %v4259_v32, %v3280_v31 }
 0x1eb   :  { %v4261_v36 = vpop.f32.mrf.mxu1 }
 0x1ec   :  { %v3325_v37 = vmax.f32 %v3320_v35, 0.0 }
 0x1ee   :  { %v3326_v38 = vpack.c.bf16 %v3325_v37, %v3325_v37 }
 0x1f0   :  { %4296 = vmatmul.mubr.msk.bf16.vlgmr.msra.gmra.mxu0 %vm3394_vm3, %v3326_v38 }
 0x2b0   :  { %v3436_v43 = vpop.f32.mrf.mxu0 }
 0x2b1   :  { %v3437_v44 = vadd.f32 %v3849_v42, %v3436_v43 }
 0x2b2   :  { %v4297_v45 = vpop.f32.mrf.mxu0 }
 0x2b3   :  { %v3442_v46 = vmax.f32 %v3437_v44, 0.0 }
 0x2b4   :  { %v3439_v47 = vpop.f32.mrf.mxu0 }
 0x2b5   :  { %v3443_v48 = vpack.c.bf16 %v3442_v46, %v3442_v46 }
 0x2b6   :  { %v4298_v49 = vpop.f32.mrf.mxu0 }
 0x2b7   :  { %4312 = vmatmul.mubr.msk.bf16.vlgmr.msra.gmra.mxu1 %vm3495_vm4, %v3443_v48 }
 0x377   :  { %v3537_v50 = vpop.f32.mrf.mxu1 }
 0x378   :  { %v3538_v51 = vadd.f32 %v3859_v26, %v3537_v50 }
 0x379   :  { %v4313_v52 = vpop.f32.mrf.mxu1 }
 0x37a   :  { %3544 = vst.msk [vmem:[#allocation2] sm:$0x3] %vm3543_vm5, %v3538_v51 }
 0x37b   :  { %v3540_v53 = vpop.f32.mrf.mxu1 }
 0x37c   :  { %4636 = shalt.err (!%p4633_p4)
}
 0x37d   :  { %3554 = dma.vmem_to_hbm [thread:$0]  %s3552_s5, 32, %s5698_s7, [#allocation3]   ;;  %v4314_v54 = vpop.f32.mrf.mxu1 }
 0x37e   :  { %4645 = dma.done.wait [#allocation3], 32  }
 0x37f   :  { %4646 = vsyncadd [#allocation3], 4294967264 }
 0x380   :  { %3558 = vsyncpa [#allocation3], 1 }

</bundles_post_ra>
